<compile_context>
chip_gen: v7x
topology: tpu7x:2x2x1
jax: 0.10.0
libtpu: 0.0.40
codegen_flags: <defaults>
</compile_context>

<pallas_src>
import jax
import jax.numpy as jnp
from jax.experimental import pallas as pl
from jax.experimental.pallas import tpu as pltpu

FDIM = 181
HIDDEN = 128
SEQ = 48
TS = 16                     # timesteps per grid step (SEQ must be divisible)


# --------------------------------------------------------------------------
# Fused LSTM + MLP kernel
#   inputs : xd (T*B, F) bf16 time-major, W_ih^T (F,4H) bf16, W_hh^T (H,4H) bf16,
#            b (1,4H) f32, Wfc (T*H,1024) bf16 streamed in (TS*H,1024) slabs,
#            bfc (1,1024), W1 (1024,512) bf16, b1, W2 (512,256) bf16, b2,
#            Wo (256,F) bf16, bo
#   output : (B, F) f32
#   scratch: xw (T*B,4H) hoisted input projection (f32), h, c, fc accumulator
# --------------------------------------------------------------------------
def fused_rnn_kernel(xd_ref, wih_ref, whh_ref, b_ref,
                     wfc_ref, bfc_ref, w1_ref, b1_ref, w2_ref, b2_ref,
                     wo_ref, bo_ref, out_ref,
                     xw_ref, h_ref, c_ref, acc_ref):
    s = pl.program_id(0)
    ns = pl.num_programs(0)
    B = h_ref.shape[0]
    H = whh_ref.shape[0]
    chunk = TS * B

    @pl.when(s == 0)
    def _init():
        # Hoisted input projection for ALL timesteps: one big MXU matmul
        # (bf16 operands, f32 accumulation) with the combined LSTM bias
        # folded in once — off the serial recurrence path.
        xw_ref[...] = (jnp.dot(xd_ref[...], wih_ref[...],
                               preferred_element_type=jnp.float32)
                       + b_ref[...])
        h_ref[...] = jnp.zeros_like(h_ref)
        c_ref[...] = jnp.zeros_like(c_ref)
        acc_ref[...] = jnp.zeros_like(acc_ref)

    # This grid step's TS timesteps of the hoisted projection (8-row aligned).
    start = pl.multiple_of(s * chunk, 8)
    xw_chunk = xw_ref[pl.ds(start, chunk), :]            # (TS*B, 4H) f32
    whh = whh_ref[...]                                   # (H, 4H) bf16
    h = h_ref[...]
    c = c_ref[...]

    acc = jnp.zeros(acc_ref.shape, acc_ref.dtype)        # (B, 1024) f32 local
    for j in range(TS):                                  # fully unrolled
        gates = (xw_chunk[j * B:(j + 1) * B, :]
                 + jnp.dot(h.astype(whh.dtype), whh,
                           preferred_element_type=jnp.float32))
        # Gate layout permuted at init to [i, f, o | g]:
        sig = jax.nn.sigmoid(gates[:, :3 * H])
        g_g = jnp.tanh(gates[:, 3 * H:])
        i_g = sig[:, 0 * H:1 * H]
        f_g = sig[:, 1 * H:2 * H]
        o_g = sig[:, 2 * H:3 * H]
        c = f_g * c + i_g * g_g
        h = o_g * jnp.tanh(c)
        # Fused fc K-reduction: MXU filler hidden under the latency-bound
        # recurrence (rows j*H..(j+1)*H of this grid step's Wfc slab).
        acc = acc + jnp.dot(h.astype(wfc_ref.dtype),
                            wfc_ref[j * H:(j + 1) * H, :],
                            preferred_element_type=jnp.float32)

    h_ref[...] = h
    c_ref[...] = c
    acc_ref[...] += acc

    @pl.when(s == ns - 1)
    def _epilogue():
        h1 = jax.nn.sigmoid(acc_ref[...] + bfc_ref[...])
        h2 = jax.nn.sigmoid(
            jnp.dot(h1.astype(w1_ref.dtype), w1_ref[...],
                    preferred_element_type=jnp.float32) + b1_ref[...])
        h3 = jax.nn.sigmoid(
            jnp.dot(h2.astype(w2_ref.dtype), w2_ref[...],
                    preferred_element_type=jnp.float32) + b2_ref[...])
        out_ref[...] = (jnp.dot(h3.astype(wo_ref.dtype), wo_ref[...],
                                preferred_element_type=jnp.float32)
                        + bo_ref[...])


def rnn_forward(x, xd, xf, params):
    # x, xf are unused (matches the PyTorch forward).
    del x, xf
    B, T, F = xd.shape
    H = HIDDEN
    assert T % TS == 0
    ns = T // TS

    # Layout plumbing only: time-major bf16 rows for the hoisted projection.
    xd_tm = (jnp.transpose(xd, (1, 0, 2))
             .reshape(T * B, F).astype(jnp.bfloat16))            # (T*B, F)

    wih, whh = params["w_ih"], params["w_hh"]                    # (F,4H),(H,4H)
    b_lstm = (params["b_ih"] + params["b_hh"]).reshape(1, -1)    # (1, 4H) f32
    wfc, bfc = params["wfc"], params["bfc"].reshape(1, -1)
    w1, b1 = params["w1"], params["b1"].reshape(1, -1)
    w2, b2 = params["w2"], params["b2"].reshape(1, -1)
    wo, bo = params["wo"], params["bo"].reshape(1, -1)
    D1, D2, D3, DO = wfc.shape[1], w1.shape[1], w2.shape[1], wo.shape[1]

    def const(shape):
        return pl.BlockSpec(shape, lambda s: (0, 0))

    grid_spec = pltpu.PrefetchScalarGridSpec(
        num_scalar_prefetch=0,
        grid=(ns,),
        in_specs=[
            const((T * B, F)),                              # xd (time-major)
            const((F, 4 * H)),                              # W_ih^T (bf16)
            const((H, 4 * H)),                              # W_hh^T (bf16)
            const((1, 4 * H)),                              # b_ih + b_hh
            pl.BlockSpec((TS * H, D1), lambda s: (s, 0)),   # Wfc row-slab
            const((1, D1)),                                 # bfc
            const((D1, D2)),                                # W1
            const((1, D2)),                                 # b1
            const((D2, D3)),                                # W2
            const((1, D3)),                                 # b2
            const((D3, DO)),                                # Wo
            const((1, DO)),                                 # bo
        ],
        out_specs=pl.BlockSpec((B, DO), lambda s: (0, 0)),
        scratch_shapes=[
            pltpu.VMEM((T * B, 4 * H), jnp.float32),        # hoisted x @ W_ih
            pltpu.VMEM((B, H), jnp.float32),                # h
            pltpu.VMEM((B, H), jnp.float32),                # c
            pltpu.VMEM((B, D1), jnp.float32),               # fc accumulator
        ],
    )
    return pl.pallas_call(
        fused_rnn_kernel,
        out_shape=jax.ShapeDtypeStruct((B, DO), jnp.float32),
        grid_spec=grid_spec,
        compiler_params=pltpu.CompilerParams(
            dimension_semantics=("arbitrary",),             # serial recurrence
            vmem_limit_bytes=32 << 20),     # footprint ~12 MiB, v7x-safe
    )(xd_tm, wih, whh, b_lstm, wfc, bfc, w1, b1, w2, b2, wo, bo)


# --------------------------------------------------------------------------
# Parameter init (PyTorch-style uniform(-1/sqrt(fan), +1/sqrt(fan)))
# LSTM weights stored pre-transposed (in, out) in bf16 with gate columns
# permuted [i,f,g,o] -> [i,f,o,g]; biases f32. MLP weights pre-transposed
# (in, out) bf16 (f32 accumulation in the kernel).
# --------------------------------------------------------------------------
def _uniform(key, shape, bound):
    return jax.random.uniform(key, shape, jnp.float32, -bound, bound)


def _permute_gates(w):
    # PyTorch LSTM gate-row blocks [i, f, g, o] -> kernel layout [i, f, o, g].
    H = HIDDEN
    return jnp.concatenate([w[:2 * H], w[3 * H:4 * H], w[2 * H:3 * H]], axis=0)


def init_params(key):
    ks = jax.random.split(key, 12)
    kb = 1.0 / jnp.sqrt(HIDDEN)
    p = {}
    # LSTM (generated in PyTorch layout (4H,F)/(4H,H), permuted + transposed).
    p["w_ih"] = _permute_gates(
        _uniform(ks[0], (4 * HIDDEN, FDIM), kb)).T.astype(jnp.bfloat16)
    p["w_hh"] = _permute_gates(
        _uniform(ks[1], (4 * HIDDEN, HIDDEN), kb)).T.astype(jnp.bfloat16)
    p["b_ih"] = _permute_gates(_uniform(ks[2], (4 * HIDDEN,), kb))
    p["b_hh"] = _permute_gates(_uniform(ks[3], (4 * HIDDEN,), kb))

    def linear(k_w, k_b, fan_in, fan_out):
        bound = 1.0 / jnp.sqrt(fan_in)
        w = _uniform(k_w, (fan_out, fan_in), bound)                # (out, in)
        bias = _uniform(k_b, (fan_out,), bound)
        return jnp.transpose(w).astype(jnp.bfloat16), bias         # (in, out)

    p["wfc"], p["bfc"] = linear(ks[4], ks[5], HIDDEN * SEQ, 1024)
    p["w1"], p["b1"] = linear(ks[6], ks[7], 1024, 512)
    p["w2"], p["b2"] = linear(ks[8], ks[9], 512, 256)
    p["wo"], p["bo"] = linear(ks[10], ks[11], 256, FDIM)
    return p


# --------------------------------------------------------------------------
# Pure-JAX f32 reference (same permuted-gate weight layout) for a tolerance
# check of the bf16-operand kernel.
# --------------------------------------------------------------------------
def rnn_reference(xd, params):
    H = HIDDEN
    wih = params["w_ih"].astype(jnp.float32)
    whh = params["w_hh"].astype(jnp.float32)
    b = (params["b_ih"] + params["b_hh"]).reshape(1, -1)
    B = xd.shape[0]

    def step(carry, x_t):
        h, c = carry
        gates = x_t @ wih + h @ whh + b
        sig = jax.nn.sigmoid(gates[:, :3 * H])
        g = jnp.tanh(gates[:, 3 * H:])
        i_g, f_g, o_g = sig[:, :H], sig[:, H:2 * H], sig[:, 2 * H:3 * H]
        c = f_g * c + i_g * g
        h = o_g * jnp.tanh(c)
        return (h, c), h

    h0 = jnp.zeros((B, H), jnp.float32)
    (_, _), hseq = jax.lax.scan(step, (h0, h0), jnp.transpose(xd, (1, 0, 2)))
    hflat = jnp.transpose(hseq, (1, 0, 2)).reshape(B, -1)
    z = jax.nn.sigmoid(hflat @ params["wfc"].astype(jnp.float32) + params["bfc"])
    z = jax.nn.sigmoid(z @ params["w1"].astype(jnp.float32) + params["b1"])
    z = jax.nn.sigmoid(z @ params["w2"].astype(jnp.float32) + params["b2"])
    return z @ params["wo"].astype(jnp.float32) + params["bo"]


if __name__ == "__main__":
    key = jax.random.PRNGKey(0)
    k_x, k_xd, k_xf, k_p = jax.random.split(key, 4)
    B = 2
    x_in = jax.random.normal(k_x, (B, 1, SEQ, FDIM), jnp.float32)   # unused
    xd_in = jax.random.normal(k_xd, (B, SEQ, FDIM), jnp.float32)
    xf_in = jax.random.normal(k_xf, (B, FDIM), jnp.float32)         # unused
    params = init_params(k_p)

    out = rnn_forward(x_in, xd_in, xf_in, params)
    out = jax.block_until_ready(out)
    assert out.shape == (B, FDIM) and out.dtype == jnp.float32
    assert bool(jnp.all(jnp.isfinite(out)))

    ref = jax.block_until_ready(rnn_reference(xd_in, params))
    max_err = float(jnp.max(jnp.abs(out - ref)))
    assert max_err < 0.1, f"kernel/reference mismatch: max_err={max_err}"

    print("KERNEL_OK")
</pallas_src>

<mosaic_0001>
module attributes {stable_mosaic.version = 11 : i64} {
  func.func @fused_rnn_kernel(%arg0: i32, %arg1: memref<96x181xbf16, #tpu.memory_space<vmem>>, %arg2: memref<181x512xbf16, #tpu.memory_space<vmem>>, %arg3: memref<128x512xbf16, #tpu.memory_space<vmem>>, %arg4: memref<1x512xf32, #tpu.memory_space<vmem>>, %arg5: memref<2048x1024xbf16, #tpu.memory_space<vmem>>, %arg6: memref<1x1024xf32, #tpu.memory_space<vmem>>, %arg7: memref<1024x512xbf16, #tpu.memory_space<vmem>>, %arg8: memref<1x512xf32, #tpu.memory_space<vmem>>, %arg9: memref<512x256xbf16, #tpu.memory_space<vmem>>, %arg10: memref<1x256xf32, #tpu.memory_space<vmem>>, %arg11: memref<256x181xbf16, #tpu.memory_space<vmem>>, %arg12: memref<1x181xf32, #tpu.memory_space<vmem>>, %arg13: memref<2x181xf32, #tpu.memory_space<vmem>>, %arg14: memref<96x512xf32, #tpu.memory_space<vmem>>, %arg15: memref<2x128xf32, #tpu.memory_space<vmem>>, %arg16: memref<2x128xf32, #tpu.memory_space<vmem>>, %arg17: memref<2x1024xf32, #tpu.memory_space<vmem>>) attributes {dimension_semantics = [#tpu.dimension_semantics<arbitrary>], iteration_bounds = array<i64: 3>, scalar_prefetch = 0 : i64, scratch_operands = 4 : i64, tpu.core_type = #tpu.core_type<tc>, window_params = [{pipeline_mode = #tpu.pipeline_mode<synchronous>, transform_indices = @transform_0, window_bounds = array<i64: 96, 181>}, {pipeline_mode = #tpu.pipeline_mode<synchronous>, transform_indices = @transform_1, window_bounds = array<i64: 181, 512>}, {pipeline_mode = #tpu.pipeline_mode<synchronous>, transform_indices = @transform_2, window_bounds = array<i64: 128, 512>}, {pipeline_mode = #tpu.pipeline_mode<synchronous>, transform_indices = @transform_3, window_bounds = array<i64: 1, 512>}, {transform_indices = @transform_4, window_bounds = array<i64: 2048, 1024>}, {pipeline_mode = #tpu.pipeline_mode<synchronous>, transform_indices = @transform_5, window_bounds = array<i64: 1, 1024>}, {pipeline_mode = #tpu.pipeline_mode<synchronous>, transform_indices = @transform_6, window_bounds = array<i64: 1024, 512>}, {pipeline_mode = #tpu.pipeline_mode<synchronous>, transform_indices = @transform_7, window_bounds = array<i64: 1, 512>}, {pipeline_mode = #tpu.pipeline_mode<synchronous>, transform_indices = @transform_8, window_bounds = array<i64: 512, 256>}, {pipeline_mode = #tpu.pipeline_mode<synchronous>, transform_indices = @transform_9, window_bounds = array<i64: 1, 256>}, {pipeline_mode = #tpu.pipeline_mode<synchronous>, transform_indices = @transform_10, window_bounds = array<i64: 256, 181>}, {pipeline_mode = #tpu.pipeline_mode<synchronous>, transform_indices = @transform_11, window_bounds = array<i64: 1, 181>}, {pipeline_mode = #tpu.pipeline_mode<synchronous>, transform_indices = @transform_12, window_bounds = array<i64: 2, 181>}]} {
    %c0_i32 = arith.constant 0 : i32
    %0 = arith.cmpi eq, %arg0, %c0_i32 : i32
    %1 = arith.extui %0 : i1 to i32
    %c0_i32_0 = arith.constant 0 : i32
    %2 = arith.cmpi ne, %1, %c0_i32_0 : i32
    scf.if %2 {
      %c0_81 = arith.constant 0 : index
      %c0_82 = arith.constant 0 : index
      %403 = vector.load %arg1[%c0_81, %c0_82] : memref<96x181xbf16, #tpu.memory_space<vmem>>, vector<96x181xbf16>
      %c0_83 = arith.constant 0 : index
      %c0_84 = arith.constant 0 : index
      %404 = vector.load %arg2[%c0_83, %c0_84] : memref<181x512xbf16, #tpu.memory_space<vmem>>, vector<181x512xbf16>
      %cst_85 = arith.constant dense<0.000000e+00> : vector<96x512xf32>
      %405 = tpu.matmul %403, %404, %cst_85 {dimension_numbers = #tpu.dot_dimension_numbers<[1], [0], [0], [1], [0, 0, 1, 1], [], []>} : vector<96x181xbf16>, vector<181x512xbf16>, vector<96x512xf32> -> vector<96x512xf32>
      %c0_86 = arith.constant 0 : index
      %c0_87 = arith.constant 0 : index
      %406 = vector.load %arg4[%c0_86, %c0_87] : memref<1x512xf32, #tpu.memory_space<vmem>>, vector<1x512xf32>
      %407 = vector.broadcast %406 : vector<1x512xf32> to vector<96x512xf32>
      %408 = arith.addf %405, %407 : vector<96x512xf32>
      %c0_88 = arith.constant 0 : index
      %c0_89 = arith.constant 0 : index
      %409 = vector.load %arg14[%c0_88, %c0_89] : memref<96x512xf32, #tpu.memory_space<vmem>>, vector<96x512xf32>
      tpu.vector_store %arg14[%c0_88, %c0_89], %408 {strides = array<i32>} : memref<96x512xf32, #tpu.memory_space<vmem>>, vector<96x512xf32>,
      %cst_90 = arith.constant 0.000000e+00 : f32
      %410 = vector.broadcast %cst_90 : f32 to vector<2x128xf32>
      %c0_91 = arith.constant 0 : index
      %c0_92 = arith.constant 0 : index
      %411 = vector.load %arg15[%c0_91, %c0_92] : memref<2x128xf32, #tpu.memory_space<vmem>>, vector<2x128xf32>
      tpu.vector_store %arg15[%c0_91, %c0_92], %410 {strides = array<i32>} : memref<2x128xf32, #tpu.memory_space<vmem>>, vector<2x128xf32>,
      %cst_93 = arith.constant 0.000000e+00 : f32
      %412 = vector.broadcast %cst_93 : f32 to vector<2x128xf32>
      %c0_94 = arith.constant 0 : index
      %c0_95 = arith.constant 0 : index
      %413 = vector.load %arg16[%c0_94, %c0_95] : memref<2x128xf32, #tpu.memory_space<vmem>>, vector<2x128xf32>
      tpu.vector_store %arg16[%c0_94, %c0_95], %412 {strides = array<i32>} : memref<2x128xf32, #tpu.memory_space<vmem>>, vector<2x128xf32>,
      %cst_96 = arith.constant 0.000000e+00 : f32
      %414 = vector.broadcast %cst_96 : f32 to vector<2x1024xf32>
      %c0_97 = arith.constant 0 : index
      %c0_98 = arith.constant 0 : index
      %415 = vector.load %arg17[%c0_97, %c0_98] : memref<2x1024xf32, #tpu.memory_space<vmem>>, vector<2x1024xf32>
      tpu.vector_store %arg17[%c0_97, %c0_98], %414 {strides = array<i32>} : memref<2x1024xf32, #tpu.memory_space<vmem>>, vector<2x1024xf32>,
    } else {
    }
    %c32_i32 = arith.constant 32 : i32
    %3 = arith.muli %arg0, %c32_i32 : i32
    %4 = tpu.assume_multiple %3, 8 : i32
    %5 = arith.index_cast %4 : i32 to index
    %c0 = arith.constant 0 : index
    %6 = vector.load %arg14[%5, %c0] : memref<96x512xf32, #tpu.memory_space<vmem>>, vector<32x512xf32>
    %c0_1 = arith.constant 0 : index
    %c0_2 = arith.constant 0 : index
    %7 = vector.load %arg3[%c0_1, %c0_2] : memref<128x512xbf16, #tpu.memory_space<vmem>>, vector<128x512xbf16>
    %c0_3 = arith.constant 0 : index
    %c0_4 = arith.constant 0 : index
    %8 = vector.load %arg15[%c0_3, %c0_4] : memref<2x128xf32, #tpu.memory_space<vmem>>, vector<2x128xf32>
    %c0_5 = arith.constant 0 : index
    %c0_6 = arith.constant 0 : index
    %9 = vector.load %arg16[%c0_5, %c0_6] : memref<2x128xf32, #tpu.memory_space<vmem>>, vector<2x128xf32>
    %cst = arith.constant 0.000000e+00 : f32
    %10 = vector.broadcast %cst : f32 to vector<2x1024xf32>
    %11 = vector.extract_strided_slice %6 {offsets = [0, 0], sizes = [2, 512], strides = [1, 1]} : vector<32x512xf32> to vector<2x512xf32>
    %12 = arith.truncf %8 : vector<2x128xf32> to vector<2x128xbf16>
    %cst_7 = arith.constant dense<0.000000e+00> : vector<2x512xf32>
    %13 = tpu.matmul %12, %7, %cst_7 {dimension_numbers = #tpu.dot_dimension_numbers<[1], [0], [0], [1], [0, 0, 1, 1], [], []>} : vector<2x128xbf16>, vector<128x512xbf16>, vector<2x512xf32> -> vector<2x512xf32>
    %14 = arith.addf %11, %13 : vector<2x512xf32>
    %15 = vector.extract_strided_slice %14 {offsets = [0, 0], sizes = [2, 384], strides = [1, 1]} : vector<2x512xf32> to vector<2x384xf32>
    %16 = arith.negf %15 : vector<2x384xf32>
    %17 = math.exp %16 : vector<2x384xf32>
    %cst_8 = arith.constant 1.000000e+00 : f32
    %18 = vector.broadcast %cst_8 : f32 to vector<2x384xf32>
    %19 = arith.addf %18, %17 : vector<2x384xf32>
    %20 = arith.divf %18, %19 : vector<2x384xf32>
    %21 = vector.extract_strided_slice %14 {offsets = [0, 384], sizes = [2, 128], strides = [1, 1]} : vector<2x512xf32> to vector<2x128xf32>
    %22 = math.tanh %21 : vector<2x128xf32>
    %23 = vector.extract_strided_slice %20 {offsets = [0, 0], sizes = [2, 128], strides = [1, 1]} : vector<2x384xf32> to vector<2x128xf32>
    %24 = vector.extract_strided_slice %20 {offsets = [0, 128], sizes = [2, 128], strides = [1, 1]} : vector<2x384xf32> to vector<2x128xf32>
    %25 = vector.extract_strided_slice %20 {offsets = [0, 256], sizes = [2, 128], strides = [1, 1]} : vector<2x384xf32> to vector<2x128xf32>
    %26 = arith.mulf %24, %9 : vector<2x128xf32>
    %27 = arith.mulf %23, %22 : vector<2x128xf32>
    %28 = arith.addf %26, %27 : vector<2x128xf32>
    %29 = math.tanh %28 : vector<2x128xf32>
    %30 = arith.mulf %25, %29 : vector<2x128xf32>
    %31 = arith.truncf %30 : vector<2x128xf32> to vector<2x128xbf16>
    %c0_9 = arith.constant 0 : index
    %c0_10 = arith.constant 0 : index
    %32 = vector.load %arg5[%c0_9, %c0_10] : memref<2048x1024xbf16, #tpu.memory_space<vmem>>, vector<128x1024xbf16>
    %cst_11 = arith.constant dense<0.000000e+00> : vector<2x1024xf32>
    %33 = tpu.matmul %31, %32, %cst_11 {dimension_numbers = #tpu.dot_dimension_numbers<[1], [0], [0], [1], [0, 0, 1, 1], [], []>} : vector<2x128xbf16>, vector<128x1024xbf16>, vector<2x1024xf32> -> vector<2x1024xf32>
    %34 = arith.addf %10, %33 : vector<2x1024xf32>
    %35 = vector.extract_strided_slice %6 {offsets = [2, 0], sizes = [2, 512], strides = [1, 1]} : vector<32x512xf32> to vector<2x512xf32>
    %36 = arith.truncf %30 : vector<2x128xf32> to vector<2x128xbf16>
    %cst_12 = arith.constant dense<0.000000e+00> : vector<2x512xf32>
    %37 = tpu.matmul %36, %7, %cst_12 {dimension_numbers = #tpu.dot_dimension_numbers<[1], [0], [0], [1], [0, 0, 1, 1], [], []>} : vector<2x128xbf16>, vector<128x512xbf16>, vector<2x512xf32> -> vector<2x512xf32>
    %38 = arith.addf %35, %37 : vector<2x512xf32>
    %39 = vector.extract_strided_slice %38 {offsets = [0, 0], sizes = [2, 384], strides = [1, 1]} : vector<2x512xf32> to vector<2x384xf32>
    %40 = arith.negf %39 : vector<2x384xf32>
    %41 = math.exp %40 : vector<2x384xf32>
    %cst_13 = arith.constant 1.000000e+00 : f32
    %42 = vector.broadcast %cst_13 : f32 to vector<2x384xf32>
    %43 = arith.addf %42, %41 : vector<2x384xf32>
    %44 = arith.divf %42, %43 : vector<2x384xf32>
    %45 = vector.extract_strided_slice %38 {offsets = [0, 384], sizes = [2, 128], strides = [1, 1]} : vector<2x512xf32> to vector<2x128xf32>
    %46 = math.tanh %45 : vector<2x128xf32>
    %47 = vector.extract_strided_slice %44 {offsets = [0, 0], sizes = [2, 128], strides = [1, 1]} : vector<2x384xf32> to vector<2x128xf32>
    %48 = vector.extract_strided_slice %44 {offsets = [0, 128], sizes = [2, 128], strides = [1, 1]} : vector<2x384xf32> to vector<2x128xf32>
    %49 = vector.extract_strided_slice %44 {offsets = [0, 256], sizes = [2, 128], strides = [1, 1]} : vector<2x384xf32> to vector<2x128xf32>
    %50 = arith.mulf %48, %28 : vector<2x128xf32>
    %51 = arith.mulf %47, %46 : vector<2x128xf32>
    %52 = arith.addf %50, %51 : vector<2x128xf32>
    %53 = math.tanh %52 : vector<2x128xf32>
    %54 = arith.mulf %49, %53 : vector<2x128xf32>
    %55 = arith.truncf %54 : vector<2x128xf32> to vector<2x128xbf16>
    %c128 = arith.constant 128 : index
    %c0_14 = arith.constant 0 : index
    %56 = vector.load %arg5[%c128, %c0_14] : memref<2048x1024xbf16, #tpu.memory_space<vmem>>, vector<128x1024xbf16>
    %cst_15 = arith.constant dense<0.000000e+00> : vector<2x1024xf32>
    %57 = tpu.matmul %55, %56, %cst_15 {dimension_numbers = #tpu.dot_dimension_numbers<[1], [0], [0], [1], [0, 0, 1, 1], [], []>} : vector<2x128xbf16>, vector<128x1024xbf16>, vector<2x1024xf32> -> vector<2x1024xf32>
    %58 = arith.addf %34, %57 : vector<2x1024xf32>
    %59 = vector.extract_strided_slice %6 {offsets = [4, 0], sizes = [2, 512], strides = [1, 1]} : vector<32x512xf32> to vector<2x512xf32>
    %60 = arith.truncf %54 : vector<2x128xf32> to vector<2x128xbf16>
    %cst_16 = arith.constant dense<0.000000e+00> : vector<2x512xf32>
    %61 = tpu.matmul %60, %7, %cst_16 {dimension_numbers = #tpu.dot_dimension_numbers<[1], [0], [0], [1], [0, 0, 1, 1], [], []>} : vector<2x128xbf16>, vector<128x512xbf16>, vector<2x512xf32> -> vector<2x512xf32>
    %62 = arith.addf %59, %61 : vector<2x512xf32>
    %63 = vector.extract_strided_slice %62 {offsets = [0, 0], sizes = [2, 384], strides = [1, 1]} : vector<2x512xf32> to vector<2x384xf32>
    %64 = arith.negf %63 : vector<2x384xf32>
    %65 = math.exp %64 : vector<2x384xf32>
    %cst_17 = arith.constant 1.000000e+00 : f32
    %66 = vector.broadcast %cst_17 : f32 to vector<2x384xf32>
    %67 = arith.addf %66, %65 : vector<2x384xf32>
    %68 = arith.divf %66, %67 : vector<2x384xf32>
    %69 = vector.extract_strided_slice %62 {offsets = [0, 384], sizes = [2, 128], strides = [1, 1]} : vector<2x512xf32> to vector<2x128xf32>
    %70 = math.tanh %69 : vector<2x128xf32>
    %71 = vector.extract_strided_slice %68 {offsets = [0, 0], sizes = [2, 128], strides = [1, 1]} : vector<2x384xf32> to vector<2x128xf32>
    %72 = vector.extract_strided_slice %68 {offsets = [0, 128], sizes = [2, 128], strides = [1, 1]} : vector<2x384xf32> to vector<2x128xf32>
    %73 = vector.extract_strided_slice %68 {offsets = [0, 256], sizes = [2, 128], strides = [1, 1]} : vector<2x384xf32> to vector<2x128xf32>
    %74 = arith.mulf %72, %52 : vector<2x128xf32>
    %75 = arith.mulf %71, %70 : vector<2x128xf32>
    %76 = arith.addf %74, %75 : vector<2x128xf32>
    %77 = math.tanh %76 : vector<2x128xf32>
    %78 = arith.mulf %73, %77 : vector<2x128xf32>
    %79 = arith.truncf %78 : vector<2x128xf32> to vector<2x128xbf16>
    %c256 = arith.constant 256 : index
    %c0_18 = arith.constant 0 : index
    %80 = vector.load %arg5[%c256, %c0_18] : memref<2048x1024xbf16, #tpu.memory_space<vmem>>, vector<128x1024xbf16>
    %cst_19 = arith.constant dense<0.000000e+00> : vector<2x1024xf32>
    %81 = tpu.matmul %79, %80, %cst_19 {dimension_numbers = #tpu.dot_dimension_numbers<[1], [0], [0], [1], [0, 0, 1, 1], [], []>} : vector<2x128xbf16>, vector<128x1024xbf16>, vector<2x1024xf32> -> vector<2x1024xf32>
    %82 = arith.addf %58, %81 : vector<2x1024xf32>
    %83 = vector.extract_strided_slice %6 {offsets = [6, 0], sizes = [2, 512], strides = [1, 1]} : vector<32x512xf32> to vector<2x512xf32>
    %84 = arith.truncf %78 : vector<2x128xf32> to vector<2x128xbf16>
    %cst_20 = arith.constant dense<0.000000e+00> : vector<2x512xf32>
    %85 = tpu.matmul %84, %7, %cst_20 {dimension_numbers = #tpu.dot_dimension_numbers<[1], [0], [0], [1], [0, 0, 1, 1], [], []>} : vector<2x128xbf16>, vector<128x512xbf16>, vector<2x512xf32> -> vector<2x512xf32>
    %86 = arith.addf %83, %85 : vector<2x512xf32>
    %87 = vector.extract_strided_slice %86 {offsets = [0, 0], sizes = [2, 384], strides = [1, 1]} : vector<2x512xf32> to vector<2x384xf32>
    %88 = arith.negf %87 : vector<2x384xf32>
    %89 = math.exp %88 : vector<2x384xf32>
    %cst_21 = arith.constant 1.000000e+00 : f32
    %90 = vector.broadcast %cst_21 : f32 to vector<2x384xf32>
    %91 = arith.addf %90, %89 : vector<2x384xf32>
    %92 = arith.divf %90, %91 : vector<2x384xf32>
    %93 = vector.extract_strided_slice %86 {offsets = [0, 384], sizes = [2, 128], strides = [1, 1]} : vector<2x512xf32> to vector<2x128xf32>
    %94 = math.tanh %93 : vector<2x128xf32>
    %95 = vector.extract_strided_slice %92 {offsets = [0, 0], sizes = [2, 128], strides = [1, 1]} : vector<2x384xf32> to vector<2x128xf32>
    %96 = vector.extract_strided_slice %92 {offsets = [0, 128], sizes = [2, 128], strides = [1, 1]} : vector<2x384xf32> to vector<2x128xf32>
    %97 = vector.extract_strided_slice %92 {offsets = [0, 256], sizes = [2, 128], strides = [1, 1]} : vector<2x384xf32> to vector<2x128xf32>
    %98 = arith.mulf %96, %76 : vector<2x128xf32>
    %99 = arith.mulf %95, %94 : vector<2x128xf32>
    %100 = arith.addf %98, %99 : vector<2x128xf32>
    %101 = math.tanh %100 : vector<2x128xf32>
    %102 = arith.mulf %97, %101 : vector<2x128xf32>
    %103 = arith.truncf %102 : vector<2x128xf32> to vector<2x128xbf16>
    %c384 = arith.constant 384 : index
    %c0_22 = arith.constant 0 : index
    %104 = vector.load %arg5[%c384, %c0_22] : memref<2048x1024xbf16, #tpu.memory_space<vmem>>, vector<128x1024xbf16>
    %cst_23 = arith.constant dense<0.000000e+00> : vector<2x1024xf32>
    %105 = tpu.matmul %103, %104, %cst_23 {dimension_numbers = #tpu.dot_dimension_numbers<[1], [0], [0], [1], [0, 0, 1, 1], [], []>} : vector<2x128xbf16>, vector<128x1024xbf16>, vector<2x1024xf32> -> vector<2x1024xf32>
    %106 = arith.addf %82, %105 : vector<2x1024xf32>
    %107 = vector.extract_strided_slice %6 {offsets = [8, 0], sizes = [2, 512], strides = [1, 1]} : vector<32x512xf32> to vector<2x512xf32>
    %108 = arith.truncf %102 : vector<2x128xf32> to vector<2x128xbf16>
    %cst_24 = arith.constant dense<0.000000e+00> : vector<2x512xf32>
    %109 = tpu.matmul %108, %7, %cst_24 {dimension_numbers = #tpu.dot_dimension_numbers<[1], [0], [0], [1], [0, 0, 1, 1], [], []>} : vector<2x128xbf16>, vector<128x512xbf16>, vector<2x512xf32> -> vector<2x512xf32>
    %110 = arith.addf %107, %109 : vector<2x512xf32>
    %111 = vector.extract_strided_slice %110 {offsets = [0, 0], sizes = [2, 384], strides = [1, 1]} : vector<2x512xf32> to vector<2x384xf32>
    %112 = arith.negf %111 : vector<2x384xf32>
    %113 = math.exp %112 : vector<2x384xf32>
    %cst_25 = arith.constant 1.000000e+00 : f32
    %114 = vector.broadcast %cst_25 : f32 to vector<2x384xf32>
    %115 = arith.addf %114, %113 : vector<2x384xf32>
    %116 = arith.divf %114, %115 : vector<2x384xf32>
    %117 = vector.extract_strided_slice %110 {offsets = [0, 384], sizes = [2, 128], strides = [1, 1]} : vector<2x512xf32> to vector<2x128xf32>
    %118 = math.tanh %117 : vector<2x128xf32>
    %119 = vector.extract_strided_slice %116 {offsets = [0, 0], sizes = [2, 128], strides = [1, 1]} : vector<2x384xf32> to vector<2x128xf32>
    %120 = vector.extract_strided_slice %116 {offsets = [0, 128], sizes = [2, 128], strides = [1, 1]} : vector<2x384xf32> to vector<2x128xf32>
    %121 = vector.extract_strided_slice %116 {offsets = [0, 256], sizes = [2, 128], strides = [1, 1]} : vector<2x384xf32> to vector<2x128xf32>
    %122 = arith.mulf %120, %100 : vector<2x128xf32>
    %123 = arith.mulf %119, %118 : vector<2x128xf32>
    %124 = arith.addf %122, %123 : vector<2x128xf32>
    %125 = math.tanh %124 : vector<2x128xf32>
    %126 = arith.mulf %121, %125 : vector<2x128xf32>
    %127 = arith.truncf %126 : vector<2x128xf32> to vector<2x128xbf16>
    %c512 = arith.constant 512 : index
    %c0_26 = arith.constant 0 : index
    %128 = vector.load %arg5[%c512, %c0_26] : memref<2048x1024xbf16, #tpu.memory_space<vmem>>, vector<128x1024xbf16>
    %cst_27 = arith.constant dense<0.000000e+00> : vector<2x1024xf32>
    %129 = tpu.matmul %127, %128, %cst_27 {dimension_numbers = #tpu.dot_dimension_numbers<[1], [0], [0], [1], [0, 0, 1, 1], [], []>} : vector<2x128xbf16>, vector<128x1024xbf16>, vector<2x1024xf32> -> vector<2x1024xf32>
    %130 = arith.addf %106, %129 : vector<2x1024xf32>
    %131 = vector.extract_strided_slice %6 {offsets = [10, 0], sizes = [2, 512], strides = [1, 1]} : vector<32x512xf32> to vector<2x512xf32>
    %132 = arith.truncf %126 : vector<2x128xf32> to vector<2x128xbf16>
    %cst_28 = arith.constant dense<0.000000e+00> : vector<2x512xf32>
    %133 = tpu.matmul %132, %7, %cst_28 {dimension_numbers = #tpu.dot_dimension_numbers<[1], [0], [0], [1], [0, 0, 1, 1], [], []>} : vector<2x128xbf16>, vector<128x512xbf16>, vector<2x512xf32> -> vector<2x512xf32>
    %134 = arith.addf %131, %133 : vector<2x512xf32>
    %135 = vector.extract_strided_slice %134 {offsets = [0, 0], sizes = [2, 384], strides = [1, 1]} : vector<2x512xf32> to vector<2x384xf32>
    %136 = arith.negf %135 : vector<2x384xf32>
    %137 = math.exp %136 : vector<2x384xf32>
    %cst_29 = arith.constant 1.000000e+00 : f32
    %138 = vector.broadcast %cst_29 : f32 to vector<2x384xf32>
    %139 = arith.addf %138, %137 : vector<2x384xf32>
    %140 = arith.divf %138, %139 : vector<2x384xf32>
    %141 = vector.extract_strided_slice %134 {offsets = [0, 384], sizes = [2, 128], strides = [1, 1]} : vector<2x512xf32> to vector<2x128xf32>
    %142 = math.tanh %141 : vector<2x128xf32>
    %143 = vector.extract_strided_slice %140 {offsets = [0, 0], sizes = [2, 128], strides = [1, 1]} : vector<2x384xf32> to vector<2x128xf32>
    %144 = vector.extract_strided_slice %140 {offsets = [0, 128], sizes = [2, 128], strides = [1, 1]} : vector<2x384xf32> to vector<2x128xf32>
    %145 = vector.extract_strided_slice %140 {offsets = [0, 256], sizes = [2, 128], strides = [1, 1]} : vector<2x384xf32> to vector<2x128xf32>
    %146 = arith.mulf %144, %124 : vector<2x128xf32>
    %147 = arith.mulf %143, %142 : vector<2x128xf32>
    %148 = arith.addf %146, %147 : vector<2x128xf32>
    %149 = math.tanh %148 : vector<2x128xf32>
    %150 = arith.mulf %145, %149 : vector<2x128xf32>
    %151 = arith.truncf %150 : vector<2x128xf32> to vector<2x128xbf16>
    %c640 = arith.constant 640 : index
    %c0_30 = arith.constant 0 : index
    %152 = vector.load %arg5[%c640, %c0_30] : memref<2048x1024xbf16, #tpu.memory_space<vmem>>, vector<128x1024xbf16>
    %cst_31 = arith.constant dense<0.000000e+00> : vector<2x1024xf32>
    %153 = tpu.matmul %151, %152, %cst_31 {dimension_numbers = #tpu.dot_dimension_numbers<[1], [0], [0], [1], [0, 0, 1, 1], [], []>} : vector<2x128xbf16>, vector<128x1024xbf16>, vector<2x1024xf32> -> vector<2x1024xf32>
    %154 = arith.addf %130, %153 : vector<2x1024xf32>
    %155 = vector.extract_strided_slice %6 {offsets = [12, 0], sizes = [2, 512], strides = [1, 1]} : vector<32x512xf32> to vector<2x512xf32>
    %156 = arith.truncf %150 : vector<2x128xf32> to vector<2x128xbf16>
    %cst_32 = arith.constant dense<0.000000e+00> : vector<2x512xf32>
    %157 = tpu.matmul %156, %7, %cst_32 {dimension_numbers = #tpu.dot_dimension_numbers<[1], [0], [0], [1], [0, 0, 1, 1], [], []>} : vector<2x128xbf16>, vector<128x512xbf16>, vector<2x512xf32> -> vector<2x512xf32>
    %158 = arith.addf %155, %157 : vector<2x512xf32>
    %159 = vector.extract_strided_slice %158 {offsets = [0, 0], sizes = [2, 384], strides = [1, 1]} : vector<2x512xf32> to vector<2x384xf32>
    %160 = arith.negf %159 : vector<2x384xf32>
    %161 = math.exp %160 : vector<2x384xf32>
    %cst_33 = arith.constant 1.000000e+00 : f32
    %162 = vector.broadcast %cst_33 : f32 to vector<2x384xf32>
    %163 = arith.addf %162, %161 : vector<2x384xf32>
    %164 = arith.divf %162, %163 : vector<2x384xf32>
    %165 = vector.extract_strided_slice %158 {offsets = [0, 384], sizes = [2, 128], strides = [1, 1]} : vector<2x512xf32> to vector<2x128xf32>
    %166 = math.tanh %165 : vector<2x128xf32>
    %167 = vector.extract_strided_slice %164 {offsets = [0, 0], sizes = [2, 128], strides = [1, 1]} : vector<2x384xf32> to vector<2x128xf32>
    %168 = vector.extract_strided_slice %164 {offsets = [0, 128], sizes = [2, 128], strides = [1, 1]} : vector<2x384xf32> to vector<2x128xf32>
    %169 = vector.extract_strided_slice %164 {offsets = [0, 256], sizes = [2, 128], strides = [1, 1]} : vector<2x384xf32> to vector<2x128xf32>
    %170 = arith.mulf %168, %148 : vector<2x128xf32>
    %171 = arith.mulf %167, %166 : vector<2x128xf32>
    %172 = arith.addf %170, %171 : vector<2x128xf32>
    %173 = math.tanh %172 : vector<2x128xf32>
    %174 = arith.mulf %169, %173 : vector<2x128xf32>
    %175 = arith.truncf %174 : vector<2x128xf32> to vector<2x128xbf16>
    %c768 = arith.constant 768 : index
    %c0_34 = arith.constant 0 : index
    %176 = vector.load %arg5[%c768, %c0_34] : memref<2048x1024xbf16, #tpu.memory_space<vmem>>, vector<128x1024xbf16>
    %cst_35 = arith.constant dense<0.000000e+00> : vector<2x1024xf32>
    %177 = tpu.matmul %175, %176, %cst_35 {dimension_numbers = #tpu.dot_dimension_numbers<[1], [0], [0], [1], [0, 0, 1, 1], [], []>} : vector<2x128xbf16>, vector<128x1024xbf16>, vector<2x1024xf32> -> vector<2x1024xf32>
    %178 = arith.addf %154, %177 : vector<2x1024xf32>
    %179 = vector.extract_strided_slice %6 {offsets = [14, 0], sizes = [2, 512], strides = [1, 1]} : vector<32x512xf32> to vector<2x512xf32>
    %180 = arith.truncf %174 : vector<2x128xf32> to vector<2x128xbf16>
    %cst_36 = arith.constant dense<0.000000e+00> : vector<2x512xf32>
    %181 = tpu.matmul %180, %7, %cst_36 {dimension_numbers = #tpu.dot_dimension_numbers<[1], [0], [0], [1], [0, 0, 1, 1], [], []>} : vector<2x128xbf16>, vector<128x512xbf16>, vector<2x512xf32> -> vector<2x512xf32>
    %182 = arith.addf %179, %181 : vector<2x512xf32>
    %183 = vector.extract_strided_slice %182 {offsets = [0, 0], sizes = [2, 384], strides = [1, 1]} : vector<2x512xf32> to vector<2x384xf32>
    %184 = arith.negf %183 : vector<2x384xf32>
    %185 = math.exp %184 : vector<2x384xf32>
    %cst_37 = arith.constant 1.000000e+00 : f32
    %186 = vector.broadcast %cst_37 : f32 to vector<2x384xf32>
    %187 = arith.addf %186, %185 : vector<2x384xf32>
    %188 = arith.divf %186, %187 : vector<2x384xf32>
    %189 = vector.extract_strided_slice %182 {offsets = [0, 384], sizes = [2, 128], strides = [1, 1]} : vector<2x512xf32> to vector<2x128xf32>
    %190 = math.tanh %189 : vector<2x128xf32>
    %191 = vector.extract_strided_slice %188 {offsets = [0, 0], sizes = [2, 128], strides = [1, 1]} : vector<2x384xf32> to vector<2x128xf32>
    %192 = vector.extract_strided_slice %188 {offsets = [0, 128], sizes = [2, 128], strides = [1, 1]} : vector<2x384xf32> to vector<2x128xf32>
    %193 = vector.extract_strided_slice %188 {offsets = [0, 256], sizes = [2, 128], strides = [1, 1]} : vector<2x384xf32> to vector<2x128xf32>
    %194 = arith.mulf %192, %172 : vector<2x128xf32>
    %195 = arith.mulf %191, %190 : vector<2x128xf32>
    %196 = arith.addf %194, %195 : vector<2x128xf32>
    %197 = math.tanh %196 : vector<2x128xf32>
    %198 = arith.mulf %193, %197 : vector<2x128xf32>
    %199 = arith.truncf %198 : vector<2x128xf32> to vector<2x128xbf16>
    %c896 = arith.constant 896 : index
    %c0_38 = arith.constant 0 : index
    %200 = vector.load %arg5[%c896, %c0_38] : memref<2048x1024xbf16, #tpu.memory_space<vmem>>, vector<128x1024xbf16>
    %cst_39 = arith.constant dense<0.000000e+00> : vector<2x1024xf32>
    %201 = tpu.matmul %199, %200, %cst_39 {dimension_numbers = #tpu.dot_dimension_numbers<[1], [0], [0], [1], [0, 0, 1, 1], [], []>} : vector<2x128xbf16>, vector<128x1024xbf16>, vector<2x1024xf32> -> vector<2x1024xf32>
    %202 = arith.addf %178, %201 : vector<2x1024xf32>
    %203 = vector.extract_strided_slice %6 {offsets = [16, 0], sizes = [2, 512], strides = [1, 1]} : vector<32x512xf32> to vector<2x512xf32>
    %204 = arith.truncf %198 : vector<2x128xf32> to vector<2x128xbf16>
    %cst_40 = arith.constant dense<0.000000e+00> : vector<2x512xf32>
    %205 = tpu.matmul %204, %7, %cst_40 {dimension_numbers = #tpu.dot_dimension_numbers<[1], [0], [0], [1], [0, 0, 1, 1], [], []>} : vector<2x128xbf16>, vector<128x512xbf16>, vector<2x512xf32> -> vector<2x512xf32>
    %206 = arith.addf %203, %205 : vector<2x512xf32>
    %207 = vector.extract_strided_slice %206 {offsets = [0, 0], sizes = [2, 384], strides = [1, 1]} : vector<2x512xf32> to vector<2x384xf32>
    %208 = arith.negf %207 : vector<2x384xf32>
    %209 = math.exp %208 : vector<2x384xf32>
    %cst_41 = arith.constant 1.000000e+00 : f32
    %210 = vector.broadcast %cst_41 : f32 to vector<2x384xf32>
    %211 = arith.addf %210, %209 : vector<2x384xf32>
    %212 = arith.divf %210, %211 : vector<2x384xf32>
    %213 = vector.extract_strided_slice %206 {offsets = [0, 384], sizes = [2, 128], strides = [1, 1]} : vector<2x512xf32> to vector<2x128xf32>
    %214 = math.tanh %213 : vector<2x128xf32>
    %215 = vector.extract_strided_slice %212 {offsets = [0, 0], sizes = [2, 128], strides = [1, 1]} : vector<2x384xf32> to vector<2x128xf32>
    %216 = vector.extract_strided_slice %212 {offsets = [0, 128], sizes = [2, 128], strides = [1, 1]} : vector<2x384xf32> to vector<2x128xf32>
    %217 = vector.extract_strided_slice %212 {offsets = [0, 256], sizes = [2, 128], strides = [1, 1]} : vector<2x384xf32> to vector<2x128xf32>
    %218 = arith.mulf %216, %196 : vector<2x128xf32>
    %219 = arith.mulf %215, %214 : vector<2x128xf32>
    %220 = arith.addf %218, %219 : vector<2x128xf32>
    %221 = math.tanh %220 : vector<2x128xf32>
    %222 = arith.mulf %217, %221 : vector<2x128xf32>
    %223 = arith.truncf %222 : vector<2x128xf32> to vector<2x128xbf16>
    %c1024 = arith.constant 1024 : index
    %c0_42 = arith.constant 0 : index
    %224 = vector.load %arg5[%c1024, %c0_42] : memref<2048x1024xbf16, #tpu.memory_space<vmem>>, vector<128x1024xbf16>
    %cst_43 = arith.constant dense<0.000000e+00> : vector<2x1024xf32>
    %225 = tpu.matmul %223, %224, %cst_43 {dimension_numbers = #tpu.dot_dimension_numbers<[1], [0], [0], [1], [0, 0, 1, 1], [], []>} : vector<2x128xbf16>, vector<128x1024xbf16>, vector<2x1024xf32> -> vector<2x1024xf32>
    %226 = arith.addf %202, %225 : vector<2x1024xf32>
    %227 = vector.extract_strided_slice %6 {offsets = [18, 0], sizes = [2, 512], strides = [1, 1]} : vector<32x512xf32> to vector<2x512xf32>
    %228 = arith.truncf %222 : vector<2x128xf32> to vector<2x128xbf16>
    %cst_44 = arith.constant dense<0.000000e+00> : vector<2x512xf32>
    %229 = tpu.matmul %228, %7, %cst_44 {dimension_numbers = #tpu.dot_dimension_numbers<[1], [0], [0], [1], [0, 0, 1, 1], [], []>} : vector<2x128xbf16>, vector<128x512xbf16>, vector<2x512xf32> -> vector<2x512xf32>
    %230 = arith.addf %227, %229 : vector<2x512xf32>
    %231 = vector.extract_strided_slice %230 {offsets = [0, 0], sizes = [2, 384], strides = [1, 1]} : vector<2x512xf32> to vector<2x384xf32>
    %232 = arith.negf %231 : vector<2x384xf32>
    %233 = math.exp %232 : vector<2x384xf32>
    %cst_45 = arith.constant 1.000000e+00 : f32
    %234 = vector.broadcast %cst_45 : f32 to vector<2x384xf32>
    %235 = arith.addf %234, %233 : vector<2x384xf32>
    %236 = arith.divf %234, %235 : vector<2x384xf32>
    %237 = vector.extract_strided_slice %230 {offsets = [0, 384], sizes = [2, 128], strides = [1, 1]} : vector<2x512xf32> to vector<2x128xf32>
    %238 = math.tanh %237 : vector<2x128xf32>
    %239 = vector.extract_strided_slice %236 {offsets = [0, 0], sizes = [2, 128], strides = [1, 1]} : vector<2x384xf32> to vector<2x128xf32>
    %240 = vector.extract_strided_slice %236 {offsets = [0, 128], sizes = [2, 128], strides = [1, 1]} : vector<2x384xf32> to vector<2x128xf32>
    %241 = vector.extract_strided_slice %236 {offsets = [0, 256], sizes = [2, 128], strides = [1, 1]} : vector<2x384xf32> to vector<2x128xf32>
    %242 = arith.mulf %240, %220 : vector<2x128xf32>
    %243 = arith.mulf %239, %238 : vector<2x128xf32>
    %244 = arith.addf %242, %243 : vector<2x128xf32>
    %245 = math.tanh %244 : vector<2x128xf32>
    %246 = arith.mulf %241, %245 : vector<2x128xf32>
    %247 = arith.truncf %246 : vector<2x128xf32> to vector<2x128xbf16>
    %c1152 = arith.constant 1152 : index
    %c0_46 = arith.constant 0 : index
    %248 = vector.load %arg5[%c1152, %c0_46] : memref<2048x1024xbf16, #tpu.memory_space<vmem>>, vector<128x1024xbf16>
    %cst_47 = arith.constant dense<0.000000e+00> : vector<2x1024xf32>
    %249 = tpu.matmul %247, %248, %cst_47 {dimension_numbers = #tpu.dot_dimension_numbers<[1], [0], [0], [1], [0, 0, 1, 1], [], []>} : vector<2x128xbf16>, vector<128x1024xbf16>, vector<2x1024xf32> -> vector<2x1024xf32>
    %250 = arith.addf %226, %249 : vector<2x1024xf32>
    %251 = vector.extract_strided_slice %6 {offsets = [20, 0], sizes = [2, 512], strides = [1, 1]} : vector<32x512xf32> to vector<2x512xf32>
    %252 = arith.truncf %246 : vector<2x128xf32> to vector<2x128xbf16>
    %cst_48 = arith.constant dense<0.000000e+00> : vector<2x512xf32>
    %253 = tpu.matmul %252, %7, %cst_48 {dimension_numbers = #tpu.dot_dimension_numbers<[1], [0], [0], [1], [0, 0, 1, 1], [], []>} : vector<2x128xbf16>, vector<128x512xbf16>, vector<2x512xf32> -> vector<2x512xf32>
    %254 = arith.addf %251, %253 : vector<2x512xf32>
    %255 = vector.extract_strided_slice %254 {offsets = [0, 0], sizes = [2, 384], strides = [1, 1]} : vector<2x512xf32> to vector<2x384xf32>
    %256 = arith.negf %255 : vector<2x384xf32>
    %257 = math.exp %256 : vector<2x384xf32>
    %cst_49 = arith.constant 1.000000e+00 : f32
    %258 = vector.broadcast %cst_49 : f32 to vector<2x384xf32>
    %259 = arith.addf %258, %257 : vector<2x384xf32>
    %260 = arith.divf %258, %259 : vector<2x384xf32>
    %261 = vector.extract_strided_slice %254 {offsets = [0, 384], sizes = [2, 128], strides = [1, 1]} : vector<2x512xf32> to vector<2x128xf32>
    %262 = math.tanh %261 : vector<2x128xf32>
    %263 = vector.extract_strided_slice %260 {offsets = [0, 0], sizes = [2, 128], strides = [1, 1]} : vector<2x384xf32> to vector<2x128xf32>
    %264 = vector.extract_strided_slice %260 {offsets = [0, 128], sizes = [2, 128], strides = [1, 1]} : vector<2x384xf32> to vector<2x128xf32>
    %265 = vector.extract_strided_slice %260 {offsets = [0, 256], sizes = [2, 128], strides = [1, 1]} : vector<2x384xf32> to vector<2x128xf32>
    %266 = arith.mulf %264, %244 : vector<2x128xf32>
    %267 = arith.mulf %263, %262 : vector<2x128xf32>
    %268 = arith.addf %266, %267 : vector<2x128xf32>
    %269 = math.tanh %268 : vector<2x128xf32>
    %270 = arith.mulf %265, %269 : vector<2x128xf32>
    %271 = arith.truncf %270 : vector<2x128xf32> to vector<2x128xbf16>
    %c1280 = arith.constant 1280 : index
    %c0_50 = arith.constant 0 : index
    %272 = vector.load %arg5[%c1280, %c0_50] : memref<2048x1024xbf16, #tpu.memory_space<vmem>>, vector<128x1024xbf16>
    %cst_51 = arith.constant dense<0.000000e+00> : vector<2x1024xf32>
    %273 = tpu.matmul %271, %272, %cst_51 {dimension_numbers = #tpu.dot_dimension_numbers<[1], [0], [0], [1], [0, 0, 1, 1], [], []>} : vector<2x128xbf16>, vector<128x1024xbf16>, vector<2x1024xf32> -> vector<2x1024xf32>
    %274 = arith.addf %250, %273 : vector<2x1024xf32>
    %275 = vector.extract_strided_slice %6 {offsets = [22, 0], sizes = [2, 512], strides = [1, 1]} : vector<32x512xf32> to vector<2x512xf32>
    %276 = arith.truncf %270 : vector<2x128xf32> to vector<2x128xbf16>
    %cst_52 = arith.constant dense<0.000000e+00> : vector<2x512xf32>
    %277 = tpu.matmul %276, %7, %cst_52 {dimension_numbers = #tpu.dot_dimension_numbers<[1], [0], [0], [1], [0, 0, 1, 1], [], []>} : vector<2x128xbf16>, vector<128x512xbf16>, vector<2x512xf32> -> vector<2x512xf32>
    %278 = arith.addf %275, %277 : vector<2x512xf32>
    %279 = vector.extract_strided_slice %278 {offsets = [0, 0], sizes = [2, 384], strides = [1, 1]} : vector<2x512xf32> to vector<2x384xf32>
    %280 = arith.negf %279 : vector<2x384xf32>
    %281 = math.exp %280 : vector<2x384xf32>
    %cst_53 = arith.constant 1.000000e+00 : f32
    %282 = vector.broadcast %cst_53 : f32 to vector<2x384xf32>
    %283 = arith.addf %282, %281 : vector<2x384xf32>
    %284 = arith.divf %282, %283 : vector<2x384xf32>
    %285 = vector.extract_strided_slice %278 {offsets = [0, 384], sizes = [2, 128], strides = [1, 1]} : vector<2x512xf32> to vector<2x128xf32>
    %286 = math.tanh %285 : vector<2x128xf32>
    %287 = vector.extract_strided_slice %284 {offsets = [0, 0], sizes = [2, 128], strides = [1, 1]} : vector<2x384xf32> to vector<2x128xf32>
    %288 = vector.extract_strided_slice %284 {offsets = [0, 128], sizes = [2, 128], strides = [1, 1]} : vector<2x384xf32> to vector<2x128xf32>
    %289 = vector.extract_strided_slice %284 {offsets = [0, 256], sizes = [2, 128], strides = [1, 1]} : vector<2x384xf32> to vector<2x128xf32>
    %290 = arith.mulf %288, %268 : vector<2x128xf32>
    %291 = arith.mulf %287, %286 : vector<2x128xf32>
    %292 = arith.addf %290, %291 : vector<2x128xf32>
    %293 = math.tanh %292 : vector<2x128xf32>
    %294 = arith.mulf %289, %293 : vector<2x128xf32>
    %295 = arith.truncf %294 : vector<2x128xf32> to vector<2x128xbf16>
    %c1408 = arith.constant 1408 : index
    %c0_54 = arith.constant 0 : index
    %296 = vector.load %arg5[%c1408, %c0_54] : memref<2048x1024xbf16, #tpu.memory_space<vmem>>, vector<128x1024xbf16>
    %cst_55 = arith.constant dense<0.000000e+00> : vector<2x1024xf32>
    %297 = tpu.matmul %295, %296, %cst_55 {dimension_numbers = #tpu.dot_dimension_numbers<[1], [0], [0], [1], [0, 0, 1, 1], [], []>} : vector<2x128xbf16>, vector<128x1024xbf16>, vector<2x1024xf32> -> vector<2x1024xf32>
    %298 = arith.addf %274, %297 : vector<2x1024xf32>
    %299 = vector.extract_strided_slice %6 {offsets = [24, 0], sizes = [2, 512], strides = [1, 1]} : vector<32x512xf32> to vector<2x512xf32>
    %300 = arith.truncf %294 : vector<2x128xf32> to vector<2x128xbf16>
    %cst_56 = arith.constant dense<0.000000e+00> : vector<2x512xf32>
    %301 = tpu.matmul %300, %7, %cst_56 {dimension_numbers = #tpu.dot_dimension_numbers<[1], [0], [0], [1], [0, 0, 1, 1], [], []>} : vector<2x128xbf16>, vector<128x512xbf16>, vector<2x512xf32> -> vector<2x512xf32>
    %302 = arith.addf %299, %301 : vector<2x512xf32>
    %303 = vector.extract_strided_slice %302 {offsets = [0, 0], sizes = [2, 384], strides = [1, 1]} : vector<2x512xf32> to vector<2x384xf32>
    %304 = arith.negf %303 : vector<2x384xf32>
    %305 = math.exp %304 : vector<2x384xf32>
    %cst_57 = arith.constant 1.000000e+00 : f32
    %306 = vector.broadcast %cst_57 : f32 to vector<2x384xf32>
    %307 = arith.addf %306, %305 : vector<2x384xf32>
    %308 = arith.divf %306, %307 : vector<2x384xf32>
    %309 = vector.extract_strided_slice %302 {offsets = [0, 384], sizes = [2, 128], strides = [1, 1]} : vector<2x512xf32> to vector<2x128xf32>
    %310 = math.tanh %309 : vector<2x128xf32>
    %311 = vector.extract_strided_slice %308 {offsets = [0, 0], sizes = [2, 128], strides = [1, 1]} : vector<2x384xf32> to vector<2x128xf32>
    %312 = vector.extract_strided_slice %308 {offsets = [0, 128], sizes = [2, 128], strides = [1, 1]} : vector<2x384xf32> to vector<2x128xf32>
    %313 = vector.extract_strided_slice %308 {offsets = [0, 256], sizes = [2, 128], strides = [1, 1]} : vector<2x384xf32> to vector<2x128xf32>
    %314 = arith.mulf %312, %292 : vector<2x128xf32>
    %315 = arith.mulf %311, %310 : vector<2x128xf32>
    %316 = arith.addf %314, %315 : vector<2x128xf32>
    %317 = math.tanh %316 : vector<2x128xf32>
    %318 = arith.mulf %313, %317 : vector<2x128xf32>
    %319 = arith.truncf %318 : vector<2x128xf32> to vector<2x128xbf16>
    %c1536 = arith.constant 1536 : index
    %c0_58 = arith.constant 0 : index
    %320 = vector.load %arg5[%c1536, %c0_58] : memref<2048x1024xbf16, #tpu.memory_space<vmem>>, vector<128x1024xbf16>
    %cst_59 = arith.constant dense<0.000000e+00> : vector<2x1024xf32>
    %321 = tpu.matmul %319, %320, %cst_59 {dimension_numbers = #tpu.dot_dimension_numbers<[1], [0], [0], [1], [0, 0, 1, 1], [], []>} : vector<2x128xbf16>, vector<128x1024xbf16>, vector<2x1024xf32> -> vector<2x1024xf32>
    %322 = arith.addf %298, %321 : vector<2x1024xf32>
    %323 = vector.extract_strided_slice %6 {offsets = [26, 0], sizes = [2, 512], strides = [1, 1]} : vector<32x512xf32> to vector<2x512xf32>
    %324 = arith.truncf %318 : vector<2x128xf32> to vector<2x128xbf16>
    %cst_60 = arith.constant dense<0.000000e+00> : vector<2x512xf32>
    %325 = tpu.matmul %324, %7, %cst_60 {dimension_numbers = #tpu.dot_dimension_numbers<[1], [0], [0], [1], [0, 0, 1, 1], [], []>} : vector<2x128xbf16>, vector<128x512xbf16>, vector<2x512xf32> -> vector<2x512xf32>
    %326 = arith.addf %323, %325 : vector<2x512xf32>
    %327 = vector.extract_strided_slice %326 {offsets = [0, 0], sizes = [2, 384], strides = [1, 1]} : vector<2x512xf32> to vector<2x384xf32>
    %328 = arith.negf %327 : vector<2x384xf32>
    %329 = math.exp %328 : vector<2x384xf32>
    %cst_61 = arith.constant 1.000000e+00 : f32
    %330 = vector.broadcast %cst_61 : f32 to vector<2x384xf32>
    %331 = arith.addf %330, %329 : vector<2x384xf32>
    %332 = arith.divf %330, %331 : vector<2x384xf32>
    %333 = vector.extract_strided_slice %326 {offsets = [0, 384], sizes = [2, 128], strides = [1, 1]} : vector<2x512xf32> to vector<2x128xf32>
    %334 = math.tanh %333 : vector<2x128xf32>
    %335 = vector.extract_strided_slice %332 {offsets = [0, 0], sizes = [2, 128], strides = [1, 1]} : vector<2x384xf32> to vector<2x128xf32>
    %336 = vector.extract_strided_slice %332 {offsets = [0, 128], sizes = [2, 128], strides = [1, 1]} : vector<2x384xf32> to vector<2x128xf32>
    %337 = vector.extract_strided_slice %332 {offsets = [0, 256], sizes = [2, 128], strides = [1, 1]} : vector<2x384xf32> to vector<2x128xf32>
    %338 = arith.mulf %336, %316 : vector<2x128xf32>
    %339 = arith.mulf %335, %334 : vector<2x128xf32>
    %340 = arith.addf %338, %339 : vector<2x128xf32>
    %341 = math.tanh %340 : vector<2x128xf32>
    %342 = arith.mulf %337, %341 : vector<2x128xf32>
    %343 = arith.truncf %342 : vector<2x128xf32> to vector<2x128xbf16>
    %c1664 = arith.constant 1664 : index
    %c0_62 = arith.constant 0 : index
    %344 = vector.load %arg5[%c1664, %c0_62] : memref<2048x1024xbf16, #tpu.memory_space<vmem>>, vector<128x1024xbf16>
    %cst_63 = arith.constant dense<0.000000e+00> : vector<2x1024xf32>
    %345 = tpu.matmul %343, %344, %cst_63 {dimension_numbers = #tpu.dot_dimension_numbers<[1], [0], [0], [1], [0, 0, 1, 1], [], []>} : vector<2x128xbf16>, vector<128x1024xbf16>, vector<2x1024xf32> -> vector<2x1024xf32>
    %346 = arith.addf %322, %345 : vector<2x1024xf32>
    %347 = vector.extract_strided_slice %6 {offsets = [28, 0], sizes = [2, 512], strides = [1, 1]} : vector<32x512xf32> to vector<2x512xf32>
    %348 = arith.truncf %342 : vector<2x128xf32> to vector<2x128xbf16>
    %cst_64 = arith.constant dense<0.000000e+00> : vector<2x512xf32>
    %349 = tpu.matmul %348, %7, %cst_64 {dimension_numbers = #tpu.dot_dimension_numbers<[1], [0], [0], [1], [0, 0, 1, 1], [], []>} : vector<2x128xbf16>, vector<128x512xbf16>, vector<2x512xf32> -> vector<2x512xf32>
    %350 = arith.addf %347, %349 : vector<2x512xf32>
    %351 = vector.extract_strided_slice %350 {offsets = [0, 0], sizes = [2, 384], strides = [1, 1]} : vector<2x512xf32> to vector<2x384xf32>
    %352 = arith.negf %351 : vector<2x384xf32>
    %353 = math.exp %352 : vector<2x384xf32>
    %cst_65 = arith.constant 1.000000e+00 : f32
    %354 = vector.broadcast %cst_65 : f32 to vector<2x384xf32>
    %355 = arith.addf %354, %353 : vector<2x384xf32>
    %356 = arith.divf %354, %355 : vector<2x384xf32>
    %357 = vector.extract_strided_slice %350 {offsets = [0, 384], sizes = [2, 128], strides = [1, 1]} : vector<2x512xf32> to vector<2x128xf32>
    %358 = math.tanh %357 : vector<2x128xf32>
    %359 = vector.extract_strided_slice %356 {offsets = [0, 0], sizes = [2, 128], strides = [1, 1]} : vector<2x384xf32> to vector<2x128xf32>
    %360 = vector.extract_strided_slice %356 {offsets = [0, 128], sizes = [2, 128], strides = [1, 1]} : vector<2x384xf32> to vector<2x128xf32>
    %361 = vector.extract_strided_slice %356 {offsets = [0, 256], sizes = [2, 128], strides = [1, 1]} : vector<2x384xf32> to vector<2x128xf32>
    %362 = arith.mulf %360, %340 : vector<2x128xf32>
    %363 = arith.mulf %359, %358 : vector<2x128xf32>
    %364 = arith.addf %362, %363 : vector<2x128xf32>
    %365 = math.tanh %364 : vector<2x128xf32>
    %366 = arith.mulf %361, %365 : vector<2x128xf32>
    %367 = arith.truncf %366 : vector<2x128xf32> to vector<2x128xbf16>
    %c1792 = arith.constant 1792 : index
    %c0_66 = arith.constant 0 : index
    %368 = vector.load %arg5[%c1792, %c0_66] : memref<2048x1024xbf16, #tpu.memory_space<vmem>>, vector<128x1024xbf16>
    %cst_67 = arith.constant dense<0.000000e+00> : vector<2x1024xf32>
    %369 = tpu.matmul %367, %368, %cst_67 {dimension_numbers = #tpu.dot_dimension_numbers<[1], [0], [0], [1], [0, 0, 1, 1], [], []>} : vector<2x128xbf16>, vector<128x1024xbf16>, vector<2x1024xf32> -> vector<2x1024xf32>
    %370 = arith.addf %346, %369 : vector<2x1024xf32>
    %371 = vector.extract_strided_slice %6 {offsets = [30, 0], sizes = [2, 512], strides = [1, 1]} : vector<32x512xf32> to vector<2x512xf32>
    %372 = arith.truncf %366 : vector<2x128xf32> to vector<2x128xbf16>
    %cst_68 = arith.constant dense<0.000000e+00> : vector<2x512xf32>
    %373 = tpu.matmul %372, %7, %cst_68 {dimension_numbers = #tpu.dot_dimension_numbers<[1], [0], [0], [1], [0, 0, 1, 1], [], []>} : vector<2x128xbf16>, vector<128x512xbf16>, vector<2x512xf32> -> vector<2x512xf32>
    %374 = arith.addf %371, %373 : vector<2x512xf32>
    %375 = vector.extract_strided_slice %374 {offsets = [0, 0], sizes = [2, 384], strides = [1, 1]} : vector<2x512xf32> to vector<2x384xf32>
    %376 = arith.negf %375 : vector<2x384xf32>
    %377 = math.exp %376 : vector<2x384xf32>
    %cst_69 = arith.constant 1.000000e+00 : f32
    %378 = vector.broadcast %cst_69 : f32 to vector<2x384xf32>
    %379 = arith.addf %378, %377 : vector<2x384xf32>
    %380 = arith.divf %378, %379 : vector<2x384xf32>
    %381 = vector.extract_strided_slice %374 {offsets = [0, 384], sizes = [2, 128], strides = [1, 1]} : vector<2x512xf32> to vector<2x128xf32>
    %382 = math.tanh %381 : vector<2x128xf32>
    %383 = vector.extract_strided_slice %380 {offsets = [0, 0], sizes = [2, 128], strides = [1, 1]} : vector<2x384xf32> to vector<2x128xf32>
    %384 = vector.extract_strided_slice %380 {offsets = [0, 128], sizes = [2, 128], strides = [1, 1]} : vector<2x384xf32> to vector<2x128xf32>
    %385 = vector.extract_strided_slice %380 {offsets = [0, 256], sizes = [2, 128], strides = [1, 1]} : vector<2x384xf32> to vector<2x128xf32>
    %386 = arith.mulf %384, %364 : vector<2x128xf32>
    %387 = arith.mulf %383, %382 : vector<2x128xf32>
    %388 = arith.addf %386, %387 : vector<2x128xf32>
    %389 = math.tanh %388 : vector<2x128xf32>
    %390 = arith.mulf %385, %389 : vector<2x128xf32>
    %391 = arith.truncf %390 : vector<2x128xf32> to vector<2x128xbf16>
    %c1920 = arith.constant 1920 : index
    %c0_70 = arith.constant 0 : index
    %392 = vector.load %arg5[%c1920, %c0_70] : memref<2048x1024xbf16, #tpu.memory_space<vmem>>, vector<128x1024xbf16>
    %cst_71 = arith.constant dense<0.000000e+00> : vector<2x1024xf32>
    %393 = tpu.matmul %391, %392, %cst_71 {dimension_numbers = #tpu.dot_dimension_numbers<[1], [0], [0], [1], [0, 0, 1, 1], [], []>} : vector<2x128xbf16>, vector<128x1024xbf16>, vector<2x1024xf32> -> vector<2x1024xf32>
    %394 = arith.addf %370, %393 : vector<2x1024xf32>
    %c0_72 = arith.constant 0 : index
    %c0_73 = arith.constant 0 : index
    %395 = vector.load %arg15[%c0_72, %c0_73] : memref<2x128xf32, #tpu.memory_space<vmem>>, vector<2x128xf32>
    tpu.vector_store %arg15[%c0_72, %c0_73], %390 {strides = array<i32>} : memref<2x128xf32, #tpu.memory_space<vmem>>, vector<2x128xf32>,
    %c0_74 = arith.constant 0 : index
    %c0_75 = arith.constant 0 : index
    %396 = vector.load %arg16[%c0_74, %c0_75] : memref<2x128xf32, #tpu.memory_space<vmem>>, vector<2x128xf32>
    tpu.vector_store %arg16[%c0_74, %c0_75], %388 {strides = array<i32>} : memref<2x128xf32, #tpu.memory_space<vmem>>, vector<2x128xf32>,
    %c0_76 = arith.constant 0 : index
    %c0_77 = arith.constant 0 : index
    %397 = vector.load %arg17[%c0_76, %c0_77] : memref<2x1024xf32, #tpu.memory_space<vmem>>, vector<2x1024xf32>
    %398 = arith.addf %397, %394 : vector<2x1024xf32>
    %c0_78 = arith.constant 0 : index
    %c0_79 = arith.constant 0 : index
    %399 = vector.load %arg17[%c0_78, %c0_79] : memref<2x1024xf32, #tpu.memory_space<vmem>>, vector<2x1024xf32>
    tpu.vector_store %arg17[%c0_78, %c0_79], %398 {strides = array<i32>} : memref<2x1024xf32, #tpu.memory_space<vmem>>, vector<2x1024xf32>,
    %c2_i32 = arith.constant 2 : i32
    %400 = arith.cmpi eq, %arg0, %c2_i32 : i32
    %401 = arith.extui %400 : i1 to i32
    %c0_i32_80 = arith.constant 0 : i32
    %402 = arith.cmpi ne, %401, %c0_i32_80 : i32
    scf.if %402 {
      %c0_81 = arith.constant 0 : index
      %c0_82 = arith.constant 0 : index
      %403 = vector.load %arg17[%c0_81, %c0_82] : memref<2x1024xf32, #tpu.memory_space<vmem>>, vector<2x1024xf32>
      %c0_83 = arith.constant 0 : index
      %c0_84 = arith.constant 0 : index
      %404 = vector.load %arg6[%c0_83, %c0_84] : memref<1x1024xf32, #tpu.memory_space<vmem>>, vector<1x1024xf32>
      %405 = vector.broadcast %404 : vector<1x1024xf32> to vector<2x1024xf32>
      %406 = arith.addf %403, %405 : vector<2x1024xf32>
      %407 = arith.negf %406 : vector<2x1024xf32>
      %408 = math.exp %407 : vector<2x1024xf32>
      %cst_85 = arith.constant 1.000000e+00 : f32
      %409 = vector.broadcast %cst_85 : f32 to vector<2x1024xf32>
      %410 = arith.addf %409, %408 : vector<2x1024xf32>
      %411 = arith.divf %409, %410 : vector<2x1024xf32>
      %412 = arith.truncf %411 : vector<2x1024xf32> to vector<2x1024xbf16>
      %c0_86 = arith.constant 0 : index
      %c0_87 = arith.constant 0 : index
      %413 = vector.load %arg7[%c0_86, %c0_87] : memref<1024x512xbf16, #tpu.memory_space<vmem>>, vector<1024x512xbf16>
      %cst_88 = arith.constant dense<0.000000e+00> : vector<2x512xf32>
      %414 = tpu.matmul %412, %413, %cst_88 {dimension_numbers = #tpu.dot_dimension_numbers<[1], [0], [0], [1], [0, 0, 1, 1], [], []>} : vector<2x1024xbf16>, vector<1024x512xbf16>, vector<2x512xf32> -> vector<2x512xf32>
      %c0_89 = arith.constant 0 : index
      %c0_90 = arith.constant 0 : index
      %415 = vector.load %arg8[%c0_89, %c0_90] : memref<1x512xf32, #tpu.memory_space<vmem>>, vector<1x512xf32>
      %416 = vector.broadcast %415 : vector<1x512xf32> to vector<2x512xf32>
      %417 = arith.addf %414, %416 : vector<2x512xf32>
      %418 = arith.negf %417 : vector<2x512xf32>
      %419 = math.exp %418 : vector<2x512xf32>
      %cst_91 = arith.constant 1.000000e+00 : f32
      %420 = vector.broadcast %cst_91 : f32 to vector<2x512xf32>
      %421 = arith.addf %420, %419 : vector<2x512xf32>
      %422 = arith.divf %420, %421 : vector<2x512xf32>
      %423 = arith.truncf %422 : vector<2x512xf32> to vector<2x512xbf16>
      %c0_92 = arith.constant 0 : index
      %c0_93 = arith.constant 0 : index
      %424 = vector.load %arg9[%c0_92, %c0_93] : memref<512x256xbf16, #tpu.memory_space<vmem>>, vector<512x256xbf16>
      %cst_94 = arith.constant dense<0.000000e+00> : vector<2x256xf32>
      %425 = tpu.matmul %423, %424, %cst_94 {dimension_numbers = #tpu.dot_dimension_numbers<[1], [0], [0], [1], [0, 0, 1, 1], [], []>} : vector<2x512xbf16>, vector<512x256xbf16>, vector<2x256xf32> -> vector<2x256xf32>
      %c0_95 = arith.constant 0 : index
      %c0_96 = arith.constant 0 : index
      %426 = vector.load %arg10[%c0_95, %c0_96] : memref<1x256xf32, #tpu.memory_space<vmem>>, vector<1x256xf32>
      %427 = vector.broadcast %426 : vector<1x256xf32> to vector<2x256xf32>
      %428 = arith.addf %425, %427 : vector<2x256xf32>
      %429 = arith.negf %428 : vector<2x256xf32>
      %430 = math.exp %429 : vector<2x256xf32>
      %cst_97 = arith.constant 1.000000e+00 : f32
      %431 = vector.broadcast %cst_97 : f32 to vector<2x256xf32>
      %432 = arith.addf %431, %430 : vector<2x256xf32>
      %433 = arith.divf %431, %432 : vector<2x256xf32>
      %434 = arith.truncf %433 : vector<2x256xf32> to vector<2x256xbf16>
      %c0_98 = arith.constant 0 : index
      %c0_99 = arith.constant 0 : index
      %435 = vector.load %arg11[%c0_98, %c0_99] : memref<256x181xbf16, #tpu.memory_space<vmem>>, vector<256x181xbf16>
      %cst_100 = arith.constant dense<0.000000e+00> : vector<2x181xf32>
      %436 = tpu.matmul %434, %435, %cst_100 {dimension_numbers = #tpu.dot_dimension_numbers<[1], [0], [0], [1], [0, 0, 1, 1], [], []>} : vector<2x256xbf16>, vector<256x181xbf16>, vector<2x181xf32> -> vector<2x181xf32>
      %c0_101 = arith.constant 0 : index
      %c0_102 = arith.constant 0 : index
      %437 = vector.load %arg12[%c0_101, %c0_102] : memref<1x181xf32, #tpu.memory_space<vmem>>, vector<1x181xf32>
      %438 = vector.broadcast %437 : vector<1x181xf32> to vector<2x181xf32>
      %439 = arith.addf %436, %438 : vector<2x181xf32>
      %c0_103 = arith.constant 0 : index
      %c0_104 = arith.constant 0 : index
      %440 = vector.load %arg13[%c0_103, %c0_104] : memref<2x181xf32, #tpu.memory_space<vmem>>, vector<2x181xf32>
      tpu.vector_store %arg13[%c0_103, %c0_104], %439 {strides = array<i32>} : memref<2x181xf32, #tpu.memory_space<vmem>>, vector<2x181xf32>,
    } else {
    }
    return
  }
  func.func @transform_0(%arg0: i32) -> (i32, i32) {
    %c0_i32 = arith.constant 0 : i32
    %c0_i32_0 = arith.constant 0 : i32
    %c0_i32_1 = arith.constant 0 : i32
    return %c0_i32, %c0_i32_0 : i32, i32
  }
  func.func @transform_1(%arg0: i32) -> (i32, i32) {
    %c0_i32 = arith.constant 0 : i32
    %c0_i32_0 = arith.constant 0 : i32
    %c0_i32_1 = arith.constant 0 : i32
    return %c0_i32, %c0_i32_0 : i32, i32
  }
  func.func @transform_2(%arg0: i32) -> (i32, i32) {
    %c0_i32 = arith.constant 0 : i32
    %c0_i32_0 = arith.constant 0 : i32
    %c0_i32_1 = arith.constant 0 : i32
    return %c0_i32, %c0_i32_0 : i32, i32
  }
  func.func @transform_3(%arg0: i32) -> (i32, i32) {
    %c0_i32 = arith.constant 0 : i32
    %c0_i32_0 = arith.constant 0 : i32
    %c0_i32_1 = arith.constant 0 : i32
    return %c0_i32, %c0_i32_0 : i32, i32
  }
  func.func @transform_4(%arg0: i32) -> (i32, i32) {
    %c0_i32 = arith.constant 0 : i32
    %c0_i32_0 = arith.constant 0 : i32
    return %arg0, %c0_i32 : i32, i32
  }
  func.func @transform_5(%arg0: i32) -> (i32, i32) {
    %c0_i32 = arith.constant 0 : i32
    %c0_i32_0 = arith.constant 0 : i32
    %c0_i32_1 = arith.constant 0 : i32
    return %c0_i32, %c0_i32_0 : i32, i32
  }
  func.func @transform_6(%arg0: i32) -> (i32, i32) {
    %c0_i32 = arith.constant 0 : i32
    %c0_i32_0 = arith.constant 0 : i32
    %c0_i32_1 = arith.constant 0 : i32
    return %c0_i32, %c0_i32_0 : i32, i32
  }
  func.func @transform_7(%arg0: i32) -> (i32, i32) {
    %c0_i32 = arith.constant 0 : i32
    %c0_i32_0 = arith.constant 0 : i32
    %c0_i32_1 = arith.constant 0 : i32
    return %c0_i32, %c0_i32_0 : i32, i32
  }
  func.func @transform_8(%arg0: i32) -> (i32, i32) {
    %c0_i32 = arith.constant 0 : i32
    %c0_i32_0 = arith.constant 0 : i32
    %c0_i32_1 = arith.constant 0 : i32
    return %c0_i32, %c0_i32_0 : i32, i32
  }
  func.func @transform_9(%arg0: i32) -> (i32, i32) {
    %c0_i32 = arith.constant 0 : i32
    %c0_i32_0 = arith.constant 0 : i32
    %c0_i32_1 = arith.constant 0 : i32
    return %c0_i32, %c0_i32_0 : i32, i32
  }
  func.func @transform_10(%arg0: i32) -> (i32, i32) {
    %c0_i32 = arith.constant 0 : i32
    %c0_i32_0 = arith.constant 0 : i32
    %c0_i32_1 = arith.constant 0 : i32
    return %c0_i32, %c0_i32_0 : i32, i32
  }
  func.func @transform_11(%arg0: i32) -> (i32, i32) {
    %c0_i32 = arith.constant 0 : i32
    %c0_i32_0 = arith.constant 0 : i32
    %c0_i32_1 = arith.constant 0 : i32
    return %c0_i32, %c0_i32_0 : i32, i32
  }
  func.func @transform_12(%arg0: i32) -> (i32, i32) {
    %c0_i32 = arith.constant 0 : i32
    %c0_i32_0 = arith.constant 0 : i32
    %c0_i32_1 = arith.constant 0 : i32
    return %c0_i32, %c0_i32_0 : i32, i32
  }
}

</mosaic_0001>

<bundles_post_ra>
// kernel: tpu_custom_call.1
= control target key start
LH: loop header
LB: loop body
LE: loop exit
PB: predicated region body
PF: predicated region fallthrough
CT: control target
= control target key end

     0   :  { %s22336_s0 = inlined_call_operand.vmem [shape: bf16[96,181], index: 0, kind: input, shape index: {}]   ;;  %s22337_s1 = inlined_call_operand.hbm [shape: bf16[181,512], index: 1, kind: input, shape index: {}]   ;;  %s22338_s2 = inlined_call_operand.hbm [shape: bf16[128,512], index: 2, kind: input, shape index: {}]   ;;  %s22339_s3 = inlined_call_operand.hbm [shape: f32[1,512], index: 3, kind: input, shape index: {}]   ;;  %s22340_s4 = inlined_call_operand.hbm [shape: bf16[6144,1024], index: 4, kind: input, shape index: {}]   ;;  %s22341_s5 = inlined_call_operand.hbm [shape: f32[1,1024], index: 5, kind: input, shape index: {}]   ;;  %s22342_s6 = inlined_call_operand.hbm [shape: bf16[1024,512], index: 6, kind: input, shape index: {}]   ;;  %s22343_s7 = inlined_call_operand.hbm [shape: f32[1,512], index: 7, kind: input, shape index: {}]   ;;  %s22344_s8 = inlined_call_operand.hbm [shape: bf16[512,256], index: 8, kind: input, shape index: {}]   ;;  %s22345_s9 = inlined_call_operand.hbm [shape: f32[1,256], index: 9, kind: input, shape index: {}]   ;;  %s22346_s10 = inlined_call_operand.vmem [shape: bf16[256,181], index: 10, kind: input, shape index: {}]   ;;  %s22347_s11 = inlined_call_operand.hbm [shape: f32[1,181], index: 11, kind: input, shape index: {}]   ;;  %s22348_s12 = inlined_call_operand.hbm [shape: f32[2,181], index: 12, kind: output, shape index: {}]  }
   0x1   :  { %22357 = sst [smem:[#allocation33_spill]] %s22336_s0 }
   0x2   :  { %22358 = sst [smem:[#allocation34_spill]] %s22346_s10 }
   0x3   :  { %22359 = sst [smem:[#allocation35_spill]] %s22348_s12 }
   0x4   :  { %17 = vsyncpa [#allocation7], 0 }
   0x5   :  { %18 = vsyncpa [#allocation10], 0 }
   0x6   :  { %19 = vsyncpa [#allocation13], 0 }
   0x7   :  { %21 = vsyncpa [#allocation13 + $0x1], 0 }
   0x8   :  { %22 = vsyncpa [#allocation16], 0 }
   0x9   :  { %23 = vsyncpa [#allocation19], 0 }
   0xa   :  { %24 = vsyncpa [#allocation22], 0 }
   0xb   :  { %25 = vsyncpa [#allocation8], 0  ;;  %s18936_s21 = smov 0   ;;  %s18938_s22 = smov 0  }
   0xc   :  { %s18940_s23 = smov 0   ;;  %s18942_s24 = smov 0  }
   0xd LB: > { %s18957_s25 = sadd.s32 4294967295, %s18848_s24   ;;  %p15291_p0 = scmp.ge.s32.totalorder %s18848_s24, 1  ;;  %s18848_s24 = sphi %s18942_s24, %s22391_s24   ;;  %s18844_s23 = sphi %s18940_s23, %s22390_s23   ;;  %s18840_s22 = sphi %s18938_s22, %s22389_s22   ;;  %s18836_s21 = sphi %s18936_s21, %s22388_s21  }
   0xe   : > { %p22353_p1 = scmp.eq.s32.totalorder %s18957_s25, 0  ;;  %p314_p2 = scmp.lt.s32.totalorder %s18848_s24, 4 }
   0xf   : > { %s18850_s27 = smov [#allocation9]   ;;  %s18851_s29 = smov [#allocation14]  }
  0x10   : > { %p18963_p4 = pnand %p15291_p0, %p314_p2  ;;  %s342_s28 = sshll.u32 %s18850_s27, 4  ;;  %s18967_s28 = int_to_ptr.vmem [resolvable:$true] %s342_s28 }
  0x11   : > { %s367_s30 = sshll.u32 %s18851_s29, 4  ;;  %s18852_s14 = smov [#allocation15]   ;;  %s18977_s30 = int_to_ptr.vmem [resolvable:$true] %s367_s30 }
  0x12   : > { %s22360_s26 = scalar_select %p18963_p4, 1, 0 }
  0x13   : > { %p17181_p5 = pneg %p18963_p4  ;;  %s377_s15 = sshll.u32 %s18852_s14, 4  ;;  %s18979_s15 = int_to_ptr.vmem [resolvable:$true] %s377_s15 }
  0x14   : > { %22361 = sst [smem:[#allocation32_spill]] %s22360_s26  ;;  %s18478_s18 = scalar_lea.hbm %s22338_s2, 4096 }
  0x15   : > { %p18973_p6 = pnand %p17181_p5, %p22353_p1  ;;  %p18479_p7 = scmp.ne.s32.totalorder %s22338_s2, %s18478_s18 }
  0x16   : > { %p18485_p11 = scmp.lt.u32.totalorder %s18478_s18, %s22338_s2 }
  0x17   : > { %p18989_p8 = pneg %p18973_p6 }
  0x19   : > { %p18481_p9 = pnand %p18989_p8, %p18479_p7 }
  0x1b   : > { %p18482_p10 = pneg %p18481_p9 }
  0x1d   : > { %p18487_p12 = pnand %p18485_p11, %p18482_p10 }
  0x1f   : > { %18490 = shalt.err (!%p18487_p12)
}
  0x20   : > { %s18491_s16 = scalar_lea.vmem %s18967_s28, 4096  ;;  %p18499_p5 = scmp.lt.s32.totalorder %s18967_s28, %s18967_s28 }
  0x21   : > { %p18492_p13 = scmp.ne.s32.totalorder %s18967_s28, %s18491_s16  ;;  %p18500_p3 = scmp.lt.s32.totalorder %s18491_s16, %s18491_s16 }
  0x23   : > { %p18494_p0 = pnand %p18492_p13, %p18989_p8  ;;  %p18501_p7 = por %p18500_p3, %p18499_p5 }
  0x25   : > { %p18495_p2 = pneg %p18494_p0 }
  0x27   : > { %p18502_p9 = pnand %p18501_p7, %p18495_p2 }
  0x29   : > { %18505 = shalt.err (!%p18502_p9)
}
  0x2a   : > { %s22355_s17 = smov 256   ;;  %s22356_s18 = smov 16  }
  0x2b   : > { %17187 = dma.hbm_to_vmem [thread:$0]  (!%p18973_p6), %s22338_s2, 4096, %s18967_s28, [#allocation10], %s22355_s17, %s22355_s17, %s22356_s18  }
  0x2c   : > { %s18506_s16 = scalar_lea.hbm %s22341_s5, 128 }
  0x2d   : > { %p18507_p3 = scmp.ne.s32.totalorder %s22341_s5, %s18506_s16  ;;  %p18513_p12 = scmp.lt.u32.totalorder %s18506_s16, %s22341_s5 }
  0x2f   : > { %p18509_p10 = pnand %p18507_p3, %p18989_p8 }
  0x31   : > { %p18510_p11 = pneg %p18509_p10 }
  0x33   : > { %p18515_p13 = pnand %p18513_p12, %p18510_p11 }
  0x35   : > { %18518 = shalt.err (!%p18515_p13)
}
  0x36   : > { %s18519_s28 = scalar_lea.vmem %s18977_s30, 128  ;;  %p18527_p7 = scmp.lt.s32.totalorder %s18977_s30, %s18977_s30 }
  0x37   : > { %p18520_p0 = scmp.ne.s32.totalorder %s18977_s30, %s18519_s28  ;;  %p18528_p9 = scmp.lt.s32.totalorder %s18519_s28, %s18519_s28 }
  0x39   : > { %p18522_p2 = pnand %p18520_p0, %p18989_p8  ;;  %p18529_p3 = por %p18528_p9, %p18527_p7 }
  0x3b   : > { %p18523_p5 = pneg %p18522_p2 }
  0x3d   : > { %p18530_p10 = pnand %p18529_p3, %p18523_p5 }
  0x3f   : > { %18533 = shalt.err (!%p18530_p10)
}
  0x40   : > { %17193 = dma.hbm_to_vmem [thread:$0]  (!%p18973_p6), %s22341_s5, 128, %s18977_s30, [#allocation13]  }
  0x41   : > { %s18534_s19 = scalar_lea.hbm %s22342_s6, 32768 }
  0x42   : > { %p18535_p11 = scmp.ne.s32.totalorder %s22342_s6, %s18534_s19  ;;  %p18541_p0 = scmp.lt.u32.totalorder %s18534_s19, %s22342_s6 }
  0x44   : > { %p18537_p12 = pnand %p18535_p11, %p18989_p8 }
  0x46   : > { %p18538_p13 = pneg %p18537_p12 }
  0x48   : > { %p18543_p2 = pnand %p18541_p0, %p18538_p13 }
  0x4a   : > { %18546 = shalt.err (!%p18543_p2)
}
  0x4b   : > { %s18547_s30 = scalar_lea.vmem %s18979_s15, 32768  ;;  %p18555_p3 = scmp.lt.s32.totalorder %s18979_s15, %s18979_s15 }
  0x4c   : > { %p18548_p5 = scmp.ne.s32.totalorder %s18979_s15, %s18547_s30  ;;  %p18556_p10 = scmp.lt.s32.totalorder %s18547_s30, %s18547_s30 }
  0x4e   : > { %p18550_p7 = pnand %p18548_p5, %p18989_p8  ;;  %p18557_p11 = por %p18556_p10, %p18555_p3 }
  0x50   : > { %p18551_p9 = pneg %p18550_p7 }
  0x52   : > { %p18558_p12 = pnand %p18557_p11, %p18551_p9 }
  0x54   : > { %18561 = shalt.err (!%p18558_p12)
}
  0x55   : > { %17196 = dma.hbm_to_vmem [thread:$0]  (!%p18973_p6), %s22342_s6, 32768, %s18979_s15, [#allocation16], %s22355_s17, %s22355_s17, %s22356_s18  }
  0x56   : > { %s18855_s10 = smov [#allocation18]   ;;  %s18562_s20 = scalar_lea.hbm %s22344_s8, 8192 }
  0x57   : > { %s401_s12 = sshll.u32 %s18855_s10, 4  ;;  %p18563_p13 = scmp.ne.s32.totalorder %s22344_s8, %s18562_s20  ;;  %s402_s12 = int_to_ptr.vmem [resolvable:$true] %s401_s12 }
  0x58   : > { %p18569_p5 = scmp.lt.u32.totalorder %s18562_s20, %s22344_s8 }
  0x59   : > { %p18565_p0 = pnand %p18563_p13, %p18989_p8 }
  0x5b   : > { %p18566_p2 = pneg %p18565_p0 }
  0x5d   : > { %p18571_p7 = pnand %p18569_p5, %p18566_p2 }
  0x5f   : > { %18574 = shalt.err (!%p18571_p7)
}
  0x60   : > { %s18575_s15 = scalar_lea.vmem %s402_s12, 8192  ;;  %p18583_p11 = scmp.lt.s32.totalorder %s402_s12, %s402_s12 }
  0x61   : > { %p18576_p9 = scmp.ne.s32.totalorder %s402_s12, %s18575_s15  ;;  %p18584_p12 = scmp.lt.s32.totalorder %s18575_s15, %s18575_s15 }
  0x63   : > { %p18578_p3 = pnand %p18576_p9, %p18989_p8  ;;  %p18585_p1 = por %p18584_p12, %p18583_p11 }
  0x65   : > { %p18579_p10 = pneg %p18578_p3 }
  0x67   : > { %p18586_p4 = pnand %p18585_p1, %p18579_p10 }
  0x69   : > { %18589 = shalt.err (!%p18586_p4)
}
  0x6a   : > { %s18856_s28 = smov 128   ;;  %s18857_s0 = smov 8  }
  0x6b   : > { %17202 = dma.hbm_to_vmem [thread:$0]  (!%p18973_p6), %s22344_s8, 8192, %s402_s12, [#allocation19], %s18856_s28, %s18856_s28, %s18857_s0  }
  0x6c   : > { %s18858_s19 = smov [#allocation6]   ;;  %s18859_s29 = smov [#allocation11]  }
  0x6d   : > { %s329_s20 = sshll.u32 %s18858_s19, 4  ;;  %s356_s14 = sshll.u32 %s18859_s29, 4  ;;  %s330_s20 = int_to_ptr.vmem [resolvable:$true] %s329_s20  ;;  %s19080_s14 = int_to_ptr.vmem [resolvable:$true] %s356_s14 }
  0x6e   : > { %s18590_s15 = scalar_lea.hbm %s22337_s1, 5888 }
  0x6f   : > { %p18591_p1 = scmp.ne.s32.totalorder %s22337_s1, %s18590_s15  ;;  %p18597_p0 = scmp.lt.u32.totalorder %s18590_s15, %s22337_s1 }
  0x71   : > { %p18593_p4 = pnand %p18591_p1, %p18989_p8 }
  0x73   : > { %p18594_p13 = pneg %p18593_p4 }
  0x75   : > { %p18599_p2 = pnand %p18597_p0, %p18594_p13 }
  0x77   : > { %18602 = shalt.err (!%p18599_p2)
}
  0x78   : > { %s18603_s28 = scalar_lea.vmem %s330_s20, 5888  ;;  %p18611_p3 = scmp.lt.s32.totalorder %s330_s20, %s330_s20 }
  0x79   : > { %p18604_p5 = scmp.ne.s32.totalorder %s330_s20, %s18603_s28  ;;  %p18612_p10 = scmp.lt.s32.totalorder %s18603_s28, %s18603_s28 }
  0x7b   : > { %p18606_p7 = pnand %p18604_p5, %p18989_p8  ;;  %p18613_p11 = por %p18612_p10, %p18611_p3 }
  0x7d   : > { %p18607_p9 = pneg %p18606_p7 }
  0x7f   : > { %p18614_p12 = pnand %p18613_p11, %p18607_p9 }
  0x81   : > { %18617 = shalt.err (!%p18614_p12)
}
  0x82   : > { %s22364_s17 = smov 16   ;;  %s22365_s18 = smov 256  }
  0x83   : > { %17184 = dma.hbm_to_vmem [thread:$0]  (!%p18973_p6), %s22337_s1, 5888, %s330_s20, [#allocation7], %s22365_s18, %s22365_s18, %s22364_s17  }
  0x84   : > { %s18618_s16 = scalar_lea.hbm %s22339_s3, 64 }
  0x85   : > { %p18619_p1 = scmp.ne.s32.totalorder %s22339_s3, %s18618_s16  ;;  %p18625_p0 = scmp.lt.u32.totalorder %s18618_s16, %s22339_s3 }
  0x87   : > { %p18621_p4 = pnand %p18619_p1, %p18989_p8 }
  0x89   : > { %p18622_p13 = pneg %p18621_p4 }
  0x8b   : > { %p18627_p2 = pnand %p18625_p0, %p18622_p13 }
  0x8d   : > { %18630 = shalt.err (!%p18627_p2)
}
  0x8e   : > { %s18631_s20 = scalar_lea.vmem %s19080_s14, 64  ;;  %p18639_p3 = scmp.lt.s32.totalorder %s19080_s14, %s19080_s14 }
  0x8f   : > { %p18632_p5 = scmp.ne.s32.totalorder %s19080_s14, %s18631_s20  ;;  %p18640_p10 = scmp.lt.s32.totalorder %s18631_s20, %s18631_s20 }
  0x91   : > { %p18634_p7 = pnand %p18632_p5, %p18989_p8  ;;  %p18641_p11 = por %p18640_p10, %p18639_p3 }
  0x93   : > { %p18635_p9 = pneg %p18634_p7 }
  0x95   : > { %p18642_p12 = pnand %p18641_p11, %p18635_p9 }
  0x97   : > { %18645 = shalt.err (!%p18642_p12)
}
  0x98   : > { %17190 = dma.hbm_to_vmem [thread:$0]  (!%p18973_p6), %s22339_s3, 64, %s19080_s14, [#allocation10]  }
  0x99   : > { %s18860_s18 = smov [#allocation17]   ;;  %s18861_s26 = smov [#allocation20]  }
  0x9a   : > { %s391_s0 = sshll.u32 %s18860_s18, 4  ;;  %s415_s19 = sshll.u32 %s18861_s26, 4  ;;  %s392_s0 = int_to_ptr.vmem [resolvable:$true] %s391_s0  ;;  %s19126_s19 = int_to_ptr.vmem [resolvable:$true] %s415_s19 }
  0x9b   : > { %s18646_s30 = scalar_lea.hbm %s22343_s7, 64 }
  0x9c   : > { %p18647_p1 = scmp.ne.s32.totalorder %s22343_s7, %s18646_s30  ;;  %p18653_p0 = scmp.lt.u32.totalorder %s18646_s30, %s22343_s7 }
  0x9e   : > { %p18649_p4 = pnand %p18647_p1, %p18989_p8 }
  0xa0   : > { %p18650_p13 = pneg %p18649_p4 }
  0xa2   : > { %p18655_p2 = pnand %p18653_p0, %p18650_p13 }
  0xa4   : > { %18658 = shalt.err (!%p18655_p2)
}
  0xa5   : > { %s18659_s20 = scalar_lea.vmem %s392_s0, 64  ;;  %p18667_p3 = scmp.lt.s32.totalorder %s392_s0, %s392_s0 }
  0xa6   : > { %p18660_p5 = scmp.ne.s32.totalorder %s392_s0, %s18659_s20  ;;  %p18668_p10 = scmp.lt.s32.totalorder %s18659_s20, %s18659_s20 }
  0xa8   : > { %p18662_p7 = pnand %p18660_p5, %p18989_p8  ;;  %p18669_p11 = por %p18668_p10, %p18667_p3 }
  0xaa   : > { %p18663_p9 = pneg %p18662_p7 }
  0xac   : > { %p18670_p12 = pnand %p18669_p11, %p18663_p9 }
  0xae   : > { %18673 = shalt.err (!%p18670_p12)
}
  0xaf   : > { %17199 = dma.hbm_to_vmem [thread:$0]  (!%p18973_p6), %s22343_s7, 64, %s392_s0, [#allocation16]  }
  0xb0   : > { %s18674_s29 = scalar_lea.hbm %s22345_s9, 32 }
  0xb1   : > { %p18675_p1 = scmp.ne.s32.totalorder %s22345_s9, %s18674_s29  ;;  %p18681_p0 = scmp.lt.u32.totalorder %s18674_s29, %s22345_s9 }
  0xb3   : > { %p18677_p4 = pnand %p18675_p1, %p18989_p8 }
  0xb5   : > { %p18678_p13 = pneg %p18677_p4 }
  0xb7   : > { %p18683_p2 = pnand %p18681_p0, %p18678_p13 }
  0xb9   : > { %18686 = shalt.err (!%p18683_p2)
}
  0xba   : > { %s18687_s0 = scalar_lea.vmem %s19126_s19, 32  ;;  %p18695_p3 = scmp.lt.s32.totalorder %s19126_s19, %s19126_s19 }
  0xbb   : > { %p18688_p5 = scmp.ne.s32.totalorder %s19126_s19, %s18687_s0  ;;  %p18696_p10 = scmp.lt.s32.totalorder %s18687_s0, %s18687_s0 }
  0xbd   : > { %p18690_p7 = pnand %p18688_p5, %p18989_p8  ;;  %p18697_p11 = por %p18696_p10, %p18695_p3 }
  0xbf   : > { %p18691_p9 = pneg %p18690_p7 }
  0xc1   : > { %p18698_p12 = pnand %p18697_p11, %p18691_p9 }
  0xc3   : > { %18701 = shalt.err (!%p18698_p12)
}
  0xc4   : > { %17205 = dma.hbm_to_vmem [thread:$0]  (!%p18973_p6), %s22345_s9, 32, %s19126_s19, [#allocation19]  }
  0xc5   : > { %s18862_s20 = smov [#allocation21]   ;;  %s18702_s26 = scalar_lea.hbm %s22347_s11, 32 }
  0xc6   : > { %s429_s28 = sshll.u32 %s18862_s20, 4  ;;  %p18703_p1 = scmp.ne.s32.totalorder %s22347_s11, %s18702_s26  ;;  %s430_s28 = int_to_ptr.vmem [resolvable:$true] %s429_s28 }
  0xc7   : > { %p18709_p0 = scmp.lt.u32.totalorder %s18702_s26, %s22347_s11 }
  0xc8   : > { %p18705_p4 = pnand %p18703_p1, %p18989_p8 }
  0xca   : > { %p18706_p13 = pneg %p18705_p4 }
  0xcc   : > { %p18711_p2 = pnand %p18709_p0, %p18706_p13 }
  0xce   : > { %18714 = shalt.err (!%p18711_p2)
}
  0xcf   : > { %s18715_s19 = scalar_lea.vmem %s430_s28, 32  ;;  %p18723_p3 = scmp.lt.s32.totalorder %s430_s28, %s430_s28 }
  0xd0   : > { %p18716_p5 = scmp.ne.s32.totalorder %s430_s28, %s18715_s19  ;;  %p18724_p10 = scmp.lt.s32.totalorder %s18715_s19, %s18715_s19 }
  0xd2   : > { %p18718_p7 = pnand %p18716_p5, %p18989_p8  ;;  %p18725_p11 = por %p18724_p10, %p18723_p3 }
  0xd4   : > { %p18719_p9 = pneg %p18718_p7 }
  0xd6   : > { %p18726_p12 = pnand %p18725_p11, %p18719_p9 }
  0xd8   : > { %18729 = shalt.err (!%p18726_p12)
}
  0xd9   : > { %17208 = dma.hbm_to_vmem [thread:$0]  (!%p18973_p6), %s22347_s11, 32, %s430_s28, [#allocation22]  }
  0xda   : > { %s19188_s27 = sadd.s32 1, %s18848_s24   ;;  %s122_s12 = sadd.s32 1, %s18844_s23 }
  0xdb   : > { %s119_s13 = ssub.s32 %s18848_s24, %s19188_s27  ;;  %p129_p1 = scmp.ne.s32.totalorder %s18844_s23, %s18840_s22 }
  0xdc   : > { %p120_p8 = scmp.eq.s32.totalorder %s119_s13, 0  ;;  %p130_p4 = scmp.eq.s32.totalorder %s18848_s24, 0 }
  0xdd   : > { %p135_p13 = scmp.ne.s32.totalorder %s18840_s22, %s18836_s21  ;;  %p22366_p2 = scmp.eq.s32.totalorder %s18957_s25, 0 }
  0xde   : > { %s19199_s14 = scalar_select %p120_p8, %s18844_s23, %s122_s12  }
  0xdf   : > { %p131_p0 = por %p130_p4, %p129_p1  ;;  %p19203_p5 = por %p22366_p2, %p135_p13 }
  0xe0   : > { %p17222_p7 = scmp.lt.s32.totalorder %s18848_s24, 3  ;;  %s440_s17 = sand.u32 1, %s18848_s24  }
  0xe1   : > { %s442_s28 = sand.u32 1, %s18844_s23   ;;  %s16863_s26 = sshll.u32 %s18848_s24, 17 }
  0xe2   : > { %s15302_s18 = sshll.u32 %s442_s28, 13  ;;  %s19214_s30 = scalar_lea.hbm %s22340_s4, %s16863_s26 }
  0xe3   : > { %s444_s21 = scalar_lea.vmem [#allocation12], %s15302_s18  ;;  %p19216_p6 = pnand %p17222_p7, %p131_p0 }
  0xe4   : > { %s452_s15 = sshll.u32 %s444_s21, 4  ;;  %s19222_s24 = scalar_lea.sflag [#allocation13], %s440_s17  ;;  %s19220_s15 = int_to_ptr.vmem [resolvable:$true] %s452_s15 }
  0xe5   : > { %s18730_s10 = scalar_lea.hbm %s19214_s30, 131072  ;;  %p18732_p3 = pneg %p19216_p6 }
  0xe6   : > { %p18731_p9 = scmp.ne.s32.totalorder %s19214_s30, %s18730_s10  ;;  %s18735_s12 = scalar_lea.hbm %s22340_s4, 393216 }
  0xe7   : > { %p18736_p12 = scmp.lt.u32.totalorder %s19214_s30, %s22340_s4  ;;  %p18737_p8 = scmp.lt.u32.totalorder %s18735_s12, %s18730_s10 }
  0xe8   : > { %p18733_p10 = pnand %p18732_p3, %p18731_p9  ;;  %p18739_p4 = scmp.lt.u32.totalorder %s18730_s10, %s19214_s30 }
  0xe9   : > { %p18738_p1 = por %p18737_p8, %p18736_p12 }
  0xea   : > { %p18734_p11 = pneg %p18733_p10 }
  0xeb   : > { %p18740_p13 = por %p18739_p4, %p18738_p1 }
  0xed   : > { %p18741_p0 = pnand %p18740_p13, %p18734_p11 }
  0xef   : > { %18744 = shalt.err (!%p18741_p0)
}
  0xf0   : > { %s18745_s17 = scalar_lea.vmem %s19220_s15, 131072  ;;  %s18863_s26 = smov [#allocation12]  }
  0xf1   : > { %p18746_p2 = scmp.ne.s32.totalorder %s19220_s15, %s18745_s17  ;;  %s18750_s29 = sshll.u32 %s18863_s26, 4  ;;  %s18751_s29 = int_to_ptr.vmem [resolvable:$false] %s18750_s29 }
  0xf2   : > { %s18752_s16 = scalar_lea.vmem %s18751_s29, 262144  ;;  %p18753_p10 = scmp.lt.s32.totalorder %s19220_s15, %s18751_s29 }
  0xf3   : > { %p18748_p7 = pnand %p18746_p2, %p18732_p3  ;;  %p18754_p12 = scmp.lt.s32.totalorder %s18752_s16, %s18745_s17 }
  0xf5   : > { %p18749_p9 = pneg %p18748_p7  ;;  %p18755_p8 = por %p18754_p12, %p18753_p10 }
  0xf7   : > { %p18756_p1 = pnand %p18755_p8, %p18749_p9 }
  0xf9   : > { %18759 = shalt.err (!%p18756_p1)
}
  0xfa   : > { %s18864_s21 = smov 512   ;;  %s18865_s10 = smov 32  }
  0xfb   : > { %17212 = dma.hbm_to_vmem [thread:$0]  (!%p19216_p6), %s19214_s30, 131072, %s19220_s15, %s19222_s24, %s18864_s21, %s18864_s21, %s18865_s10  }
  0xfc   : > { %s22369_s0 = sld [smem:[#allocation32_spill]] }
 0x102   : > { %p22370_p3 = scmp.ne.s32.totalorder %s22369_s0, 0 }
 0x103   : > { %p22371_p11 = scmp.eq.s32.totalorder (!%p22370_p3), %s18957_s25, 0 }
 0x104   : > { %464 = sbr.rel (%p22370_p3) target bundleno = 7085 (0x1bad), region = 68 }
 0x10b   : > { %18803 = dma.done.wait (%p22371_p11), [#allocation7], 5888   ;;  %p22372_p4 = pmov %p22371_p11 }
 0x10d   : > { %18805 = vsyncadd (%p22372_p4), [#allocation7], 4294961408  ;;  %p22373_p13 = pmov %p22372_p4 }
 0x10e   : > { %p22374_p0 = pmov %p22372_p4 }
 0x10f   : > { %18807 = dma.done.wait (%p22373_p13), [#allocation10], 4160  }
 0x110   : > { %18809 = vsyncadd (%p22374_p0), [#allocation10], 4294963136  ;;  %s478_s19 = sand.u32 1, %s18957_s25   ;;  %s480_s30 = sand.u32 1, %s18840_s22  }
 0x111   : > { %s15310_s15 = sshll.u32 %s480_s30, 13  ;;  %s479_s24 = scalar_lea.sflag [#allocation13], %s478_s19 }
 0x112   : > { %s19262_s13 = scalar_lea.vmem [#allocation12], %s15310_s15 }
 0x113   : > { %18811 = dma.done.wait (%p19203_p5), %s479_s24, 131072  }
 0x114   : > { %18813 = vsyncadd (%p19203_p5), %s479_s24, 4294836224  ;;  %p22375_p6 = pmov %p22374_p0 }
 0x115   : > { %p22376_p2 = pmov %p22374_p0 }
 0x116   : > { %18815 = dma.done.wait (%p22375_p6), [#allocation13], 128  }
 0x117   : > { %18817 = vsyncadd (%p22376_p2), [#allocation13], 4294967168  ;;  %p22377_p7 = pmov %p22374_p0 }
 0x118   : > { %p22378_p9 = pmov %p22374_p0 }
 0x119   : > { %18819 = dma.done.wait (%p22377_p7), [#allocation16], 32832  }
 0x11a   : > { %18821 = vsyncadd (%p22378_p9), [#allocation16], 4294934464  ;;  %p22379_p10 = pmov %p22374_p0 }
 0x11b   : > { %p22380_p12 = pmov %p22374_p0 }
 0x11c   : > { %18823 = dma.done.wait (%p22379_p10), [#allocation19], 8224  }
 0x11d   : > { %18825 = vsyncadd (%p22380_p12), [#allocation19], 4294959072  ;;  %p22381_p5 = pmov %p22374_p0 }
 0x11e   : > { %p22382_p8 = pmov %p22374_p0 }
 0x11f   : > { %18827 = dma.done.wait (%p22381_p5), [#allocation22], 32  }
 0x120   : > { %18829 = vsyncadd (%p22382_p8), [#allocation22], 4294967264  ;;  %p22383_p1 = scmp.ne.s32.totalorder %s18957_s25, 0 }
 0x121   : > { %v17286_v0 = vld [vmem:[#allocation6 + $0x4] ss:$16 sps:$4 sm:$0xff] (!%p22383_p1)   ;;  %v17288_v1 = vld [vmem:[#allocation6 + $0xc] ss:$16 sps:$4 sm:$0xff] (!%p22383_p1)   ;;  %v17290_v2 = vld [vmem:[#allocation6] ss:$16 sps:$4 sm:$0xff] (!%p22383_p1)  }
 0x122   : > { %547 = sbr.rel (%p22383_p1) target bundleno = 596 (0x254), region = 112  ;;  %947 = vmatprep.subr.bf16.mxu0 (!%p22383_p1), %v17286_v0  ;;  %v17291_v3 = vld [vmem:[#allocation6 + $0x8] ss:$16 sps:$4 sm:$0xff] (!%p22383_p1)   ;;  %1040 = vmatprep.subr.bf16.mxu1 (!%p22383_p1), %v17288_v1  ;;  %v17292_v4 = vld [vmem:[#allocation6 + $0x24] ss:$16 sps:$4 sm:$0xff] (!%p22383_p1)   ;;  %vm931_vm0 = vcmask (!%p22383_p1), 1041408  }
 0x123   : > { %948 = vmatpush1.bf16.msra.mxu0 (!%p22383_p1), %v17290_v2  ;;  %1041 = vmatpush1.bf16.msra.mxu1 (!%p22383_p1), %v17291_v3  ;;  %v17294_v5 = vld [vmem:[#allocation6 + $0x2c] ss:$16 sps:$4 sm:$0xff] (!%p22383_p1)   ;;  %v17296_v6 = vld [vmem:[#allocation6 + $0x20] ss:$16 sps:$4 sm:$0xff] (!%p22383_p1)   ;;  %v17297_v7 = vld [vmem:[#allocation6 + $0x28] ss:$16 sps:$4 sm:$0xff] (!%p22383_p1)  }
 0x124   : > { %949 = vmatprep.subr.bf16.mxu0 (!%p22383_p1), %v17292_v4  ;;  %1042 = vmatprep.subr.bf16.mxu1 (!%p22383_p1), %v17294_v5  ;;  %v17298_v8 = vld [vmem:[#allocation6 + $0x44] ss:$16 sps:$4 sm:$0xff] (!%p22383_p1)   ;;  %v17300_v9 = vld [vmem:[#allocation6 + $0x4c] ss:$16 sps:$4 sm:$0xff] (!%p22383_p1)   ;;  %v17302_v10 = vld [vmem:[#allocation6 + $0x40] ss:$16 sps:$4 sm:$0xff] (!%p22383_p1)  }
 0x125   : > { %v17303_v11 = vld [vmem:[#allocation6 + $0x48] ss:$16 sps:$4 sm:$0xff] (!%p22383_p1)   ;;  %v17304_v12 = vld [vmem:[#allocation6 + $0x64] ss:$16 sps:$4 sm:$0xff] (!%p22383_p1)   ;;  %v17306_v13 = vld [vmem:[#allocation6 + $0x6c] ss:$16 sps:$4 sm:$0xff] (!%p22383_p1)  }
 0x126   : > { %v17308_v14 = vld [vmem:[#allocation6 + $0x60] ss:$16 sps:$4 sm:$0xff] (!%p22383_p1)   ;;  %v17309_v15 = vld [vmem:[#allocation6 + $0x68] ss:$16 sps:$4 sm:$0xff] (!%p22383_p1)   ;;  %v17310_v16 = vld [vmem:[#allocation6 + $0x84] ss:$16 sps:$4 sm:$0xff] (!%p22383_p1)  }
 0x127   : > { %950 = vmatpush1.bf16.msra.mxu0 (!%p22383_p1), %v17296_v6  ;;  %1043 = vmatpush1.bf16.msra.mxu1 (!%p22383_p1), %v17297_v7  ;;  %v17312_v17 = vld [vmem:[#allocation6 + $0x8c] ss:$16 sps:$4 sm:$0xff] (!%p22383_p1)   ;;  %v17314_v18 = vld [vmem:[#allocation6 + $0x80] ss:$16 sps:$4 sm:$0xff] (!%p22383_p1)   ;;  %v17315_v19 = vld [vmem:[#allocation6 + $0x88] ss:$16 sps:$4 sm:$0xff] (!%p22383_p1)   ;;  %v608_v6 = vlaneseq (!%p22383_p1) }
 0x128   : > { %951 = vmatprep.subr.bf16.mxu0 (!%p22383_p1), %v17298_v8  ;;  %1044 = vmatprep.subr.bf16.mxu1 (!%p22383_p1), %v17300_v9  ;;  %v17316_v20 = vld [vmem:[#allocation6 + $0xa4] ss:$16 sps:$4 sm:$0xff] (!%p22383_p1)   ;;  %v17318_v21 = vld [vmem:[#allocation6 + $0xac] ss:$16 sps:$4 sm:$0xff] (!%p22383_p1)   ;;  %v17320_v22 = vld [vmem:[#allocation6 + $0xa0] ss:$16 sps:$4 sm:$0xff] (!%p22383_p1)  }
 0x129   : > { %v17321_v23 = vld [vmem:[#allocation6 + $0xa8] ss:$16 sps:$4 sm:$0xff]   ;;  %v17322_v24 = vld [vmem:[#allocation6 + $0xc4] ss:$16 sps:$4 sm:$0xff]   ;;  %v17324_v25 = vld [vmem:[#allocation6 + $0xcc] ss:$16 sps:$4 sm:$0xff]  }
 0x12a   : > { %v17326_v26 = vld [vmem:[#allocation6 + $0xc0] ss:$16 sps:$4 sm:$0xff]   ;;  %v17327_v27 = vld [vmem:[#allocation6 + $0xc8] ss:$16 sps:$4 sm:$0xff]   ;;  %v17328_v28 = vld [vmem:[#allocation6 + $0xe4] ss:$16 sps:$4 sm:$0xff]  }
 0x12b   : > { %952 = vmatpush1.bf16.msra.mxu0 %v17302_v10  ;;  %1045 = vmatpush1.bf16.msra.mxu1 %v17303_v11  ;;  %v17330_v29 = vld [vmem:[#allocation6 + $0xec] ss:$16 sps:$4 sm:$0xff]   ;;  %v17332_v30 = vld [vmem:[#allocation6 + $0xe0] ss:$16 sps:$4 sm:$0xff]   ;;  %v17333_v31 = vld [vmem:[#allocation6 + $0xe8] ss:$16 sps:$4 sm:$0xff]  }
 0x12c   : > { %953 = vmatprep.subr.bf16.mxu0 %v17304_v12  ;;  %1046 = vmatprep.subr.bf16.mxu1 %v17306_v13  ;;  %v17334_v32 = vld [vmem:[#allocation6 + $0x104] ss:$16 sps:$4 sm:$0xff]   ;;  %v17336_v33 = vld [vmem:[#allocation6 + $0x10c] ss:$16 sps:$4 sm:$0xff]   ;;  %v17338_v34 = vld [vmem:[#allocation6 + $0x100] ss:$16 sps:$4 sm:$0xff]  }
 0x12d   : > { %s22384_s28 = sld [smem:[#allocation33_spill]]  ;;  %vm912_vm1 = vcmask 433152   ;;  %v17339_v36 = vld [vmem:[#allocation6 + $0x108] ss:$16 sps:$4 sm:$0xff]   ;;  %v17340_v37 = vld [vmem:[#allocation6 + $0x124] ss:$16 sps:$4 sm:$0xff]  }
 0x12e   : > { %v17342_v38 = vld [vmem:[#allocation6 + $0x12c] ss:$16 sps:$4 sm:$0xff]   ;;  %v604_v39 = vld [vmem:[#allocation6 + $0x160] sm:$0x77]  ;;  %vm932_vm2 = vcmask 1042432   ;;  %v18866_v41 = vmov 65535  }
 0x12f   : > { %954 = vmatpush1.bf16.msra.mxu0 %v17308_v14  ;;  %1047 = vmatpush1.bf16.msra.mxu1 %v17309_v15  ;;  %v605_v40 = vld [vmem:[#allocation6 + $0x168] sm:$0x77]  ;;  %v933_v42 = vsel %vm931_vm0, 4294967295, %v18866_v41  ;;  %v17344_v43 = vld [vmem:[#allocation6 + $0x120] ss:$16 sps:$4 sm:$0xff]   ;;  %v15375_v47 = vcombine.high %v604_v39, %v604_v39  ;;  %v15374_v52 = vcombine.low %v604_v39, %v604_v39  ;;  %v18867_v5 = vmov 0.0  }
 0x130   : > { %955 = vmatprep.subr.bf16.mxu0 %v17310_v16  ;;  %1048 = vmatprep.subr.bf16.mxu1 %v17312_v17  ;;  %v17345_v44 = vld [vmem:[#allocation6 + $0x128] ss:$16 sps:$4 sm:$0xff]   ;;  %v17346_v45 = vld [vmem:[#allocation6 + $0x144] ss:$16 sps:$4 sm:$0xff]   ;;  %v17348_v46 = vld [vmem:[#allocation6 + $0x14c] ss:$16 sps:$4 sm:$0xff]   ;;  %v15377_v48 = vcombine.high %v605_v40, %v605_v40  ;;  %v15376_v53 = vcombine.low %v605_v40, %v605_v40 }
 0x131   : > { %v934_v49 = vsel %vm932_vm2, %v933_v42, 0  ;;  %v17350_v50 = vld [vmem:[#allocation6 + $0x140] ss:$16 sps:$4 sm:$0xff]   ;;  %v17351_v51 = vld [vmem:[#allocation6 + $0x148] ss:$16 sps:$4 sm:$0xff]   ;;  %1183 = vst [vmem:[#allocation5] sm:$0xff] %v18867_v5 }
 0x132   : > { %v939_v54 = vand.u32 %v15375_v47, %v934_v49  ;;  %v945_v55 = vand.u32 %v15377_v48, %v934_v49  ;;  %v936_v56 = vand.u32 %v15374_v52, %v934_v49  ;;  %v942_v57 = vand.u32 %v15376_v53, %v934_v49  ;;  %1181 = vst [vmem:[#allocation3] sm:$0x3] %v18867_v5  ;;  %v606_v10 = vld [vmem:[#allocation11] sm:$0xf] }
 0x133   : > { %956 = vmatpush1.bf16.msra.mxu0 %v17314_v18  ;;  %1049 = vmatpush1.bf16.msra.mxu1 %v17315_v19  ;;  %v17358_v35 = vld [vmem:[%s22384_s28 + $0x4] ss:$8 sps:$4 sm:$0xff]   ;;  %v17356_v58 = vld [vmem:[%s22384_s28] ss:$8 sps:$4 sm:$0xff]   ;;  %v17359_v59 = vld [vmem:[%s22384_s28 + $0x14] ss:$8 sps:$4 sm:$0xff]  }
 0x134   : > { %957 = vmatprep.subr.bf16.mxu0 %v17316_v20  ;;  %1050 = vmatprep.subr.bf16.mxu1 %v17318_v21  ;;  %v17361_v60 = vld [vmem:[%s22384_s28 + $0x10] ss:$8 sps:$4 sm:$0xff]   ;;  %v17362_v61 = vld [vmem:[%s22384_s28 + $0x24] ss:$8 sps:$4 sm:$0xff]   ;;  %v17364_v62 = vld [vmem:[%s22384_s28 + $0x20] ss:$8 sps:$4 sm:$0xff]  }
 0x135   : > { %15378 = vmatprep.mubr.msk.bf16.mxu0 %vm912_vm1, %v17358_v35  ;;  %15384 = vmatprep.mubr.msk.bf16.mxu1 %vm912_vm1, %v17358_v35  ;;  %v17365_v63 = vld [vmem:[%s22384_s28 + $0x34] ss:$8 sps:$4 sm:$0xff]   ;;  %v17367_v0 = vld [vmem:[%s22384_s28 + $0x30] ss:$8 sps:$4 sm:$0xff]   ;;  %v17368_v1 = vld [vmem:[%s22384_s28 + $0x44] ss:$8 sps:$4 sm:$0xff]  }
 0x136   : > { %v17370_v2 = vld [vmem:[%s22384_s28 + $0x40] ss:$8 sps:$4 sm:$0xff]   ;;  %v17371_v3 = vld [vmem:[%s22384_s28 + $0x54] ss:$8 sps:$4 sm:$0xff]   ;;  %v17373_v4 = vld [vmem:[%s22384_s28 + $0x50] ss:$8 sps:$4 sm:$0xff]  }
 0x137   : > { %958 = vmatpush1.bf16.msra.mxu0 %v17320_v22  ;;  %1051 = vmatpush1.bf16.msra.mxu1 %v17321_v23  ;;  %1182 = vst [vmem:[#allocation4] sm:$0x3] %v18867_v5  ;;  %1184 = vst [vmem:[#allocation5 + $0x8] sm:$0xff] %v18867_v5  ;;  %v609_v7 = vshrl.u32 %v608_v6, 7 }
 0x138   : > { %959 = vmatprep.subr.bf16.mxu0 %v17322_v24  ;;  %1052 = vmatprep.subr.bf16.mxu1 %v17324_v25 }
 0x139   : > { %v610_v8 = vsub.s32 0, %v609_v7  ;;  %v618_v9 = vsub.s32 2, %v609_v7  ;;  %v614_v11 = vsub.s32 1, %v609_v7  ;;  %v622_v12 = vsub.s32 3, %v609_v7 }
 0x13b   : > { %960 = vmatpush1.bf16.msra.mxu0 %v17326_v26  ;;  %1053 = vmatpush1.bf16.msra.mxu1 %v17327_v27  ;;  %v19335_v13 = vrot.slane %v606_v10, %v610_v8  ;;  %v19337_v14 = vrot.slane %v606_v10, %v618_v9  ;;  %v19339_v15 = vrot.slane %v606_v10, %v614_v11 }
 0x13c   : > { %961 = vmatprep.subr.bf16.mxu0 %v17328_v28  ;;  %1054 = vmatprep.subr.bf16.mxu1 %v17330_v29  ;;  %v19341_v16 = vrot.slane %v606_v10, %v622_v12 }
 0x13f   : > { %962 = vmatpush1.bf16.msra.mxu0 %v17332_v30  ;;  %1055 = vmatpush1.bf16.msra.mxu1 %v17333_v31 }
 0x140   : > { %963 = vmatprep.subr.bf16.mxu0 %v17334_v32  ;;  %1056 = vmatprep.subr.bf16.mxu1 %v17336_v33 }
 0x143   : > { %964 = vmatpush1.bf16.msra.mxu0 %v17338_v34  ;;  %1057 = vmatpush1.bf16.msra.mxu1 %v17339_v36 }
 0x144   : > { %965 = vmatprep.subr.bf16.mxu0 %v17340_v37  ;;  %1058 = vmatprep.subr.bf16.mxu1 %v17342_v38 }
 0x147   : > { %966 = vmatpush1.bf16.msra.mxu0 %v17344_v43  ;;  %1059 = vmatpush1.bf16.msra.mxu1 %v17345_v44 }
 0x148   : > { %967 = vmatprep.subr.bf16.mxu0 %v17346_v45  ;;  %1060 = vmatprep.subr.bf16.mxu1 %v17348_v46 }
 0x14b   : > { %968 = vmatpush1.bf16.msra.mxu0 %v17350_v50  ;;  %1061 = vmatpush1.bf16.msra.mxu1 %v17351_v51 }
 0x14c   : > { %969 = vmatprep.subr.bf16.mxu0 %v939_v54  ;;  %1062 = vmatprep.subr.bf16.mxu1 %v945_v55 }
 0x14f   : > { %970 = vmatpush1.bf16.msra.mxu0 %v936_v56  ;;  %1063 = vmatpush1.bf16.msra.mxu1 %v942_v57 }
 0x152   : > { %980 = vmatmul.mubr.bf16.vlgmr.msra.gmra.mrb[0].mxu0 %v17356_v58  ;;  %1073 = vmatmul.mubr.bf16.vlgmr.msra.gmra.mrb[0].mxu1 %v17356_v58 }
 0x153   : > { %15379 = vmatprep.mubr.msk.bf16.mxu0 %vm912_vm1, %v17359_v59  ;;  %15385 = vmatprep.mubr.msk.bf16.mxu1 %vm912_vm1, %v17359_v59 }
 0x15a   : > { %990 = vmatmul.mubr.bf16.gmra.mrb[4].mxu0 %v17361_v60  ;;  %1083 = vmatmul.mubr.bf16.gmra.mrb[4].mxu1 %v17361_v60 }
 0x15b   : > { %15380 = vmatprep.mubr.msk.bf16.mxu0 %vm912_vm1, %v17362_v61  ;;  %15386 = vmatprep.mubr.msk.bf16.mxu1 %vm912_vm1, %v17362_v61 }
 0x162   : > { %1000 = vmatmul.mubr.bf16.gmra.mrb[8].mxu0 %v17364_v62  ;;  %1093 = vmatmul.mubr.bf16.gmra.mrb[8].mxu1 %v17364_v62 }
 0x163   : > { %15381 = vmatprep.mubr.msk.bf16.mxu0 %vm912_vm1, %v17365_v63  ;;  %15387 = vmatprep.mubr.msk.bf16.mxu1 %vm912_vm1, %v17365_v63 }
 0x16a   : > { %1010 = vmatmul.mubr.bf16.gmra.mrb[12].mxu0 %v17367_v0  ;;  %1103 = vmatmul.mubr.bf16.gmra.mrb[12].mxu1 %v17367_v0 }
 0x16b   : > { %15382 = vmatprep.mubr.msk.bf16.mxu0 %vm912_vm1, %v17368_v1  ;;  %15388 = vmatprep.mubr.msk.bf16.mxu1 %vm912_vm1, %v17368_v1 }
 0x172   : > { %1020 = vmatmul.mubr.bf16.gmra.mrb[16].mxu0 %v17370_v2  ;;  %1113 = vmatmul.mubr.bf16.gmra.mrb[16].mxu1 %v17370_v2 }
 0x173   : > { %15383 = vmatprep.mubr.msk.bf16.mxu0 %vm912_vm1, %v17371_v3  ;;  %15389 = vmatprep.mubr.msk.bf16.mxu1 %vm912_vm1, %v17371_v3 }
 0x17a   : > { %1030 = vmatmul.mubr.bf16.gmra.mrb[20].mxu0 %v17373_v4  ;;  %1123 = vmatmul.mubr.bf16.gmra.mrb[20].mxu1 %v17373_v4 }
 0x225   : > { %v981_v17 = vpop.f32.mrb[0].mxu0  ;;  %v1074_v18 = vpop.f32.mrb[0].mxu1 }
 0x226   : > { %v982_v19 = vadd.f32 %v981_v17, %v19335_v13  ;;  %v1075_v20 = vadd.f32 %v1074_v18, %v19337_v14  ;;  %v983_v21 = vpop.f32.mrb[1].mxu0  ;;  %v1076_v22 = vpop.f32.mrb[1].mxu1 }
 0x227   : > { %v984_v23 = vadd.f32 %v983_v21, %v19339_v15  ;;  %v1077_v24 = vadd.f32 %v1076_v22, %v19341_v16  ;;  %v985_v25 = vpop.f32.mrb[2].mxu0  ;;  %v1078_v26 = vpop.f32.mrb[2].mxu1 }
 0x228   : > { %1133 = vst [vmem:[#allocation2] sm:$0xff] %v982_v19  ;;  %1135 = vst [vmem:[#allocation2 + $0x10] sm:$0xff] %v1075_v20  ;;  %v986_v27 = vadd.f32 %v985_v25, %v19335_v13  ;;  %v1079_v28 = vadd.f32 %v1078_v26, %v19337_v14  ;;  %v987_v29 = vpop.f32.mrb[3].mxu0  ;;  %v1080_v30 = vpop.f32.mrb[3].mxu1 }
 0x229   : > { %1134 = vst [vmem:[#allocation2 + $0x8] sm:$0xff] %v984_v23  ;;  %1136 = vst [vmem:[#allocation2 + $0x18] sm:$0xff] %v1077_v24  ;;  %v988_v31 = vadd.f32 %v987_v29, %v19339_v15  ;;  %v1081_v32 = vadd.f32 %v1080_v30, %v19341_v16 }
 0x22a   : > { %1137 = vst [vmem:[#allocation2 + $0x20] sm:$0xff] %v986_v27  ;;  %1139 = vst [vmem:[#allocation2 + $0x30] sm:$0xff] %v1079_v28 }
 0x22b   : > { %1138 = vst [vmem:[#allocation2 + $0x28] sm:$0xff] %v988_v31  ;;  %1140 = vst [vmem:[#allocation2 + $0x38] sm:$0xff] %v1081_v32 }
 0x22d   : > { %v991_v33 = vpop.f32.mrb[4].mxu0  ;;  %v1084_v34 = vpop.f32.mrb[4].mxu1 }
 0x22e   : > { %v992_v35 = vadd.f32 %v991_v33, %v19335_v13  ;;  %v1085_v36 = vadd.f32 %v1084_v34, %v19337_v14  ;;  %v993_v37 = vpop.f32.mrb[5].mxu0  ;;  %v1086_v38 = vpop.f32.mrb[5].mxu1 }
 0x22f   : > { %v994_v39 = vadd.f32 %v993_v37, %v19339_v15  ;;  %v1087_v40 = vadd.f32 %v1086_v38, %v19341_v16  ;;  %v995_v41 = vpop.f32.mrb[6].mxu0  ;;  %v1088_v42 = vpop.f32.mrb[6].mxu1 }
 0x230   : > { %1141 = vst [vmem:[#allocation2 + $0x40] sm:$0xff] %v992_v35  ;;  %1143 = vst [vmem:[#allocation2 + $0x50] sm:$0xff] %v1085_v36  ;;  %v996_v43 = vadd.f32 %v995_v41, %v19335_v13  ;;  %v1089_v44 = vadd.f32 %v1088_v42, %v19337_v14  ;;  %v997_v45 = vpop.f32.mrb[7].mxu0  ;;  %v1090_v46 = vpop.f32.mrb[7].mxu1 }
 0x231   : > { %1142 = vst [vmem:[#allocation2 + $0x48] sm:$0xff] %v994_v39  ;;  %1144 = vst [vmem:[#allocation2 + $0x58] sm:$0xff] %v1087_v40  ;;  %v998_v47 = vadd.f32 %v997_v45, %v19339_v15  ;;  %v1091_v48 = vadd.f32 %v1090_v46, %v19341_v16 }
 0x232   : > { %1145 = vst [vmem:[#allocation2 + $0x60] sm:$0xff] %v996_v43  ;;  %1147 = vst [vmem:[#allocation2 + $0x70] sm:$0xff] %v1089_v44 }
 0x233   : > { %1146 = vst [vmem:[#allocation2 + $0x68] sm:$0xff] %v998_v47  ;;  %1148 = vst [vmem:[#allocation2 + $0x78] sm:$0xff] %v1091_v48 }
 0x235   : > { %v1001_v49 = vpop.f32.mrb[8].mxu0  ;;  %v1094_v50 = vpop.f32.mrb[8].mxu1 }
 0x236   : > { %v1002_v51 = vadd.f32 %v1001_v49, %v19335_v13  ;;  %v1095_v52 = vadd.f32 %v1094_v50, %v19337_v14  ;;  %v1003_v53 = vpop.f32.mrb[9].mxu0  ;;  %v1096_v54 = vpop.f32.mrb[9].mxu1 }
 0x237   : > { %v1004_v55 = vadd.f32 %v1003_v53, %v19339_v15  ;;  %v1097_v56 = vadd.f32 %v1096_v54, %v19341_v16  ;;  %v1005_v57 = vpop.f32.mrb[10].mxu0  ;;  %v1098_v58 = vpop.f32.mrb[10].mxu1 }
 0x238   : > { %1149 = vst [vmem:[#allocation2 + $0x80] sm:$0xff] %v1002_v51  ;;  %1151 = vst [vmem:[#allocation2 + $0x90] sm:$0xff] %v1095_v52  ;;  %v1006_v59 = vadd.f32 %v1005_v57, %v19335_v13  ;;  %v1099_v60 = vadd.f32 %v1098_v58, %v19337_v14  ;;  %v1007_v61 = vpop.f32.mrb[11].mxu0  ;;  %v1100_v62 = vpop.f32.mrb[11].mxu1 }
 0x239   : > { %1150 = vst [vmem:[#allocation2 + $0x88] sm:$0xff] %v1004_v55  ;;  %1152 = vst [vmem:[#allocation2 + $0x98] sm:$0xff] %v1097_v56  ;;  %v1008_v63 = vadd.f32 %v1007_v61, %v19339_v15  ;;  %v1101_v0 = vadd.f32 %v1100_v62, %v19341_v16 }
 0x23a   : > { %1153 = vst [vmem:[#allocation2 + $0xa0] sm:$0xff] %v1006_v59  ;;  %1155 = vst [vmem:[#allocation2 + $0xb0] sm:$0xff] %v1099_v60 }
 0x23b   : > { %1154 = vst [vmem:[#allocation2 + $0xa8] sm:$0xff] %v1008_v63  ;;  %1156 = vst [vmem:[#allocation2 + $0xb8] sm:$0xff] %v1101_v0 }
 0x23d   : > { %v1011_v1 = vpop.f32.mrb[12].mxu0  ;;  %v1104_v2 = vpop.f32.mrb[12].mxu1 }
 0x23e   : > { %v1012_v3 = vadd.f32 %v1011_v1, %v19335_v13  ;;  %v1105_v4 = vadd.f32 %v1104_v2, %v19337_v14  ;;  %v1013_v5 = vpop.f32.mrb[13].mxu0  ;;  %v1106_v6 = vpop.f32.mrb[13].mxu1 }
 0x23f   : > { %v1014_v7 = vadd.f32 %v1013_v5, %v19339_v15  ;;  %v1107_v8 = vadd.f32 %v1106_v6, %v19341_v16  ;;  %v1015_v9 = vpop.f32.mrb[14].mxu0  ;;  %v1108_v10 = vpop.f32.mrb[14].mxu1 }
 0x240   : > { %1157 = vst [vmem:[#allocation2 + $0xc0] sm:$0xff] %v1012_v3  ;;  %1159 = vst [vmem:[#allocation2 + $0xd0] sm:$0xff] %v1105_v4  ;;  %v1016_v11 = vadd.f32 %v1015_v9, %v19335_v13  ;;  %v1109_v12 = vadd.f32 %v1108_v10, %v19337_v14  ;;  %v1017_v17 = vpop.f32.mrb[15].mxu0  ;;  %v1110_v18 = vpop.f32.mrb[15].mxu1 }
 0x241   : > { %1158 = vst [vmem:[#allocation2 + $0xc8] sm:$0xff] %v1014_v7  ;;  %1160 = vst [vmem:[#allocation2 + $0xd8] sm:$0xff] %v1107_v8  ;;  %v1018_v19 = vadd.f32 %v1017_v17, %v19339_v15  ;;  %v1111_v20 = vadd.f32 %v1110_v18, %v19341_v16 }
 0x242   : > { %1161 = vst [vmem:[#allocation2 + $0xe0] sm:$0xff] %v1016_v11  ;;  %1163 = vst [vmem:[#allocation2 + $0xf0] sm:$0xff] %v1109_v12 }
 0x243   : > { %1162 = vst [vmem:[#allocation2 + $0xe8] sm:$0xff] %v1018_v19  ;;  %1164 = vst [vmem:[#allocation2 + $0xf8] sm:$0xff] %v1111_v20 }
 0x245   : > { %v1021_v21 = vpop.f32.mrb[16].mxu0  ;;  %v1114_v22 = vpop.f32.mrb[16].mxu1 }
 0x246   : > { %v1022_v23 = vadd.f32 %v1021_v21, %v19335_v13  ;;  %v1115_v24 = vadd.f32 %v1114_v22, %v19337_v14  ;;  %v1023_v25 = vpop.f32.mrb[17].mxu0  ;;  %v1116_v26 = vpop.f32.mrb[17].mxu1 }
 0x247   : > { %v1024_v27 = vadd.f32 %v1023_v25, %v19339_v15  ;;  %v1117_v28 = vadd.f32 %v1116_v26, %v19341_v16  ;;  %v1025_v29 = vpop.f32.mrb[18].mxu0  ;;  %v1118_v30 = vpop.f32.mrb[18].mxu1 }
 0x248   : > { %1165 = vst [vmem:[#allocation2 + $0x100] sm:$0xff] %v1022_v23  ;;  %1167 = vst [vmem:[#allocation2 + $0x110] sm:$0xff] %v1115_v24  ;;  %v1026_v31 = vadd.f32 %v1025_v29, %v19335_v13  ;;  %v1119_v32 = vadd.f32 %v1118_v30, %v19337_v14  ;;  %v1027_v33 = vpop.f32.mrb[19].mxu0  ;;  %v1120_v34 = vpop.f32.mrb[19].mxu1 }
 0x249   : > { %1166 = vst [vmem:[#allocation2 + $0x108] sm:$0xff] %v1024_v27  ;;  %1168 = vst [vmem:[#allocation2 + $0x118] sm:$0xff] %v1117_v28  ;;  %v1028_v35 = vadd.f32 %v1027_v33, %v19339_v15  ;;  %v1121_v36 = vadd.f32 %v1120_v34, %v19341_v16 }
 0x24a   : > { %1169 = vst [vmem:[#allocation2 + $0x120] sm:$0xff] %v1026_v31  ;;  %1171 = vst [vmem:[#allocation2 + $0x130] sm:$0xff] %v1119_v32 }
 0x24b   : > { %1170 = vst [vmem:[#allocation2 + $0x128] sm:$0xff] %v1028_v35  ;;  %1172 = vst [vmem:[#allocation2 + $0x138] sm:$0xff] %v1121_v36 }
 0x24d   : > { %v1031_v37 = vpop.f32.mrb[20].mxu0  ;;  %v1124_v38 = vpop.f32.mrb[20].mxu1 }
 0x24e   : > { %v1032_v39 = vadd.f32 %v1031_v37, %v19335_v13  ;;  %v1125_v40 = vadd.f32 %v1124_v38, %v19337_v14  ;;  %v1033_v41 = vpop.f32.mrb[21].mxu0  ;;  %v1126_v42 = vpop.f32.mrb[21].mxu1 }
 0x24f   : > { %v1034_v43 = vadd.f32 %v1033_v41, %v19339_v15  ;;  %v1127_v44 = vadd.f32 %v1126_v42, %v19341_v16  ;;  %v1035_v45 = vpop.f32.mrb[22].mxu0  ;;  %v1128_v46 = vpop.f32.mrb[22].mxu1 }
 0x250   : > { %1173 = vst [vmem:[#allocation2 + $0x140] sm:$0xff] %v1032_v39  ;;  %1175 = vst [vmem:[#allocation2 + $0x150] sm:$0xff] %v1125_v40  ;;  %v1036_v47 = vadd.f32 %v1035_v45, %v19335_v13  ;;  %v1129_v48 = vadd.f32 %v1128_v46, %v19337_v14  ;;  %v1037_v49 = vpop.f32.mrb[23].mxu0  ;;  %v1130_v50 = vpop.f32.mrb[23].mxu1 }
 0x251   : > { %1174 = vst [vmem:[#allocation2 + $0x148] sm:$0xff] %v1034_v43  ;;  %1176 = vst [vmem:[#allocation2 + $0x158] sm:$0xff] %v1127_v44  ;;  %v1038_v51 = vadd.f32 %v1037_v49, %v19339_v15  ;;  %v1131_v52 = vadd.f32 %v1130_v50, %v19341_v16 }
 0x252   : > { %1177 = vst [vmem:[#allocation2 + $0x160] sm:$0xff] %v1036_v47  ;;  %1179 = vst [vmem:[#allocation2 + $0x170] sm:$0xff] %v1129_v48 }
 0x253   : > { %1178 = vst [vmem:[#allocation2 + $0x168] sm:$0xff] %v1038_v51  ;;  %1180 = vst [vmem:[#allocation2 + $0x178] sm:$0xff] %v1131_v52 }
 0x254 PF: > { %v19391_v53 = vld [vmem:[#allocation9 + $0x4] ss:$16 sps:$4 sm:$0xff]   ;;  %v19393_v54 = vld [vmem:[#allocation9] ss:$16 sps:$4 sm:$0xff]   ;;  %v18868_v13 = vmov 0   ;;  %s15390_s19 = sshll.u32 %s18957_s25, 5 }
 0x255   : > { %1434 = vmatprep.mubr.bf16.mxu0 %v18868_v13  ;;  %1475 = vmatprep.mubr.bf16.mxu1 %v18868_v13  ;;  %v19398_v14 = vld [vmem:[#allocation9 + $0x24] ss:$16 sps:$4 sm:$0xff]   ;;  %v19401_v15 = vld [vmem:[#allocation9 + $0x20] ss:$16 sps:$4 sm:$0xff]   ;;  %v17385_v55 = vld [vmem:[#allocation9 + $0xc] ss:$16 sps:$4 sm:$0xff]  }
 0x256   : > { %1402 = vmatprep.subr.bf16.mxu0 %v19391_v53  ;;  %v19404_v16 = vld [vmem:[#allocation9 + $0x44] ss:$16 sps:$4 sm:$0xff]   ;;  %v19406_v56 = vld [vmem:[#allocation9 + $0x8] ss:$16 sps:$4 sm:$0xff]   ;;  %v19409_v57 = vld [vmem:[#allocation9 + $0x40] ss:$16 sps:$4 sm:$0xff]   ;;  %1443 = vmatprep.subr.bf16.mxu1 %v17385_v55 }
 0x257   : > { %1403 = vmatpush1.bf16.msra.mxu0 %v19393_v54  ;;  %v19412_v58 = vld [vmem:[#allocation9 + $0x64] ss:$16 sps:$4 sm:$0xff]   ;;  %1444 = vmatpush1.bf16.msra.mxu1 %v19406_v56  ;;  %v17391_v59 = vld [vmem:[#allocation9 + $0x2c] ss:$16 sps:$4 sm:$0xff]   ;;  %v17394_v60 = vld [vmem:[#allocation9 + $0x28] ss:$16 sps:$4 sm:$0xff]  }
 0x258   : > { %1404 = vmatprep.subr.bf16.mxu0 %v19398_v14  ;;  %1445 = vmatprep.subr.bf16.mxu1 %v17391_v59  ;;  %v17387_v61 = vld [vmem:[#allocation9 + $0x60] ss:$16 sps:$4 sm:$0xff]   ;;  %v17389_v62 = vld [vmem:[#allocation9 + $0x84] ss:$16 sps:$4 sm:$0xff]   ;;  %v17397_v63 = vld [vmem:[#allocation9 + $0x4c] ss:$16 sps:$4 sm:$0xff]  }
 0x259   : > { %v17400_v0 = vld [vmem:[#allocation9 + $0x48] ss:$16 sps:$4 sm:$0xff]   ;;  %v17403_v1 = vld [vmem:[#allocation9 + $0x6c] ss:$16 sps:$4 sm:$0xff]   ;;  %v17393_v2 = vld [vmem:[#allocation9 + $0x80] ss:$16 sps:$4 sm:$0xff]  }
 0x25a   : > { %v17395_v3 = vld [vmem:[#allocation9 + $0xa4] ss:$16 sps:$4 sm:$0xff]   ;;  %v17406_v4 = vld [vmem:[#allocation9 + $0x68] ss:$16 sps:$4 sm:$0xff]   ;;  %v17409_v5 = vld [vmem:[#allocation9 + $0x8c] ss:$16 sps:$4 sm:$0xff]  }
 0x25b   : > { %1405 = vmatpush1.bf16.msra.mxu0 %v19401_v15  ;;  %1446 = vmatpush1.bf16.msra.mxu1 %v17394_v60  ;;  %v17399_v6 = vld [vmem:[#allocation9 + $0xa0] ss:$16 sps:$4 sm:$0xff]   ;;  %v17401_v7 = vld [vmem:[#allocation9 + $0xc4] ss:$16 sps:$4 sm:$0xff]   ;;  %v17412_v8 = vld [vmem:[#allocation9 + $0x88] ss:$16 sps:$4 sm:$0xff]  }
 0x25c   : > { %1406 = vmatprep.subr.bf16.mxu0 %v19404_v16  ;;  %1447 = vmatprep.subr.bf16.mxu1 %v17397_v63  ;;  %v17413_v9 = vld [vmem:[#allocation9 + $0xac] ss:$16 sps:$4 sm:$0xff]   ;;  %v17405_v10 = vld [vmem:[#allocation9 + $0xc0] ss:$16 sps:$4 sm:$0xff]   ;;  %v17407_v11 = vld [vmem:[#allocation9 + $0xe4] ss:$16 sps:$4 sm:$0xff]  }
 0x25d   : > { %v17415_v12 = vld [vmem:[#allocation9 + $0xa8] ss:$16 sps:$4 sm:$0xff]   ;;  %v17416_v17 = vld [vmem:[#allocation9 + $0xcc] ss:$16 sps:$4 sm:$0xff]   ;;  %v17411_v18 = vld [vmem:[#allocation9 + $0xe0] ss:$16 sps:$4 sm:$0xff]  }
 0x25e   : > { %v1239_v19 = vld [vmem:[#allocation3] sm:$0x3]  ;;  %v17418_v20 = vld [vmem:[#allocation9 + $0xc8] ss:$16 sps:$4 sm:$0xff]   ;;  %s1186_s30 = sshra.s32 %s15390_s19, 3  ;;  %p16497_p3 = scmp.ne.s32.totalorder %s18957_s25, 2 }
 0x25f   : > { %1407 = vmatpush1.bf16.msra.mxu0 %v19409_v57  ;;  %1448 = vmatpush1.bf16.msra.mxu1 %v17400_v0  ;;  %v17419_v21 = vld [vmem:[#allocation9 + $0xec] ss:$16 sps:$4 sm:$0xff]   ;;  %v1241_v22 = vpack.c.bf16 %v1239_v19, %v1239_v19  ;;  %v17421_v23 = vld [vmem:[#allocation9 + $0xe8] ss:$16 sps:$4 sm:$0xff]   ;;  %s16864_s15 = sshll.u32 %s1186_s30, 5  ;;  %s22385_s12 = sld [smem:[#allocation34_spill]] (!%p16497_p3) }
 0x260   : > { %1408 = vmatprep.subr.bf16.mxu0 %v19412_v58  ;;  %1449 = vmatprep.subr.bf16.mxu1 %v17403_v1  ;;  %s19428_s24 = scalar_lea.vmem [#allocation2], %s16864_s15  ;;  %v1240_v49 = vld [vmem:[#allocation4] sm:$0x3]  ;;  %vm15139_vm3 = vcmask (!%p16497_p3), 1041408   ;;  %vm15140_vm4 = vcmask (!%p16497_p3), 429058  }
 0x261   : > { %v19431_v24 = vld [vmem:[%s19428_s24] sm:$0xff]  ;;  %v19434_v25 = vld [vmem:[%s19428_s24 + $0x8] sm:$0xff]  ;;  %v19439_v34 = vld [vmem:[%s19428_s24 + $0x10] sm:$0xff] }
 0x262   : > { %v19443_v40 = vld [vmem:[%s19428_s24 + $0x18] sm:$0xff]  ;;  %vm15141_vm5 = vmor (!%p16497_p3), %vm15140_vm4, %vm15139_vm3 }
 0x263   : > { %1409 = vmatpush1.bf16.msra.mxu0 %v17387_v61  ;;  %1450 = vmatpush1.bf16.msra.mxu1 %v17406_v4 }
 0x264   : > { %1410 = vmatprep.subr.bf16.mxu0 %v17389_v62  ;;  %1451 = vmatprep.subr.bf16.mxu1 %v17409_v5 }
 0x267   : > { %1411 = vmatpush1.bf16.msra.mxu0 %v17393_v2  ;;  %1452 = vmatpush1.bf16.msra.mxu1 %v17412_v8 }
 0x268   : > { %1412 = vmatprep.subr.bf16.mxu0 %v17395_v3  ;;  %1453 = vmatprep.subr.bf16.mxu1 %v17413_v9 }
 0x26b   : > { %1413 = vmatpush1.bf16.msra.mxu0 %v17399_v6  ;;  %1454 = vmatpush1.bf16.msra.mxu1 %v17415_v12 }
 0x26c   : > { %1414 = vmatprep.subr.bf16.mxu0 %v17401_v7  ;;  %1455 = vmatprep.subr.bf16.mxu1 %v17416_v17 }
 0x26f   : > { %1415 = vmatpush1.bf16.msra.mxu0 %v17405_v10  ;;  %1456 = vmatpush1.bf16.msra.mxu1 %v17418_v20 }
 0x270   : > { %1416 = vmatprep.subr.bf16.mxu0 %v17407_v11  ;;  %1457 = vmatprep.subr.bf16.mxu1 %v17419_v21 }
 0x273   : > { %1417 = vmatpush1.bf16.msra.mxu0 %v17411_v18  ;;  %1458 = vmatpush1.bf16.msra.mxu1 %v17421_v23 }
 0x274   : > { %1577 = vmatprep.subr.bf16.mxu0 %v19391_v53  ;;  %1618 = vmatprep.subr.bf16.mxu1 %v17385_v55 }
 0x276   : > { %1435 = vmatmul.mubr.bf16.vlgmr.msra.gmra.mrb[0].mxu0 %v1241_v22  ;;  %1476 = vmatmul.mubr.bf16.vlgmr.msra.gmra.mrb[0].mxu1 %v1241_v22  ;;  %v1731_v22 = vld [vmem:[%s19262_s13 + $0x2e0] sm:$0xff] }
 0x277   : > { %1578 = vmatpush1.bf16.msra.mxu0 %v19393_v54  ;;  %1609 = vmatprep.mubr.bf16.mxu0 %v18868_v13 }
 0x278   : > { %1579 = vmatprep.subr.bf16.mxu0 %v19398_v14  ;;  %1619 = vmatpush1.bf16.msra.mxu1 %v19406_v56 }
 0x279   : > { %1620 = vmatprep.subr.bf16.mxu1 %v17391_v59  ;;  %1650 = vmatprep.mubr.bf16.mxu1 %v18868_v13  ;;  %v1704_v59 = vld [vmem:[%s19262_s13 + $0x208] sm:$0xff] }
 0x27b   : > { %1580 = vmatpush1.bf16.msra.mxu0 %v19401_v15 }
 0x27c   : > { %1581 = vmatprep.subr.bf16.mxu0 %v19404_v16  ;;  %1621 = vmatpush1.bf16.msra.mxu1 %v17394_v60 }
 0x27d   : > { %1622 = vmatprep.subr.bf16.mxu1 %v17397_v63 }
 0x27f   : > { %1582 = vmatpush1.bf16.msra.mxu0 %v19409_v57  ;;  %v1703_v57 = vld [vmem:[%s19262_s13 + $0x200] sm:$0xff] }
 0x280   : > { %1583 = vmatprep.subr.bf16.mxu0 %v19412_v58  ;;  %1623 = vmatpush1.bf16.msra.mxu1 %v17400_v0  ;;  %v1707_v58 = vld [vmem:[%s19262_s13 + $0x220] sm:$0xff] }
 0x281   : > { %1624 = vmatprep.subr.bf16.mxu1 %v17403_v1  ;;  %v15432_v60 = vcombine.high %v1703_v57, %v1707_v58  ;;  %v1711_v1 = vld [vmem:[%s19262_s13 + $0x240] sm:$0xff] }
 0x283   : > { %1584 = vmatpush1.bf16.msra.mxu0 %v17387_v61  ;;  %v1708_v61 = vld [vmem:[%s19262_s13 + $0x228] sm:$0xff] }
 0x284   : > { %1585 = vmatprep.subr.bf16.mxu0 %v17389_v62  ;;  %1625 = vmatpush1.bf16.msra.mxu1 %v17406_v4  ;;  %v15431_v62 = vcombine.low %v1703_v57, %v1707_v58  ;;  %v15433_v63 = vcombine.low %v1704_v59, %v1708_v61  ;;  %v15434_v0 = vcombine.high %v1704_v59, %v1708_v61  ;;  %v1764_v57 = vld [vmem:[%s19262_s13 + $0x3e8] sm:$0xff]  ;;  %v19488_v58 = vld [vmem:[%s19262_s13 + $0x210] sm:$0xff] }
 0x285   : > { %1626 = vmatprep.subr.bf16.mxu1 %v17409_v5  ;;  %v1716_v5 = vld [vmem:[%s19262_s13 + $0x268] sm:$0xff]  ;;  %v19491_v59 = vld [vmem:[%s19262_s13 + $0x230] sm:$0xff] }
 0x287   : > { %1586 = vmatpush1.bf16.msra.mxu0 %v17393_v2  ;;  %v1715_v2 = vld [vmem:[%s19262_s13 + $0x260] sm:$0xff] }
 0x288   : > { %1587 = vmatprep.subr.bf16.mxu0 %v17395_v3  ;;  %1627 = vmatpush1.bf16.msra.mxu1 %v17412_v8  ;;  %v1712_v3 = vld [vmem:[%s19262_s13 + $0x248] sm:$0xff]  ;;  %v15440_v4 = vcombine.high %v1711_v1, %v1715_v2 }
 0x289   : > { %1628 = vmatprep.subr.bf16.mxu1 %v17413_v9  ;;  %v15442_v8 = vcombine.high %v1712_v3, %v1716_v5  ;;  %v1719_v9 = vld [vmem:[%s19262_s13 + $0x280] sm:$0xff] }
 0x28b   : > { %1588 = vmatpush1.bf16.msra.mxu0 %v17399_v6  ;;  %v15439_v6 = vcombine.low %v1711_v1, %v1715_v2 }
 0x28c   : > { %1589 = vmatprep.subr.bf16.mxu0 %v17401_v7  ;;  %1629 = vmatpush1.bf16.msra.mxu1 %v17415_v12  ;;  %v15441_v7 = vcombine.low %v1712_v3, %v1716_v5 }
 0x28d   : > { %1630 = vmatprep.subr.bf16.mxu1 %v17416_v17  ;;  %v1724_v17 = vld [vmem:[%s19262_s13 + $0x2a8] sm:$0xff] }
 0x28f   : > { %1590 = vmatpush1.bf16.msra.mxu0 %v17405_v10  ;;  %v1723_v10 = vld [vmem:[%s19262_s13 + $0x2a0] sm:$0xff] }
 0x290   : > { %1591 = vmatprep.subr.bf16.mxu0 %v17407_v11  ;;  %1631 = vmatpush1.bf16.msra.mxu1 %v17418_v20  ;;  %v1720_v11 = vld [vmem:[%s19262_s13 + $0x288] sm:$0xff]  ;;  %v15448_v12 = vcombine.high %v1719_v9, %v1723_v10 }
 0x291   : > { %1632 = vmatprep.subr.bf16.mxu1 %v17419_v21  ;;  %v15449_v19 = vcombine.low %v1720_v11, %v1724_v17  ;;  %v15450_v20 = vcombine.high %v1720_v11, %v1724_v17  ;;  %v1727_v21 = vld [vmem:[%s19262_s13 + $0x2c0] sm:$0xff] }
 0x293   : > { %1592 = vmatpush1.bf16.msra.mxu0 %v17411_v18  ;;  %v15447_v18 = vcombine.low %v1719_v9, %v1723_v10 }
 0x294   : > { %1633 = vmatpush1.bf16.msra.mxu1 %v17421_v23  ;;  %2090 = vmatprep.subr.bf16.mxu0 %v15432_v60  ;;  %v1728_v23 = vld [vmem:[%s19262_s13 + $0x2c8] sm:$0xff]  ;;  %v19494_v60 = vld [vmem:[%s19262_s13 + $0x218] sm:$0xff] }
 0x295   : > { %2131 = vmatprep.subr.bf16.mxu1 %v15434_v0 }
 0x349   : > { %v1436_v26 = vpop.f32.mrb[0].mxu0  ;;  %v1477_v35 = vpop.f32.mrb[0].mxu1 }
 0x34a   : > { %v1484_v27 = vadd.f32 %v1436_v26, %v19431_v24  ;;  %v1438_v28 = vpop.f32.mrb[1].mxu0  ;;  %v1479_v36 = vpop.f32.mrb[1].mxu1  ;;  %v1486_v37 = vadd.f32 %v1477_v35, %v19439_v34  ;;  %v15456_v26 = vcombine.high %v1727_v21, %v1731_v22 }
 0x34b   : > { %v1485_v29 = vadd.f32 %v1438_v28, %v19434_v25  ;;  %v1440_v30 = vpop.f32.mrb[2].mxu0  ;;  %v1481_v38 = vpop.f32.mrb[2].mxu1  ;;  %v1487_v42 = vadd.f32 %v1479_v36, %v19443_v40  ;;  %v15455_v28 = vcombine.low %v1727_v21, %v1731_v22  ;;  %v1740_v36 = vld [vmem:[%s19262_s13 + $0x328] sm:$0xff] }
 0x34c   : > { %v15425_v31 = vmul.f32 -1.442695, %v1484_v27  ;;  %v1441_v32 = vpop.f32.mrb[3].mxu0  ;;  %v1482_v39 = vpop.f32.mrb[3].mxu1  ;;  %v15427_v41 = vmul.f32 -1.442695, %v1486_v37 }
 0x34d   : > { %v15426_v33 = vmul.f32 -1.442695, %v1485_v29  ;;  %v1732_v27 = vld [vmem:[%s19262_s13 + $0x2e8] sm:$0xff]  ;;  %v1739_v32 = vld [vmem:[%s19262_s13 + $0x320] sm:$0xff] }
 0x34e   : > { %17422 = vpow2.f32 %v15425_v31  ;;  %v15457_v29 = vcombine.low %v1728_v23, %v1732_v27  ;;  %v15458_v30 = vcombine.high %v1728_v23, %v1732_v27  ;;  %v1735_v31 = vld [vmem:[%s19262_s13 + $0x300] sm:$0xff] }
 0x34f   : > { %17424 = vpow2.f32 %v15426_v33  ;;  %v1736_v33 = vld [vmem:[%s19262_s13 + $0x308] sm:$0xff]  ;;  %v15464_v35 = vcombine.high %v1735_v31, %v1739_v32  ;;  %v15463_v37 = vcombine.low %v1735_v31, %v1739_v32 }
 0x350   : > { %17426 = vpow2.f32 %v15427_v41  ;;  %v15465_v38 = vcombine.low %v1736_v33, %v1740_v36  ;;  %v15466_v39 = vcombine.high %v1736_v33, %v1740_v36  ;;  %v1743_v41 = vld [vmem:[%s19262_s13 + $0x340] sm:$0xff] }
 0x351   : > { %17428 = vtanh.f32 %v1487_v42  ;;  %v1747_v42 = vld [vmem:[%s19262_s13 + $0x360] sm:$0xff] }
 0x358   : > { %v17423_v43 = vpop.eup %17422 }
 0x359   : > { %v17425_v44 = vpop.eup %17424  ;;  %v1497_v45 = vadd.f32 1.0, %v17423_v43  ;;  %v1744_v43 = vld [vmem:[%s19262_s13 + $0x348] sm:$0xff] }
 0x35a   : > { %v1498_v46 = vadd.f32 1.0, %v17425_v44  ;;  %v17427_v47 = vpop.eup %17426  ;;  %v15471_v44 = vcombine.low %v1743_v41, %v1747_v42 }
 0x35b   : > { %17430 = vrcp.f32 %v1497_v45  ;;  %v17429_v48 = vpop.eup %17428  ;;  %v1499_v51 = vadd.f32 1.0, %v17427_v47  ;;  %v15472_v45 = vcombine.high %v1743_v41, %v1747_v42  ;;  %v1751_v47 = vld [vmem:[%s19262_s13 + $0x380] sm:$0xff] }
 0x35c   : > { %17432 = vrcp.f32 %v1498_v46  ;;  %v1748_v46 = vld [vmem:[%s19262_s13 + $0x368] sm:$0xff] }
 0x35d   : > { %17434 = vrcp.f32 %v1499_v51 }
 0x365   : > { %v17431_v50 = vpop.eup %17430 }
 0x366   : > { %v17433_v52 = vpop.eup %17432  ;;  %v1508_v53 = vmul.f32 %v17431_v50, %v17429_v48  ;;  %v1755_v48 = vld [vmem:[%s19262_s13 + $0x3a0] sm:$0xff]  ;;  %v15474_v50 = vcombine.high %v1744_v43, %v1748_v46 }
 0x367   : > { %v1507_v54 = vmul.f32 %v17433_v52, %v1240_v49  ;;  %v17435_v15 = vpop.eup %17434  ;;  %v15473_v49 = vcombine.low %v1744_v43, %v1748_v46  ;;  %v15480_v51 = vcombine.high %v1751_v47, %v1755_v48  ;;  %v1752_v52 = vld [vmem:[%s19262_s13 + $0x388] sm:$0xff]  ;;  %v15479_v61 = vcombine.low %v1751_v47, %v1755_v48  ;;  %v1713_v47 = vld [vmem:[%s19262_s13 + $0x250] sm:$0xff] }
 0x368   : > { %v1717_v48 = vld [vmem:[%s19262_s13 + $0x270] sm:$0xff] }
 0x369   : > { %v19446_v14 = vadd.f32 %v1508_v53, %v1507_v54  ;;  %v1756_v53 = vld [vmem:[%s19262_s13 + $0x3a8] sm:$0xff]  ;;  %v1759_v54 = vld [vmem:[%s19262_s13 + $0x3c0] sm:$0xff] }
 0x36a   : > { %v15481_v0 = vcombine.low %v1752_v52, %v1756_v53 }
 0x36b   : > { %17436 = vtanh.f32 %v19446_v14 }
 0x375   : > { %v17437_v16 = vpop.eup %17436 }
 0x376   : > { %v1511_v55 = vmul.f32 %v17437_v16, %v17435_v15  ;;  %v15482_v15 = vcombine.high %v1752_v52, %v1756_v53  ;;  %v1763_v16 = vld [vmem:[%s19262_s13 + $0x3e0] sm:$0xff]  ;;  %v15444_v52 = vcombine.high %v1713_v47, %v1717_v48 }
 0x377   : > { %v15488_v1 = vcombine.high %v1759_v54, %v1763_v16 }
 0x378   : > { %v19449_v56 = vpack.c.bf16 %v1511_v55, %v1511_v55  ;;  %v1760_v55 = vld [vmem:[%s19262_s13 + $0x3c8] sm:$0xff] }
 0x379   : > { %v15490_v3 = vcombine.high %v1760_v55, %v1764_v57  ;;  %v15489_v5 = vcombine.low %v1760_v55, %v1764_v57  ;;  %v1726_v55 = vld [vmem:[%s19262_s13 + $0x2b8] sm:$0xff]  ;;  %v15443_v57 = vcombine.low %v1713_v47, %v1717_v48 }
 0x37a   : > { %1610 = vmatmul.mubr.bf16.vlgmr.msra.gmra.mrb[4].mxu0 %v19449_v56  ;;  %1651 = vmatmul.mubr.bf16.vlgmr.msra.gmra.mrb[4].mxu1 %v19449_v56 }
 0x37b   : > { %2122 = vmatprep.mubr.bf16.mxu0 %v18868_v13  ;;  %2163 = vmatprep.mubr.bf16.mxu1 %v18868_v13 }
 0x37c   : > { %2091 = vmatpush1.bf16.msra.mxu0 %v15431_v62  ;;  %2132 = vmatpush1.bf16.msra.mxu1 %v15433_v63  ;;  %v15435_v62 = vcombine.low %v19488_v58, %v19491_v59  ;;  %v19499_v63 = vld [vmem:[%s19262_s13 + $0x238] sm:$0xff] }
 0x37d   : > { %2092 = vmatprep.subr.bf16.mxu0 %v15440_v4  ;;  %2133 = vmatprep.subr.bf16.mxu1 %v15442_v8  ;;  %v15437_v2 = vcombine.low %v19494_v60, %v19499_v63  ;;  %v15487_v4 = vcombine.low %v1759_v54, %v1763_v16  ;;  %v1721_v54 = vld [vmem:[%s19262_s13 + $0x290] sm:$0xff]  ;;  %v1722_v16 = vld [vmem:[%s19262_s13 + $0x298] sm:$0xff] }
 0x380   : > { %2093 = vmatpush1.bf16.msra.mxu0 %v15439_v6  ;;  %2134 = vmatpush1.bf16.msra.mxu1 %v15441_v7  ;;  %v15436_v6 = vcombine.high %v19488_v58, %v19491_v59  ;;  %v15438_v7 = vcombine.high %v19494_v60, %v19499_v63  ;;  %v15453_v59 = vcombine.low %v1722_v16, %v1726_v55  ;;  %v1737_v63 = vld [vmem:[%s19262_s13 + $0x310] sm:$0xff] }
 0x381   : > { %2094 = vmatprep.subr.bf16.mxu0 %v15448_v12  ;;  %2135 = vmatprep.subr.bf16.mxu1 %v15450_v20 }
 0x384   : > { %2095 = vmatpush1.bf16.msra.mxu0 %v15447_v18  ;;  %2136 = vmatpush1.bf16.msra.mxu1 %v15449_v19 }
 0x385   : > { %2096 = vmatprep.subr.bf16.mxu0 %v15456_v26  ;;  %2137 = vmatprep.subr.bf16.mxu1 %v15458_v30 }
 0x388   : > { %2097 = vmatpush1.bf16.msra.mxu0 %v15455_v28  ;;  %2138 = vmatpush1.bf16.msra.mxu1 %v15457_v29 }
 0x389   : > { %2098 = vmatprep.subr.bf16.mxu0 %v15464_v35  ;;  %2139 = vmatprep.subr.bf16.mxu1 %v15466_v39 }
 0x38c   : > { %2099 = vmatpush1.bf16.msra.mxu0 %v15463_v37  ;;  %2140 = vmatpush1.bf16.msra.mxu1 %v15465_v38 }
 0x38d   : > { %2100 = vmatprep.subr.bf16.mxu0 %v15472_v45  ;;  %2141 = vmatprep.subr.bf16.mxu1 %v15474_v50 }
 0x390   : > { %2101 = vmatpush1.bf16.msra.mxu0 %v15471_v44  ;;  %2142 = vmatpush1.bf16.msra.mxu1 %v15473_v49  ;;  %v1714_v49 = vld [vmem:[%s19262_s13 + $0x258] sm:$0xff] }
 0x391   : > { %2102 = vmatprep.subr.bf16.mxu0 %v15480_v51  ;;  %2143 = vmatprep.subr.bf16.mxu1 %v15482_v15  ;;  %v1725_v15 = vld [vmem:[%s19262_s13 + $0x2b0] sm:$0xff] }
 0x392   : > { %v15451_v58 = vcombine.low %v1721_v54, %v1725_v15 }
 0x394   : > { %2103 = vmatpush1.bf16.msra.mxu0 %v15479_v61  ;;  %2144 = vmatpush1.bf16.msra.mxu1 %v15481_v0  ;;  %v15452_v0 = vcombine.high %v1721_v54, %v1725_v15 }
 0x395   : > { %2104 = vmatprep.subr.bf16.mxu0 %v15488_v1  ;;  %2145 = vmatprep.subr.bf16.mxu1 %v15490_v3  ;;  %v15454_v1 = vcombine.high %v1722_v16, %v1726_v55  ;;  %v1729_v3 = vld [vmem:[%s19262_s13 + $0x2d0] sm:$0xff] }
 0x398   : > { %2105 = vmatpush1.bf16.msra.mxu0 %v15487_v4  ;;  %2146 = vmatpush1.bf16.msra.mxu1 %v15489_v5  ;;  %v1733_v4 = vld [vmem:[%s19262_s13 + $0x2f0] sm:$0xff]  ;;  %v1730_v5 = vld [vmem:[%s19262_s13 + $0x2d8] sm:$0xff] }
 0x399   : > { %2172 = vmatprep.subr.bf16.mxu0 %v15436_v6  ;;  %2213 = vmatprep.subr.bf16.mxu1 %v15438_v7  ;;  %v1734_v6 = vld [vmem:[%s19262_s13 + $0x2f8] sm:$0xff]  ;;  %v15460_v60 = vcombine.high %v1729_v3, %v1733_v4 }
 0x39a   : > { %v1738_v7 = vld [vmem:[%s19262_s13 + $0x318] sm:$0xff] }
 0x44d   : > { %v1611_v8 = vpop.f32.mrb[4].mxu0  ;;  %v1652_v9 = vpop.f32.mrb[4].mxu1 }
 0x44e   : > { %v1663_v10 = vrot.slane %v1611_v8, 6  ;;  %v1613_v11 = vpop.f32.mrb[5].mxu0  ;;  %v1654_v12 = vpop.f32.mrb[5].mxu1  ;;  %v1665_v28 = vrot.slane %v1652_v9, 6  ;;  %v1742_v8 = vld [vmem:[%s19262_s13 + $0x338] sm:$0xff]  ;;  %v15459_v9 = vcombine.low %v1729_v3, %v1733_v4 }
 0x44f   : > { %v1664_v17 = vrot.slane %v1613_v11, 6  ;;  %v1615_v18 = vpop.f32.mrb[6].mxu0  ;;  %v1656_v19 = vpop.f32.mrb[6].mxu1  ;;  %v1666_v29 = vrot.slane %v1654_v12, 6  ;;  %v15470_v12 = vcombine.high %v1738_v7, %v1742_v8 }
 0x450   : > { %v1671_v20 = vadd.f32 %v1663_v10, %v19431_v24  ;;  %v1616_v21 = vpop.f32.mrb[7].mxu0  ;;  %v1657_v22 = vpop.f32.mrb[7].mxu1  ;;  %v1673_v30 = vadd.f32 %v1665_v28, %v19439_v34  ;;  %v1695_v34 = vrot.slane %v19446_v14, 6  ;;  %v1718_v14 = vld [vmem:[%s19262_s13 + $0x278] sm:$0xff]  ;;  %v15461_v10 = vcombine.low %v1730_v5, %v1734_v6  ;;  %v1749_v18 = vld [vmem:[%s19262_s13 + $0x370] sm:$0xff] }
 0x451   : > { %v1672_v23 = vadd.f32 %v1664_v17, %v19434_v25  ;;  %v1674_v31 = vadd.f32 %v1666_v29, %v19443_v40  ;;  %v15446_v53 = vcombine.high %v1714_v49, %v1718_v14  ;;  %v15445_v61 = vcombine.low %v1714_v49, %v1718_v14  ;;  %v1745_v17 = vld [vmem:[%s19262_s13 + $0x350] sm:$0xff]  ;;  %v1746_v19 = vld [vmem:[%s19262_s13 + $0x358] sm:$0xff]  ;;  %v1521_v14 = vld [vmem:[%s19262_s13 + $0x40] sm:$0xff] }
 0x452   : > { %v15428_v26 = vmul.f32 -1.442695, %v1671_v20  ;;  %v15430_v32 = vmul.f32 -1.442695, %v1673_v30  ;;  %v1750_v20 = vld [vmem:[%s19262_s13 + $0x378] sm:$0xff]  ;;  %v15469_v22 = vcombine.low %v1738_v7, %v1742_v8  ;;  %v1757_v28 = vld [vmem:[%s19262_s13 + $0x3b0] sm:$0xff] }
 0x453   : > { %v15429_v27 = vmul.f32 -1.442695, %v1672_v23  ;;  %v15476_v23 = vcombine.high %v1745_v17, %v1749_v18  ;;  %v1754_v29 = vld [vmem:[%s19262_s13 + $0x398] sm:$0xff] }
 0x454   : > { %17438 = vpow2.f32 %v15428_v26  ;;  %v15478_v26 = vcombine.high %v1746_v19, %v1750_v20  ;;  %v1758_v30 = vld [vmem:[%s19262_s13 + $0x3b8] sm:$0xff] }
 0x455   : > { %17440 = vpow2.f32 %v15429_v27  ;;  %v1753_v27 = vld [vmem:[%s19262_s13 + $0x390] sm:$0xff] }
 0x456   : > { %17442 = vtanh.f32 %v1674_v31  ;;  %v15475_v31 = vcombine.low %v1745_v17, %v1749_v18 }
 0x457   : > { %17444 = vpow2.f32 %v15430_v32  ;;  %v15477_v32 = vcombine.low %v1746_v19, %v1750_v20 }
 0x45e   : > { %v17439_v33 = vpop.eup %17438 }
 0x45f   : > { %v1684_v35 = vadd.f32 1.0, %v17439_v33  ;;  %v17441_v36 = vpop.eup %17440  ;;  %v15484_v33 = vcombine.high %v1753_v27, %v1757_v28 }
 0x460   : > { %v1685_v24 = vadd.f32 1.0, %v17441_v36  ;;  %v17443_v25 = vpop.eup %17442  ;;  %v1761_v36 = vld [vmem:[%s19262_s13 + $0x3d0] sm:$0xff] }
 0x461   : > { %17446 = vrcp.f32 %v1684_v35  ;;  %v17445_v37 = vpop.eup %17444  ;;  %v15486_v35 = vcombine.high %v1754_v29, %v1758_v30 }
 0x462   : > { %17448 = vrcp.f32 %v1685_v24  ;;  %v1686_v41 = vadd.f32 1.0, %v17445_v37  ;;  %v1765_v24 = vld [vmem:[%s19262_s13 + $0x3f0] sm:$0xff]  ;;  %v1766_v37 = vld [vmem:[%s19262_s13 + $0x3f8] sm:$0xff] }
 0x464   : > { %17450 = vrcp.f32 %v1686_v41  ;;  %v1513_v41 = vld [vmem:[%s19262_s13] sm:$0xff] }
 0x46b   : > { %v17447_v38 = vpop.eup %17446 }
 0x46c   : > { %v1698_v39 = vmul.f32 %v17447_v38, %v17443_v25  ;;  %v17449_v40 = vpop.eup %17448  ;;  %v1762_v25 = vld [vmem:[%s19262_s13 + $0x3d8] sm:$0xff]  ;;  %v15483_v38 = vcombine.low %v1753_v27, %v1757_v28 }
 0x46d   : > { %v1697_v42 = vmul.f32 %v17449_v40, %v1695_v34  ;;  %v15485_v34 = vcombine.low %v1754_v29, %v1758_v30  ;;  %v15494_v40 = vcombine.high %v1762_v25, %v1766_v37  ;;  %v15493_v47 = vcombine.low %v1762_v25, %v1766_v37 }
 0x46e   : > { %v17451_v44 = vpop.eup %17450 }
 0x46f   : > { %v19512_v43 = vadd.f32 %v1698_v39, %v1697_v42  ;;  %v15492_v39 = vcombine.high %v1761_v36, %v1765_v24  ;;  %v1517_v42 = vld [vmem:[%s19262_s13 + $0x20] sm:$0xff] }
 0x470   : > { %v15496_v48 = vcombine.high %v1513_v41, %v1517_v42  ;;  %v15495_v54 = vcombine.low %v1513_v41, %v1517_v42 }
 0x471   : > { %17452 = vtanh.f32 %v19512_v43 }
 0x47b   : > { %v17453_v45 = vpop.eup %17452 }
 0x47c   : > { %v1701_v46 = vmul.f32 %v17453_v45, %v17451_v44  ;;  %v1514_v44 = vld [vmem:[%s19262_s13 + $0x8] sm:$0xff] }
 0x47d   : > { %v1518_v45 = vld [vmem:[%s19262_s13 + $0x28] sm:$0xff] }
 0x47e   : > { %v1702_v50 = vpack.c.bf16 %v1701_v46, %v1701_v46  ;;  %v15491_v46 = vcombine.low %v1761_v36, %v1765_v24  ;;  %v15498_v49 = vcombine.high %v1514_v44, %v1518_v45  ;;  %v15497_v15 = vcombine.low %v1514_v44, %v1518_v45 }
 0x480   : > { %v19519_v51 = vrot.slane %v1702_v50, 1  ;;  %v1525_v50 = vld [vmem:[%s19262_s13 + $0x60] sm:$0xff] }
 0x481   : > { %v15504_v16 = vcombine.high %v1521_v14, %v1525_v50  ;;  %v15503_v3 = vcombine.low %v1521_v14, %v1525_v50 }
 0x482   : > { %2123 = vmatmul.mubr.bf16.vlgmr.msra.gmra.mrb[8].mxu0 %v19519_v51  ;;  %2164 = vmatmul.mubr.bf16.vlgmr.msra.gmra.mrb[8].mxu1 %v19519_v51 }
 0x483   : > { %2173 = vmatpush1.bf16.msra.mxu0 %v15435_v62  ;;  %2214 = vmatpush1.bf16.msra.mxu1 %v15437_v2  ;;  %v15462_v62 = vcombine.high %v1730_v5, %v1734_v6  ;;  %v1741_v2 = vld [vmem:[%s19262_s13 + $0x330] sm:$0xff] }
 0x484   : > { %2174 = vmatprep.subr.bf16.mxu0 %v15444_v52  ;;  %2215 = vmatprep.subr.bf16.mxu1 %v15446_v53  ;;  %v15468_v11 = vcombine.high %v1737_v63, %v1741_v2  ;;  %v15467_v21 = vcombine.low %v1737_v63, %v1741_v2  ;;  %v1522_v52 = vld [vmem:[%s19262_s13 + $0x48] sm:$0xff] }
 0x485   : > { %2204 = vmatprep.mubr.bf16.mxu0 %v18868_v13  ;;  %2245 = vmatprep.mubr.bf16.mxu1 %v18868_v13  ;;  %v1526_v53 = vld [vmem:[%s19262_s13 + $0x68] sm:$0xff] }
 0x486   : > { %v15506_v55 = vcombine.high %v1522_v52, %v1526_v53  ;;  %v15505_v4 = vcombine.low %v1522_v52, %v1526_v53 }
 0x487   : > { %2175 = vmatpush1.bf16.msra.mxu0 %v15443_v57  ;;  %2216 = vmatpush1.bf16.msra.mxu1 %v15445_v61  ;;  %v1529_v57 = vld [vmem:[%s19262_s13 + $0x80] sm:$0xff] }
 0x488   : > { %2176 = vmatprep.subr.bf16.mxu0 %v15452_v0  ;;  %2217 = vmatprep.subr.bf16.mxu1 %v15454_v1  ;;  %v1533_v61 = vld [vmem:[%s19262_s13 + $0xa0] sm:$0xff]  ;;  %v1530_v0 = vld [vmem:[%s19262_s13 + $0x88] sm:$0xff] }
 0x489   : > { %v1534_v1 = vld [vmem:[%s19262_s13 + $0xa8] sm:$0xff]  ;;  %v15512_v5 = vcombine.high %v1529_v57, %v1533_v61  ;;  %v15511_v63 = vcombine.low %v1529_v57, %v1533_v61 }
 0x48a   : > { %v15514_v6 = vcombine.high %v1530_v0, %v1534_v1  ;;  %v15513_v2 = vcombine.low %v1530_v0, %v1534_v1 }
 0x48b   : > { %2177 = vmatpush1.bf16.msra.mxu0 %v15451_v58  ;;  %2218 = vmatpush1.bf16.msra.mxu1 %v15453_v59  ;;  %v1537_v58 = vld [vmem:[%s19262_s13 + $0xc0] sm:$0xff] }
 0x48c   : > { %2178 = vmatprep.subr.bf16.mxu0 %v15460_v60  ;;  %2219 = vmatprep.subr.bf16.mxu1 %v15462_v62  ;;  %v1541_v59 = vld [vmem:[%s19262_s13 + $0xe0] sm:$0xff]  ;;  %v1538_v60 = vld [vmem:[%s19262_s13 + $0xc8] sm:$0xff] }
 0x48d   : > { %v1542_v62 = vld [vmem:[%s19262_s13 + $0xe8] sm:$0xff]  ;;  %v15520_v7 = vcombine.high %v1537_v58, %v1541_v59  ;;  %v15519_v17 = vcombine.low %v1537_v58, %v1541_v59 }
 0x48e   : > { %v15522_v8 = vcombine.high %v1538_v60, %v1542_v62  ;;  %v15521_v18 = vcombine.low %v1538_v60, %v1542_v62 }
 0x48f   : > { %2179 = vmatpush1.bf16.msra.mxu0 %v15459_v9  ;;  %2220 = vmatpush1.bf16.msra.mxu1 %v15461_v10  ;;  %v1545_v9 = vld [vmem:[%s19262_s13 + $0x100] sm:$0xff] }
 0x490   : > { %2180 = vmatprep.subr.bf16.mxu0 %v15468_v11  ;;  %2221 = vmatprep.subr.bf16.mxu1 %v15470_v12  ;;  %v1549_v10 = vld [vmem:[%s19262_s13 + $0x120] sm:$0xff]  ;;  %v1546_v11 = vld [vmem:[%s19262_s13 + $0x108] sm:$0xff] }
 0x491   : > { %v1550_v12 = vld [vmem:[%s19262_s13 + $0x128] sm:$0xff]  ;;  %v15528_v19 = vcombine.high %v1545_v9, %v1549_v10  ;;  %v15527_v27 = vcombine.low %v1545_v9, %v1549_v10 }
 0x492   : > { %v15530_v20 = vcombine.high %v1546_v11, %v1550_v12  ;;  %v15529_v28 = vcombine.low %v1546_v11, %v1550_v12 }
 0x493   : > { %2181 = vmatpush1.bf16.msra.mxu0 %v15467_v21  ;;  %2222 = vmatpush1.bf16.msra.mxu1 %v15469_v22  ;;  %v1553_v21 = vld [vmem:[%s19262_s13 + $0x140] sm:$0xff] }
 0x494   : > { %2182 = vmatprep.subr.bf16.mxu0 %v15476_v23  ;;  %2223 = vmatprep.subr.bf16.mxu1 %v15478_v26  ;;  %v1557_v22 = vld [vmem:[%s19262_s13 + $0x160] sm:$0xff]  ;;  %v1554_v23 = vld [vmem:[%s19262_s13 + $0x148] sm:$0xff] }
 0x495   : > { %v1558_v26 = vld [vmem:[%s19262_s13 + $0x168] sm:$0xff]  ;;  %v15536_v29 = vcombine.high %v1553_v21, %v1557_v22  ;;  %v15535_v36 = vcombine.low %v1553_v21, %v1557_v22 }
 0x496   : > { %v15538_v30 = vcombine.high %v1554_v23, %v1558_v26  ;;  %v15537_v24 = vcombine.low %v1554_v23, %v1558_v26 }
 0x497   : > { %2183 = vmatpush1.bf16.msra.mxu0 %v15475_v31  ;;  %2224 = vmatpush1.bf16.msra.mxu1 %v15477_v32  ;;  %v1561_v31 = vld [vmem:[%s19262_s13 + $0x180] sm:$0xff] }
 0x498   : > { %2184 = vmatprep.subr.bf16.mxu0 %v15484_v33  ;;  %2225 = vmatprep.subr.bf16.mxu1 %v15486_v35  ;;  %v1565_v32 = vld [vmem:[%s19262_s13 + $0x1a0] sm:$0xff]  ;;  %v1562_v33 = vld [vmem:[%s19262_s13 + $0x188] sm:$0xff] }
 0x499   : > { %v1566_v35 = vld [vmem:[%s19262_s13 + $0x1a8] sm:$0xff]  ;;  %v15544_v25 = vcombine.high %v1561_v31, %v1565_v32  ;;  %v15543_v41 = vcombine.low %v1561_v31, %v1565_v32 }
 0x49a   : > { %v15546_v37 = vcombine.high %v1562_v33, %v1566_v35  ;;  %v15545_v42 = vcombine.low %v1562_v33, %v1566_v35 }
 0x49b   : > { %2185 = vmatpush1.bf16.msra.mxu0 %v15483_v38  ;;  %2226 = vmatpush1.bf16.msra.mxu1 %v15485_v34  ;;  %v1569_v38 = vld [vmem:[%s19262_s13 + $0x1c0] sm:$0xff] }
 0x49c   : > { %2186 = vmatprep.subr.bf16.mxu0 %v15492_v39  ;;  %2227 = vmatprep.subr.bf16.mxu1 %v15494_v40  ;;  %v1573_v34 = vld [vmem:[%s19262_s13 + $0x1e0] sm:$0xff]  ;;  %v1570_v39 = vld [vmem:[%s19262_s13 + $0x1c8] sm:$0xff] }
 0x49d   : > { %v1574_v40 = vld [vmem:[%s19262_s13 + $0x1e8] sm:$0xff]  ;;  %v15552_v44 = vcombine.high %v1569_v38, %v1573_v34  ;;  %v15551_v14 = vcombine.low %v1569_v38, %v1573_v34 }
 0x49e   : > { %v15554_v45 = vcombine.high %v1570_v39, %v1574_v40  ;;  %v15553_v50 = vcombine.low %v1570_v39, %v1574_v40 }
 0x49f   : > { %2187 = vmatpush1.bf16.msra.mxu0 %v15491_v46  ;;  %2228 = vmatpush1.bf16.msra.mxu1 %v15493_v47  ;;  %v1515_v46 = vld [vmem:[%s19262_s13 + $0x10] sm:$0xff] }
 0x4a0   : > { %2574 = vmatprep.subr.bf16.mxu0 %v15496_v48  ;;  %2615 = vmatprep.subr.bf16.mxu1 %v15498_v49  ;;  %v1519_v47 = vld [vmem:[%s19262_s13 + $0x30] sm:$0xff]  ;;  %v1516_v48 = vld [vmem:[%s19262_s13 + $0x18] sm:$0xff] }
 0x4a1   : > { %v1520_v49 = vld [vmem:[%s19262_s13 + $0x38] sm:$0xff]  ;;  %v15500_v52 = vcombine.high %v1515_v46, %v1519_v47  ;;  %v15499_v57 = vcombine.low %v1515_v46, %v1519_v47 }
 0x4a2   : > { %2205 = vmatmul.mubr.bf16.vlgmr.msra.gmra.mrb[12].mxu0 %v19519_v51  ;;  %2246 = vmatmul.mubr.bf16.vlgmr.msra.gmra.mrb[12].mxu1 %v19519_v51  ;;  %v15502_v53 = vcombine.high %v1516_v48, %v1520_v49  ;;  %v15501_v61 = vcombine.low %v1516_v48, %v1520_v49 }
 0x4a3   : > { %2575 = vmatpush1.bf16.msra.mxu0 %v15495_v54  ;;  %2616 = vmatpush1.bf16.msra.mxu1 %v15497_v15  ;;  %v1523_v54 = vld [vmem:[%s19262_s13 + $0x50] sm:$0xff] }
 0x4a4   : > { %2576 = vmatprep.subr.bf16.mxu0 %v15504_v16  ;;  %2617 = vmatprep.subr.bf16.mxu1 %v15506_v55  ;;  %v1527_v15 = vld [vmem:[%s19262_s13 + $0x70] sm:$0xff]  ;;  %v1524_v16 = vld [vmem:[%s19262_s13 + $0x58] sm:$0xff] }
 0x4a5   : > { %2606 = vmatprep.mubr.bf16.mxu0 %v18868_v13  ;;  %2647 = vmatprep.mubr.bf16.mxu1 %v18868_v13  ;;  %v1528_v55 = vld [vmem:[%s19262_s13 + $0x78] sm:$0xff]  ;;  %v15508_v0 = vcombine.high %v1523_v54, %v1527_v15  ;;  %v15507_v58 = vcombine.low %v1523_v54, %v1527_v15  ;;  %v19638_v15 = vld [vmem:[#allocation9 + $0x8] ss:$16 sps:$4 sm:$0xff]  }
 0x4a6   : > { %v15510_v1 = vcombine.high %v1524_v16, %v1528_v55  ;;  %v15509_v59 = vcombine.low %v1524_v16, %v1528_v55  ;;  %v19635_v54 = vld [vmem:[#allocation9] ss:$16 sps:$4 sm:$0xff]   ;;  %v19641_v16 = vld [vmem:[#allocation9 + $0x24] ss:$16 sps:$4 sm:$0xff]   ;;  %v19644_v55 = vld [vmem:[#allocation9 + $0x2c] ss:$16 sps:$4 sm:$0xff]  }
 0x4a7   : > { %2577 = vmatpush1.bf16.msra.mxu0 %v15503_v3  ;;  %2618 = vmatpush1.bf16.msra.mxu1 %v15505_v4  ;;  %v1531_v3 = vld [vmem:[%s19262_s13 + $0x90] sm:$0xff] }
 0x4a8   : > { %2578 = vmatprep.subr.bf16.mxu0 %v15512_v5  ;;  %2619 = vmatprep.subr.bf16.mxu1 %v15514_v6  ;;  %v1535_v4 = vld [vmem:[%s19262_s13 + $0xb0] sm:$0xff]  ;;  %v1532_v5 = vld [vmem:[%s19262_s13 + $0x98] sm:$0xff] }
 0x4a9   : > { %v1536_v6 = vld [vmem:[%s19262_s13 + $0xb8] sm:$0xff]  ;;  %v15516_v60 = vcombine.high %v1531_v3, %v1535_v4  ;;  %v15515_v9 = vcombine.low %v1531_v3, %v1535_v4  ;;  %v19664_v3 = vld [vmem:[#allocation9 + $0x48] ss:$16 sps:$4 sm:$0xff]   ;;  %v19667_v4 = vld [vmem:[#allocation9 + $0x64] ss:$16 sps:$4 sm:$0xff]  }
 0x4aa   : > { %v15518_v62 = vcombine.high %v1532_v5, %v1536_v6  ;;  %v15517_v10 = vcombine.low %v1532_v5, %v1536_v6  ;;  %v19670_v5 = vld [vmem:[#allocation9 + $0x6c] ss:$16 sps:$4 sm:$0xff]   ;;  %v19673_v6 = vld [vmem:[#allocation9 + $0x60] ss:$16 sps:$4 sm:$0xff]  }
 0x4ab   : > { %2579 = vmatpush1.bf16.msra.mxu0 %v15511_v63  ;;  %2620 = vmatpush1.bf16.msra.mxu1 %v15513_v2  ;;  %v1539_v63 = vld [vmem:[%s19262_s13 + $0xd0] sm:$0xff] }
 0x4ac   : > { %2580 = vmatprep.subr.bf16.mxu0 %v15520_v7  ;;  %2621 = vmatprep.subr.bf16.mxu1 %v15522_v8  ;;  %v1543_v2 = vld [vmem:[%s19262_s13 + $0xf0] sm:$0xff]  ;;  %v1540_v7 = vld [vmem:[%s19262_s13 + $0xd8] sm:$0xff] }
 0x4ad   : > { %v1544_v8 = vld [vmem:[%s19262_s13 + $0xf8] sm:$0xff]  ;;  %v15524_v11 = vcombine.high %v1539_v63, %v1543_v2  ;;  %v15523_v21 = vcombine.low %v1539_v63, %v1543_v2  ;;  %v19688_v63 = vld [vmem:[#allocation9 + $0x88] ss:$16 sps:$4 sm:$0xff]   ;;  %v19691_v2 = vld [vmem:[#allocation9 + $0xa4] ss:$16 sps:$4 sm:$0xff]  }
 0x4ae   : > { %v15526_v12 = vcombine.high %v1540_v7, %v1544_v8  ;;  %v15525_v22 = vcombine.low %v1540_v7, %v1544_v8  ;;  %v19694_v7 = vld [vmem:[#allocation9 + $0xac] ss:$16 sps:$4 sm:$0xff]   ;;  %v19697_v8 = vld [vmem:[#allocation9 + $0xa0] ss:$16 sps:$4 sm:$0xff]  }
 0x4af   : > { %2581 = vmatpush1.bf16.msra.mxu0 %v15519_v17  ;;  %2622 = vmatpush1.bf16.msra.mxu1 %v15521_v18  ;;  %v1547_v17 = vld [vmem:[%s19262_s13 + $0x110] sm:$0xff] }
 0x4b0   : > { %2582 = vmatprep.subr.bf16.mxu0 %v15528_v19  ;;  %2623 = vmatprep.subr.bf16.mxu1 %v15530_v20  ;;  %v1551_v18 = vld [vmem:[%s19262_s13 + $0x130] sm:$0xff]  ;;  %v1548_v19 = vld [vmem:[%s19262_s13 + $0x118] sm:$0xff] }
 0x4b1   : > { %v1552_v20 = vld [vmem:[%s19262_s13 + $0x138] sm:$0xff]  ;;  %v15532_v23 = vcombine.high %v1547_v17, %v1551_v18  ;;  %v15531_v31 = vcombine.low %v1547_v17, %v1551_v18  ;;  %v19712_v17 = vld [vmem:[#allocation9 + $0xc8] ss:$16 sps:$4 sm:$0xff]   ;;  %v19715_v18 = vld [vmem:[#allocation9 + $0xe4] ss:$16 sps:$4 sm:$0xff]  }
 0x4b2   : > { %v15534_v26 = vcombine.high %v1548_v19, %v1552_v20  ;;  %v15533_v32 = vcombine.low %v1548_v19, %v1552_v20  ;;  %v19718_v19 = vld [vmem:[#allocation9 + $0xec] ss:$16 sps:$4 sm:$0xff]   ;;  %v19721_v20 = vld [vmem:[#allocation9 + $0xe0] ss:$16 sps:$4 sm:$0xff]  }
 0x4b3   : > { %2583 = vmatpush1.bf16.msra.mxu0 %v15527_v27  ;;  %2624 = vmatpush1.bf16.msra.mxu1 %v15529_v28  ;;  %v1555_v27 = vld [vmem:[%s19262_s13 + $0x150] sm:$0xff] }
 0x4b4   : > { %2584 = vmatprep.subr.bf16.mxu0 %v15536_v29  ;;  %2625 = vmatprep.subr.bf16.mxu1 %v15538_v30  ;;  %v1559_v28 = vld [vmem:[%s19262_s13 + $0x170] sm:$0xff]  ;;  %v1556_v29 = vld [vmem:[%s19262_s13 + $0x158] sm:$0xff] }
 0x4b5   : > { %v1560_v30 = vld [vmem:[%s19262_s13 + $0x178] sm:$0xff]  ;;  %v15540_v33 = vcombine.high %v1555_v27, %v1559_v28  ;;  %v15539_v38 = vcombine.low %v1555_v27, %v1559_v28  ;;  %v2869_v28 = vld [vmem:[%s19262_s13 + $0x428] sm:$0xff] }
 0x4b6   : > { %v15542_v35 = vcombine.high %v1556_v29, %v1560_v30  ;;  %v15541_v34 = vcombine.low %v1556_v29, %v1560_v30 }
 0x4b7   : > { %2585 = vmatpush1.bf16.msra.mxu0 %v15535_v36  ;;  %2626 = vmatpush1.bf16.msra.mxu1 %v15537_v24  ;;  %v1563_v36 = vld [vmem:[%s19262_s13 + $0x190] sm:$0xff] }
 0x4b8   : > { %2586 = vmatprep.subr.bf16.mxu0 %v15544_v25  ;;  %2627 = vmatprep.subr.bf16.mxu1 %v15546_v37  ;;  %v1567_v24 = vld [vmem:[%s19262_s13 + $0x1b0] sm:$0xff]  ;;  %v1564_v25 = vld [vmem:[%s19262_s13 + $0x198] sm:$0xff] }
 0x4b9   : > { %v1568_v37 = vld [vmem:[%s19262_s13 + $0x1b8] sm:$0xff]  ;;  %v15548_v39 = vcombine.high %v1563_v36, %v1567_v24  ;;  %v15547_v46 = vcombine.low %v1563_v36, %v1567_v24  ;;  %v2877_v36 = vld [vmem:[%s19262_s13 + $0x468] sm:$0xff] }
 0x4ba   : > { %v15550_v40 = vcombine.high %v1564_v25, %v1568_v37  ;;  %v15549_v47 = vcombine.low %v1564_v25, %v1568_v37 }
 0x4bb   : > { %2587 = vmatpush1.bf16.msra.mxu0 %v15543_v41  ;;  %2628 = vmatpush1.bf16.msra.mxu1 %v15545_v42  ;;  %v1571_v41 = vld [vmem:[%s19262_s13 + $0x1d0] sm:$0xff] }
 0x4bc   : > { %2588 = vmatprep.subr.bf16.mxu0 %v15552_v44  ;;  %2629 = vmatprep.subr.bf16.mxu1 %v15554_v45  ;;  %v1575_v42 = vld [vmem:[%s19262_s13 + $0x1f0] sm:$0xff]  ;;  %v1572_v44 = vld [vmem:[%s19262_s13 + $0x1d8] sm:$0xff] }
 0x4bd   : > { %v1576_v45 = vld [vmem:[%s19262_s13 + $0x1f8] sm:$0xff]  ;;  %v15556_v48 = vcombine.high %v1571_v41, %v1575_v42 }
 0x4be   : > { %v15558_v49 = vcombine.high %v1572_v44, %v1576_v45 }
 0x4bf   : > { %2589 = vmatpush1.bf16.msra.mxu0 %v15551_v14  ;;  %2630 = vmatpush1.bf16.msra.mxu1 %v15553_v50  ;;  %v15555_v14 = vcombine.low %v1571_v41, %v1575_v42  ;;  %v15557_v50 = vcombine.low %v1572_v44, %v1576_v45  ;;  %v2885_v41 = vld [vmem:[%s19262_s13 + $0x4a8] sm:$0xff] }
 0x4c0   : > { %2656 = vmatprep.subr.bf16.mxu0 %v15500_v52  ;;  %2697 = vmatprep.subr.bf16.mxu1 %v15502_v53  ;;  %v19627_v52 = vld [vmem:[#allocation9 + $0x4] ss:$16 sps:$4 sm:$0xff]   ;;  %v19630_v53 = vld [vmem:[#allocation9 + $0xc] ss:$16 sps:$4 sm:$0xff]  }
 0x4c2   : > { %2607 = vmatmul.mubr.bf16.vlgmr.msra.gmra.mrb[8].mxu0 %v19449_v56  ;;  %2648 = vmatmul.mubr.bf16.vlgmr.msra.gmra.mrb[8].mxu1 %v19449_v56 }
 0x4c3   : > { %2657 = vmatpush1.bf16.msra.mxu0 %v15499_v57  ;;  %2698 = vmatpush1.bf16.msra.mxu1 %v15501_v61  ;;  %v19652_v57 = vld [vmem:[#allocation9 + $0x28] ss:$16 sps:$4 sm:$0xff]   ;;  %v19655_v61 = vld [vmem:[#allocation9 + $0x44] ss:$16 sps:$4 sm:$0xff]  }
 0x4c4   : > { %2658 = vmatprep.subr.bf16.mxu0 %v15508_v0  ;;  %2699 = vmatprep.subr.bf16.mxu1 %v15510_v1  ;;  %v19658_v0 = vld [vmem:[#allocation9 + $0x4c] ss:$16 sps:$4 sm:$0xff]   ;;  %v19661_v1 = vld [vmem:[#allocation9 + $0x40] ss:$16 sps:$4 sm:$0xff]  }
 0x4c5   : > { %2688 = vmatprep.mubr.bf16.mxu0 %v18868_v13  ;;  %2729 = vmatprep.mubr.bf16.mxu1 %v18868_v13 }
 0x4c7   : > { %2659 = vmatpush1.bf16.msra.mxu0 %v15507_v58  ;;  %2700 = vmatpush1.bf16.msra.mxu1 %v15509_v59  ;;  %v19676_v58 = vld [vmem:[#allocation9 + $0x68] ss:$16 sps:$4 sm:$0xff]   ;;  %v19679_v59 = vld [vmem:[#allocation9 + $0x84] ss:$16 sps:$4 sm:$0xff]  }
 0x4c8   : > { %2660 = vmatprep.subr.bf16.mxu0 %v15516_v60  ;;  %2701 = vmatprep.subr.bf16.mxu1 %v15518_v62  ;;  %v19682_v60 = vld [vmem:[#allocation9 + $0x8c] ss:$16 sps:$4 sm:$0xff]   ;;  %v19685_v62 = vld [vmem:[#allocation9 + $0x80] ss:$16 sps:$4 sm:$0xff]  }
 0x4cb   : > { %2661 = vmatpush1.bf16.msra.mxu0 %v15515_v9  ;;  %2702 = vmatpush1.bf16.msra.mxu1 %v15517_v10  ;;  %v19700_v9 = vld [vmem:[#allocation9 + $0xa8] ss:$16 sps:$4 sm:$0xff]   ;;  %v19703_v10 = vld [vmem:[#allocation9 + $0xc4] ss:$16 sps:$4 sm:$0xff]  }
 0x4cc   : > { %2662 = vmatprep.subr.bf16.mxu0 %v15524_v11  ;;  %2703 = vmatprep.subr.bf16.mxu1 %v15526_v12  ;;  %v19706_v11 = vld [vmem:[#allocation9 + $0xcc] ss:$16 sps:$4 sm:$0xff]   ;;  %v19709_v12 = vld [vmem:[#allocation9 + $0xc0] ss:$16 sps:$4 sm:$0xff]  }
 0x4cf   : > { %2663 = vmatpush1.bf16.msra.mxu0 %v15523_v21  ;;  %2704 = vmatpush1.bf16.msra.mxu1 %v15525_v22  ;;  %v19724_v21 = vld [vmem:[#allocation9 + $0xe8] ss:$16 sps:$4 sm:$0xff]  }
 0x4d0   : > { %2664 = vmatprep.subr.bf16.mxu0 %v15532_v23  ;;  %2705 = vmatprep.subr.bf16.mxu1 %v15534_v26  ;;  %v2864_v22 = vld [vmem:[%s19262_s13 + $0x400] sm:$0xff]  ;;  %v2865_v26 = vld [vmem:[%s19262_s13 + $0x408] sm:$0xff] }
 0x4d1   : > { %v2868_v23 = vld [vmem:[%s19262_s13 + $0x420] sm:$0xff]  ;;  %v15564_v30 = vcombine.low %v2865_v26, %v2869_v28 }
 0x4d2   : > { %v15563_v27 = vcombine.high %v2864_v22, %v2868_v23  ;;  %v15562_v29 = vcombine.low %v2864_v22, %v2868_v23 }
 0x4d3   : > { %2665 = vmatpush1.bf16.msra.mxu0 %v15531_v31  ;;  %2706 = vmatpush1.bf16.msra.mxu1 %v15533_v32  ;;  %v15565_v31 = vcombine.high %v2865_v26, %v2869_v28  ;;  %v2876_v32 = vld [vmem:[%s19262_s13 + $0x460] sm:$0xff]  ;;  %v2897_v28 = vld [vmem:[%s19262_s13 + $0x508] sm:$0xff] }
 0x4d4   : > { %2666 = vmatprep.subr.bf16.mxu0 %v15540_v33  ;;  %2707 = vmatprep.subr.bf16.mxu1 %v15542_v35  ;;  %v2873_v33 = vld [vmem:[%s19262_s13 + $0x448] sm:$0xff]  ;;  %v2896_v26 = vld [vmem:[%s19262_s13 + $0x500] sm:$0xff] }
 0x4d5   : > { %v15572_v25 = vcombine.low %v2873_v33, %v2877_v36  ;;  %v15573_v37 = vcombine.high %v2873_v33, %v2877_v36  ;;  %v2904_v33 = vld [vmem:[%s19262_s13 + $0x540] sm:$0xff]  ;;  %v2905_v36 = vld [vmem:[%s19262_s13 + $0x548] sm:$0xff] }
 0x4d7   : > { %2667 = vmatpush1.bf16.msra.mxu0 %v15539_v38  ;;  %2708 = vmatpush1.bf16.msra.mxu1 %v15541_v34  ;;  %v2880_v38 = vld [vmem:[%s19262_s13 + $0x480] sm:$0xff] }
 0x4d8   : > { %2668 = vmatprep.subr.bf16.mxu0 %v15548_v39  ;;  %2709 = vmatprep.subr.bf16.mxu1 %v15550_v40  ;;  %v2884_v34 = vld [vmem:[%s19262_s13 + $0x4a0] sm:$0xff]  ;;  %v2881_v39 = vld [vmem:[%s19262_s13 + $0x488] sm:$0xff] }
 0x4d9   : > { %v15579_v40 = vcombine.high %v2880_v38, %v2884_v34  ;;  %v15578_v42 = vcombine.low %v2880_v38, %v2884_v34  ;;  %v15580_v44 = vcombine.low %v2881_v39, %v2885_v41  ;;  %v15581_v45 = vcombine.high %v2881_v39, %v2885_v41  ;;  %v2912_v38 = vld [vmem:[%s19262_s13 + $0x580] sm:$0xff] }
 0x4da   : > { %v2916_v34 = vld [vmem:[%s19262_s13 + $0x5a0] sm:$0xff] }
 0x4db   : > { %2669 = vmatpush1.bf16.msra.mxu0 %v15547_v46  ;;  %2710 = vmatpush1.bf16.msra.mxu1 %v15549_v47  ;;  %v2888_v46 = vld [vmem:[%s19262_s13 + $0x4c0] sm:$0xff]  ;;  %v15611_v41 = vcombine.high %v2912_v38, %v2916_v34 }
 0x4dc   : > { %2670 = vmatprep.subr.bf16.mxu0 %v15556_v48  ;;  %2711 = vmatprep.subr.bf16.mxu1 %v15558_v49  ;;  %v2892_v47 = vld [vmem:[%s19262_s13 + $0x4e0] sm:$0xff]  ;;  %v2889_v48 = vld [vmem:[%s19262_s13 + $0x4c8] sm:$0xff] }
 0x4dd   : > { %v15587_v49 = vcombine.high %v2888_v46, %v2892_v47 }
 0x4df   : > { %2671 = vmatpush1.bf16.msra.mxu0 %v15555_v14  ;;  %2712 = vmatpush1.bf16.msra.mxu1 %v15557_v50  ;;  %v2893_v14 = vld [vmem:[%s19262_s13 + $0x4e8] sm:$0xff]  ;;  %v15586_v50 = vcombine.low %v2888_v46, %v2892_v47  ;;  %v2924_v47 = vld [vmem:[%s19262_s13 + $0x5e0] sm:$0xff] }
 0x4e0   : > { %2738 = vmatprep.subr.bf16.mxu0 %v19627_v52  ;;  %2779 = vmatprep.subr.bf16.mxu1 %v19630_v53  ;;  %v15588_v22 = vcombine.low %v2889_v48, %v2893_v14  ;;  %v15589_v23 = vcombine.high %v2889_v48, %v2893_v14  ;;  %v2921_v48 = vld [vmem:[%s19262_s13 + $0x5c8] sm:$0xff]  ;;  %v19764_v14 = vld [vmem:[%s19262_s13 + $0x410] sm:$0xff] }
 0x4e2   : > { %2689 = vmatmul.mubr.bf16.vlgmr.msra.gmra.mrb[12].mxu0 %v19449_v56  ;;  %2730 = vmatmul.mubr.bf16.vlgmr.msra.gmra.mrb[12].mxu1 %v19449_v56  ;;  %v19649_v56 = vld [vmem:[#allocation9 + $0x20] ss:$16 sps:$4 sm:$0xff]  }
 0x4e3   : > { %2739 = vmatpush1.bf16.msra.mxu0 %v19635_v54  ;;  %2780 = vmatpush1.bf16.msra.mxu1 %v19638_v15 }
 0x4e4   : > { %2740 = vmatprep.subr.bf16.mxu0 %v19641_v16  ;;  %2781 = vmatprep.subr.bf16.mxu1 %v19644_v55 }
 0x4e5   : > { %2770 = vmatprep.mubr.bf16.mxu0 %v18868_v13  ;;  %2811 = vmatprep.mubr.bf16.mxu1 %v18868_v13 }
 0x4e7   : > { %2741 = vmatpush1.bf16.msra.mxu0 %v19649_v56  ;;  %2782 = vmatpush1.bf16.msra.mxu1 %v19652_v57 }
 0x4e8   : > { %2742 = vmatprep.subr.bf16.mxu0 %v19655_v61  ;;  %2783 = vmatprep.subr.bf16.mxu1 %v19658_v0 }
 0x4eb   : > { %2743 = vmatpush1.bf16.msra.mxu0 %v19661_v1  ;;  %2784 = vmatpush1.bf16.msra.mxu1 %v19664_v3 }
 0x4ec   : > { %2744 = vmatprep.subr.bf16.mxu0 %v19667_v4  ;;  %2785 = vmatprep.subr.bf16.mxu1 %v19670_v5 }
 0x4ef   : > { %2745 = vmatpush1.bf16.msra.mxu0 %v19673_v6  ;;  %2786 = vmatpush1.bf16.msra.mxu1 %v19676_v58 }
 0x4f0   : > { %2746 = vmatprep.subr.bf16.mxu0 %v19679_v59  ;;  %2787 = vmatprep.subr.bf16.mxu1 %v19682_v60 }
 0x4f3   : > { %2747 = vmatpush1.bf16.msra.mxu0 %v19685_v62  ;;  %2788 = vmatpush1.bf16.msra.mxu1 %v19688_v63 }
 0x4f4   : > { %2748 = vmatprep.subr.bf16.mxu0 %v19691_v2  ;;  %2789 = vmatprep.subr.bf16.mxu1 %v19694_v7 }
 0x4f7   : > { %2749 = vmatpush1.bf16.msra.mxu0 %v19697_v8  ;;  %2790 = vmatpush1.bf16.msra.mxu1 %v19700_v9 }
 0x4f8   : > { %2750 = vmatprep.subr.bf16.mxu0 %v19703_v10  ;;  %2791 = vmatprep.subr.bf16.mxu1 %v19706_v11 }
 0x4fb   : > { %2751 = vmatpush1.bf16.msra.mxu0 %v19709_v12  ;;  %2792 = vmatpush1.bf16.msra.mxu1 %v19712_v17 }
 0x4fc   : > { %2752 = vmatprep.subr.bf16.mxu0 %v19715_v18  ;;  %2793 = vmatprep.subr.bf16.mxu1 %v19718_v19 }
 0x4ff   : > { %2753 = vmatpush1.bf16.msra.mxu0 %v19721_v20  ;;  %2794 = vmatpush1.bf16.msra.mxu1 %v19724_v21 }
 0x500   : > { %3251 = vmatprep.subr.bf16.mxu0 %v15563_v27  ;;  %3292 = vmatprep.subr.bf16.mxu1 %v15565_v31  ;;  %v2900_v27 = vld [vmem:[%s19262_s13 + $0x520] sm:$0xff] }
 0x501   : > { %v15594_v31 = vcombine.low %v2896_v26, %v2900_v27 }
 0x502   : > { %2771 = vmatmul.mubr.bf16.vlgmr.msra.gmra.mrb[16].mxu0 %v19519_v51  ;;  %2812 = vmatmul.mubr.bf16.vlgmr.msra.gmra.mrb[16].mxu1 %v19519_v51  ;;  %v2872_v51 = vld [vmem:[%s19262_s13 + $0x440] sm:$0xff] }
 0x503   : > { %3283 = vmatprep.mubr.bf16.mxu0 %v18868_v13  ;;  %3324 = vmatprep.mubr.bf16.mxu1 %v18868_v13  ;;  %v15571_v35 = vcombine.high %v2872_v51, %v2876_v32  ;;  %v15570_v24 = vcombine.low %v2872_v51, %v2876_v32 }
 0x504   : > { %3252 = vmatpush1.bf16.msra.mxu0 %v15562_v29  ;;  %3293 = vmatpush1.bf16.msra.mxu1 %v15564_v30  ;;  %v15595_v29 = vcombine.high %v2896_v26, %v2900_v27  ;;  %v2901_v30 = vld [vmem:[%s19262_s13 + $0x528] sm:$0xff]  ;;  %v19775_v27 = vld [vmem:[%s19262_s13 + $0x438] sm:$0xff] }
 0x505   : > { %3253 = vmatprep.subr.bf16.mxu0 %v15571_v35  ;;  %3294 = vmatprep.subr.bf16.mxu1 %v15573_v37  ;;  %v15596_v51 = vcombine.low %v2897_v28, %v2901_v30  ;;  %v15597_v32 = vcombine.high %v2897_v28, %v2901_v30  ;;  %v2908_v35 = vld [vmem:[%s19262_s13 + $0x560] sm:$0xff]  ;;  %v2909_v37 = vld [vmem:[%s19262_s13 + $0x568] sm:$0xff] }
 0x506   : > { %v15604_v39 = vcombine.low %v2905_v36, %v2909_v37 }
 0x508   : > { %3254 = vmatpush1.bf16.msra.mxu0 %v15570_v24  ;;  %3295 = vmatpush1.bf16.msra.mxu1 %v15572_v25  ;;  %v15602_v24 = vcombine.low %v2904_v33, %v2908_v35  ;;  %v15603_v25 = vcombine.high %v2904_v33, %v2908_v35 }
 0x509   : > { %3255 = vmatprep.subr.bf16.mxu0 %v15579_v40  ;;  %3296 = vmatprep.subr.bf16.mxu1 %v15581_v45  ;;  %v15605_v40 = vcombine.high %v2905_v36, %v2909_v37  ;;  %v2920_v45 = vld [vmem:[%s19262_s13 + $0x5c0] sm:$0xff] }
 0x50c   : > { %3256 = vmatpush1.bf16.msra.mxu0 %v15578_v42  ;;  %3297 = vmatpush1.bf16.msra.mxu1 %v15580_v44  ;;  %v2913_v42 = vld [vmem:[%s19262_s13 + $0x588] sm:$0xff] }
 0x50d   : > { %3257 = vmatprep.subr.bf16.mxu0 %v15587_v49  ;;  %3298 = vmatprep.subr.bf16.mxu1 %v15589_v23  ;;  %v2917_v44 = vld [vmem:[%s19262_s13 + $0x5a8] sm:$0xff]  ;;  %v15610_v23 = vcombine.low %v2912_v38, %v2916_v34 }
 0x50e   : > { %v15613_v46 = vcombine.high %v2913_v42, %v2917_v44  ;;  %v2925_v49 = vld [vmem:[%s19262_s13 + $0x5e8] sm:$0xff]  ;;  %v15612_v28 = vcombine.low %v2913_v42, %v2917_v44 }
 0x510   : > { %3258 = vmatpush1.bf16.msra.mxu0 %v15586_v50  ;;  %3299 = vmatpush1.bf16.msra.mxu1 %v15588_v22  ;;  %v19767_v50 = vld [vmem:[%s19262_s13 + $0x430] sm:$0xff]  ;;  %v19770_v22 = vld [vmem:[%s19262_s13 + $0x418] sm:$0xff] }
 0x511   : > { %3259 = vmatprep.subr.bf16.mxu0 %v15595_v29  ;;  %3300 = vmatprep.subr.bf16.mxu1 %v15597_v32  ;;  %v15566_v26 = vcombine.low %v19764_v14, %v19767_v50  ;;  %v15619_v29 = vcombine.high %v2920_v45, %v2924_v47  ;;  %v15568_v30 = vcombine.low %v19770_v22, %v19775_v27 }
 0x512   : > { %v15620_v32 = vcombine.low %v2921_v48, %v2925_v49  ;;  %v15567_v33 = vcombine.high %v19764_v14, %v19767_v50  ;;  %v15569_v35 = vcombine.high %v19770_v22, %v19775_v27  ;;  %v2898_v27 = vld [vmem:[%s19262_s13 + $0x510] sm:$0xff] }
 0x514   : > { %3260 = vmatpush1.bf16.msra.mxu0 %v15594_v31  ;;  %3301 = vmatpush1.bf16.msra.mxu1 %v15596_v51  ;;  %v15621_v31 = vcombine.high %v2921_v48, %v2925_v49  ;;  %v15618_v51 = vcombine.low %v2920_v45, %v2924_v47 }
 0x515   : > { %3261 = vmatprep.subr.bf16.mxu0 %v15603_v25  ;;  %3302 = vmatprep.subr.bf16.mxu1 %v15605_v40 }
 0x518   : > { %3262 = vmatpush1.bf16.msra.mxu0 %v15602_v24  ;;  %3303 = vmatpush1.bf16.msra.mxu1 %v15604_v39 }
 0x519   : > { %3263 = vmatprep.subr.bf16.mxu0 %v15611_v41  ;;  %3304 = vmatprep.subr.bf16.mxu1 %v15613_v46  ;;  %v19784_v41 = vld [vmem:[%s19428_s24] sm:$0xff]  ;;  %v19788_v46 = vld [vmem:[%s19428_s24 + $0x8] sm:$0xff] }
 0x51c   : > { %3264 = vmatpush1.bf16.msra.mxu0 %v15610_v23  ;;  %3305 = vmatpush1.bf16.msra.mxu1 %v15612_v28 }
 0x51d   : > { %3265 = vmatprep.subr.bf16.mxu0 %v15619_v29  ;;  %3306 = vmatprep.subr.bf16.mxu1 %v15621_v31  ;;  %v19792_v29 = vld [vmem:[%s19428_s24 + $0x10] sm:$0xff] }
 0x520   : > { %3266 = vmatpush1.bf16.msra.mxu0 %v15618_v51  ;;  %3307 = vmatpush1.bf16.msra.mxu1 %v15620_v32  ;;  %v19796_v51 = vld [vmem:[%s19428_s24 + $0x18] sm:$0xff] }
 0x521   : > { %3333 = vmatprep.subr.bf16.mxu0 %v15567_v33  ;;  %3374 = vmatprep.subr.bf16.mxu1 %v15569_v35 }
 0x5d5   : > { %v2772_v36 = vpop.f32.mrb[16].mxu0  ;;  %v2813_v24 = vpop.f32.mrb[16].mxu1 }
 0x5d6   : > { %v2824_v25 = vrot.slane %v2772_v36, 4  ;;  %v2774_v37 = vpop.f32.mrb[17].mxu0  ;;  %v2815_v38 = vpop.f32.mrb[17].mxu1  ;;  %v2826_v23 = vrot.slane %v2813_v24, 4 }
 0x5d7   : > { %v2825_v34 = vrot.slane %v2774_v37, 4  ;;  %v2776_v39 = vpop.f32.mrb[18].mxu0  ;;  %v2817_v40 = vpop.f32.mrb[18].mxu1  ;;  %v2827_v28 = vrot.slane %v2815_v38, 4 }
 0x5d8   : > { %v2832_v42 = vadd.f32 %v19784_v41, %v2824_v25  ;;  %v2777_v44 = vpop.f32.mrb[19].mxu0  ;;  %v2818_v45 = vpop.f32.mrb[19].mxu1  ;;  %v2834_v31 = vadd.f32 %v19792_v29, %v2826_v23  ;;  %v2856_v39 = vrot.slane %v19512_v43, 6  ;;  %v2879_v43 = vld [vmem:[%s19262_s13 + $0x478] sm:$0xff] }
 0x5d9   : > { %v2833_v47 = vadd.f32 %v19788_v46, %v2825_v34  ;;  %v2835_v32 = vadd.f32 %v19796_v51, %v2827_v28  ;;  %v2874_v28 = vld [vmem:[%s19262_s13 + $0x450] sm:$0xff] }
 0x5da   : > { %v15559_v48 = vmul.f32 -1.442695, %v2832_v42  ;;  %v15561_v33 = vmul.f32 -1.442695, %v2834_v31  ;;  %v2878_v31 = vld [vmem:[%s19262_s13 + $0x470] sm:$0xff] }
 0x5db   : > { %v15560_v49 = vmul.f32 -1.442695, %v2833_v47 }
 0x5dc   : > { %17454 = vpow2.f32 %v15559_v48 }
 0x5dd   : > { %17456 = vpow2.f32 %v15560_v49 }
 0x5de   : > { %17458 = vtanh.f32 %v2835_v32  ;;  %v2875_v32 = vld [vmem:[%s19262_s13 + $0x458] sm:$0xff] }
 0x5df   : > { %17460 = vpow2.f32 %v15561_v33 }
 0x5e6   : > { %v17455_v35 = vpop.eup %17454 }
 0x5e7   : > { %v2845_v36 = vadd.f32 1.0, %v17455_v35  ;;  %v17457_v25 = vpop.eup %17456 }
 0x5e8   : > { %v2846_v37 = vadd.f32 1.0, %v17457_v25  ;;  %v17459_v24 = vpop.eup %17458  ;;  %v15577_v25 = vcombine.high %v2875_v32, %v2879_v43 }
 0x5e9   : > { %17462 = vrcp.f32 %v2845_v36  ;;  %v17461_v38 = vpop.eup %17460  ;;  %v15575_v36 = vcombine.high %v2874_v28, %v2878_v31 }
 0x5ea   : > { %17464 = vrcp.f32 %v2846_v37  ;;  %v2847_v44 = vadd.f32 1.0, %v17461_v38  ;;  %v2882_v37 = vld [vmem:[%s19262_s13 + $0x490] sm:$0xff]  ;;  %v2883_v38 = vld [vmem:[%s19262_s13 + $0x498] sm:$0xff] }
 0x5ec   : > { %17466 = vrcp.f32 %v2847_v44 }
 0x5f3   : > { %v17463_v34 = vpop.eup %17462 }
 0x5f4   : > { %v2859_v40 = vmul.f32 %v17463_v34, %v17459_v24  ;;  %v17465_v42 = vpop.eup %17464  ;;  %v2886_v24 = vld [vmem:[%s19262_s13 + $0x4b0] sm:$0xff]  ;;  %v2887_v34 = vld [vmem:[%s19262_s13 + $0x4b8] sm:$0xff] }
 0x5f5   : > { %v2858_v45 = vmul.f32 %v17465_v42, %v2856_v39  ;;  %v15574_v39 = vcombine.low %v2874_v28, %v2878_v31  ;;  %v15583_v42 = vcombine.high %v2882_v37, %v2886_v24  ;;  %v15585_v44 = vcombine.high %v2883_v38, %v2887_v34  ;;  %v2899_v28 = vld [vmem:[%s19262_s13 + $0x518] sm:$0xff] }
 0x5f6   : > { %v17467_v48 = vpop.eup %17466  ;;  %v15582_v14 = vcombine.low %v2882_v37, %v2886_v24  ;;  %v15584_v50 = vcombine.low %v2883_v38, %v2887_v34  ;;  %v2903_v31 = vld [vmem:[%s19262_s13 + $0x538] sm:$0xff]  ;;  %v2910_v37 = vld [vmem:[%s19262_s13 + $0x570] sm:$0xff] }
 0x5f7   : > { %v19800_v47 = vadd.f32 %v2859_v40, %v2858_v45  ;;  %v15576_v40 = vcombine.low %v2875_v32, %v2879_v43  ;;  %v2890_v45 = vld [vmem:[%s19262_s13 + $0x4d0] sm:$0xff]  ;;  %v2907_v24 = vld [vmem:[%s19262_s13 + $0x558] sm:$0xff] }
 0x5f8   : > { %v2911_v38 = vld [vmem:[%s19262_s13 + $0x578] sm:$0xff] }
 0x5f9   : > { %17468 = vtanh.f32 %v19800_v47 }
 0x603   : > { %v17469_v49 = vpop.eup %17468 }
 0x604   : > { %v2862_v23 = vmul.f32 %v17469_v49, %v17467_v48  ;;  %v2894_v48 = vld [vmem:[%s19262_s13 + $0x4f0] sm:$0xff]  ;;  %v2891_v49 = vld [vmem:[%s19262_s13 + $0x4d8] sm:$0xff] }
 0x605   : > { %v15591_v22 = vcombine.high %v2890_v45, %v2894_v48  ;;  %v15590_v32 = vcombine.low %v2890_v45, %v2894_v48  ;;  %v2918_v45 = vld [vmem:[%s19262_s13 + $0x5b0] sm:$0xff]  ;;  %v2915_v48 = vld [vmem:[%s19262_s13 + $0x598] sm:$0xff] }
 0x606   : > { %v2863_v33 = vpack.c.bf16 %v2862_v23, %v2862_v23  ;;  %v2895_v23 = vld [vmem:[%s19262_s13 + $0x4f8] sm:$0xff] }
 0x607   : > { %v15592_v43 = vcombine.low %v2891_v49, %v2895_v23 }
 0x608   : > { %v19807_v35 = vrot.slane %v2863_v33, 2 }
 0x60a   : > { %3284 = vmatmul.mubr.bf16.vlgmr.msra.gmra.mrb[8].mxu0 %v19807_v35  ;;  %3325 = vmatmul.mubr.bf16.vlgmr.msra.gmra.mrb[8].mxu1 %v19807_v35 }
 0x60b   : > { %3334 = vmatpush1.bf16.msra.mxu0 %v15566_v26  ;;  %3375 = vmatpush1.bf16.msra.mxu1 %v15568_v30  ;;  %v15593_v26 = vcombine.high %v2891_v49, %v2895_v23  ;;  %v2902_v30 = vld [vmem:[%s19262_s13 + $0x530] sm:$0xff]  ;;  %v2919_v49 = vld [vmem:[%s19262_s13 + $0x5b8] sm:$0xff] }
 0x60c   : > { %3335 = vmatprep.subr.bf16.mxu0 %v15575_v36  ;;  %3376 = vmatprep.subr.bf16.mxu1 %v15577_v25  ;;  %v15599_v33 = vcombine.high %v2898_v27, %v2902_v30  ;;  %v15601_v36 = vcombine.high %v2899_v28, %v2903_v31  ;;  %v2906_v25 = vld [vmem:[%s19262_s13 + $0x550] sm:$0xff]  ;;  %v15598_v34 = vcombine.low %v2898_v27, %v2902_v30  ;;  %v2923_v30 = vld [vmem:[%s19262_s13 + $0x5d8] sm:$0xff] }
 0x60d   : > { %3365 = vmatprep.mubr.bf16.mxu0 %v18868_v13  ;;  %3406 = vmatprep.mubr.bf16.mxu1 %v18868_v13  ;;  %v15606_v23 = vcombine.low %v2906_v25, %v2910_v37  ;;  %v2926_v27 = vld [vmem:[%s19262_s13 + $0x5f0] sm:$0xff] }
 0x60f   : > { %3336 = vmatpush1.bf16.msra.mxu0 %v15574_v39  ;;  %3377 = vmatpush1.bf16.msra.mxu1 %v15576_v40  ;;  %v15600_v39 = vcombine.low %v2899_v28, %v2903_v31  ;;  %v15607_v40 = vcombine.high %v2906_v25, %v2910_v37  ;;  %v2927_v28 = vld [vmem:[%s19262_s13 + $0x5f8] sm:$0xff]  ;;  %v3585_v37 = vld [vmem:[%s19262_s13 + $0x720] sm:$0xff] }
 0x610   : > { %3337 = vmatprep.subr.bf16.mxu0 %v15583_v42  ;;  %3378 = vmatprep.subr.bf16.mxu1 %v15585_v44  ;;  %v15609_v42 = vcombine.high %v2907_v24, %v2911_v38  ;;  %v2914_v44 = vld [vmem:[%s19262_s13 + $0x590] sm:$0xff]  ;;  %v15624_v25 = vcombine.low %v2923_v30, %v2927_v28 }
 0x611   : > { %v15614_v31 = vcombine.low %v2914_v44, %v2918_v45 }
 0x613   : > { %3338 = vmatpush1.bf16.msra.mxu0 %v15582_v14  ;;  %3379 = vmatpush1.bf16.msra.mxu1 %v15584_v50  ;;  %v15608_v14 = vcombine.low %v2907_v24, %v2911_v38  ;;  %v15615_v50 = vcombine.high %v2914_v44, %v2918_v45  ;;  %v3582_v24 = vld [vmem:[%s19262_s13 + $0x708] sm:$0xff]  ;;  %v3589_v44 = vld [vmem:[%s19262_s13 + $0x740] sm:$0xff] }
 0x614   : > { %3339 = vmatprep.subr.bf16.mxu0 %v15591_v22  ;;  %3380 = vmatprep.subr.bf16.mxu1 %v15593_v26  ;;  %v15617_v22 = vcombine.high %v2915_v48, %v2919_v49  ;;  %v2922_v26 = vld [vmem:[%s19262_s13 + $0x5d0] sm:$0xff]  ;;  %v3593_v45 = vld [vmem:[%s19262_s13 + $0x760] sm:$0xff] }
 0x617   : > { %3340 = vmatpush1.bf16.msra.mxu0 %v15590_v32  ;;  %3381 = vmatpush1.bf16.msra.mxu1 %v15592_v43  ;;  %v15616_v32 = vcombine.low %v2915_v48, %v2919_v49  ;;  %v15623_v43 = vcombine.high %v2922_v26, %v2926_v27  ;;  %v3590_v48 = vld [vmem:[%s19262_s13 + $0x748] sm:$0xff]  ;;  %v15669_v49 = vcombine.low %v3589_v44, %v3593_v45 }
 0x618   : > { %3341 = vmatprep.subr.bf16.mxu0 %v15599_v33  ;;  %3382 = vmatprep.subr.bf16.mxu1 %v15601_v36  ;;  %v15625_v33 = vcombine.high %v2923_v30, %v2927_v28  ;;  %v15622_v36 = vcombine.low %v2922_v26, %v2926_v27  ;;  %v3598_v28 = vld [vmem:[%s19262_s13 + $0x788] sm:$0xff] }
 0x61b   : > { %3342 = vmatpush1.bf16.msra.mxu0 %v15598_v34  ;;  %3383 = vmatpush1.bf16.msra.mxu1 %v15600_v39  ;;  %v3586_v34 = vld [vmem:[%s19262_s13 + $0x728] sm:$0xff] }
 0x61c   : > { %3343 = vmatprep.subr.bf16.mxu0 %v15607_v40  ;;  %3384 = vmatprep.subr.bf16.mxu1 %v15609_v42  ;;  %v15663_v40 = vcombine.low %v3582_v24, %v3586_v34  ;;  %v15664_v42 = vcombine.high %v3582_v24, %v3586_v34 }
 0x61f   : > { %3344 = vmatpush1.bf16.msra.mxu0 %v15606_v23  ;;  %3385 = vmatpush1.bf16.msra.mxu1 %v15608_v14  ;;  %v15670_v23 = vcombine.high %v3589_v44, %v3593_v45  ;;  %v3594_v14 = vld [vmem:[%s19262_s13 + $0x768] sm:$0xff] }
 0x620   : > { %3345 = vmatprep.subr.bf16.mxu0 %v15615_v50  ;;  %3386 = vmatprep.subr.bf16.mxu1 %v15617_v22  ;;  %v3597_v50 = vld [vmem:[%s19262_s13 + $0x780] sm:$0xff]  ;;  %v15671_v26 = vcombine.low %v3590_v48, %v3594_v14  ;;  %v15672_v27 = vcombine.high %v3590_v48, %v3594_v14  ;;  %v3559_v14 = vld [vmem:[%s19262_s13 + $0x650] sm:$0xff] }
 0x621   : > { %v3601_v22 = vld [vmem:[%s19262_s13 + $0x7a0] sm:$0xff] }
 0x622   : > { %v15678_v30 = vcombine.high %v3597_v50, %v3601_v22 }
 0x623   : > { %3346 = vmatpush1.bf16.msra.mxu0 %v15614_v31  ;;  %3387 = vmatpush1.bf16.msra.mxu1 %v15616_v32  ;;  %v3602_v31 = vld [vmem:[%s19262_s13 + $0x7a8] sm:$0xff]  ;;  %v3605_v32 = vld [vmem:[%s19262_s13 + $0x7c0] sm:$0xff] }
 0x624   : > { %3347 = vmatprep.subr.bf16.mxu0 %v15623_v43  ;;  %3388 = vmatprep.subr.bf16.mxu1 %v15625_v33  ;;  %v15680_v43 = vcombine.high %v3598_v28, %v3602_v31  ;;  %v3609_v33 = vld [vmem:[%s19262_s13 + $0x7e0] sm:$0xff] }
 0x627   : > { %3348 = vmatpush1.bf16.msra.mxu0 %v15622_v36  ;;  %3389 = vmatpush1.bf16.msra.mxu1 %v15624_v25  ;;  %v3606_v36 = vld [vmem:[%s19262_s13 + $0x7c8] sm:$0xff] }
 0x628   : > { %3423 = vmatprep.subr.bf16.mxu0 %v19627_v52  ;;  %3464 = vmatprep.subr.bf16.mxu1 %v19630_v53  ;;  %v3549_v52 = vld [vmem:[%s19262_s13 + $0x600] sm:$0xff]  ;;  %v3610_v25 = vld [vmem:[%s19262_s13 + $0x7e8] sm:$0xff] }
 0x629   : > { %v3553_v53 = vld [vmem:[%s19262_s13 + $0x620] sm:$0xff] }
 0x62a   : > { %3366 = vmatmul.mubr.bf16.vlgmr.msra.gmra.mrb[12].mxu0 %v19807_v35  ;;  %3407 = vmatmul.mubr.bf16.vlgmr.msra.gmra.mrb[12].mxu1 %v19807_v35 }
 0x62b   : > { %3424 = vmatpush1.bf16.msra.mxu0 %v19635_v54  ;;  %3465 = vmatpush1.bf16.msra.mxu1 %v19638_v15  ;;  %v3550_v54 = vld [vmem:[%s19262_s13 + $0x608] sm:$0xff]  ;;  %v15630_v15 = vcombine.high %v3549_v52, %v3553_v53 }
 0x62c   : > { %3425 = vmatprep.subr.bf16.mxu0 %v19641_v16  ;;  %3466 = vmatprep.subr.bf16.mxu1 %v19644_v55  ;;  %v3554_v16 = vld [vmem:[%s19262_s13 + $0x628] sm:$0xff]  ;;  %v15629_v55 = vcombine.low %v3549_v52, %v3553_v53  ;;  %v19916_v52 = vld [vmem:[%s19262_s13 + $0x610] sm:$0xff] }
 0x62d   : > { %3455 = vmatprep.mubr.bf16.mxu0 %v18868_v13  ;;  %3496 = vmatprep.mubr.bf16.mxu1 %v18868_v13  ;;  %v19919_v53 = vld [vmem:[%s19262_s13 + $0x630] sm:$0xff] }
 0x62f   : > { %3426 = vmatpush1.bf16.msra.mxu0 %v19649_v56  ;;  %3467 = vmatpush1.bf16.msra.mxu1 %v19652_v57  ;;  %v15631_v56 = vcombine.low %v3550_v54, %v3554_v16  ;;  %v15632_v57 = vcombine.high %v3550_v54, %v3554_v16  ;;  %v19922_v54 = vld [vmem:[%s19262_s13 + $0x618] sm:$0xff]  ;;  %v15633_v16 = vcombine.low %v19916_v52, %v19919_v53 }
 0x630   : > { %3427 = vmatprep.subr.bf16.mxu0 %v19655_v61  ;;  %3468 = vmatprep.subr.bf16.mxu1 %v19658_v0  ;;  %v3557_v61 = vld [vmem:[%s19262_s13 + $0x640] sm:$0xff] }
 0x631   : > { %v3561_v0 = vld [vmem:[%s19262_s13 + $0x660] sm:$0xff] }
 0x633   : > { %3428 = vmatpush1.bf16.msra.mxu0 %v19661_v1  ;;  %3469 = vmatpush1.bf16.msra.mxu1 %v19664_v3  ;;  %v3558_v1 = vld [vmem:[%s19262_s13 + $0x648] sm:$0xff]  ;;  %v15638_v3 = vcombine.high %v3557_v61, %v3561_v0 }
 0x634   : > { %3429 = vmatprep.subr.bf16.mxu0 %v19667_v4  ;;  %3470 = vmatprep.subr.bf16.mxu1 %v19670_v5  ;;  %v3562_v4 = vld [vmem:[%s19262_s13 + $0x668] sm:$0xff]  ;;  %v15637_v5 = vcombine.low %v3557_v61, %v3561_v0  ;;  %v15688_v0 = vcombine.high %v3606_v36, %v3610_v25 }
 0x637   : > { %3430 = vmatpush1.bf16.msra.mxu0 %v19673_v6  ;;  %3471 = vmatpush1.bf16.msra.mxu1 %v19676_v58  ;;  %v15639_v6 = vcombine.low %v3558_v1, %v3562_v4  ;;  %v15640_v58 = vcombine.high %v3558_v1, %v3562_v4  ;;  %v15685_v1 = vcombine.low %v3605_v32, %v3609_v33 }
 0x638   : > { %3431 = vmatprep.subr.bf16.mxu0 %v19679_v59  ;;  %3472 = vmatprep.subr.bf16.mxu1 %v19682_v60  ;;  %v3565_v59 = vld [vmem:[%s19262_s13 + $0x680] sm:$0xff]  ;;  %v15634_v4 = vcombine.high %v19916_v52, %v19919_v53 }
 0x639   : > { %v3569_v60 = vld [vmem:[%s19262_s13 + $0x6a0] sm:$0xff] }
 0x63b   : > { %3432 = vmatpush1.bf16.msra.mxu0 %v19685_v62  ;;  %3473 = vmatpush1.bf16.msra.mxu1 %v19688_v63  ;;  %v3566_v62 = vld [vmem:[%s19262_s13 + $0x688] sm:$0xff]  ;;  %v15646_v63 = vcombine.high %v3565_v59, %v3569_v60 }
 0x63c   : > { %3433 = vmatprep.subr.bf16.mxu0 %v19691_v2  ;;  %3474 = vmatprep.subr.bf16.mxu1 %v19694_v7  ;;  %v3570_v2 = vld [vmem:[%s19262_s13 + $0x6a8] sm:$0xff]  ;;  %v15645_v7 = vcombine.low %v3565_v59, %v3569_v60 }
 0x63f   : > { %3434 = vmatpush1.bf16.msra.mxu0 %v19697_v8  ;;  %3475 = vmatpush1.bf16.msra.mxu1 %v19700_v9  ;;  %v15647_v8 = vcombine.low %v3566_v62, %v3570_v2  ;;  %v15648_v9 = vcombine.high %v3566_v62, %v3570_v2 }
 0x640   : > { %3435 = vmatprep.subr.bf16.mxu0 %v19703_v10  ;;  %3476 = vmatprep.subr.bf16.mxu1 %v19706_v11  ;;  %v3573_v10 = vld [vmem:[%s19262_s13 + $0x6c0] sm:$0xff] }
 0x641   : > { %v3577_v11 = vld [vmem:[%s19262_s13 + $0x6e0] sm:$0xff] }
 0x643   : > { %3436 = vmatpush1.bf16.msra.mxu0 %v19709_v12  ;;  %3477 = vmatpush1.bf16.msra.mxu1 %v19712_v17  ;;  %v3574_v12 = vld [vmem:[%s19262_s13 + $0x6c8] sm:$0xff]  ;;  %v15654_v17 = vcombine.high %v3573_v10, %v3577_v11 }
 0x644   : > { %3437 = vmatprep.subr.bf16.mxu0 %v19715_v18  ;;  %3478 = vmatprep.subr.bf16.mxu1 %v19718_v19  ;;  %v3578_v18 = vld [vmem:[%s19262_s13 + $0x6e8] sm:$0xff]  ;;  %v15653_v19 = vcombine.low %v3573_v10, %v3577_v11 }
 0x647   : > { %3438 = vmatpush1.bf16.msra.mxu0 %v19721_v20  ;;  %3479 = vmatpush1.bf16.msra.mxu1 %v19724_v21  ;;  %v15655_v20 = vcombine.low %v3574_v12, %v3578_v18  ;;  %v15656_v21 = vcombine.high %v3574_v12, %v3578_v18 }
 0x648   : > { %3936 = vmatprep.subr.bf16.mxu0 %v15630_v15  ;;  %3977 = vmatprep.subr.bf16.mxu1 %v15632_v57  ;;  %v15677_v15 = vcombine.low %v3597_v50, %v3601_v22  ;;  %v15686_v57 = vcombine.high %v3605_v32, %v3609_v33  ;;  %v3563_v50 = vld [vmem:[%s19262_s13 + $0x670] sm:$0xff]  ;;  %v3560_v22 = vld [vmem:[%s19262_s13 + $0x658] sm:$0xff] }
 0x649   : > { %v3571_v32 = vld [vmem:[%s19262_s13 + $0x6b0] sm:$0xff]  ;;  %v3572_v33 = vld [vmem:[%s19262_s13 + $0x6b8] sm:$0xff] }
 0x64a   : > { %3456 = vmatmul.mubr.bf16.vlgmr.msra.gmra.mrb[20].mxu0 %v19807_v35  ;;  %3497 = vmatmul.mubr.bf16.vlgmr.msra.gmra.mrb[20].mxu1 %v19807_v35  ;;  %v3581_v35 = vld [vmem:[%s19262_s13 + $0x700] sm:$0xff] }
 0x64b   : > { %3968 = vmatprep.mubr.bf16.mxu0 %v18868_v13  ;;  %4009 = vmatprep.mubr.bf16.mxu1 %v18868_v13  ;;  %v15662_v38 = vcombine.high %v3581_v35, %v3585_v37  ;;  %v15661_v39 = vcombine.low %v3581_v35, %v3585_v37 }
 0x64c   : > { %3937 = vmatpush1.bf16.msra.mxu0 %v15629_v55  ;;  %3978 = vmatpush1.bf16.msra.mxu1 %v15631_v56  ;;  %v19927_v55 = vld [vmem:[%s19262_s13 + $0x638] sm:$0xff]  ;;  %v15679_v56 = vcombine.low %v3598_v28, %v3602_v31  ;;  %v3567_v31 = vld [vmem:[%s19262_s13 + $0x690] sm:$0xff] }
 0x64d   : > { %3938 = vmatprep.subr.bf16.mxu0 %v15638_v3  ;;  %3979 = vmatprep.subr.bf16.mxu1 %v15640_v58  ;;  %v15635_v61 = vcombine.low %v19922_v54, %v19927_v55  ;;  %v15687_v3 = vcombine.low %v3606_v36, %v3610_v25  ;;  %v15641_v36 = vcombine.low %v3559_v14, %v3563_v50 }
 0x64e   : > { %v15649_v52 = vcombine.low %v3567_v31, %v3571_v32 }
 0x650   : > { %3939 = vmatpush1.bf16.msra.mxu0 %v15637_v5  ;;  %3980 = vmatpush1.bf16.msra.mxu1 %v15639_v6  ;;  %v15636_v5 = vcombine.high %v19922_v54, %v19927_v55  ;;  %v3583_v55 = vld [vmem:[%s19262_s13 + $0x710] sm:$0xff] }
 0x651   : > { %3940 = vmatprep.subr.bf16.mxu0 %v15646_v63  ;;  %3981 = vmatprep.subr.bf16.mxu1 %v15648_v9 }
 0x654   : > { %3941 = vmatpush1.bf16.msra.mxu0 %v15645_v7  ;;  %3982 = vmatpush1.bf16.msra.mxu1 %v15647_v8 }
 0x655   : > { %3942 = vmatprep.subr.bf16.mxu0 %v15654_v17  ;;  %3983 = vmatprep.subr.bf16.mxu1 %v15656_v21 }
 0x658   : > { %3943 = vmatpush1.bf16.msra.mxu0 %v15653_v19  ;;  %3984 = vmatpush1.bf16.msra.mxu1 %v15655_v20 }
 0x659   : > { %3944 = vmatprep.subr.bf16.mxu0 %v15662_v38  ;;  %3985 = vmatprep.subr.bf16.mxu1 %v15664_v42 }
 0x65c   : > { %3945 = vmatpush1.bf16.msra.mxu0 %v15661_v39  ;;  %3986 = vmatpush1.bf16.msra.mxu1 %v15663_v40 }
 0x65d   : > { %3946 = vmatprep.subr.bf16.mxu0 %v15670_v23  ;;  %3987 = vmatprep.subr.bf16.mxu1 %v15672_v27 }
 0x660   : > { %3947 = vmatpush1.bf16.msra.mxu0 %v15669_v49  ;;  %3988 = vmatpush1.bf16.msra.mxu1 %v15671_v26 }
 0x661   : > { %3948 = vmatprep.subr.bf16.mxu0 %v15678_v30  ;;  %3989 = vmatprep.subr.bf16.mxu1 %v15680_v43  ;;  %v15642_v30 = vcombine.high %v3559_v14, %v3563_v50  ;;  %v3568_v43 = vld [vmem:[%s19262_s13 + $0x698] sm:$0xff]  ;;  %v19997_v14 = vld [vmem:[#allocation9 + $0x24] ss:$16 sps:$4 sm:$0xff]  }
 0x662   : > { %v15651_v53 = vcombine.low %v3568_v43, %v3572_v33  ;;  %v20000_v50 = vld [vmem:[#allocation9 + $0x2c] ss:$16 sps:$4 sm:$0xff]  }
 0x664   : > { %3949 = vmatpush1.bf16.msra.mxu0 %v15677_v15  ;;  %3990 = vmatpush1.bf16.msra.mxu1 %v15679_v56  ;;  %v15650_v15 = vcombine.high %v3567_v31, %v3571_v32  ;;  %v15652_v56 = vcombine.high %v3568_v43, %v3572_v33  ;;  %v20020_v31 = vld [vmem:[#allocation9 + $0x48] ss:$16 sps:$4 sm:$0xff]   ;;  %v20023_v32 = vld [vmem:[#allocation9 + $0x64] ss:$16 sps:$4 sm:$0xff]   ;;  %v20026_v43 = vld [vmem:[#allocation9 + $0x6c] ss:$16 sps:$4 sm:$0xff]  }
 0x665   : > { %3950 = vmatprep.subr.bf16.mxu0 %v15686_v57  ;;  %3991 = vmatprep.subr.bf16.mxu1 %v15688_v0  ;;  %v3575_v57 = vld [vmem:[%s19262_s13 + $0x6d0] sm:$0xff]  ;;  %v20029_v33 = vld [vmem:[#allocation9 + $0x60] ss:$16 sps:$4 sm:$0xff]  }
 0x666   : > { %v3579_v0 = vld [vmem:[%s19262_s13 + $0x6f0] sm:$0xff] }
 0x667   : > { %v15658_v54 = vcombine.high %v3575_v57, %v3579_v0 }
 0x668   : > { %3951 = vmatpush1.bf16.msra.mxu0 %v15685_v1  ;;  %3992 = vmatpush1.bf16.msra.mxu1 %v15687_v3  ;;  %v3576_v1 = vld [vmem:[%s19262_s13 + $0x6d8] sm:$0xff] }
 0x669   : > { %4018 = vmatprep.subr.bf16.mxu0 %v15634_v4  ;;  %4059 = vmatprep.subr.bf16.mxu1 %v15636_v5  ;;  %v3580_v3 = vld [vmem:[%s19262_s13 + $0x6f8] sm:$0xff] }
 0x66a   : > { %v3584_v4 = vld [vmem:[%s19262_s13 + $0x718] sm:$0xff] }
 0x66b   : > { %v3588_v5 = vld [vmem:[%s19262_s13 + $0x738] sm:$0xff] }
 0x71d   : > { %v3457_v6 = vpop.f32.mrb[20].mxu0  ;;  %v3498_v58 = vpop.f32.mrb[20].mxu1 }
 0x71e   : > { %v3509_v59 = vrot.slane %v3457_v6, 2  ;;  %v3459_v60 = vpop.f32.mrb[21].mxu0  ;;  %v3500_v62 = vpop.f32.mrb[21].mxu1  ;;  %v3511_v18 = vrot.slane %v3498_v58, 2  ;;  %v15657_v6 = vcombine.low %v3575_v57, %v3579_v0  ;;  %v15659_v58 = vcombine.low %v3576_v1, %v3580_v3  ;;  %v20044_v57 = vld [vmem:[#allocation9 + $0x88] ss:$16 sps:$4 sm:$0xff]  }
 0x71f   : > { %v3510_v63 = vrot.slane %v3459_v60, 2  ;;  %v3461_v2 = vpop.f32.mrb[22].mxu0  ;;  %v3502_v7 = vpop.f32.mrb[22].mxu1  ;;  %v3512_v19 = vrot.slane %v3500_v62, 2  ;;  %v15668_v60 = vcombine.high %v3584_v4, %v3588_v5  ;;  %v3591_v62 = vld [vmem:[%s19262_s13 + $0x750] sm:$0xff] }
 0x720   : > { %v3517_v8 = vadd.f32 %v19784_v41, %v3509_v59  ;;  %v3462_v9 = vpop.f32.mrb[23].mxu0  ;;  %v3503_v10 = vpop.f32.mrb[23].mxu1  ;;  %v3519_v20 = vadd.f32 %v19792_v29, %v3511_v18  ;;  %v3541_v29 = vrot.slane %v19800_v47, 6  ;;  %v3564_v47 = vld [vmem:[%s19262_s13 + $0x678] sm:$0xff]  ;;  %v20047_v0 = vld [vmem:[#allocation9 + $0xa4] ss:$16 sps:$4 sm:$0xff]  }
 0x721   : > { %v3518_v11 = vadd.f32 %v19788_v46, %v3510_v63  ;;  %v3520_v21 = vadd.f32 %v19796_v51, %v3512_v19  ;;  %v15644_v28 = vcombine.high %v3560_v22, %v3564_v47  ;;  %v15643_v25 = vcombine.low %v3560_v22, %v3564_v47  ;;  %v3595_v63 = vld [vmem:[%s19262_s13 + $0x770] sm:$0xff]  ;;  %v3592_v2 = vld [vmem:[%s19262_s13 + $0x758] sm:$0xff] }
 0x722   : > { %v15626_v12 = vmul.f32 -1.442695, %v3517_v8  ;;  %v15628_v35 = vmul.f32 -1.442695, %v3519_v20  ;;  %v3596_v7 = vld [vmem:[%s19262_s13 + $0x778] sm:$0xff]  ;;  %v15667_v9 = vcombine.low %v3584_v4, %v3588_v5  ;;  %v15674_v10 = vcombine.high %v3591_v62, %v3595_v63 }
 0x723   : > { %v15627_v17 = vmul.f32 -1.442695, %v3518_v11  ;;  %v15676_v11 = vcombine.high %v3592_v2, %v3596_v7  ;;  %v3600_v18 = vld [vmem:[%s19262_s13 + $0x798] sm:$0xff]  ;;  %v15673_v20 = vcombine.low %v3591_v62, %v3595_v63  ;;  %v20008_v47 = vld [vmem:[#allocation9 + $0x28] ss:$16 sps:$4 sm:$0xff]   ;;  %v4227_v63 = vld [vmem:[%s19262_s13 + $0x828] sm:$0xff] }
 0x724   : > { %17470 = vpow2.f32 %v15626_v12  ;;  %v3599_v12 = vld [vmem:[%s19262_s13 + $0x790] sm:$0xff]  ;;  %v3604_v19 = vld [vmem:[%s19262_s13 + $0x7b8] sm:$0xff] }
 0x725   : > { %17472 = vpow2.f32 %v15627_v17  ;;  %v3603_v17 = vld [vmem:[%s19262_s13 + $0x7b0] sm:$0xff]  ;;  %v20005_v22 = vld [vmem:[#allocation9 + $0x20] ss:$16 sps:$4 sm:$0xff]   ;;  %v20074_v4 = vld [vmem:[#allocation9 + $0xec] ss:$16 sps:$4 sm:$0xff]  }
 0x726   : > { %17474 = vtanh.f32 %v3520_v21  ;;  %v15675_v21 = vcombine.low %v3592_v2, %v3596_v7  ;;  %v20077_v5 = vld [vmem:[#allocation9 + $0xe0] ss:$16 sps:$4 sm:$0xff]  }
 0x727   : > { %17476 = vpow2.f32 %v15628_v35  ;;  %v15682_v35 = vcombine.high %v3599_v12, %v3603_v17 }
 0x72e   : > { %v17471_v37 = vpop.eup %17470 }
 0x72f   : > { %v3530_v24 = vadd.f32 1.0, %v17471_v37  ;;  %v17473_v38 = vpop.eup %17472  ;;  %v15684_v37 = vcombine.high %v3600_v18, %v3604_v19 }
 0x730   : > { %v3531_v41 = vadd.f32 1.0, %v17473_v38  ;;  %v17475_v46 = vpop.eup %17474  ;;  %v3611_v38 = vld [vmem:[%s19262_s13 + $0x7f0] sm:$0xff] }
 0x731   : > { %17478 = vrcp.f32 %v3530_v24  ;;  %v17477_v34 = vpop.eup %17476  ;;  %v3607_v24 = vld [vmem:[%s19262_s13 + $0x7d0] sm:$0xff] }
 0x732   : > { %17480 = vrcp.f32 %v3531_v41  ;;  %v3532_v42 = vadd.f32 1.0, %v17477_v34  ;;  %v3608_v41 = vld [vmem:[%s19262_s13 + $0x7d8] sm:$0xff]  ;;  %v15681_v34 = vcombine.low %v3599_v12, %v3603_v17  ;;  %v4235_v12 = vld [vmem:[%s19262_s13 + $0x868] sm:$0xff] }
 0x734   : > { %17482 = vrcp.f32 %v3532_v42 }
 0x73b   : > { %v17479_v39 = vpop.eup %17478 }
 0x73c   : > { %v3544_v40 = vmul.f32 %v17479_v39, %v17475_v46  ;;  %v17481_v51 = vpop.eup %17480  ;;  %v3612_v46 = vld [vmem:[%s19262_s13 + $0x7f8] sm:$0xff]  ;;  %v15683_v39 = vcombine.low %v3600_v18, %v3604_v19 }
 0x73d   : > { %v3543_v44 = vmul.f32 %v17481_v51, %v3541_v29  ;;  %v15690_v29 = vcombine.high %v3607_v24, %v3611_v38  ;;  %v15689_v51 = vcombine.low %v3607_v24, %v3611_v38  ;;  %v15691_v42 = vcombine.low %v3608_v41, %v3612_v46  ;;  %v4243_v24 = vld [vmem:[%s19262_s13 + $0x8a8] sm:$0xff] }
 0x73e   : > { %v17483_v48 = vpop.eup %17482 }
 0x73f   : > { %v19940_v45 = vadd.f32 %v3544_v40, %v3543_v44  ;;  %v15692_v40 = vcombine.high %v3608_v41, %v3612_v46  ;;  %v19983_v44 = vld [vmem:[#allocation9 + $0x4] ss:$16 sps:$4 sm:$0xff]  }
 0x741   : > { %17484 = vtanh.f32 %v19940_v45 }
 0x74b   : > { %v17485_v49 = vpop.eup %17484 }
 0x74c   : > { %v3547_v23 = vmul.f32 %v17485_v49, %v17483_v48  ;;  %v19986_v48 = vld [vmem:[#allocation9 + $0xc] ss:$16 sps:$4 sm:$0xff]   ;;  %v19991_v49 = vld [vmem:[#allocation9] ss:$16 sps:$4 sm:$0xff]  }
 0x74e   : > { %v3548_v26 = vpack.c.bf16 %v3547_v23, %v3547_v23  ;;  %v19994_v23 = vld [vmem:[#allocation9 + $0x8] ss:$16 sps:$4 sm:$0xff]  }
 0x750   : > { %v19947_v27 = vrot.slane %v3548_v26, 3  ;;  %v20011_v26 = vld [vmem:[#allocation9 + $0x44] ss:$16 sps:$4 sm:$0xff]  }
 0x752   : > { %3969 = vmatmul.mubr.bf16.vlgmr.msra.gmra.mrb[8].mxu0 %v19947_v27  ;;  %4010 = vmatmul.mubr.bf16.vlgmr.msra.gmra.mrb[8].mxu1 %v19947_v27 }
 0x753   : > { %4019 = vmatpush1.bf16.msra.mxu0 %v15633_v16  ;;  %4060 = vmatpush1.bf16.msra.mxu1 %v15635_v61  ;;  %v15660_v16 = vcombine.high %v3576_v1, %v3580_v3  ;;  %v3587_v61 = vld [vmem:[%s19262_s13 + $0x730] sm:$0xff]  ;;  %v20050_v1 = vld [vmem:[#allocation9 + $0xac] ss:$16 sps:$4 sm:$0xff]   ;;  %v20053_v3 = vld [vmem:[#allocation9 + $0xa0] ss:$16 sps:$4 sm:$0xff]  }
 0x754   : > { %4020 = vmatprep.subr.bf16.mxu0 %v15642_v30  ;;  %4061 = vmatprep.subr.bf16.mxu1 %v15644_v28  ;;  %v15666_v59 = vcombine.high %v3583_v55, %v3587_v61  ;;  %v15665_v8 = vcombine.low %v3583_v55, %v3587_v61  ;;  %v20014_v30 = vld [vmem:[#allocation9 + $0x4c] ss:$16 sps:$4 sm:$0xff]   ;;  %v20017_v28 = vld [vmem:[#allocation9 + $0x40] ss:$16 sps:$4 sm:$0xff]   ;;  %v20068_v55 = vld [vmem:[#allocation9 + $0xc8] ss:$16 sps:$4 sm:$0xff]  }
 0x755   : > { %4050 = vmatprep.mubr.bf16.mxu0 %v18868_v13  ;;  %4091 = vmatprep.mubr.bf16.mxu1 %v18868_v13  ;;  %v20071_v61 = vld [vmem:[#allocation9 + $0xe4] ss:$16 sps:$4 sm:$0xff]  }
 0x757   : > { %4021 = vmatpush1.bf16.msra.mxu0 %v15641_v36  ;;  %4062 = vmatpush1.bf16.msra.mxu1 %v15643_v25  ;;  %v20032_v36 = vld [vmem:[#allocation9 + $0x68] ss:$16 sps:$4 sm:$0xff]   ;;  %v20035_v25 = vld [vmem:[#allocation9 + $0x84] ss:$16 sps:$4 sm:$0xff]  }
 0x758   : > { %4022 = vmatprep.subr.bf16.mxu0 %v15650_v15  ;;  %4063 = vmatprep.subr.bf16.mxu1 %v15652_v56  ;;  %v20038_v15 = vld [vmem:[#allocation9 + $0x8c] ss:$16 sps:$4 sm:$0xff]   ;;  %v20041_v56 = vld [vmem:[#allocation9 + $0x80] ss:$16 sps:$4 sm:$0xff]  }
 0x75b   : > { %4023 = vmatpush1.bf16.msra.mxu0 %v15649_v52  ;;  %4064 = vmatpush1.bf16.msra.mxu1 %v15651_v53  ;;  %v20056_v52 = vld [vmem:[#allocation9 + $0xa8] ss:$16 sps:$4 sm:$0xff]   ;;  %v20059_v53 = vld [vmem:[#allocation9 + $0xc4] ss:$16 sps:$4 sm:$0xff]  }
 0x75c   : > { %4024 = vmatprep.subr.bf16.mxu0 %v15658_v54  ;;  %4065 = vmatprep.subr.bf16.mxu1 %v15660_v16  ;;  %v20062_v54 = vld [vmem:[#allocation9 + $0xcc] ss:$16 sps:$4 sm:$0xff]   ;;  %v20065_v16 = vld [vmem:[#allocation9 + $0xc0] ss:$16 sps:$4 sm:$0xff]  }
 0x75f   : > { %4025 = vmatpush1.bf16.msra.mxu0 %v15657_v6  ;;  %4066 = vmatpush1.bf16.msra.mxu1 %v15659_v58  ;;  %v20080_v6 = vld [vmem:[#allocation9 + $0xe8] ss:$16 sps:$4 sm:$0xff]  }
 0x760   : > { %4026 = vmatprep.subr.bf16.mxu0 %v15666_v59  ;;  %4067 = vmatprep.subr.bf16.mxu1 %v15668_v60  ;;  %v4222_v58 = vld [vmem:[%s19262_s13 + $0x800] sm:$0xff]  ;;  %v4223_v60 = vld [vmem:[%s19262_s13 + $0x808] sm:$0xff] }
 0x761   : > { %v4226_v59 = vld [vmem:[%s19262_s13 + $0x820] sm:$0xff]  ;;  %v15698_v7 = vcombine.low %v4223_v60, %v4227_v63 }
 0x762   : > { %v15697_v62 = vcombine.high %v4222_v58, %v4226_v59  ;;  %v15696_v2 = vcombine.low %v4222_v58, %v4226_v59 }
 0x763   : > { %4027 = vmatpush1.bf16.msra.mxu0 %v15665_v8  ;;  %4068 = vmatpush1.bf16.msra.mxu1 %v15667_v9  ;;  %v15699_v8 = vcombine.high %v4223_v60, %v4227_v63  ;;  %v4234_v9 = vld [vmem:[%s19262_s13 + $0x860] sm:$0xff]  ;;  %v4255_v63 = vld [vmem:[%s19262_s13 + $0x908] sm:$0xff] }
 0x764   : > { %4028 = vmatprep.subr.bf16.mxu0 %v15674_v10  ;;  %4069 = vmatprep.subr.bf16.mxu1 %v15676_v11  ;;  %v4231_v10 = vld [vmem:[%s19262_s13 + $0x848] sm:$0xff]  ;;  %v4254_v60 = vld [vmem:[%s19262_s13 + $0x900] sm:$0xff] }
 0x765   : > { %v15706_v18 = vcombine.low %v4231_v10, %v4235_v12  ;;  %v15707_v19 = vcombine.high %v4231_v10, %v4235_v12  ;;  %v4262_v10 = vld [vmem:[%s19262_s13 + $0x940] sm:$0xff]  ;;  %v4263_v12 = vld [vmem:[%s19262_s13 + $0x948] sm:$0xff] }
 0x767   : > { %4029 = vmatpush1.bf16.msra.mxu0 %v15673_v20  ;;  %4070 = vmatpush1.bf16.msra.mxu1 %v15675_v21  ;;  %v4238_v20 = vld [vmem:[%s19262_s13 + $0x880] sm:$0xff] }
 0x768   : > { %4030 = vmatprep.subr.bf16.mxu0 %v15682_v35  ;;  %4071 = vmatprep.subr.bf16.mxu1 %v15684_v37  ;;  %v4242_v21 = vld [vmem:[%s19262_s13 + $0x8a0] sm:$0xff]  ;;  %v4239_v35 = vld [vmem:[%s19262_s13 + $0x888] sm:$0xff] }
 0x769   : > { %v15713_v37 = vcombine.high %v4238_v20, %v4242_v21  ;;  %v15712_v38 = vcombine.low %v4238_v20, %v4242_v21  ;;  %v15714_v41 = vcombine.low %v4239_v35, %v4243_v24  ;;  %v15715_v46 = vcombine.high %v4239_v35, %v4243_v24  ;;  %v4270_v20 = vld [vmem:[%s19262_s13 + $0x980] sm:$0xff] }
 0x76a   : > { %v4274_v21 = vld [vmem:[%s19262_s13 + $0x9a0] sm:$0xff] }
 0x76b   : > { %4031 = vmatpush1.bf16.msra.mxu0 %v15681_v34  ;;  %4072 = vmatpush1.bf16.msra.mxu1 %v15683_v39  ;;  %v4246_v34 = vld [vmem:[%s19262_s13 + $0x8c0] sm:$0xff]  ;;  %v15745_v24 = vcombine.high %v4270_v20, %v4274_v21 }
 0x76c   : > { %4032 = vmatprep.subr.bf16.mxu0 %v15690_v29  ;;  %4073 = vmatprep.subr.bf16.mxu1 %v15692_v40  ;;  %v4250_v39 = vld [vmem:[%s19262_s13 + $0x8e0] sm:$0xff]  ;;  %v4247_v29 = vld [vmem:[%s19262_s13 + $0x8c8] sm:$0xff] }
 0x76d   : > { %v15721_v40 = vcombine.high %v4246_v34, %v4250_v39 }
 0x76f   : > { %4033 = vmatpush1.bf16.msra.mxu0 %v15689_v51  ;;  %4074 = vmatpush1.bf16.msra.mxu1 %v15691_v42  ;;  %v4251_v51 = vld [vmem:[%s19262_s13 + $0x8e8] sm:$0xff]  ;;  %v15720_v42 = vcombine.low %v4246_v34, %v4250_v39  ;;  %v4282_v39 = vld [vmem:[%s19262_s13 + $0x9e0] sm:$0xff] }
 0x770   : > { %4108 = vmatprep.subr.bf16.mxu0 %v19983_v44  ;;  %4149 = vmatprep.subr.bf16.mxu1 %v19986_v48  ;;  %v15722_v58 = vcombine.low %v4247_v29, %v4251_v51  ;;  %v15723_v59 = vcombine.high %v4247_v29, %v4251_v51  ;;  %v4279_v29 = vld [vmem:[%s19262_s13 + $0x9c8] sm:$0xff]  ;;  %v15744_v51 = vcombine.low %v4270_v20, %v4274_v21 }
 0x772   : > { %4051 = vmatmul.mubr.bf16.vlgmr.msra.gmra.mrb[12].mxu0 %v19947_v27  ;;  %4092 = vmatmul.mubr.bf16.vlgmr.msra.gmra.mrb[12].mxu1 %v19947_v27 }
 0x773   : > { %4109 = vmatpush1.bf16.msra.mxu0 %v19991_v49  ;;  %4150 = vmatpush1.bf16.msra.mxu1 %v19994_v23 }
 0x774   : > { %4110 = vmatprep.subr.bf16.mxu0 %v19997_v14  ;;  %4151 = vmatprep.subr.bf16.mxu1 %v20000_v50 }
 0x775   : > { %4140 = vmatprep.mubr.bf16.mxu0 %v18868_v13  ;;  %4181 = vmatprep.mubr.bf16.mxu1 %v18868_v13 }
 0x777   : > { %4111 = vmatpush1.bf16.msra.mxu0 %v20005_v22  ;;  %4152 = vmatpush1.bf16.msra.mxu1 %v20008_v47 }
 0x778   : > { %4112 = vmatprep.subr.bf16.mxu0 %v20011_v26  ;;  %4153 = vmatprep.subr.bf16.mxu1 %v20014_v30 }
 0x77b   : > { %4113 = vmatpush1.bf16.msra.mxu0 %v20017_v28  ;;  %4154 = vmatpush1.bf16.msra.mxu1 %v20020_v31 }
 0x77c   : > { %4114 = vmatprep.subr.bf16.mxu0 %v20023_v32  ;;  %4155 = vmatprep.subr.bf16.mxu1 %v20026_v43 }
 0x77f   : > { %4115 = vmatpush1.bf16.msra.mxu0 %v20029_v33  ;;  %4156 = vmatpush1.bf16.msra.mxu1 %v20032_v36 }
 0x780   : > { %4116 = vmatprep.subr.bf16.mxu0 %v20035_v25  ;;  %4157 = vmatprep.subr.bf16.mxu1 %v20038_v15 }
 0x783   : > { %4117 = vmatpush1.bf16.msra.mxu0 %v20041_v56  ;;  %4158 = vmatpush1.bf16.msra.mxu1 %v20044_v57 }
 0x784   : > { %4118 = vmatprep.subr.bf16.mxu0 %v20047_v0  ;;  %4159 = vmatprep.subr.bf16.mxu1 %v20050_v1 }
 0x787   : > { %4119 = vmatpush1.bf16.msra.mxu0 %v20053_v3  ;;  %4160 = vmatpush1.bf16.msra.mxu1 %v20056_v52 }
 0x788   : > { %4120 = vmatprep.subr.bf16.mxu0 %v20059_v53  ;;  %4161 = vmatprep.subr.bf16.mxu1 %v20062_v54 }
 0x78b   : > { %4121 = vmatpush1.bf16.msra.mxu0 %v20065_v16  ;;  %4162 = vmatpush1.bf16.msra.mxu1 %v20068_v55 }
 0x78c   : > { %4122 = vmatprep.subr.bf16.mxu0 %v20071_v61  ;;  %4163 = vmatprep.subr.bf16.mxu1 %v20074_v4 }
 0x78f   : > { %4123 = vmatpush1.bf16.msra.mxu0 %v20077_v5  ;;  %4164 = vmatpush1.bf16.msra.mxu1 %v20080_v6 }
 0x790   : > { %4606 = vmatprep.subr.bf16.mxu0 %v15697_v62  ;;  %4647 = vmatprep.subr.bf16.mxu1 %v15699_v8  ;;  %v4258_v62 = vld [vmem:[%s19262_s13 + $0x920] sm:$0xff] }
 0x791   : > { %v15728_v8 = vcombine.low %v4254_v60, %v4258_v62 }
 0x792   : > { %4141 = vmatmul.mubr.bf16.vlgmr.msra.gmra.mrb[24].mxu0 %v19947_v27  ;;  %4182 = vmatmul.mubr.bf16.vlgmr.msra.gmra.mrb[24].mxu1 %v19947_v27  ;;  %v4230_v27 = vld [vmem:[%s19262_s13 + $0x840] sm:$0xff] }
 0x793   : > { %4638 = vmatprep.mubr.bf16.mxu0 %v18868_v13  ;;  %4679 = vmatprep.mubr.bf16.mxu1 %v18868_v13  ;;  %v15705_v11 = vcombine.high %v4230_v27, %v4234_v9  ;;  %v15704_v17 = vcombine.low %v4230_v27, %v4234_v9 }
 0x794   : > { %4607 = vmatpush1.bf16.msra.mxu0 %v15696_v2  ;;  %4648 = vmatpush1.bf16.msra.mxu1 %v15698_v7  ;;  %v15729_v2 = vcombine.high %v4254_v60, %v4258_v62  ;;  %v4259_v7 = vld [vmem:[%s19262_s13 + $0x928] sm:$0xff] }
 0x795   : > { %4608 = vmatprep.subr.bf16.mxu0 %v15705_v11  ;;  %4649 = vmatprep.subr.bf16.mxu1 %v15707_v19  ;;  %v15730_v27 = vcombine.low %v4255_v63, %v4259_v7  ;;  %v15731_v9 = vcombine.high %v4255_v63, %v4259_v7  ;;  %v4266_v11 = vld [vmem:[%s19262_s13 + $0x960] sm:$0xff]  ;;  %v4267_v19 = vld [vmem:[%s19262_s13 + $0x968] sm:$0xff] }
 0x796   : > { %v15738_v35 = vcombine.low %v4263_v12, %v4267_v19 }
 0x798   : > { %4609 = vmatpush1.bf16.msra.mxu0 %v15704_v17  ;;  %4650 = vmatpush1.bf16.msra.mxu1 %v15706_v18  ;;  %v15736_v17 = vcombine.low %v4262_v10, %v4266_v11  ;;  %v15737_v18 = vcombine.high %v4262_v10, %v4266_v11 }
 0x799   : > { %4610 = vmatprep.subr.bf16.mxu0 %v15713_v37  ;;  %4651 = vmatprep.subr.bf16.mxu1 %v15715_v46  ;;  %v15739_v37 = vcombine.high %v4263_v12, %v4267_v19  ;;  %v4278_v46 = vld [vmem:[%s19262_s13 + $0x9c0] sm:$0xff]  ;;  %v20140_v12 = vld [vmem:[%s19428_s24 + $0x20] sm:$0xff] }
 0x79a   : > { %v15753_v62 = vcombine.high %v4278_v46, %v4282_v39 }
 0x79c   : > { %4611 = vmatpush1.bf16.msra.mxu0 %v15712_v38  ;;  %4652 = vmatpush1.bf16.msra.mxu1 %v15714_v41  ;;  %v4271_v38 = vld [vmem:[%s19262_s13 + $0x988] sm:$0xff] }
 0x79d   : > { %4612 = vmatprep.subr.bf16.mxu0 %v15721_v40  ;;  %4653 = vmatprep.subr.bf16.mxu1 %v15723_v59  ;;  %v4275_v41 = vld [vmem:[%s19262_s13 + $0x9a8] sm:$0xff]  ;;  %v20126_v59 = vld [vmem:[%s19262_s13 + $0x818] sm:$0xff] }
 0x79e   : > { %v15747_v34 = vcombine.high %v4271_v38, %v4275_v41  ;;  %v4283_v40 = vld [vmem:[%s19262_s13 + $0x9e8] sm:$0xff]  ;;  %v15746_v60 = vcombine.low %v4271_v38, %v4275_v41 }
 0x79f   : > { %v15755_v7 = vcombine.high %v4279_v29, %v4283_v40 }
 0x7a0   : > { %4613 = vmatpush1.bf16.msra.mxu0 %v15720_v42  ;;  %4654 = vmatpush1.bf16.msra.mxu1 %v15722_v58  ;;  %v20120_v42 = vld [vmem:[%s19262_s13 + $0x810] sm:$0xff] }
 0x7a1   : > { %4614 = vmatprep.subr.bf16.mxu0 %v15729_v2  ;;  %4655 = vmatprep.subr.bf16.mxu1 %v15731_v9  ;;  %v20123_v58 = vld [vmem:[%s19262_s13 + $0x830] sm:$0xff]  ;;  %v20131_v2 = vld [vmem:[%s19262_s13 + $0x838] sm:$0xff]  ;;  %v15754_v9 = vcombine.low %v4279_v29, %v4283_v40  ;;  %v20148_v29 = vld [vmem:[%s19428_s24 + $0x30] sm:$0xff] }
 0x7a2   : > { %v15700_v63 = vcombine.low %v20120_v42, %v20123_v58  ;;  %v15701_v10 = vcombine.high %v20120_v42, %v20123_v58  ;;  %v15703_v11 = vcombine.high %v20126_v59, %v20131_v2 }
 0x7a4   : > { %4615 = vmatpush1.bf16.msra.mxu0 %v15728_v8  ;;  %4656 = vmatpush1.bf16.msra.mxu1 %v15730_v27  ;;  %v15702_v8 = vcombine.low %v20126_v59, %v20131_v2  ;;  %v15752_v27 = vcombine.low %v4278_v46, %v4282_v39  ;;  %v4256_v2 = vld [vmem:[%s19262_s13 + $0x910] sm:$0xff] }
 0x7a5   : > { %4616 = vmatprep.subr.bf16.mxu0 %v15737_v18  ;;  %4657 = vmatprep.subr.bf16.mxu1 %v15739_v37 }
 0x7a8   : > { %4617 = vmatpush1.bf16.msra.mxu0 %v15736_v17  ;;  %4658 = vmatpush1.bf16.msra.mxu1 %v15738_v35  ;;  %v20143_v17 = vld [vmem:[%s19428_s24 + $0x28] sm:$0xff] }
 0x7a9   : > { %4618 = vmatprep.subr.bf16.mxu0 %v15745_v24  ;;  %4659 = vmatprep.subr.bf16.mxu1 %v15747_v34 }
 0x7ac   : > { %4619 = vmatpush1.bf16.msra.mxu0 %v15744_v51  ;;  %4660 = vmatpush1.bf16.msra.mxu1 %v15746_v60  ;;  %v20152_v51 = vld [vmem:[%s19428_s24 + $0x38] sm:$0xff] }
 0x7ad   : > { %4620 = vmatprep.subr.bf16.mxu0 %v15753_v62  ;;  %4661 = vmatprep.subr.bf16.mxu1 %v15755_v7 }
 0x7b0   : > { %4621 = vmatpush1.bf16.msra.mxu0 %v15752_v27  ;;  %4662 = vmatpush1.bf16.msra.mxu1 %v15754_v9 }
 0x7b1   : > { %4688 = vmatprep.subr.bf16.mxu0 %v15701_v10  ;;  %4729 = vmatprep.subr.bf16.mxu1 %v15703_v11 }
 0x865   : > { %v4142_v18 = vpop.f32.mrb[24].mxu0  ;;  %v4183_v19 = vpop.f32.mrb[24].mxu1 }
 0x866   : > { %v4190_v20 = vadd.f32 %v4142_v18, %v20140_v12  ;;  %v4144_v21 = vpop.f32.mrb[25].mxu0  ;;  %v4185_v35 = vpop.f32.mrb[25].mxu1  ;;  %v4192_v40 = vadd.f32 %v4183_v19, %v20148_v29 }
 0x867   : > { %v4191_v37 = vadd.f32 %v4144_v21, %v20143_v17  ;;  %v4146_v24 = vpop.f32.mrb[26].mxu0  ;;  %v4187_v38 = vpop.f32.mrb[26].mxu1  ;;  %v4193_v60 = vadd.f32 %v4185_v35, %v20152_v51 }
 0x868   : > { %v15693_v41 = vmul.f32 -1.442695, %v4190_v20  ;;  %v4147_v46 = vpop.f32.mrb[27].mxu0  ;;  %v4188_v34 = vpop.f32.mrb[27].mxu1  ;;  %v15695_v62 = vmul.f32 -1.442695, %v4192_v40 }
 0x869   : > { %v15694_v39 = vmul.f32 -1.442695, %v4191_v37  ;;  %v4214_v20 = vrot.slane %v19940_v45, 6  ;;  %v4232_v46 = vld [vmem:[%s19262_s13 + $0x850] sm:$0xff]  ;;  %v4233_v40 = vld [vmem:[%s19262_s13 + $0x858] sm:$0xff] }
 0x86a   : > { %17486 = vpow2.f32 %v15693_v41 }
 0x86b   : > { %17488 = vpow2.f32 %v15694_v39  ;;  %v4236_v39 = vld [vmem:[%s19262_s13 + $0x870] sm:$0xff] }
 0x86c   : > { %17490 = vtanh.f32 %v4193_v60  ;;  %v4237_v60 = vld [vmem:[%s19262_s13 + $0x878] sm:$0xff] }
 0x86d   : > { %17492 = vpow2.f32 %v15695_v62 }
 0x874   : > { %v17487_v7 = vpop.eup %17486 }
 0x875   : > { %v4203_v27 = vadd.f32 1.0, %v17487_v7  ;;  %v17489_v9 = vpop.eup %17488  ;;  %v15709_v7 = vcombine.high %v4232_v46, %v4236_v39 }
 0x876   : > { %v4204_v10 = vadd.f32 1.0, %v17489_v9  ;;  %v17491_v11 = vpop.eup %17490  ;;  %v4240_v9 = vld [vmem:[%s19262_s13 + $0x890] sm:$0xff] }
 0x877   : > { %17494 = vrcp.f32 %v4203_v27  ;;  %v17493_v18 = vpop.eup %17492  ;;  %v15711_v27 = vcombine.high %v4233_v40, %v4237_v60 }
 0x878   : > { %17496 = vrcp.f32 %v4204_v10  ;;  %v4205_v37 = vadd.f32 1.0, %v17493_v18  ;;  %v4244_v10 = vld [vmem:[%s19262_s13 + $0x8b0] sm:$0xff]  ;;  %v4245_v18 = vld [vmem:[%s19262_s13 + $0x8b8] sm:$0xff] }
 0x879   : > { %v15716_v42 = vcombine.low %v4240_v9, %v4244_v10 }
 0x87a   : > { %17498 = vrcp.f32 %v4205_v37  ;;  %v4248_v37 = vld [vmem:[%s19262_s13 + $0x8d0] sm:$0xff] }
 0x881   : > { %v17495_v19 = vpop.eup %17494 }
 0x882   : > { %v4217_v21 = vmul.f32 %v17495_v19, %v17491_v11  ;;  %v17497_v35 = vpop.eup %17496  ;;  %v4241_v11 = vld [vmem:[%s19262_s13 + $0x898] sm:$0xff]  ;;  %v15708_v19 = vcombine.low %v4232_v46, %v4236_v39 }
 0x883   : > { %v4216_v24 = vmul.f32 %v17497_v35, %v4214_v20  ;;  %v15710_v20 = vcombine.low %v4233_v40, %v4237_v60  ;;  %v15719_v35 = vcombine.high %v4241_v11, %v4245_v18  ;;  %v15718_v58 = vcombine.low %v4241_v11, %v4245_v18  ;;  %v4257_v46 = vld [vmem:[%s19262_s13 + $0x918] sm:$0xff] }
 0x884   : > { %v17499_v41 = vpop.eup %17498  ;;  %v4261_v39 = vld [vmem:[%s19262_s13 + $0x938] sm:$0xff] }
 0x885   : > { %v20156_v38 = vadd.f32 %v4217_v21, %v4216_v24  ;;  %v15717_v21 = vcombine.high %v4240_v9, %v4244_v10  ;;  %v4252_v24 = vld [vmem:[%s19262_s13 + $0x8f0] sm:$0xff]  ;;  %v4265_v10 = vld [vmem:[%s19262_s13 + $0x958] sm:$0xff] }
 0x886   : > { %v15725_v59 = vcombine.high %v4248_v37, %v4252_v24  ;;  %v15724_v40 = vcombine.low %v4248_v37, %v4252_v24  ;;  %v4268_v9 = vld [vmem:[%s19262_s13 + $0x970] sm:$0xff]  ;;  %v4269_v11 = vld [vmem:[%s19262_s13 + $0x978] sm:$0xff] }
 0x887   : > { %17500 = vtanh.f32 %v20156_v38  ;;  %v4276_v37 = vld [vmem:[%s19262_s13 + $0x9b0] sm:$0xff]  ;;  %v4273_v24 = vld [vmem:[%s19262_s13 + $0x998] sm:$0xff] }
 0x891   : > { %v17501_v34 = vpop.eup %17500 }
 0x892   : > { %v4220_v45 = vmul.f32 %v17501_v34, %v17499_v41  ;;  %v4249_v41 = vld [vmem:[%s19262_s13 + $0x8d8] sm:$0xff] }
 0x893   : > { %v4253_v34 = vld [vmem:[%s19262_s13 + $0x8f8] sm:$0xff] }
 0x894   : > { %v20163_v62 = vpack.c.bf16 %v4220_v45, %v4220_v45  ;;  %v15726_v60 = vcombine.low %v4249_v41, %v4253_v34 }
 0x896   : > { %4639 = vmatmul.mubr.bf16.vlgmr.msra.gmra.mrb[8].mxu0 %v20163_v62  ;;  %4680 = vmatmul.mubr.bf16.vlgmr.msra.gmra.mrb[8].mxu1 %v20163_v62 }
 0x897   : > { %4689 = vmatpush1.bf16.msra.mxu0 %v15700_v63  ;;  %4730 = vmatpush1.bf16.msra.mxu1 %v15702_v8  ;;  %v15727_v63 = vcombine.high %v4249_v41, %v4253_v34  ;;  %v4260_v8 = vld [vmem:[%s19262_s13 + $0x930] sm:$0xff]  ;;  %v4277_v41 = vld [vmem:[%s19262_s13 + $0x9b8] sm:$0xff] }
 0x898   : > { %4690 = vmatprep.subr.bf16.mxu0 %v15709_v7  ;;  %4731 = vmatprep.subr.bf16.mxu1 %v15711_v27  ;;  %v15733_v45 = vcombine.high %v4256_v2, %v4260_v8  ;;  %v15735_v7 = vcombine.high %v4257_v46, %v4261_v39  ;;  %v4264_v27 = vld [vmem:[%s19262_s13 + $0x950] sm:$0xff]  ;;  %v15732_v18 = vcombine.low %v4256_v2, %v4260_v8  ;;  %v4281_v8 = vld [vmem:[%s19262_s13 + $0x9d8] sm:$0xff] }
 0x899   : > { %4720 = vmatprep.mubr.bf16.mxu0 %v18868_v13  ;;  %4761 = vmatprep.mubr.bf16.mxu1 %v18868_v13  ;;  %v15740_v34 = vcombine.low %v4264_v27, %v4268_v9  ;;  %v4284_v2 = vld [vmem:[%s19262_s13 + $0x9f0] sm:$0xff] }
 0x89b   : > { %4691 = vmatpush1.bf16.msra.mxu0 %v15708_v19  ;;  %4732 = vmatpush1.bf16.msra.mxu1 %v15710_v20  ;;  %v15734_v19 = vcombine.low %v4257_v46, %v4261_v39  ;;  %v15741_v20 = vcombine.high %v4264_v27, %v4268_v9  ;;  %v4285_v46 = vld [vmem:[%s19262_s13 + $0x9f8] sm:$0xff]  ;;  %v4940_v9 = vld [vmem:[%s19262_s13 + $0xb20] sm:$0xff] }
 0x89c   : > { %4692 = vmatprep.subr.bf16.mxu0 %v15717_v21  ;;  %4733 = vmatprep.subr.bf16.mxu1 %v15719_v35  ;;  %v15743_v21 = vcombine.high %v4265_v10, %v4269_v11  ;;  %v4272_v35 = vld [vmem:[%s19262_s13 + $0x990] sm:$0xff]  ;;  %v15758_v27 = vcombine.low %v4281_v8, %v4285_v46 }
 0x89d   : > { %v15748_v39 = vcombine.low %v4272_v35, %v4276_v37 }
 0x89f   : > { %4693 = vmatpush1.bf16.msra.mxu0 %v15716_v42  ;;  %4734 = vmatpush1.bf16.msra.mxu1 %v15718_v58  ;;  %v15742_v42 = vcombine.low %v4265_v10, %v4269_v11  ;;  %v15749_v58 = vcombine.high %v4272_v35, %v4276_v37  ;;  %v4937_v10 = vld [vmem:[%s19262_s13 + $0xb08] sm:$0xff]  ;;  %v4944_v35 = vld [vmem:[%s19262_s13 + $0xb40] sm:$0xff] }
 0x8a0   : > { %4694 = vmatprep.subr.bf16.mxu0 %v15725_v59  ;;  %4735 = vmatprep.subr.bf16.mxu1 %v15727_v63  ;;  %v15751_v59 = vcombine.high %v4273_v24, %v4277_v41  ;;  %v4280_v63 = vld [vmem:[%s19262_s13 + $0x9d0] sm:$0xff]  ;;  %v4948_v37 = vld [vmem:[%s19262_s13 + $0xb60] sm:$0xff] }
 0x8a3   : > { %4695 = vmatpush1.bf16.msra.mxu0 %v15724_v40  ;;  %4736 = vmatpush1.bf16.msra.mxu1 %v15726_v60  ;;  %v15750_v40 = vcombine.low %v4273_v24, %v4277_v41  ;;  %v15757_v60 = vcombine.high %v4280_v63, %v4284_v2  ;;  %v4945_v24 = vld [vmem:[%s19262_s13 + $0xb48] sm:$0xff]  ;;  %v15803_v41 = vcombine.low %v4944_v35, %v4948_v37 }
 0x8a4   : > { %4696 = vmatprep.subr.bf16.mxu0 %v15733_v45  ;;  %4737 = vmatprep.subr.bf16.mxu1 %v15735_v7  ;;  %v15759_v45 = vcombine.high %v4281_v8, %v4285_v46  ;;  %v15756_v7 = vcombine.low %v4280_v63, %v4284_v2  ;;  %v4953_v46 = vld [vmem:[%s19262_s13 + $0xb88] sm:$0xff] }
 0x8a7   : > { %4697 = vmatpush1.bf16.msra.mxu0 %v15732_v18  ;;  %4738 = vmatpush1.bf16.msra.mxu1 %v15734_v19  ;;  %v4941_v18 = vld [vmem:[%s19262_s13 + $0xb28] sm:$0xff] }
 0x8a8   : > { %4698 = vmatprep.subr.bf16.mxu0 %v15741_v20  ;;  %4739 = vmatprep.subr.bf16.mxu1 %v15743_v21  ;;  %v15797_v20 = vcombine.low %v4937_v10, %v4941_v18  ;;  %v15798_v21 = vcombine.high %v4937_v10, %v4941_v18 }
 0x8ab   : > { %4699 = vmatpush1.bf16.msra.mxu0 %v15740_v34  ;;  %4740 = vmatpush1.bf16.msra.mxu1 %v15742_v42  ;;  %v15804_v34 = vcombine.high %v4944_v35, %v4948_v37  ;;  %v4949_v42 = vld [vmem:[%s19262_s13 + $0xb68] sm:$0xff] }
 0x8ac   : > { %4700 = vmatprep.subr.bf16.mxu0 %v15749_v58  ;;  %4741 = vmatprep.subr.bf16.mxu1 %v15751_v59  ;;  %v4952_v58 = vld [vmem:[%s19262_s13 + $0xb80] sm:$0xff]  ;;  %v15805_v63 = vcombine.low %v4945_v24, %v4949_v42  ;;  %v15806_v2 = vcombine.high %v4945_v24, %v4949_v42  ;;  %v4914_v42 = vld [vmem:[%s19262_s13 + $0xa50] sm:$0xff] }
 0x8ad   : > { %v4956_v59 = vld [vmem:[%s19262_s13 + $0xba0] sm:$0xff] }
 0x8ae   : > { %v15812_v8 = vcombine.high %v4952_v58, %v4956_v59 }
 0x8af   : > { %4701 = vmatpush1.bf16.msra.mxu0 %v15748_v39  ;;  %4742 = vmatpush1.bf16.msra.mxu1 %v15750_v40  ;;  %v4957_v39 = vld [vmem:[%s19262_s13 + $0xba8] sm:$0xff]  ;;  %v4960_v40 = vld [vmem:[%s19262_s13 + $0xbc0] sm:$0xff] }
 0x8b0   : > { %4702 = vmatprep.subr.bf16.mxu0 %v15757_v60  ;;  %4743 = vmatprep.subr.bf16.mxu1 %v15759_v45  ;;  %v15814_v60 = vcombine.high %v4953_v46, %v4957_v39  ;;  %v4964_v45 = vld [vmem:[%s19262_s13 + $0xbe0] sm:$0xff] }
 0x8b3   : > { %4703 = vmatpush1.bf16.msra.mxu0 %v15756_v7  ;;  %4744 = vmatpush1.bf16.msra.mxu1 %v15758_v27  ;;  %v4961_v7 = vld [vmem:[%s19262_s13 + $0xbc8] sm:$0xff] }
 0x8b4   : > { %4778 = vmatprep.subr.bf16.mxu0 %v19983_v44  ;;  %4819 = vmatprep.subr.bf16.mxu1 %v19986_v48  ;;  %v4904_v44 = vld [vmem:[%s19262_s13 + $0xa00] sm:$0xff]  ;;  %v4965_v27 = vld [vmem:[%s19262_s13 + $0xbe8] sm:$0xff] }
 0x8b5   : > { %v4908_v48 = vld [vmem:[%s19262_s13 + $0xa20] sm:$0xff] }
 0x8b6   : > { %4721 = vmatmul.mubr.bf16.vlgmr.msra.gmra.mrb[12].mxu0 %v20163_v62  ;;  %4762 = vmatmul.mubr.bf16.vlgmr.msra.gmra.mrb[12].mxu1 %v20163_v62 }
 0x8b7   : > { %4779 = vmatpush1.bf16.msra.mxu0 %v19991_v49  ;;  %4820 = vmatpush1.bf16.msra.mxu1 %v19994_v23  ;;  %v4905_v49 = vld [vmem:[%s19262_s13 + $0xa08] sm:$0xff]  ;;  %v15764_v23 = vcombine.high %v4904_v44, %v4908_v48 }
 0x8b8   : > { %4780 = vmatprep.subr.bf16.mxu0 %v19997_v14  ;;  %4821 = vmatprep.subr.bf16.mxu1 %v20000_v50  ;;  %v4909_v14 = vld [vmem:[%s19262_s13 + $0xa28] sm:$0xff]  ;;  %v15763_v50 = vcombine.low %v4904_v44, %v4908_v48  ;;  %v20272_v44 = vld [vmem:[%s19262_s13 + $0xa10] sm:$0xff] }
 0x8b9   : > { %4810 = vmatprep.mubr.bf16.mxu0 %v18868_v13  ;;  %4851 = vmatprep.mubr.bf16.mxu1 %v18868_v13  ;;  %v20275_v48 = vld [vmem:[%s19262_s13 + $0xa30] sm:$0xff] }
 0x8bb   : > { %4781 = vmatpush1.bf16.msra.mxu0 %v20005_v22  ;;  %4822 = vmatpush1.bf16.msra.mxu1 %v20008_v47  ;;  %v15765_v22 = vcombine.low %v4905_v49, %v4909_v14  ;;  %v15766_v47 = vcombine.high %v4905_v49, %v4909_v14  ;;  %v20278_v49 = vld [vmem:[%s19262_s13 + $0xa18] sm:$0xff]  ;;  %v15767_v14 = vcombine.low %v20272_v44, %v20275_v48 }
 0x8bc   : > { %4782 = vmatprep.subr.bf16.mxu0 %v20011_v26  ;;  %4823 = vmatprep.subr.bf16.mxu1 %v20014_v30  ;;  %v4912_v26 = vld [vmem:[%s19262_s13 + $0xa40] sm:$0xff] }
 0x8bd   : > { %v4916_v30 = vld [vmem:[%s19262_s13 + $0xa60] sm:$0xff] }
 0x8bf   : > { %4783 = vmatpush1.bf16.msra.mxu0 %v20017_v28  ;;  %4824 = vmatpush1.bf16.msra.mxu1 %v20020_v31  ;;  %v4913_v28 = vld [vmem:[%s19262_s13 + $0xa48] sm:$0xff]  ;;  %v15772_v31 = vcombine.high %v4912_v26, %v4916_v30 }
 0x8c0   : > { %4784 = vmatprep.subr.bf16.mxu0 %v20023_v32  ;;  %4825 = vmatprep.subr.bf16.mxu1 %v20026_v43  ;;  %v4917_v32 = vld [vmem:[%s19262_s13 + $0xa68] sm:$0xff]  ;;  %v15771_v43 = vcombine.low %v4912_v26, %v4916_v30  ;;  %v15822_v30 = vcombine.high %v4961_v7, %v4965_v27 }
 0x8c3   : > { %4785 = vmatpush1.bf16.msra.mxu0 %v20029_v33  ;;  %4826 = vmatpush1.bf16.msra.mxu1 %v20032_v36  ;;  %v15773_v33 = vcombine.low %v4913_v28, %v4917_v32  ;;  %v15774_v36 = vcombine.high %v4913_v28, %v4917_v32  ;;  %v15819_v28 = vcombine.low %v4960_v40, %v4964_v45 }
 0x8c4   : > { %4786 = vmatprep.subr.bf16.mxu0 %v20035_v25  ;;  %4827 = vmatprep.subr.bf16.mxu1 %v20038_v15  ;;  %v4920_v25 = vld [vmem:[%s19262_s13 + $0xa80] sm:$0xff]  ;;  %v15768_v32 = vcombine.high %v20272_v44, %v20275_v48 }
 0x8c5   : > { %v4924_v15 = vld [vmem:[%s19262_s13 + $0xaa0] sm:$0xff] }
 0x8c7   : > { %4787 = vmatpush1.bf16.msra.mxu0 %v20041_v56  ;;  %4828 = vmatpush1.bf16.msra.mxu1 %v20044_v57  ;;  %v4921_v56 = vld [vmem:[%s19262_s13 + $0xa88] sm:$0xff]  ;;  %v15780_v57 = vcombine.high %v4920_v25, %v4924_v15 }
 0x8c8   : > { %4788 = vmatprep.subr.bf16.mxu0 %v20047_v0  ;;  %4829 = vmatprep.subr.bf16.mxu1 %v20050_v1  ;;  %v4925_v0 = vld [vmem:[%s19262_s13 + $0xaa8] sm:$0xff]  ;;  %v15779_v1 = vcombine.low %v4920_v25, %v4924_v15 }
 0x8cb   : > { %4789 = vmatpush1.bf16.msra.mxu0 %v20053_v3  ;;  %4830 = vmatpush1.bf16.msra.mxu1 %v20056_v52  ;;  %v15781_v3 = vcombine.low %v4921_v56, %v4925_v0  ;;  %v15782_v52 = vcombine.high %v4921_v56, %v4925_v0 }
 0x8cc   : > { %4790 = vmatprep.subr.bf16.mxu0 %v20059_v53  ;;  %4831 = vmatprep.subr.bf16.mxu1 %v20062_v54  ;;  %v4928_v53 = vld [vmem:[%s19262_s13 + $0xac0] sm:$0xff] }
 0x8cd   : > { %v4932_v54 = vld [vmem:[%s19262_s13 + $0xae0] sm:$0xff] }
 0x8cf   : > { %4791 = vmatpush1.bf16.msra.mxu0 %v20065_v16  ;;  %4832 = vmatpush1.bf16.msra.mxu1 %v20068_v55  ;;  %v4929_v16 = vld [vmem:[%s19262_s13 + $0xac8] sm:$0xff]  ;;  %v15788_v55 = vcombine.high %v4928_v53, %v4932_v54 }
 0x8d0   : > { %4792 = vmatprep.subr.bf16.mxu0 %v20071_v61  ;;  %4833 = vmatprep.subr.bf16.mxu1 %v20074_v4  ;;  %v4933_v61 = vld [vmem:[%s19262_s13 + $0xae8] sm:$0xff]  ;;  %v15787_v4 = vcombine.low %v4928_v53, %v4932_v54 }
 0x8d3   : > { %4793 = vmatpush1.bf16.msra.mxu0 %v20077_v5  ;;  %4834 = vmatpush1.bf16.msra.mxu1 %v20080_v6  ;;  %v15789_v5 = vcombine.low %v4929_v16, %v4933_v61  ;;  %v15790_v6 = vcombine.high %v4929_v16, %v4933_v61 }
 0x8d4   : > { %5291 = vmatprep.subr.bf16.mxu0 %v15764_v23  ;;  %5332 = vmatprep.subr.bf16.mxu1 %v15766_v47  ;;  %v15811_v23 = vcombine.low %v4952_v58, %v4956_v59  ;;  %v15820_v47 = vcombine.high %v4960_v40, %v4964_v45  ;;  %v4918_v58 = vld [vmem:[%s19262_s13 + $0xa70] sm:$0xff]  ;;  %v4915_v59 = vld [vmem:[%s19262_s13 + $0xa58] sm:$0xff] }
 0x8d5   : > { %v4926_v40 = vld [vmem:[%s19262_s13 + $0xab0] sm:$0xff]  ;;  %v4927_v45 = vld [vmem:[%s19262_s13 + $0xab8] sm:$0xff] }
 0x8d6   : > { %4811 = vmatmul.mubr.bf16.vlgmr.msra.gmra.mrb[28].mxu0 %v20163_v62  ;;  %4852 = vmatmul.mubr.bf16.vlgmr.msra.gmra.mrb[28].mxu1 %v20163_v62  ;;  %v4936_v62 = vld [vmem:[%s19262_s13 + $0xb00] sm:$0xff] }
 0x8d7   : > { %5323 = vmatprep.mubr.bf16.mxu0 %v18868_v13  ;;  %5364 = vmatprep.mubr.bf16.mxu1 %v18868_v13  ;;  %v15796_v11 = vcombine.high %v4936_v62, %v4940_v9  ;;  %v15795_v19 = vcombine.low %v4936_v62, %v4940_v9 }
 0x8d8   : > { %5292 = vmatpush1.bf16.msra.mxu0 %v15763_v50  ;;  %5333 = vmatpush1.bf16.msra.mxu1 %v15765_v22  ;;  %v20283_v50 = vld [vmem:[%s19262_s13 + $0xa38] sm:$0xff]  ;;  %v15813_v22 = vcombine.low %v4953_v46, %v4957_v39  ;;  %v4922_v39 = vld [vmem:[%s19262_s13 + $0xa90] sm:$0xff] }
 0x8d9   : > { %5293 = vmatprep.subr.bf16.mxu0 %v15772_v31  ;;  %5334 = vmatprep.subr.bf16.mxu1 %v15774_v36  ;;  %v15769_v26 = vcombine.low %v20278_v49, %v20283_v50  ;;  %v15821_v31 = vcombine.low %v4961_v7, %v4965_v27  ;;  %v15775_v7 = vcombine.low %v4914_v42, %v4918_v58 }
 0x8da   : > { %v15783_v44 = vcombine.low %v4922_v39, %v4926_v40 }
 0x8dc   : > { %5294 = vmatpush1.bf16.msra.mxu0 %v15771_v43  ;;  %5335 = vmatpush1.bf16.msra.mxu1 %v15773_v33  ;;  %v15770_v43 = vcombine.high %v20278_v49, %v20283_v50  ;;  %v4938_v50 = vld [vmem:[%s19262_s13 + $0xb10] sm:$0xff] }
 0x8dd   : > { %5295 = vmatprep.subr.bf16.mxu0 %v15780_v57  ;;  %5336 = vmatprep.subr.bf16.mxu1 %v15782_v52 }
 0x8e0   : > { %5296 = vmatpush1.bf16.msra.mxu0 %v15779_v1  ;;  %5337 = vmatpush1.bf16.msra.mxu1 %v15781_v3 }
 0x8e1   : > { %5297 = vmatprep.subr.bf16.mxu0 %v15788_v55  ;;  %5338 = vmatprep.subr.bf16.mxu1 %v15790_v6 }
 0x8e4   : > { %5298 = vmatpush1.bf16.msra.mxu0 %v15787_v4  ;;  %5339 = vmatpush1.bf16.msra.mxu1 %v15789_v5 }
 0x8e5   : > { %5299 = vmatprep.subr.bf16.mxu0 %v15796_v11  ;;  %5340 = vmatprep.subr.bf16.mxu1 %v15798_v21 }
 0x8e8   : > { %5300 = vmatpush1.bf16.msra.mxu0 %v15795_v19  ;;  %5341 = vmatpush1.bf16.msra.mxu1 %v15797_v20 }
 0x8e9   : > { %5301 = vmatprep.subr.bf16.mxu0 %v15804_v34  ;;  %5342 = vmatprep.subr.bf16.mxu1 %v15806_v2 }
 0x8ec   : > { %5302 = vmatpush1.bf16.msra.mxu0 %v15803_v41  ;;  %5343 = vmatpush1.bf16.msra.mxu1 %v15805_v63 }
 0x8ed   : > { %5303 = vmatprep.subr.bf16.mxu0 %v15812_v8  ;;  %5344 = vmatprep.subr.bf16.mxu1 %v15814_v60  ;;  %v15776_v8 = vcombine.high %v4914_v42, %v4918_v58  ;;  %v4923_v60 = vld [vmem:[%s19262_s13 + $0xa98] sm:$0xff]  ;;  %v20353_v42 = vld [vmem:[#allocation9 + $0x24] ss:$16 sps:$4 sm:$0xff]  }
 0x8ee   : > { %v15785_v48 = vcombine.low %v4923_v60, %v4927_v45  ;;  %v20356_v58 = vld [vmem:[#allocation9 + $0x2c] ss:$16 sps:$4 sm:$0xff]  }
 0x8f0   : > { %5304 = vmatpush1.bf16.msra.mxu0 %v15811_v23  ;;  %5345 = vmatpush1.bf16.msra.mxu1 %v15813_v22  ;;  %v15784_v23 = vcombine.high %v4922_v39, %v4926_v40  ;;  %v15786_v22 = vcombine.high %v4923_v60, %v4927_v45  ;;  %v20376_v39 = vld [vmem:[#allocation9 + $0x48] ss:$16 sps:$4 sm:$0xff]   ;;  %v20379_v40 = vld [vmem:[#allocation9 + $0x64] ss:$16 sps:$4 sm:$0xff]   ;;  %v20382_v60 = vld [vmem:[#allocation9 + $0x6c] ss:$16 sps:$4 sm:$0xff]  }
 0x8f1   : > { %5305 = vmatprep.subr.bf16.mxu0 %v15820_v47  ;;  %5346 = vmatprep.subr.bf16.mxu1 %v15822_v30  ;;  %v4930_v47 = vld [vmem:[%s19262_s13 + $0xad0] sm:$0xff]  ;;  %v20385_v45 = vld [vmem:[#allocation9 + $0x60] ss:$16 sps:$4 sm:$0xff]  }
 0x8f2   : > { %v4934_v30 = vld [vmem:[%s19262_s13 + $0xaf0] sm:$0xff] }
 0x8f3   : > { %v15792_v49 = vcombine.high %v4930_v47, %v4934_v30 }
 0x8f4   : > { %5306 = vmatpush1.bf16.msra.mxu0 %v15819_v28  ;;  %5347 = vmatpush1.bf16.msra.mxu1 %v15821_v31  ;;  %v4931_v28 = vld [vmem:[%s19262_s13 + $0xad8] sm:$0xff] }
 0x8f5   : > { %5373 = vmatprep.subr.bf16.mxu0 %v15768_v32  ;;  %5414 = vmatprep.subr.bf16.mxu1 %v15770_v43  ;;  %v4935_v31 = vld [vmem:[%s19262_s13 + $0xaf8] sm:$0xff] }
 0x8f6   : > { %v4939_v32 = vld [vmem:[%s19262_s13 + $0xb18] sm:$0xff] }
 0x8f7   : > { %v4943_v43 = vld [vmem:[%s19262_s13 + $0xb38] sm:$0xff] }
 0x9a9   : > { %v4812_v33 = vpop.f32.mrb[28].mxu0  ;;  %v4853_v36 = vpop.f32.mrb[28].mxu1 }
 0x9aa   : > { %v4864_v25 = vrot.slane %v4812_v33, 6  ;;  %v4814_v15 = vpop.f32.mrb[29].mxu0  ;;  %v4855_v56 = vpop.f32.mrb[29].mxu1  ;;  %v4866_v61 = vrot.slane %v4853_v36, 6  ;;  %v15791_v33 = vcombine.low %v4930_v47, %v4934_v30  ;;  %v15793_v36 = vcombine.low %v4931_v28, %v4935_v31  ;;  %v20400_v47 = vld [vmem:[#allocation9 + $0x88] ss:$16 sps:$4 sm:$0xff]  }
 0x9ab   : > { %v4865_v57 = vrot.slane %v4814_v15, 6  ;;  %v4816_v0 = vpop.f32.mrb[30].mxu0  ;;  %v4857_v1 = vpop.f32.mrb[30].mxu1  ;;  %v4867_v4 = vrot.slane %v4855_v56, 6  ;;  %v15802_v15 = vcombine.high %v4939_v32, %v4943_v43  ;;  %v4946_v56 = vld [vmem:[%s19262_s13 + $0xb50] sm:$0xff] }
 0x9ac   : > { %v4872_v3 = vadd.f32 %v4864_v25, %v20140_v12  ;;  %v4817_v52 = vpop.f32.mrb[31].mxu0  ;;  %v4858_v53 = vpop.f32.mrb[31].mxu1  ;;  %v4874_v5 = vadd.f32 %v4866_v61, %v20148_v29  ;;  %v4896_v29 = vrot.slane %v20156_v38, 6  ;;  %v4919_v38 = vld [vmem:[%s19262_s13 + $0xa78] sm:$0xff]  ;;  %v20403_v30 = vld [vmem:[#allocation9 + $0xa4] ss:$16 sps:$4 sm:$0xff]  }
 0x9ad   : > { %v4873_v54 = vadd.f32 %v4865_v57, %v20143_v17  ;;  %v4875_v6 = vadd.f32 %v4867_v4, %v20152_v51  ;;  %v15778_v46 = vcombine.high %v4915_v59, %v4919_v38  ;;  %v15777_v27 = vcombine.low %v4915_v59, %v4919_v38  ;;  %v4950_v57 = vld [vmem:[%s19262_s13 + $0xb70] sm:$0xff]  ;;  %v4947_v0 = vld [vmem:[%s19262_s13 + $0xb58] sm:$0xff] }
 0x9ae   : > { %v15760_v16 = vmul.f32 -1.442695, %v4872_v3  ;;  %v15762_v62 = vmul.f32 -1.442695, %v4874_v5  ;;  %v4951_v1 = vld [vmem:[%s19262_s13 + $0xb78] sm:$0xff]  ;;  %v15801_v52 = vcombine.low %v4939_v32, %v4943_v43  ;;  %v15808_v53 = vcombine.high %v4946_v56, %v4950_v57 }
 0x9af   : > { %v15761_v55 = vmul.f32 -1.442695, %v4873_v54  ;;  %v15810_v54 = vcombine.high %v4947_v0, %v4951_v1  ;;  %v4955_v61 = vld [vmem:[%s19262_s13 + $0xb98] sm:$0xff]  ;;  %v15807_v5 = vcombine.low %v4946_v56, %v4950_v57  ;;  %v20364_v38 = vld [vmem:[#allocation9 + $0x28] ss:$16 sps:$4 sm:$0xff]   ;;  %v5594_v57 = vld [vmem:[%s19262_s13 + $0xc28] sm:$0xff] }
 0x9b0   : > { %17502 = vpow2.f32 %v15760_v16  ;;  %v4954_v16 = vld [vmem:[%s19262_s13 + $0xb90] sm:$0xff]  ;;  %v4959_v4 = vld [vmem:[%s19262_s13 + $0xbb8] sm:$0xff] }
 0x9b1   : > { %17504 = vpow2.f32 %v15761_v55  ;;  %v4958_v55 = vld [vmem:[%s19262_s13 + $0xbb0] sm:$0xff]  ;;  %v20361_v59 = vld [vmem:[#allocation9 + $0x20] ss:$16 sps:$4 sm:$0xff]   ;;  %v20430_v32 = vld [vmem:[#allocation9 + $0xec] ss:$16 sps:$4 sm:$0xff]  }
 0x9b2   : > { %17506 = vtanh.f32 %v4875_v6  ;;  %v15809_v6 = vcombine.low %v4947_v0, %v4951_v1  ;;  %v20433_v43 = vld [vmem:[#allocation9 + $0xe0] ss:$16 sps:$4 sm:$0xff]  }
 0x9b3   : > { %17508 = vpow2.f32 %v15762_v62  ;;  %v15816_v62 = vcombine.high %v4954_v16, %v4958_v55 }
 0x9ba   : > { %v17503_v9 = vpop.eup %17502 }
 0x9bb   : > { %v4885_v10 = vadd.f32 1.0, %v17503_v9  ;;  %v17505_v11 = vpop.eup %17504  ;;  %v15818_v9 = vcombine.high %v4955_v61, %v4959_v4 }
 0x9bc   : > { %v4886_v12 = vadd.f32 1.0, %v17505_v11  ;;  %v17507_v17 = vpop.eup %17506  ;;  %v4966_v11 = vld [vmem:[%s19262_s13 + $0xbf0] sm:$0xff] }
 0x9bd   : > { %17510 = vrcp.f32 %v4885_v10  ;;  %v17509_v18 = vpop.eup %17508  ;;  %v4962_v10 = vld [vmem:[%s19262_s13 + $0xbd0] sm:$0xff] }
 0x9be   : > { %17512 = vrcp.f32 %v4886_v12  ;;  %v4887_v21 = vadd.f32 1.0, %v17509_v18  ;;  %v4963_v12 = vld [vmem:[%s19262_s13 + $0xbd8] sm:$0xff]  ;;  %v15815_v18 = vcombine.low %v4954_v16, %v4958_v55  ;;  %v5602_v16 = vld [vmem:[%s19262_s13 + $0xc68] sm:$0xff] }
 0x9c0   : > { %17514 = vrcp.f32 %v4887_v21 }
 0x9c7   : > { %v17511_v19 = vpop.eup %17510 }
 0x9c8   : > { %v4899_v20 = vmul.f32 %v17511_v19, %v17507_v17  ;;  %v17513_v51 = vpop.eup %17512  ;;  %v4967_v17 = vld [vmem:[%s19262_s13 + $0xbf8] sm:$0xff]  ;;  %v15817_v19 = vcombine.low %v4955_v61, %v4959_v4 }
 0x9c9   : > { %v4898_v35 = vmul.f32 %v17513_v51, %v4896_v29  ;;  %v15824_v29 = vcombine.high %v4962_v10, %v4966_v11  ;;  %v15823_v51 = vcombine.low %v4962_v10, %v4966_v11  ;;  %v15825_v21 = vcombine.low %v4963_v12, %v4967_v17  ;;  %v5610_v10 = vld [vmem:[%s19262_s13 + $0xca8] sm:$0xff] }
 0x9ca   : > { %v17515_v24 = vpop.eup %17514 }
 0x9cb   : > { %v20296_v37 = vadd.f32 %v4899_v20, %v4898_v35  ;;  %v15826_v20 = vcombine.high %v4963_v12, %v4967_v17  ;;  %v20339_v35 = vld [vmem:[#allocation9 + $0x4] ss:$16 sps:$4 sm:$0xff]  }
 0x9cd   : > { %17516 = vtanh.f32 %v20296_v37 }
 0x9d7   : > { %v17517_v41 = vpop.eup %17516 }
 0x9d8   : > { %v4902_v34 = vmul.f32 %v17517_v41, %v17515_v24  ;;  %v20342_v24 = vld [vmem:[#allocation9 + $0xc] ss:$16 sps:$4 sm:$0xff]   ;;  %v20347_v41 = vld [vmem:[#allocation9] ss:$16 sps:$4 sm:$0xff]  }
 0x9da   : > { %v4903_v63 = vpack.c.bf16 %v4902_v34, %v4902_v34  ;;  %v20350_v34 = vld [vmem:[#allocation9 + $0x8] ss:$16 sps:$4 sm:$0xff]  }
 0x9dc   : > { %v20303_v2 = vrot.slane %v4903_v63, 1  ;;  %v20367_v63 = vld [vmem:[#allocation9 + $0x44] ss:$16 sps:$4 sm:$0xff]  }
 0x9de   : > { %5324 = vmatmul.mubr.bf16.vlgmr.msra.gmra.mrb[8].mxu0 %v20303_v2  ;;  %5365 = vmatmul.mubr.bf16.vlgmr.msra.gmra.mrb[8].mxu1 %v20303_v2 }
 0x9df   : > { %5374 = vmatpush1.bf16.msra.mxu0 %v15767_v14  ;;  %5415 = vmatpush1.bf16.msra.mxu1 %v15769_v26  ;;  %v15794_v14 = vcombine.high %v4931_v28, %v4935_v31  ;;  %v4942_v26 = vld [vmem:[%s19262_s13 + $0xb30] sm:$0xff]  ;;  %v20406_v28 = vld [vmem:[#allocation9 + $0xac] ss:$16 sps:$4 sm:$0xff]   ;;  %v20409_v31 = vld [vmem:[#allocation9 + $0xa0] ss:$16 sps:$4 sm:$0xff]  }
 0x9e0   : > { %5375 = vmatprep.subr.bf16.mxu0 %v15776_v8  ;;  %5416 = vmatprep.subr.bf16.mxu1 %v15778_v46  ;;  %v15800_v25 = vcombine.high %v4938_v50, %v4942_v26  ;;  %v15799_v3 = vcombine.low %v4938_v50, %v4942_v26  ;;  %v20370_v8 = vld [vmem:[#allocation9 + $0x4c] ss:$16 sps:$4 sm:$0xff]   ;;  %v20373_v46 = vld [vmem:[#allocation9 + $0x40] ss:$16 sps:$4 sm:$0xff]   ;;  %v20424_v50 = vld [vmem:[#allocation9 + $0xc8] ss:$16 sps:$4 sm:$0xff]  }
 0x9e1   : > { %5405 = vmatprep.mubr.bf16.mxu0 %v18868_v13  ;;  %5446 = vmatprep.mubr.bf16.mxu1 %v18868_v13  ;;  %v20427_v26 = vld [vmem:[#allocation9 + $0xe4] ss:$16 sps:$4 sm:$0xff]  }
 0x9e3   : > { %5376 = vmatpush1.bf16.msra.mxu0 %v15775_v7  ;;  %5417 = vmatpush1.bf16.msra.mxu1 %v15777_v27  ;;  %v20388_v7 = vld [vmem:[#allocation9 + $0x68] ss:$16 sps:$4 sm:$0xff]   ;;  %v20391_v27 = vld [vmem:[#allocation9 + $0x84] ss:$16 sps:$4 sm:$0xff]  }
 0x9e4   : > { %5377 = vmatprep.subr.bf16.mxu0 %v15784_v23  ;;  %5418 = vmatprep.subr.bf16.mxu1 %v15786_v22  ;;  %v20394_v23 = vld [vmem:[#allocation9 + $0x8c] ss:$16 sps:$4 sm:$0xff]   ;;  %v20397_v22 = vld [vmem:[#allocation9 + $0x80] ss:$16 sps:$4 sm:$0xff]  }
 0x9e7   : > { %5378 = vmatpush1.bf16.msra.mxu0 %v15783_v44  ;;  %5419 = vmatpush1.bf16.msra.mxu1 %v15785_v48  ;;  %v20412_v44 = vld [vmem:[#allocation9 + $0xa8] ss:$16 sps:$4 sm:$0xff]   ;;  %v20415_v48 = vld [vmem:[#allocation9 + $0xc4] ss:$16 sps:$4 sm:$0xff]  }
 0x9e8   : > { %5379 = vmatprep.subr.bf16.mxu0 %v15792_v49  ;;  %5420 = vmatprep.subr.bf16.mxu1 %v15794_v14  ;;  %v20418_v49 = vld [vmem:[#allocation9 + $0xcc] ss:$16 sps:$4 sm:$0xff]   ;;  %v20421_v14 = vld [vmem:[#allocation9 + $0xc0] ss:$16 sps:$4 sm:$0xff]  }
 0x9eb   : > { %5380 = vmatpush1.bf16.msra.mxu0 %v15791_v33  ;;  %5421 = vmatpush1.bf16.msra.mxu1 %v15793_v36  ;;  %v20436_v33 = vld [vmem:[#allocation9 + $0xe8] ss:$16 sps:$4 sm:$0xff]  }
 0x9ec   : > { %5381 = vmatprep.subr.bf16.mxu0 %v15800_v25  ;;  %5422 = vmatprep.subr.bf16.mxu1 %v15802_v15  ;;  %v5589_v36 = vld [vmem:[%s19262_s13 + $0xc00] sm:$0xff]  ;;  %v5590_v15 = vld [vmem:[%s19262_s13 + $0xc08] sm:$0xff] }
 0x9ed   : > { %v5593_v25 = vld [vmem:[%s19262_s13 + $0xc20] sm:$0xff]  ;;  %v15832_v1 = vcombine.low %v5590_v15, %v5594_v57 }
 0x9ee   : > { %v15831_v56 = vcombine.high %v5589_v36, %v5593_v25  ;;  %v15830_v0 = vcombine.low %v5589_v36, %v5593_v25 }
 0x9ef   : > { %5382 = vmatpush1.bf16.msra.mxu0 %v15799_v3  ;;  %5423 = vmatpush1.bf16.msra.mxu1 %v15801_v52  ;;  %v15833_v3 = vcombine.high %v5590_v15, %v5594_v57  ;;  %v5601_v52 = vld [vmem:[%s19262_s13 + $0xc60] sm:$0xff]  ;;  %v5622_v57 = vld [vmem:[%s19262_s13 + $0xd08] sm:$0xff] }
 0x9f0   : > { %5383 = vmatprep.subr.bf16.mxu0 %v15808_v53  ;;  %5424 = vmatprep.subr.bf16.mxu1 %v15810_v54  ;;  %v5598_v53 = vld [vmem:[%s19262_s13 + $0xc48] sm:$0xff]  ;;  %v5621_v15 = vld [vmem:[%s19262_s13 + $0xd00] sm:$0xff] }
 0x9f1   : > { %v15840_v61 = vcombine.low %v5598_v53, %v5602_v16  ;;  %v15841_v4 = vcombine.high %v5598_v53, %v5602_v16  ;;  %v5629_v53 = vld [vmem:[%s19262_s13 + $0xd40] sm:$0xff]  ;;  %v5630_v16 = vld [vmem:[%s19262_s13 + $0xd48] sm:$0xff] }
 0x9f3   : > { %5384 = vmatpush1.bf16.msra.mxu0 %v15807_v5  ;;  %5425 = vmatpush1.bf16.msra.mxu1 %v15809_v6  ;;  %v5605_v5 = vld [vmem:[%s19262_s13 + $0xc80] sm:$0xff] }
 0x9f4   : > { %5385 = vmatprep.subr.bf16.mxu0 %v15816_v62  ;;  %5426 = vmatprep.subr.bf16.mxu1 %v15818_v9  ;;  %v5609_v6 = vld [vmem:[%s19262_s13 + $0xca0] sm:$0xff]  ;;  %v5606_v62 = vld [vmem:[%s19262_s13 + $0xc88] sm:$0xff] }
 0x9f5   : > { %v15847_v9 = vcombine.high %v5605_v5, %v5609_v6  ;;  %v15846_v11 = vcombine.low %v5605_v5, %v5609_v6  ;;  %v15848_v12 = vcombine.low %v5606_v62, %v5610_v10  ;;  %v15849_v17 = vcombine.high %v5606_v62, %v5610_v10  ;;  %v5637_v5 = vld [vmem:[%s19262_s13 + $0xd80] sm:$0xff] }
 0x9f6   : > { %v5641_v6 = vld [vmem:[%s19262_s13 + $0xda0] sm:$0xff] }
 0x9f7   : > { %5386 = vmatpush1.bf16.msra.mxu0 %v15815_v18  ;;  %5427 = vmatpush1.bf16.msra.mxu1 %v15817_v19  ;;  %v5613_v18 = vld [vmem:[%s19262_s13 + $0xcc0] sm:$0xff]  ;;  %v15879_v10 = vcombine.high %v5637_v5, %v5641_v6 }
 0x9f8   : > { %5387 = vmatprep.subr.bf16.mxu0 %v15824_v29  ;;  %5428 = vmatprep.subr.bf16.mxu1 %v15826_v20  ;;  %v5617_v19 = vld [vmem:[%s19262_s13 + $0xce0] sm:$0xff]  ;;  %v5614_v29 = vld [vmem:[%s19262_s13 + $0xcc8] sm:$0xff] }
 0x9f9   : > { %v15855_v20 = vcombine.high %v5613_v18, %v5617_v19 }
 0x9fb   : > { %5388 = vmatpush1.bf16.msra.mxu0 %v15823_v51  ;;  %5429 = vmatpush1.bf16.msra.mxu1 %v15825_v21  ;;  %v5618_v51 = vld [vmem:[%s19262_s13 + $0xce8] sm:$0xff]  ;;  %v15854_v21 = vcombine.low %v5613_v18, %v5617_v19  ;;  %v5649_v19 = vld [vmem:[%s19262_s13 + $0xde0] sm:$0xff] }
 0x9fc   : > { %5463 = vmatprep.subr.bf16.mxu0 %v20339_v35  ;;  %5504 = vmatprep.subr.bf16.mxu1 %v20342_v24  ;;  %v15856_v36 = vcombine.low %v5614_v29, %v5618_v51  ;;  %v15857_v25 = vcombine.high %v5614_v29, %v5618_v51  ;;  %v5646_v29 = vld [vmem:[%s19262_s13 + $0xdc8] sm:$0xff]  ;;  %v20476_v51 = vld [vmem:[%s19262_s13 + $0xc10] sm:$0xff] }
 0x9fe   : > { %5406 = vmatmul.mubr.bf16.vlgmr.msra.gmra.mrb[12].mxu0 %v20303_v2  ;;  %5447 = vmatmul.mubr.bf16.vlgmr.msra.gmra.mrb[12].mxu1 %v20303_v2 }
 0x9ff   : > { %5464 = vmatpush1.bf16.msra.mxu0 %v20347_v41  ;;  %5505 = vmatpush1.bf16.msra.mxu1 %v20350_v34 }
 0xa00   : > { %5465 = vmatprep.subr.bf16.mxu0 %v20353_v42  ;;  %5506 = vmatprep.subr.bf16.mxu1 %v20356_v58 }
 0xa01   : > { %5495 = vmatprep.mubr.bf16.mxu0 %v18868_v13  ;;  %5536 = vmatprep.mubr.bf16.mxu1 %v18868_v13 }
 0xa03   : > { %5466 = vmatpush1.bf16.msra.mxu0 %v20361_v59  ;;  %5507 = vmatpush1.bf16.msra.mxu1 %v20364_v38 }
 0xa04   : > { %5467 = vmatprep.subr.bf16.mxu0 %v20367_v63  ;;  %5508 = vmatprep.subr.bf16.mxu1 %v20370_v8 }
 0xa07   : > { %5468 = vmatpush1.bf16.msra.mxu0 %v20373_v46  ;;  %5509 = vmatpush1.bf16.msra.mxu1 %v20376_v39 }
 0xa08   : > { %5469 = vmatprep.subr.bf16.mxu0 %v20379_v40  ;;  %5510 = vmatprep.subr.bf16.mxu1 %v20382_v60 }
 0xa0b   : > { %5470 = vmatpush1.bf16.msra.mxu0 %v20385_v45  ;;  %5511 = vmatpush1.bf16.msra.mxu1 %v20388_v7 }
 0xa0c   : > { %5471 = vmatprep.subr.bf16.mxu0 %v20391_v27  ;;  %5512 = vmatprep.subr.bf16.mxu1 %v20394_v23 }
 0xa0f   : > { %5472 = vmatpush1.bf16.msra.mxu0 %v20397_v22  ;;  %5513 = vmatpush1.bf16.msra.mxu1 %v20400_v47 }
 0xa10   : > { %5473 = vmatprep.subr.bf16.mxu0 %v20403_v30  ;;  %5514 = vmatprep.subr.bf16.mxu1 %v20406_v28 }
 0xa13   : > { %5474 = vmatpush1.bf16.msra.mxu0 %v20409_v31  ;;  %5515 = vmatpush1.bf16.msra.mxu1 %v20412_v44 }
 0xa14   : > { %5475 = vmatprep.subr.bf16.mxu0 %v20415_v48  ;;  %5516 = vmatprep.subr.bf16.mxu1 %v20418_v49 }
 0xa17   : > { %5476 = vmatpush1.bf16.msra.mxu0 %v20421_v14  ;;  %5517 = vmatpush1.bf16.msra.mxu1 %v20424_v50 }
 0xa18   : > { %5477 = vmatprep.subr.bf16.mxu0 %v20427_v26  ;;  %5518 = vmatprep.subr.bf16.mxu1 %v20430_v32 }
 0xa1b   : > { %5478 = vmatpush1.bf16.msra.mxu0 %v20433_v43  ;;  %5519 = vmatpush1.bf16.msra.mxu1 %v20436_v33 }
 0xa1c   : > { %5976 = vmatprep.subr.bf16.mxu0 %v15831_v56  ;;  %6017 = vmatprep.subr.bf16.mxu1 %v15833_v3  ;;  %v5625_v56 = vld [vmem:[%s19262_s13 + $0xd20] sm:$0xff] }
 0xa1d   : > { %v15862_v3 = vcombine.low %v5621_v15, %v5625_v56 }
 0xa1e   : > { %5496 = vmatmul.mubr.bf16.vlgmr.msra.gmra.mrb[32].mxu0 %v20303_v2  ;;  %5537 = vmatmul.mubr.bf16.vlgmr.msra.gmra.mrb[32].mxu1 %v20303_v2  ;;  %v5597_v2 = vld [vmem:[%s19262_s13 + $0xc40] sm:$0xff] }
 0xa1f   : > { %6008 = vmatprep.mubr.bf16.mxu0 %v18868_v13  ;;  %6049 = vmatprep.mubr.bf16.mxu1 %v18868_v13  ;;  %v15839_v54 = vcombine.high %v5597_v2, %v5601_v52  ;;  %v15838_v55 = vcombine.low %v5597_v2, %v5601_v52 }
 0xa20   : > { %5977 = vmatpush1.bf16.msra.mxu0 %v15830_v0  ;;  %6018 = vmatpush1.bf16.msra.mxu1 %v15832_v1  ;;  %v15863_v0 = vcombine.high %v5621_v15, %v5625_v56  ;;  %v5626_v1 = vld [vmem:[%s19262_s13 + $0xd28] sm:$0xff]  ;;  %v20487_v56 = vld [vmem:[%s19262_s13 + $0xc38] sm:$0xff] }
 0xa21   : > { %5978 = vmatprep.subr.bf16.mxu0 %v15839_v54  ;;  %6019 = vmatprep.subr.bf16.mxu1 %v15841_v4  ;;  %v15864_v2 = vcombine.low %v5622_v57, %v5626_v1  ;;  %v15865_v52 = vcombine.high %v5622_v57, %v5626_v1  ;;  %v5633_v54 = vld [vmem:[%s19262_s13 + $0xd60] sm:$0xff]  ;;  %v5634_v4 = vld [vmem:[%s19262_s13 + $0xd68] sm:$0xff] }
 0xa22   : > { %v15872_v62 = vcombine.low %v5630_v16, %v5634_v4 }
 0xa24   : > { %5979 = vmatpush1.bf16.msra.mxu0 %v15838_v55  ;;  %6020 = vmatpush1.bf16.msra.mxu1 %v15840_v61  ;;  %v15870_v55 = vcombine.low %v5629_v53, %v5633_v54  ;;  %v15871_v61 = vcombine.high %v5629_v53, %v5633_v54 }
 0xa25   : > { %5980 = vmatprep.subr.bf16.mxu0 %v15847_v9  ;;  %6021 = vmatprep.subr.bf16.mxu1 %v15849_v17  ;;  %v15873_v9 = vcombine.high %v5630_v16, %v5634_v4  ;;  %v5645_v17 = vld [vmem:[%s19262_s13 + $0xdc0] sm:$0xff] }
 0xa28   : > { %5981 = vmatpush1.bf16.msra.mxu0 %v15846_v11  ;;  %6022 = vmatpush1.bf16.msra.mxu1 %v15848_v12  ;;  %v5638_v11 = vld [vmem:[%s19262_s13 + $0xd88] sm:$0xff] }
 0xa29   : > { %5982 = vmatprep.subr.bf16.mxu0 %v15855_v20  ;;  %6023 = vmatprep.subr.bf16.mxu1 %v15857_v25  ;;  %v5642_v12 = vld [vmem:[%s19262_s13 + $0xda8] sm:$0xff]  ;;  %v15878_v25 = vcombine.low %v5637_v5, %v5641_v6 }
 0xa2a   : > { %v15881_v18 = vcombine.high %v5638_v11, %v5642_v12  ;;  %v5650_v20 = vld [vmem:[%s19262_s13 + $0xde8] sm:$0xff]  ;;  %v15880_v57 = vcombine.low %v5638_v11, %v5642_v12 }
 0xa2c   : > { %5983 = vmatpush1.bf16.msra.mxu0 %v15854_v21  ;;  %6024 = vmatpush1.bf16.msra.mxu1 %v15856_v36  ;;  %v20479_v21 = vld [vmem:[%s19262_s13 + $0xc30] sm:$0xff]  ;;  %v20482_v36 = vld [vmem:[%s19262_s13 + $0xc18] sm:$0xff] }
 0xa2d   : > { %5984 = vmatprep.subr.bf16.mxu0 %v15863_v0  ;;  %6025 = vmatprep.subr.bf16.mxu1 %v15865_v52  ;;  %v15834_v15 = vcombine.low %v20476_v51, %v20479_v21  ;;  %v15887_v0 = vcombine.high %v5645_v17, %v5649_v19  ;;  %v15836_v1 = vcombine.low %v20482_v36, %v20487_v56 }
 0xa2e   : > { %v15888_v52 = vcombine.low %v5646_v29, %v5650_v20  ;;  %v15835_v53 = vcombine.high %v20476_v51, %v20479_v21  ;;  %v15837_v54 = vcombine.high %v20482_v36, %v20487_v56  ;;  %v5623_v56 = vld [vmem:[%s19262_s13 + $0xd10] sm:$0xff] }
 0xa30   : > { %5985 = vmatpush1.bf16.msra.mxu0 %v15862_v3  ;;  %6026 = vmatpush1.bf16.msra.mxu1 %v15864_v2  ;;  %v15889_v3 = vcombine.high %v5646_v29, %v5650_v20  ;;  %v15886_v2 = vcombine.low %v5645_v17, %v5649_v19 }
 0xa31   : > { %5986 = vmatprep.subr.bf16.mxu0 %v15871_v61  ;;  %6027 = vmatprep.subr.bf16.mxu1 %v15873_v9 }
 0xa34   : > { %5987 = vmatpush1.bf16.msra.mxu0 %v15870_v55  ;;  %6028 = vmatpush1.bf16.msra.mxu1 %v15872_v62 }
 0xa35   : > { %5988 = vmatprep.subr.bf16.mxu0 %v15879_v10  ;;  %6029 = vmatprep.subr.bf16.mxu1 %v15881_v18  ;;  %v20496_v10 = vld [vmem:[%s19428_s24 + $0x20] sm:$0xff]  ;;  %v20500_v18 = vld [vmem:[%s19428_s24 + $0x28] sm:$0xff] }
 0xa38   : > { %5989 = vmatpush1.bf16.msra.mxu0 %v15878_v25  ;;  %6030 = vmatpush1.bf16.msra.mxu1 %v15880_v57 }
 0xa39   : > { %5990 = vmatprep.subr.bf16.mxu0 %v15887_v0  ;;  %6031 = vmatprep.subr.bf16.mxu1 %v15889_v3  ;;  %v20504_v0 = vld [vmem:[%s19428_s24 + $0x30] sm:$0xff] }
 0xa3c   : > { %5991 = vmatpush1.bf16.msra.mxu0 %v15886_v2  ;;  %6032 = vmatpush1.bf16.msra.mxu1 %v15888_v52  ;;  %v20508_v2 = vld [vmem:[%s19428_s24 + $0x38] sm:$0xff] }
 0xa3d   : > { %6058 = vmatprep.subr.bf16.mxu0 %v15835_v53  ;;  %6099 = vmatprep.subr.bf16.mxu1 %v15837_v54 }
 0xaf1   : > { %v5497_v16 = vpop.f32.mrb[32].mxu0  ;;  %v5538_v55 = vpop.f32.mrb[32].mxu1 }
 0xaf2   : > { %v5549_v61 = vrot.slane %v5497_v16, 4  ;;  %v5499_v4 = vpop.f32.mrb[33].mxu0  ;;  %v5540_v5 = vpop.f32.mrb[33].mxu1  ;;  %v5551_v25 = vrot.slane %v5538_v55, 4 }
 0xaf3   : > { %v5550_v6 = vrot.slane %v5499_v4, 4  ;;  %v5501_v62 = vpop.f32.mrb[34].mxu0  ;;  %v5542_v9 = vpop.f32.mrb[34].mxu1  ;;  %v5552_v57 = vrot.slane %v5540_v5, 4 }
 0xaf4   : > { %v5557_v11 = vadd.f32 %v20496_v10, %v5549_v61  ;;  %v5502_v12 = vpop.f32.mrb[35].mxu0  ;;  %v5543_v17 = vpop.f32.mrb[35].mxu1  ;;  %v5559_v3 = vadd.f32 %v20504_v0, %v5551_v25  ;;  %v5581_v62 = vrot.slane %v20296_v37, 6  ;;  %v5604_v37 = vld [vmem:[%s19262_s13 + $0xc78] sm:$0xff] }
 0xaf5   : > { %v5558_v19 = vadd.f32 %v20500_v18, %v5550_v6  ;;  %v5560_v52 = vadd.f32 %v20508_v2, %v5552_v57  ;;  %v5599_v57 = vld [vmem:[%s19262_s13 + $0xc50] sm:$0xff] }
 0xaf6   : > { %v15827_v29 = vmul.f32 -1.442695, %v5557_v11  ;;  %v15829_v53 = vmul.f32 -1.442695, %v5559_v3  ;;  %v5603_v3 = vld [vmem:[%s19262_s13 + $0xc70] sm:$0xff] }
 0xaf7   : > { %v15828_v20 = vmul.f32 -1.442695, %v5558_v19 }
 0xaf8   : > { %17518 = vpow2.f32 %v15827_v29 }
 0xaf9   : > { %17520 = vpow2.f32 %v15828_v20 }
 0xafa   : > { %17522 = vtanh.f32 %v5560_v52  ;;  %v5600_v52 = vld [vmem:[%s19262_s13 + $0xc58] sm:$0xff] }
 0xafb   : > { %17524 = vpow2.f32 %v15829_v53 }
 0xb02   : > { %v17519_v54 = vpop.eup %17518 }
 0xb03   : > { %v5570_v16 = vadd.f32 1.0, %v17519_v54  ;;  %v17521_v61 = vpop.eup %17520 }
 0xb04   : > { %v5571_v4 = vadd.f32 1.0, %v17521_v61  ;;  %v17523_v55 = vpop.eup %17522  ;;  %v15845_v61 = vcombine.high %v5600_v52, %v5604_v37 }
 0xb05   : > { %17526 = vrcp.f32 %v5570_v16  ;;  %v17525_v5 = vpop.eup %17524  ;;  %v15843_v16 = vcombine.high %v5599_v57, %v5603_v3 }
 0xb06   : > { %17528 = vrcp.f32 %v5571_v4  ;;  %v5572_v12 = vadd.f32 1.0, %v17525_v5  ;;  %v5607_v4 = vld [vmem:[%s19262_s13 + $0xc90] sm:$0xff]  ;;  %v5608_v5 = vld [vmem:[%s19262_s13 + $0xc98] sm:$0xff] }
 0xb08   : > { %17530 = vrcp.f32 %v5572_v12 }
 0xb0f   : > { %v17527_v6 = vpop.eup %17526 }
 0xb10   : > { %v5584_v9 = vmul.f32 %v17527_v6, %v17523_v55  ;;  %v17529_v11 = vpop.eup %17528  ;;  %v5611_v55 = vld [vmem:[%s19262_s13 + $0xcb0] sm:$0xff]  ;;  %v5612_v6 = vld [vmem:[%s19262_s13 + $0xcb8] sm:$0xff] }
 0xb11   : > { %v5583_v17 = vmul.f32 %v17529_v11, %v5581_v62  ;;  %v15842_v62 = vcombine.low %v5599_v57, %v5603_v3  ;;  %v15851_v11 = vcombine.high %v5607_v4, %v5611_v55  ;;  %v15853_v12 = vcombine.high %v5608_v5, %v5612_v6  ;;  %v5624_v57 = vld [vmem:[%s19262_s13 + $0xd18] sm:$0xff] }
 0xb12   : > { %v17531_v29 = vpop.eup %17530  ;;  %v15850_v51 = vcombine.low %v5607_v4, %v5611_v55  ;;  %v15852_v21 = vcombine.low %v5608_v5, %v5612_v6  ;;  %v5628_v3 = vld [vmem:[%s19262_s13 + $0xd38] sm:$0xff]  ;;  %v5635_v4 = vld [vmem:[%s19262_s13 + $0xd70] sm:$0xff] }
 0xb13   : > { %v20512_v19 = vadd.f32 %v5584_v9, %v5583_v17  ;;  %v15844_v9 = vcombine.low %v5600_v52, %v5604_v37  ;;  %v5615_v17 = vld [vmem:[%s19262_s13 + $0xcd0] sm:$0xff]  ;;  %v5632_v55 = vld [vmem:[%s19262_s13 + $0xd58] sm:$0xff] }
 0xb14   : > { %v5636_v5 = vld [vmem:[%s19262_s13 + $0xd78] sm:$0xff] }
 0xb15   : > { %17532 = vtanh.f32 %v20512_v19 }
 0xb1f   : > { %v17533_v20 = vpop.eup %17532 }
 0xb20   : > { %v5587_v25 = vmul.f32 %v17533_v20, %v17531_v29  ;;  %v5619_v29 = vld [vmem:[%s19262_s13 + $0xcf0] sm:$0xff]  ;;  %v5616_v20 = vld [vmem:[%s19262_s13 + $0xcd8] sm:$0xff] }
 0xb21   : > { %v15859_v36 = vcombine.high %v5615_v17, %v5619_v29  ;;  %v15858_v52 = vcombine.low %v5615_v17, %v5619_v29  ;;  %v5643_v17 = vld [vmem:[%s19262_s13 + $0xdb0] sm:$0xff]  ;;  %v5640_v29 = vld [vmem:[%s19262_s13 + $0xd98] sm:$0xff] }
 0xb22   : > { %v5588_v53 = vpack.c.bf16 %v5587_v25, %v5587_v25  ;;  %v5620_v25 = vld [vmem:[%s19262_s13 + $0xcf8] sm:$0xff] }
 0xb23   : > { %v15860_v37 = vcombine.low %v5616_v20, %v5620_v25 }
 0xb24   : > { %v20519_v54 = vrot.slane %v5588_v53, 2 }
 0xb26   : > { %6009 = vmatmul.mubr.bf16.vlgmr.msra.gmra.mrb[8].mxu0 %v20519_v54  ;;  %6050 = vmatmul.mubr.bf16.vlgmr.msra.gmra.mrb[8].mxu1 %v20519_v54 }
 0xb27   : > { %6059 = vmatpush1.bf16.msra.mxu0 %v15834_v15  ;;  %6100 = vmatpush1.bf16.msra.mxu1 %v15836_v1  ;;  %v15861_v15 = vcombine.high %v5616_v20, %v5620_v25  ;;  %v5627_v1 = vld [vmem:[%s19262_s13 + $0xd30] sm:$0xff]  ;;  %v5644_v20 = vld [vmem:[%s19262_s13 + $0xdb8] sm:$0xff] }
 0xb28   : > { %6060 = vmatprep.subr.bf16.mxu0 %v15843_v16  ;;  %6101 = vmatprep.subr.bf16.mxu1 %v15845_v61  ;;  %v15867_v53 = vcombine.high %v5623_v56, %v5627_v1  ;;  %v15869_v16 = vcombine.high %v5624_v57, %v5628_v3  ;;  %v5631_v61 = vld [vmem:[%s19262_s13 + $0xd50] sm:$0xff]  ;;  %v15866_v6 = vcombine.low %v5623_v56, %v5627_v1  ;;  %v5648_v1 = vld [vmem:[%s19262_s13 + $0xdd8] sm:$0xff] }
 0xb29   : > { %6090 = vmatprep.mubr.bf16.mxu0 %v18868_v13  ;;  %6131 = vmatprep.mubr.bf16.mxu1 %v18868_v13  ;;  %v15874_v25 = vcombine.low %v5631_v61, %v5635_v4  ;;  %v5651_v56 = vld [vmem:[%s19262_s13 + $0xdf0] sm:$0xff] }
 0xb2b   : > { %6061 = vmatpush1.bf16.msra.mxu0 %v15842_v62  ;;  %6102 = vmatpush1.bf16.msra.mxu1 %v15844_v9  ;;  %v15868_v62 = vcombine.low %v5624_v57, %v5628_v3  ;;  %v15875_v9 = vcombine.high %v5631_v61, %v5635_v4  ;;  %v5652_v57 = vld [vmem:[%s19262_s13 + $0xdf8] sm:$0xff]  ;;  %v6310_v4 = vld [vmem:[%s19262_s13 + $0xf20] sm:$0xff] }
 0xb2c   : > { %6062 = vmatprep.subr.bf16.mxu0 %v15851_v11  ;;  %6103 = vmatprep.subr.bf16.mxu1 %v15853_v12  ;;  %v15877_v11 = vcombine.high %v5632_v55, %v5636_v5  ;;  %v5639_v12 = vld [vmem:[%s19262_s13 + $0xd90] sm:$0xff]  ;;  %v15892_v61 = vcombine.low %v5648_v1, %v5652_v57 }
 0xb2d   : > { %v15882_v3 = vcombine.low %v5639_v12, %v5643_v17 }
 0xb2f   : > { %6063 = vmatpush1.bf16.msra.mxu0 %v15850_v51  ;;  %6104 = vmatpush1.bf16.msra.mxu1 %v15852_v21  ;;  %v15876_v51 = vcombine.low %v5632_v55, %v5636_v5  ;;  %v15883_v21 = vcombine.high %v5639_v12, %v5643_v17  ;;  %v6307_v55 = vld [vmem:[%s19262_s13 + $0xf08] sm:$0xff]  ;;  %v6314_v12 = vld [vmem:[%s19262_s13 + $0xf40] sm:$0xff] }
 0xb30   : > { %6064 = vmatprep.subr.bf16.mxu0 %v15859_v36  ;;  %6105 = vmatprep.subr.bf16.mxu1 %v15861_v15  ;;  %v15885_v36 = vcombine.high %v5640_v29, %v5644_v20  ;;  %v5647_v15 = vld [vmem:[%s19262_s13 + $0xdd0] sm:$0xff]  ;;  %v6318_v17 = vld [vmem:[%s19262_s13 + $0xf60] sm:$0xff] }
 0xb33   : > { %6065 = vmatpush1.bf16.msra.mxu0 %v15858_v52  ;;  %6106 = vmatpush1.bf16.msra.mxu1 %v15860_v37  ;;  %v15884_v52 = vcombine.low %v5640_v29, %v5644_v20  ;;  %v15891_v37 = vcombine.high %v5647_v15, %v5651_v56  ;;  %v6315_v29 = vld [vmem:[%s19262_s13 + $0xf48] sm:$0xff]  ;;  %v15937_v20 = vcombine.low %v6314_v12, %v6318_v17 }
 0xb34   : > { %6066 = vmatprep.subr.bf16.mxu0 %v15867_v53  ;;  %6107 = vmatprep.subr.bf16.mxu1 %v15869_v16  ;;  %v15893_v53 = vcombine.high %v5648_v1, %v5652_v57  ;;  %v15890_v16 = vcombine.low %v5647_v15, %v5651_v56  ;;  %v6323_v57 = vld [vmem:[%s19262_s13 + $0xf88] sm:$0xff] }
 0xb37   : > { %6067 = vmatpush1.bf16.msra.mxu0 %v15866_v6  ;;  %6108 = vmatpush1.bf16.msra.mxu1 %v15868_v62  ;;  %v6311_v6 = vld [vmem:[%s19262_s13 + $0xf28] sm:$0xff] }
 0xb38   : > { %6068 = vmatprep.subr.bf16.mxu0 %v15875_v9  ;;  %6109 = vmatprep.subr.bf16.mxu1 %v15877_v11  ;;  %v15931_v9 = vcombine.low %v6307_v55, %v6311_v6  ;;  %v15932_v11 = vcombine.high %v6307_v55, %v6311_v6 }
 0xb3b   : > { %6069 = vmatpush1.bf16.msra.mxu0 %v15874_v25  ;;  %6110 = vmatpush1.bf16.msra.mxu1 %v15876_v51  ;;  %v15938_v25 = vcombine.high %v6314_v12, %v6318_v17  ;;  %v6319_v51 = vld [vmem:[%s19262_s13 + $0xf68] sm:$0xff] }
 0xb3c   : > { %6070 = vmatprep.subr.bf16.mxu0 %v15883_v21  ;;  %6111 = vmatprep.subr.bf16.mxu1 %v15885_v36  ;;  %v6322_v21 = vld [vmem:[%s19262_s13 + $0xf80] sm:$0xff]  ;;  %v15939_v15 = vcombine.low %v6315_v29, %v6319_v51  ;;  %v15940_v56 = vcombine.high %v6315_v29, %v6319_v51  ;;  %v6284_v51 = vld [vmem:[%s19262_s13 + $0xe50] sm:$0xff] }
 0xb3d   : > { %v6326_v36 = vld [vmem:[%s19262_s13 + $0xfa0] sm:$0xff] }
 0xb3e   : > { %v15946_v1 = vcombine.high %v6322_v21, %v6326_v36 }
 0xb3f   : > { %6071 = vmatpush1.bf16.msra.mxu0 %v15882_v3  ;;  %6112 = vmatpush1.bf16.msra.mxu1 %v15884_v52  ;;  %v6327_v3 = vld [vmem:[%s19262_s13 + $0xfa8] sm:$0xff]  ;;  %v6330_v52 = vld [vmem:[%s19262_s13 + $0xfc0] sm:$0xff] }
 0xb40   : > { %6072 = vmatprep.subr.bf16.mxu0 %v15891_v37  ;;  %6113 = vmatprep.subr.bf16.mxu1 %v15893_v53  ;;  %v15948_v37 = vcombine.high %v6323_v57, %v6327_v3  ;;  %v6334_v53 = vld [vmem:[%s19262_s13 + $0xfe0] sm:$0xff] }
 0xb43   : > { %6073 = vmatpush1.bf16.msra.mxu0 %v15890_v16  ;;  %6114 = vmatpush1.bf16.msra.mxu1 %v15892_v61  ;;  %v6331_v16 = vld [vmem:[%s19262_s13 + $0xfc8] sm:$0xff] }
 0xb44   : > { %6148 = vmatprep.subr.bf16.mxu0 %v20339_v35  ;;  %6189 = vmatprep.subr.bf16.mxu1 %v20342_v24  ;;  %v6274_v35 = vld [vmem:[%s19262_s13 + $0xe00] sm:$0xff]  ;;  %v6335_v61 = vld [vmem:[%s19262_s13 + $0xfe8] sm:$0xff] }
 0xb45   : > { %v6278_v24 = vld [vmem:[%s19262_s13 + $0xe20] sm:$0xff] }
 0xb46   : > { %6091 = vmatmul.mubr.bf16.vlgmr.msra.gmra.mrb[12].mxu0 %v20519_v54  ;;  %6132 = vmatmul.mubr.bf16.vlgmr.msra.gmra.mrb[12].mxu1 %v20519_v54 }
 0xb47   : > { %6149 = vmatpush1.bf16.msra.mxu0 %v20347_v41  ;;  %6190 = vmatpush1.bf16.msra.mxu1 %v20350_v34  ;;  %v6275_v41 = vld [vmem:[%s19262_s13 + $0xe08] sm:$0xff]  ;;  %v15898_v34 = vcombine.high %v6274_v35, %v6278_v24 }
 0xb48   : > { %6150 = vmatprep.subr.bf16.mxu0 %v20353_v42  ;;  %6191 = vmatprep.subr.bf16.mxu1 %v20356_v58  ;;  %v6279_v42 = vld [vmem:[%s19262_s13 + $0xe28] sm:$0xff]  ;;  %v15897_v58 = vcombine.low %v6274_v35, %v6278_v24  ;;  %v20628_v35 = vld [vmem:[%s19262_s13 + $0xe10] sm:$0xff] }
 0xb49   : > { %6180 = vmatprep.mubr.bf16.mxu0 %v18868_v13  ;;  %6221 = vmatprep.mubr.bf16.mxu1 %v18868_v13  ;;  %v20631_v24 = vld [vmem:[%s19262_s13 + $0xe30] sm:$0xff] }
 0xb4b   : > { %6151 = vmatpush1.bf16.msra.mxu0 %v20361_v59  ;;  %6192 = vmatpush1.bf16.msra.mxu1 %v20364_v38  ;;  %v15899_v59 = vcombine.low %v6275_v41, %v6279_v42  ;;  %v15900_v38 = vcombine.high %v6275_v41, %v6279_v42  ;;  %v20634_v41 = vld [vmem:[%s19262_s13 + $0xe18] sm:$0xff]  ;;  %v15901_v42 = vcombine.low %v20628_v35, %v20631_v24 }
 0xb4c   : > { %6152 = vmatprep.subr.bf16.mxu0 %v20367_v63  ;;  %6193 = vmatprep.subr.bf16.mxu1 %v20370_v8  ;;  %v6282_v63 = vld [vmem:[%s19262_s13 + $0xe40] sm:$0xff] }
 0xb4d   : > { %v6286_v8 = vld [vmem:[%s19262_s13 + $0xe60] sm:$0xff] }
 0xb4f   : > { %6153 = vmatpush1.bf16.msra.mxu0 %v20373_v46  ;;  %6194 = vmatpush1.bf16.msra.mxu1 %v20376_v39  ;;  %v6283_v46 = vld [vmem:[%s19262_s13 + $0xe48] sm:$0xff]  ;;  %v15906_v39 = vcombine.high %v6282_v63, %v6286_v8 }
 0xb50   : > { %6154 = vmatprep.subr.bf16.mxu0 %v20379_v40  ;;  %6195 = vmatprep.subr.bf16.mxu1 %v20382_v60  ;;  %v6287_v40 = vld [vmem:[%s19262_s13 + $0xe68] sm:$0xff]  ;;  %v15905_v60 = vcombine.low %v6282_v63, %v6286_v8  ;;  %v15956_v8 = vcombine.high %v6331_v16, %v6335_v61 }
 0xb53   : > { %6155 = vmatpush1.bf16.msra.mxu0 %v20385_v45  ;;  %6196 = vmatpush1.bf16.msra.mxu1 %v20388_v7  ;;  %v15907_v45 = vcombine.low %v6283_v46, %v6287_v40  ;;  %v15908_v7 = vcombine.high %v6283_v46, %v6287_v40  ;;  %v15953_v46 = vcombine.low %v6330_v52, %v6334_v53 }
 0xb54   : > { %6156 = vmatprep.subr.bf16.mxu0 %v20391_v27  ;;  %6197 = vmatprep.subr.bf16.mxu1 %v20394_v23  ;;  %v6290_v27 = vld [vmem:[%s19262_s13 + $0xe80] sm:$0xff]  ;;  %v15902_v40 = vcombine.high %v20628_v35, %v20631_v24 }
 0xb55   : > { %v6294_v23 = vld [vmem:[%s19262_s13 + $0xea0] sm:$0xff] }
 0xb57   : > { %6157 = vmatpush1.bf16.msra.mxu0 %v20397_v22  ;;  %6198 = vmatpush1.bf16.msra.mxu1 %v20400_v47  ;;  %v6291_v22 = vld [vmem:[%s19262_s13 + $0xe88] sm:$0xff]  ;;  %v15914_v47 = vcombine.high %v6290_v27, %v6294_v23 }
 0xb58   : > { %6158 = vmatprep.subr.bf16.mxu0 %v20403_v30  ;;  %6199 = vmatprep.subr.bf16.mxu1 %v20406_v28  ;;  %v6295_v30 = vld [vmem:[%s19262_s13 + $0xea8] sm:$0xff]  ;;  %v15913_v28 = vcombine.low %v6290_v27, %v6294_v23 }
 0xb5b   : > { %6159 = vmatpush1.bf16.msra.mxu0 %v20409_v31  ;;  %6200 = vmatpush1.bf16.msra.mxu1 %v20412_v44  ;;  %v15915_v31 = vcombine.low %v6291_v22, %v6295_v30  ;;  %v15916_v44 = vcombine.high %v6291_v22, %v6295_v30 }
 0xb5c   : > { %6160 = vmatprep.subr.bf16.mxu0 %v20415_v48  ;;  %6201 = vmatprep.subr.bf16.mxu1 %v20418_v49  ;;  %v6298_v48 = vld [vmem:[%s19262_s13 + $0xec0] sm:$0xff] }
 0xb5d   : > { %v6302_v49 = vld [vmem:[%s19262_s13 + $0xee0] sm:$0xff] }
 0xb5f   : > { %6161 = vmatpush1.bf16.msra.mxu0 %v20421_v14  ;;  %6202 = vmatpush1.bf16.msra.mxu1 %v20424_v50  ;;  %v6299_v14 = vld [vmem:[%s19262_s13 + $0xec8] sm:$0xff]  ;;  %v15922_v50 = vcombine.high %v6298_v48, %v6302_v49 }
 0xb60   : > { %6162 = vmatprep.subr.bf16.mxu0 %v20427_v26  ;;  %6203 = vmatprep.subr.bf16.mxu1 %v20430_v32  ;;  %v6303_v26 = vld [vmem:[%s19262_s13 + $0xee8] sm:$0xff]  ;;  %v15921_v32 = vcombine.low %v6298_v48, %v6302_v49 }
 0xb63   : > { %6163 = vmatpush1.bf16.msra.mxu0 %v20433_v43  ;;  %6204 = vmatpush1.bf16.msra.mxu1 %v20436_v33  ;;  %v15923_v43 = vcombine.low %v6299_v14, %v6303_v26  ;;  %v15924_v33 = vcombine.high %v6299_v14, %v6303_v26 }
 0xb64   : > { %6661 = vmatprep.subr.bf16.mxu0 %v15898_v34  ;;  %6702 = vmatprep.subr.bf16.mxu1 %v15900_v38  ;;  %v15945_v34 = vcombine.low %v6322_v21, %v6326_v36  ;;  %v15954_v38 = vcombine.high %v6330_v52, %v6334_v53  ;;  %v6288_v21 = vld [vmem:[%s19262_s13 + $0xe70] sm:$0xff]  ;;  %v6285_v36 = vld [vmem:[%s19262_s13 + $0xe58] sm:$0xff] }
 0xb65   : > { %v6296_v52 = vld [vmem:[%s19262_s13 + $0xeb0] sm:$0xff]  ;;  %v6297_v53 = vld [vmem:[%s19262_s13 + $0xeb8] sm:$0xff] }
 0xb66   : > { %6181 = vmatmul.mubr.bf16.vlgmr.msra.gmra.mrb[36].mxu0 %v20519_v54  ;;  %6222 = vmatmul.mubr.bf16.vlgmr.msra.gmra.mrb[36].mxu1 %v20519_v54  ;;  %v6306_v54 = vld [vmem:[%s19262_s13 + $0xf00] sm:$0xff] }
 0xb67   : > { %6693 = vmatprep.mubr.bf16.mxu0 %v18868_v13  ;;  %6734 = vmatprep.mubr.bf16.mxu1 %v18868_v13  ;;  %v15930_v5 = vcombine.high %v6306_v54, %v6310_v4  ;;  %v15929_v62 = vcombine.low %v6306_v54, %v6310_v4 }
 0xb68   : > { %6662 = vmatpush1.bf16.msra.mxu0 %v15897_v58  ;;  %6703 = vmatpush1.bf16.msra.mxu1 %v15899_v59  ;;  %v20639_v58 = vld [vmem:[%s19262_s13 + $0xe38] sm:$0xff]  ;;  %v15947_v59 = vcombine.low %v6323_v57, %v6327_v3  ;;  %v6292_v3 = vld [vmem:[%s19262_s13 + $0xe90] sm:$0xff] }
 0xb69   : > { %6663 = vmatprep.subr.bf16.mxu0 %v15906_v39  ;;  %6704 = vmatprep.subr.bf16.mxu1 %v15908_v7  ;;  %v15903_v63 = vcombine.low %v20634_v41, %v20639_v58  ;;  %v15955_v39 = vcombine.low %v6331_v16, %v6335_v61  ;;  %v15909_v16 = vcombine.low %v6284_v51, %v6288_v21 }
 0xb6a   : > { %v15917_v35 = vcombine.low %v6292_v3, %v6296_v52 }
 0xb6c   : > { %6664 = vmatpush1.bf16.msra.mxu0 %v15905_v60  ;;  %6705 = vmatpush1.bf16.msra.mxu1 %v15907_v45  ;;  %v15904_v60 = vcombine.high %v20634_v41, %v20639_v58  ;;  %v6308_v58 = vld [vmem:[%s19262_s13 + $0xf10] sm:$0xff] }
 0xb6d   : > { %6665 = vmatprep.subr.bf16.mxu0 %v15914_v47  ;;  %6706 = vmatprep.subr.bf16.mxu1 %v15916_v44 }
 0xb70   : > { %6666 = vmatpush1.bf16.msra.mxu0 %v15913_v28  ;;  %6707 = vmatpush1.bf16.msra.mxu1 %v15915_v31 }
 0xb71   : > { %6667 = vmatprep.subr.bf16.mxu0 %v15922_v50  ;;  %6708 = vmatprep.subr.bf16.mxu1 %v15924_v33 }
 0xb74   : > { %6668 = vmatpush1.bf16.msra.mxu0 %v15921_v32  ;;  %6709 = vmatpush1.bf16.msra.mxu1 %v15923_v43 }
 0xb75   : > { %6669 = vmatprep.subr.bf16.mxu0 %v15930_v5  ;;  %6710 = vmatprep.subr.bf16.mxu1 %v15932_v11 }
 0xb78   : > { %6670 = vmatpush1.bf16.msra.mxu0 %v15929_v62  ;;  %6711 = vmatpush1.bf16.msra.mxu1 %v15931_v9 }
 0xb79   : > { %6671 = vmatprep.subr.bf16.mxu0 %v15938_v25  ;;  %6712 = vmatprep.subr.bf16.mxu1 %v15940_v56 }
 0xb7c   : > { %6672 = vmatpush1.bf16.msra.mxu0 %v15937_v20  ;;  %6713 = vmatpush1.bf16.msra.mxu1 %v15939_v15 }
 0xb7d   : > { %6673 = vmatprep.subr.bf16.mxu0 %v15946_v1  ;;  %6714 = vmatprep.subr.bf16.mxu1 %v15948_v37  ;;  %v15910_v1 = vcombine.high %v6284_v51, %v6288_v21  ;;  %v6293_v37 = vld [vmem:[%s19262_s13 + $0xe98] sm:$0xff]  ;;  %v20709_v51 = vld [vmem:[#allocation9 + $0x24] ss:$16 sps:$4 sm:$0xff]  }
 0xb7e   : > { %v15919_v24 = vcombine.low %v6293_v37, %v6297_v53  ;;  %v20712_v21 = vld [vmem:[#allocation9 + $0x2c] ss:$16 sps:$4 sm:$0xff]  }
 0xb80   : > { %6674 = vmatpush1.bf16.msra.mxu0 %v15945_v34  ;;  %6715 = vmatpush1.bf16.msra.mxu1 %v15947_v59  ;;  %v15918_v34 = vcombine.high %v6292_v3, %v6296_v52  ;;  %v15920_v59 = vcombine.high %v6293_v37, %v6297_v53  ;;  %v20732_v3 = vld [vmem:[#allocation9 + $0x48] ss:$16 sps:$4 sm:$0xff]   ;;  %v20735_v52 = vld [vmem:[#allocation9 + $0x64] ss:$16 sps:$4 sm:$0xff]   ;;  %v20738_v37 = vld [vmem:[#allocation9 + $0x6c] ss:$16 sps:$4 sm:$0xff]  }
 0xb81   : > { %6675 = vmatprep.subr.bf16.mxu0 %v15954_v38  ;;  %6716 = vmatprep.subr.bf16.mxu1 %v15956_v8  ;;  %v6300_v38 = vld [vmem:[%s19262_s13 + $0xed0] sm:$0xff]  ;;  %v20741_v53 = vld [vmem:[#allocation9 + $0x60] ss:$16 sps:$4 sm:$0xff]  }
 0xb82   : > { %v6304_v8 = vld [vmem:[%s19262_s13 + $0xef0] sm:$0xff] }
 0xb83   : > { %v15926_v41 = vcombine.high %v6300_v38, %v6304_v8 }
 0xb84   : > { %6676 = vmatpush1.bf16.msra.mxu0 %v15953_v46  ;;  %6717 = vmatpush1.bf16.msra.mxu1 %v15955_v39  ;;  %v6301_v46 = vld [vmem:[%s19262_s13 + $0xed8] sm:$0xff] }
 0xb85   : > { %6743 = vmatprep.subr.bf16.mxu0 %v15902_v40  ;;  %6784 = vmatprep.subr.bf16.mxu1 %v15904_v60  ;;  %v6305_v39 = vld [vmem:[%s19262_s13 + $0xef8] sm:$0xff] }
 0xb86   : > { %v6309_v40 = vld [vmem:[%s19262_s13 + $0xf18] sm:$0xff] }
 0xb87   : > { %v6313_v60 = vld [vmem:[%s19262_s13 + $0xf38] sm:$0xff] }
 0xc39   : > { %v6182_v45 = vpop.f32.mrb[36].mxu0  ;;  %v6223_v7 = vpop.f32.mrb[36].mxu1 }
 0xc3a   : > { %v6234_v27 = vrot.slane %v6182_v45, 2  ;;  %v6184_v23 = vpop.f32.mrb[37].mxu0  ;;  %v6225_v22 = vpop.f32.mrb[37].mxu1  ;;  %v6236_v26 = vrot.slane %v6223_v7, 2  ;;  %v15925_v45 = vcombine.low %v6300_v38, %v6304_v8  ;;  %v15927_v7 = vcombine.low %v6301_v46, %v6305_v39  ;;  %v20756_v38 = vld [vmem:[#allocation9 + $0x88] ss:$16 sps:$4 sm:$0xff]  }
 0xc3b   : > { %v6235_v47 = vrot.slane %v6184_v23, 2  ;;  %v6186_v30 = vpop.f32.mrb[38].mxu0  ;;  %v6227_v28 = vpop.f32.mrb[38].mxu1  ;;  %v6237_v32 = vrot.slane %v6225_v22, 2  ;;  %v15936_v23 = vcombine.high %v6309_v40, %v6313_v60  ;;  %v6316_v22 = vld [vmem:[%s19262_s13 + $0xf50] sm:$0xff] }
 0xc3c   : > { %v6242_v31 = vadd.f32 %v20496_v10, %v6234_v27  ;;  %v6187_v44 = vpop.f32.mrb[39].mxu0  ;;  %v6228_v48 = vpop.f32.mrb[39].mxu1  ;;  %v6244_v43 = vadd.f32 %v20504_v0, %v6236_v26  ;;  %v6266_v0 = vrot.slane %v20512_v19, 6  ;;  %v6289_v19 = vld [vmem:[%s19262_s13 + $0xe78] sm:$0xff]  ;;  %v20759_v8 = vld [vmem:[#allocation9 + $0xa4] ss:$16 sps:$4 sm:$0xff]  }
 0xc3d   : > { %v6243_v49 = vadd.f32 %v20500_v18, %v6235_v47  ;;  %v6245_v33 = vadd.f32 %v20508_v2, %v6237_v32  ;;  %v15912_v57 = vcombine.high %v6285_v36, %v6289_v19  ;;  %v15911_v61 = vcombine.low %v6285_v36, %v6289_v19  ;;  %v6320_v47 = vld [vmem:[%s19262_s13 + $0xf70] sm:$0xff]  ;;  %v6317_v30 = vld [vmem:[%s19262_s13 + $0xf58] sm:$0xff] }
 0xc3e   : > { %v15894_v14 = vmul.f32 -1.442695, %v6242_v31  ;;  %v15896_v54 = vmul.f32 -1.442695, %v6244_v43  ;;  %v6321_v28 = vld [vmem:[%s19262_s13 + $0xf78] sm:$0xff]  ;;  %v15935_v44 = vcombine.low %v6309_v40, %v6313_v60  ;;  %v15942_v48 = vcombine.high %v6316_v22, %v6320_v47 }
 0xc3f   : > { %v15895_v50 = vmul.f32 -1.442695, %v6243_v49  ;;  %v15944_v49 = vcombine.high %v6317_v30, %v6321_v28  ;;  %v6325_v26 = vld [vmem:[%s19262_s13 + $0xf98] sm:$0xff]  ;;  %v15941_v43 = vcombine.low %v6316_v22, %v6320_v47  ;;  %v20720_v19 = vld [vmem:[#allocation9 + $0x28] ss:$16 sps:$4 sm:$0xff]   ;;  %v6952_v47 = vld [vmem:[%s19262_s13 + $0x1028] sm:$0xff] }
 0xc40   : > { %17534 = vpow2.f32 %v15894_v14  ;;  %v6324_v14 = vld [vmem:[%s19262_s13 + $0xf90] sm:$0xff]  ;;  %v6329_v32 = vld [vmem:[%s19262_s13 + $0xfb8] sm:$0xff] }
 0xc41   : > { %17536 = vpow2.f32 %v15895_v50  ;;  %v6328_v50 = vld [vmem:[%s19262_s13 + $0xfb0] sm:$0xff]  ;;  %v20717_v36 = vld [vmem:[#allocation9 + $0x20] ss:$16 sps:$4 sm:$0xff]   ;;  %v20786_v40 = vld [vmem:[#allocation9 + $0xec] ss:$16 sps:$4 sm:$0xff]  }
 0xc42   : > { %17538 = vtanh.f32 %v6245_v33  ;;  %v15943_v33 = vcombine.low %v6317_v30, %v6321_v28  ;;  %v20789_v60 = vld [vmem:[#allocation9 + $0xe0] ss:$16 sps:$4 sm:$0xff]  }
 0xc43   : > { %17540 = vpow2.f32 %v15896_v54  ;;  %v15950_v54 = vcombine.high %v6324_v14, %v6328_v50 }
 0xc4a   : > { %v17535_v4 = vpop.eup %17534 }
 0xc4b   : > { %v6255_v55 = vadd.f32 1.0, %v17535_v4  ;;  %v17537_v5 = vpop.eup %17536  ;;  %v15952_v4 = vcombine.high %v6325_v26, %v6329_v32 }
 0xc4c   : > { %v6256_v10 = vadd.f32 1.0, %v17537_v5  ;;  %v17539_v18 = vpop.eup %17538  ;;  %v6336_v5 = vld [vmem:[%s19262_s13 + $0xff0] sm:$0xff] }
 0xc4d   : > { %17542 = vrcp.f32 %v6255_v55  ;;  %v17541_v6 = vpop.eup %17540  ;;  %v6332_v55 = vld [vmem:[%s19262_s13 + $0xfd0] sm:$0xff] }
 0xc4e   : > { %17544 = vrcp.f32 %v6256_v10  ;;  %v6257_v11 = vadd.f32 1.0, %v17541_v6  ;;  %v6333_v10 = vld [vmem:[%s19262_s13 + $0xfd8] sm:$0xff]  ;;  %v15949_v6 = vcombine.low %v6324_v14, %v6328_v50  ;;  %v6960_v14 = vld [vmem:[%s19262_s13 + $0x1068] sm:$0xff] }
 0xc50   : > { %17546 = vrcp.f32 %v6257_v11 }
 0xc57   : > { %v17543_v62 = vpop.eup %17542 }
 0xc58   : > { %v6269_v9 = vmul.f32 %v17543_v62, %v17539_v18  ;;  %v17545_v2 = vpop.eup %17544  ;;  %v6337_v18 = vld [vmem:[%s19262_s13 + $0xff8] sm:$0xff]  ;;  %v15951_v62 = vcombine.low %v6325_v26, %v6329_v32 }
 0xc59   : > { %v6268_v12 = vmul.f32 %v17545_v2, %v6266_v0  ;;  %v15958_v0 = vcombine.high %v6332_v55, %v6336_v5  ;;  %v15957_v2 = vcombine.low %v6332_v55, %v6336_v5  ;;  %v15959_v11 = vcombine.low %v6333_v10, %v6337_v18  ;;  %v6968_v55 = vld [vmem:[%s19262_s13 + $0x10a8] sm:$0xff] }
 0xc5a   : > { %v17547_v29 = vpop.eup %17546 }
 0xc5b   : > { %v20652_v17 = vadd.f32 %v6269_v9, %v6268_v12  ;;  %v15960_v9 = vcombine.high %v6333_v10, %v6337_v18  ;;  %v20695_v12 = vld [vmem:[#allocation9 + $0x4] ss:$16 sps:$4 sm:$0xff]  }
 0xc5d   : > { %17548 = vtanh.f32 %v20652_v17 }
 0xc67   : > { %v17549_v20 = vpop.eup %17548 }
 0xc68   : > { %v6272_v25 = vmul.f32 %v17549_v20, %v17547_v29  ;;  %v20698_v29 = vld [vmem:[#allocation9 + $0xc] ss:$16 sps:$4 sm:$0xff]   ;;  %v20703_v20 = vld [vmem:[#allocation9] ss:$16 sps:$4 sm:$0xff]  }
 0xc6a   : > { %v6273_v15 = vpack.c.bf16 %v6272_v25, %v6272_v25  ;;  %v20706_v25 = vld [vmem:[#allocation9 + $0x8] ss:$16 sps:$4 sm:$0xff]  }
 0xc6c   : > { %v20659_v56 = vrot.slane %v6273_v15, 3  ;;  %v20723_v15 = vld [vmem:[#allocation9 + $0x44] ss:$16 sps:$4 sm:$0xff]  }
 0xc6e   : > { %6694 = vmatmul.mubr.bf16.vlgmr.msra.gmra.mrb[8].mxu0 %v20659_v56  ;;  %6735 = vmatmul.mubr.bf16.vlgmr.msra.gmra.mrb[8].mxu1 %v20659_v56 }
 0xc6f   : > { %6744 = vmatpush1.bf16.msra.mxu0 %v15901_v42  ;;  %6785 = vmatpush1.bf16.msra.mxu1 %v15903_v63  ;;  %v15928_v42 = vcombine.high %v6301_v46, %v6305_v39  ;;  %v6312_v63 = vld [vmem:[%s19262_s13 + $0xf30] sm:$0xff]  ;;  %v20762_v46 = vld [vmem:[#allocation9 + $0xac] ss:$16 sps:$4 sm:$0xff]   ;;  %v20765_v39 = vld [vmem:[#allocation9 + $0xa0] ss:$16 sps:$4 sm:$0xff]  }
 0xc70   : > { %6745 = vmatprep.subr.bf16.mxu0 %v15910_v1  ;;  %6786 = vmatprep.subr.bf16.mxu1 %v15912_v57  ;;  %v15934_v27 = vcombine.high %v6308_v58, %v6312_v63  ;;  %v15933_v31 = vcombine.low %v6308_v58, %v6312_v63  ;;  %v20726_v1 = vld [vmem:[#allocation9 + $0x4c] ss:$16 sps:$4 sm:$0xff]   ;;  %v20729_v57 = vld [vmem:[#allocation9 + $0x40] ss:$16 sps:$4 sm:$0xff]   ;;  %v20780_v58 = vld [vmem:[#allocation9 + $0xc8] ss:$16 sps:$4 sm:$0xff]  }
 0xc71   : > { %6775 = vmatprep.mubr.bf16.mxu0 %v18868_v13  ;;  %6816 = vmatprep.mubr.bf16.mxu1 %v18868_v13  ;;  %v20783_v63 = vld [vmem:[#allocation9 + $0xe4] ss:$16 sps:$4 sm:$0xff]  }
 0xc73   : > { %6746 = vmatpush1.bf16.msra.mxu0 %v15909_v16  ;;  %6787 = vmatpush1.bf16.msra.mxu1 %v15911_v61  ;;  %v20744_v16 = vld [vmem:[#allocation9 + $0x68] ss:$16 sps:$4 sm:$0xff]   ;;  %v20747_v61 = vld [vmem:[#allocation9 + $0x84] ss:$16 sps:$4 sm:$0xff]  }
 0xc74   : > { %6747 = vmatprep.subr.bf16.mxu0 %v15918_v34  ;;  %6788 = vmatprep.subr.bf16.mxu1 %v15920_v59  ;;  %v20750_v34 = vld [vmem:[#allocation9 + $0x8c] ss:$16 sps:$4 sm:$0xff]   ;;  %v20753_v59 = vld [vmem:[#allocation9 + $0x80] ss:$16 sps:$4 sm:$0xff]  }
 0xc77   : > { %6748 = vmatpush1.bf16.msra.mxu0 %v15917_v35  ;;  %6789 = vmatpush1.bf16.msra.mxu1 %v15919_v24  ;;  %v20768_v35 = vld [vmem:[#allocation9 + $0xa8] ss:$16 sps:$4 sm:$0xff]   ;;  %v20771_v24 = vld [vmem:[#allocation9 + $0xc4] ss:$16 sps:$4 sm:$0xff]  }
 0xc78   : > { %6749 = vmatprep.subr.bf16.mxu0 %v15926_v41  ;;  %6790 = vmatprep.subr.bf16.mxu1 %v15928_v42  ;;  %v20774_v41 = vld [vmem:[#allocation9 + $0xcc] ss:$16 sps:$4 sm:$0xff]   ;;  %v20777_v42 = vld [vmem:[#allocation9 + $0xc0] ss:$16 sps:$4 sm:$0xff]  }
 0xc7b   : > { %6750 = vmatpush1.bf16.msra.mxu0 %v15925_v45  ;;  %6791 = vmatpush1.bf16.msra.mxu1 %v15927_v7  ;;  %v20792_v45 = vld [vmem:[#allocation9 + $0xe8] ss:$16 sps:$4 sm:$0xff]  }
 0xc7c   : > { %6751 = vmatprep.subr.bf16.mxu0 %v15934_v27  ;;  %6792 = vmatprep.subr.bf16.mxu1 %v15936_v23  ;;  %v6947_v7 = vld [vmem:[%s19262_s13 + $0x1000] sm:$0xff]  ;;  %v6948_v23 = vld [vmem:[%s19262_s13 + $0x1008] sm:$0xff] }
 0xc7d   : > { %v6951_v27 = vld [vmem:[%s19262_s13 + $0x1020] sm:$0xff]  ;;  %v15966_v28 = vcombine.low %v6948_v23, %v6952_v47 }
 0xc7e   : > { %v15965_v22 = vcombine.high %v6947_v7, %v6951_v27  ;;  %v15964_v30 = vcombine.low %v6947_v7, %v6951_v27 }
 0xc7f   : > { %6752 = vmatpush1.bf16.msra.mxu0 %v15933_v31  ;;  %6793 = vmatpush1.bf16.msra.mxu1 %v15935_v44  ;;  %v15967_v31 = vcombine.high %v6948_v23, %v6952_v47  ;;  %v6959_v44 = vld [vmem:[%s19262_s13 + $0x1060] sm:$0xff]  ;;  %v6980_v47 = vld [vmem:[%s19262_s13 + $0x1108] sm:$0xff] }
 0xc80   : > { %6753 = vmatprep.subr.bf16.mxu0 %v15942_v48  ;;  %6794 = vmatprep.subr.bf16.mxu1 %v15944_v49  ;;  %v6956_v48 = vld [vmem:[%s19262_s13 + $0x1048] sm:$0xff]  ;;  %v6979_v23 = vld [vmem:[%s19262_s13 + $0x1100] sm:$0xff] }
 0xc81   : > { %v15974_v26 = vcombine.low %v6956_v48, %v6960_v14  ;;  %v15975_v32 = vcombine.high %v6956_v48, %v6960_v14  ;;  %v6987_v48 = vld [vmem:[%s19262_s13 + $0x1140] sm:$0xff]  ;;  %v6988_v14 = vld [vmem:[%s19262_s13 + $0x1148] sm:$0xff] }
 0xc83   : > { %6754 = vmatpush1.bf16.msra.mxu0 %v15941_v43  ;;  %6795 = vmatpush1.bf16.msra.mxu1 %v15943_v33  ;;  %v6963_v43 = vld [vmem:[%s19262_s13 + $0x1080] sm:$0xff] }
 0xc84   : > { %6755 = vmatprep.subr.bf16.mxu0 %v15950_v54  ;;  %6796 = vmatprep.subr.bf16.mxu1 %v15952_v4  ;;  %v6967_v33 = vld [vmem:[%s19262_s13 + $0x10a0] sm:$0xff]  ;;  %v6964_v54 = vld [vmem:[%s19262_s13 + $0x1088] sm:$0xff] }
 0xc85   : > { %v15981_v4 = vcombine.high %v6963_v43, %v6967_v33  ;;  %v15980_v5 = vcombine.low %v6963_v43, %v6967_v33  ;;  %v15982_v10 = vcombine.low %v6964_v54, %v6968_v55  ;;  %v15983_v18 = vcombine.high %v6964_v54, %v6968_v55  ;;  %v6995_v43 = vld [vmem:[%s19262_s13 + $0x1180] sm:$0xff] }
 0xc86   : > { %v6999_v33 = vld [vmem:[%s19262_s13 + $0x11a0] sm:$0xff] }
 0xc87   : > { %6756 = vmatpush1.bf16.msra.mxu0 %v15949_v6  ;;  %6797 = vmatpush1.bf16.msra.mxu1 %v15951_v62  ;;  %v6971_v6 = vld [vmem:[%s19262_s13 + $0x10c0] sm:$0xff]  ;;  %v16013_v55 = vcombine.high %v6995_v43, %v6999_v33 }
 0xc88   : > { %6757 = vmatprep.subr.bf16.mxu0 %v15958_v0  ;;  %6798 = vmatprep.subr.bf16.mxu1 %v15960_v9  ;;  %v6975_v62 = vld [vmem:[%s19262_s13 + $0x10e0] sm:$0xff]  ;;  %v6972_v0 = vld [vmem:[%s19262_s13 + $0x10c8] sm:$0xff] }
 0xc89   : > { %v15989_v9 = vcombine.high %v6971_v6, %v6975_v62 }
 0xc8b   : > { %6758 = vmatpush1.bf16.msra.mxu0 %v15957_v2  ;;  %6799 = vmatpush1.bf16.msra.mxu1 %v15959_v11  ;;  %v6976_v2 = vld [vmem:[%s19262_s13 + $0x10e8] sm:$0xff]  ;;  %v15988_v11 = vcombine.low %v6971_v6, %v6975_v62  ;;  %v7007_v62 = vld [vmem:[%s19262_s13 + $0x11e0] sm:$0xff] }
 0xc8c   : > { %6833 = vmatprep.subr.bf16.mxu0 %v20695_v12  ;;  %6874 = vmatprep.subr.bf16.mxu1 %v20698_v29  ;;  %v15990_v7 = vcombine.low %v6972_v0, %v6976_v2  ;;  %v15991_v27 = vcombine.high %v6972_v0, %v6976_v2  ;;  %v7004_v0 = vld [vmem:[%s19262_s13 + $0x11c8] sm:$0xff]  ;;  %v16012_v2 = vcombine.low %v6995_v43, %v6999_v33 }
 0xc8e   : > { %6776 = vmatmul.mubr.bf16.vlgmr.msra.gmra.mrb[12].mxu0 %v20659_v56  ;;  %6817 = vmatmul.mubr.bf16.vlgmr.msra.gmra.mrb[12].mxu1 %v20659_v56 }
 0xc8f   : > { %6834 = vmatpush1.bf16.msra.mxu0 %v20703_v20  ;;  %6875 = vmatpush1.bf16.msra.mxu1 %v20706_v25 }
 0xc90   : > { %6835 = vmatprep.subr.bf16.mxu0 %v20709_v51  ;;  %6876 = vmatprep.subr.bf16.mxu1 %v20712_v21 }
 0xc91   : > { %6865 = vmatprep.mubr.bf16.mxu0 %v18868_v13  ;;  %6906 = vmatprep.mubr.bf16.mxu1 %v18868_v13 }
 0xc93   : > { %6836 = vmatpush1.bf16.msra.mxu0 %v20717_v36  ;;  %6877 = vmatpush1.bf16.msra.mxu1 %v20720_v19 }
 0xc94   : > { %6837 = vmatprep.subr.bf16.mxu0 %v20723_v15  ;;  %6878 = vmatprep.subr.bf16.mxu1 %v20726_v1 }
 0xc97   : > { %6838 = vmatpush1.bf16.msra.mxu0 %v20729_v57  ;;  %6879 = vmatpush1.bf16.msra.mxu1 %v20732_v3 }
 0xc98   : > { %6839 = vmatprep.subr.bf16.mxu0 %v20735_v52  ;;  %6880 = vmatprep.subr.bf16.mxu1 %v20738_v37 }
 0xc9b   : > { %6840 = vmatpush1.bf16.msra.mxu0 %v20741_v53  ;;  %6881 = vmatpush1.bf16.msra.mxu1 %v20744_v16 }
 0xc9c   : > { %6841 = vmatprep.subr.bf16.mxu0 %v20747_v61  ;;  %6882 = vmatprep.subr.bf16.mxu1 %v20750_v34 }
 0xc9f   : > { %6842 = vmatpush1.bf16.msra.mxu0 %v20753_v59  ;;  %6883 = vmatpush1.bf16.msra.mxu1 %v20756_v38 }
 0xca0   : > { %6843 = vmatprep.subr.bf16.mxu0 %v20759_v8  ;;  %6884 = vmatprep.subr.bf16.mxu1 %v20762_v46 }
 0xca3   : > { %6844 = vmatpush1.bf16.msra.mxu0 %v20765_v39  ;;  %6885 = vmatpush1.bf16.msra.mxu1 %v20768_v35 }
 0xca4   : > { %6845 = vmatprep.subr.bf16.mxu0 %v20771_v24  ;;  %6886 = vmatprep.subr.bf16.mxu1 %v20774_v41 }
 0xca7   : > { %6846 = vmatpush1.bf16.msra.mxu0 %v20777_v42  ;;  %6887 = vmatpush1.bf16.msra.mxu1 %v20780_v58 }
 0xca8   : > { %6847 = vmatprep.subr.bf16.mxu0 %v20783_v63  ;;  %6888 = vmatprep.subr.bf16.mxu1 %v20786_v40 }
 0xcab   : > { %6848 = vmatpush1.bf16.msra.mxu0 %v20789_v60  ;;  %6889 = vmatpush1.bf16.msra.mxu1 %v20792_v45 }
 0xcac   : > { %7331 = vmatprep.subr.bf16.mxu0 %v15965_v22  ;;  %7372 = vmatprep.subr.bf16.mxu1 %v15967_v31  ;;  %v6983_v22 = vld [vmem:[%s19262_s13 + $0x1120] sm:$0xff] }
 0xcad   : > { %v15996_v31 = vcombine.low %v6979_v23, %v6983_v22 }
 0xcae   : > { %6866 = vmatmul.mubr.bf16.vlgmr.msra.gmra.mrb[40].mxu0 %v20659_v56  ;;  %6907 = vmatmul.mubr.bf16.vlgmr.msra.gmra.mrb[40].mxu1 %v20659_v56  ;;  %v6955_v56 = vld [vmem:[%s19262_s13 + $0x1040] sm:$0xff] }
 0xcaf   : > { %7363 = vmatprep.mubr.bf16.mxu0 %v18868_v13  ;;  %7404 = vmatprep.mubr.bf16.mxu1 %v18868_v13  ;;  %v15973_v49 = vcombine.high %v6955_v56, %v6959_v44  ;;  %v15972_v50 = vcombine.low %v6955_v56, %v6959_v44 }
 0xcb0   : > { %7332 = vmatpush1.bf16.msra.mxu0 %v15964_v30  ;;  %7373 = vmatpush1.bf16.msra.mxu1 %v15966_v28  ;;  %v15997_v30 = vcombine.high %v6979_v23, %v6983_v22  ;;  %v6984_v28 = vld [vmem:[%s19262_s13 + $0x1128] sm:$0xff] }
 0xcb1   : > { %7333 = vmatprep.subr.bf16.mxu0 %v15973_v49  ;;  %7374 = vmatprep.subr.bf16.mxu1 %v15975_v32  ;;  %v15998_v56 = vcombine.low %v6980_v47, %v6984_v28  ;;  %v15999_v44 = vcombine.high %v6980_v47, %v6984_v28  ;;  %v6991_v49 = vld [vmem:[%s19262_s13 + $0x1160] sm:$0xff]  ;;  %v6992_v32 = vld [vmem:[%s19262_s13 + $0x1168] sm:$0xff] }
 0xcb2   : > { %v16006_v54 = vcombine.low %v6988_v14, %v6992_v32 }
 0xcb4   : > { %7334 = vmatpush1.bf16.msra.mxu0 %v15972_v50  ;;  %7375 = vmatpush1.bf16.msra.mxu1 %v15974_v26  ;;  %v16004_v50 = vcombine.low %v6987_v48, %v6991_v49  ;;  %v16005_v26 = vcombine.high %v6987_v48, %v6991_v49 }
 0xcb5   : > { %7335 = vmatprep.subr.bf16.mxu0 %v15981_v4  ;;  %7376 = vmatprep.subr.bf16.mxu1 %v15983_v18  ;;  %v16007_v4 = vcombine.high %v6988_v14, %v6992_v32  ;;  %v7003_v18 = vld [vmem:[%s19262_s13 + $0x11c0] sm:$0xff]  ;;  %v20852_v14 = vld [vmem:[%s19428_s24 + $0x40] sm:$0xff] }
 0xcb6   : > { %v16021_v22 = vcombine.high %v7003_v18, %v7007_v62 }
 0xcb8   : > { %7336 = vmatpush1.bf16.msra.mxu0 %v15980_v5  ;;  %7377 = vmatpush1.bf16.msra.mxu1 %v15982_v10  ;;  %v6996_v5 = vld [vmem:[%s19262_s13 + $0x1188] sm:$0xff] }
 0xcb9   : > { %7337 = vmatprep.subr.bf16.mxu0 %v15989_v9  ;;  %7378 = vmatprep.subr.bf16.mxu1 %v15991_v27  ;;  %v7000_v10 = vld [vmem:[%s19262_s13 + $0x11a8] sm:$0xff]  ;;  %v20838_v27 = vld [vmem:[%s19262_s13 + $0x1018] sm:$0xff] }
 0xcba   : > { %v16015_v6 = vcombine.high %v6996_v5, %v7000_v10  ;;  %v7008_v9 = vld [vmem:[%s19262_s13 + $0x11e8] sm:$0xff]  ;;  %v16014_v23 = vcombine.low %v6996_v5, %v7000_v10 }
 0xcbb   : > { %v16023_v28 = vcombine.high %v7004_v0, %v7008_v9 }
 0xcbc   : > { %7338 = vmatpush1.bf16.msra.mxu0 %v15988_v11  ;;  %7379 = vmatpush1.bf16.msra.mxu1 %v15990_v7  ;;  %v20832_v11 = vld [vmem:[%s19262_s13 + $0x1010] sm:$0xff] }
 0xcbd   : > { %7339 = vmatprep.subr.bf16.mxu0 %v15997_v30  ;;  %7380 = vmatprep.subr.bf16.mxu1 %v15999_v44  ;;  %v20835_v7 = vld [vmem:[%s19262_s13 + $0x1030] sm:$0xff]  ;;  %v20843_v30 = vld [vmem:[%s19262_s13 + $0x1038] sm:$0xff]  ;;  %v16022_v44 = vcombine.low %v7004_v0, %v7008_v9  ;;  %v20860_v0 = vld [vmem:[%s19428_s24 + $0x50] sm:$0xff] }
 0xcbe   : > { %v15968_v47 = vcombine.low %v20832_v11, %v20835_v7  ;;  %v15969_v48 = vcombine.high %v20832_v11, %v20835_v7  ;;  %v15971_v49 = vcombine.high %v20838_v27, %v20843_v30 }
 0xcc0   : > { %7340 = vmatpush1.bf16.msra.mxu0 %v15996_v31  ;;  %7381 = vmatpush1.bf16.msra.mxu1 %v15998_v56  ;;  %v15970_v31 = vcombine.low %v20838_v27, %v20843_v30  ;;  %v16020_v56 = vcombine.low %v7003_v18, %v7007_v62  ;;  %v6981_v30 = vld [vmem:[%s19262_s13 + $0x1110] sm:$0xff] }
 0xcc1   : > { %7341 = vmatprep.subr.bf16.mxu0 %v16005_v26  ;;  %7382 = vmatprep.subr.bf16.mxu1 %v16007_v4 }
 0xcc4   : > { %7342 = vmatpush1.bf16.msra.mxu0 %v16004_v50  ;;  %7383 = vmatpush1.bf16.msra.mxu1 %v16006_v54  ;;  %v20855_v50 = vld [vmem:[%s19428_s24 + $0x48] sm:$0xff] }
 0xcc5   : > { %7343 = vmatprep.subr.bf16.mxu0 %v16013_v55  ;;  %7384 = vmatprep.subr.bf16.mxu1 %v16015_v6 }
 0xcc8   : > { %7344 = vmatpush1.bf16.msra.mxu0 %v16012_v2  ;;  %7385 = vmatpush1.bf16.msra.mxu1 %v16014_v23  ;;  %v20864_v2 = vld [vmem:[%s19428_s24 + $0x58] sm:$0xff] }
 0xcc9   : > { %7345 = vmatprep.subr.bf16.mxu0 %v16021_v22  ;;  %7386 = vmatprep.subr.bf16.mxu1 %v16023_v28 }
 0xccc   : > { %7346 = vmatpush1.bf16.msra.mxu0 %v16020_v56  ;;  %7387 = vmatpush1.bf16.msra.mxu1 %v16022_v44 }
 0xccd   : > { %7413 = vmatprep.subr.bf16.mxu0 %v15969_v48  ;;  %7454 = vmatprep.subr.bf16.mxu1 %v15971_v49 }
 0xd81   : > { %v6867_v26 = vpop.f32.mrb[40].mxu0  ;;  %v6908_v32 = vpop.f32.mrb[40].mxu1 }
 0xd82   : > { %v6915_v43 = vadd.f32 %v6867_v26, %v20852_v14  ;;  %v6869_v33 = vpop.f32.mrb[41].mxu0  ;;  %v6910_v54 = vpop.f32.mrb[41].mxu1  ;;  %v6917_v9 = vadd.f32 %v6908_v32, %v20860_v0 }
 0xd83   : > { %v6916_v4 = vadd.f32 %v6869_v33, %v20855_v50  ;;  %v6871_v55 = vpop.f32.mrb[42].mxu0  ;;  %v6912_v5 = vpop.f32.mrb[42].mxu1  ;;  %v6918_v23 = vadd.f32 %v6910_v54, %v20864_v2 }
 0xd84   : > { %v15961_v10 = vmul.f32 -1.442695, %v6915_v43  ;;  %v6872_v18 = vpop.f32.mrb[43].mxu0  ;;  %v6913_v6 = vpop.f32.mrb[43].mxu1  ;;  %v15963_v22 = vmul.f32 -1.442695, %v6917_v9 }
 0xd85   : > { %v15962_v62 = vmul.f32 -1.442695, %v6916_v4  ;;  %v6939_v43 = vrot.slane %v20652_v17, 6  ;;  %v6957_v18 = vld [vmem:[%s19262_s13 + $0x1050] sm:$0xff]  ;;  %v6958_v9 = vld [vmem:[%s19262_s13 + $0x1058] sm:$0xff] }
 0xd86   : > { %17550 = vpow2.f32 %v15961_v10 }
 0xd87   : > { %17552 = vpow2.f32 %v15962_v62  ;;  %v6961_v62 = vld [vmem:[%s19262_s13 + $0x1070] sm:$0xff] }
 0xd88   : > { %17554 = vtanh.f32 %v6918_v23  ;;  %v6962_v23 = vld [vmem:[%s19262_s13 + $0x1078] sm:$0xff] }
 0xd89   : > { %17556 = vpow2.f32 %v15963_v22 }
 0xd90   : > { %v17551_v28 = vpop.eup %17550 }
 0xd91   : > { %v6928_v56 = vadd.f32 1.0, %v17551_v28  ;;  %v17553_v44 = vpop.eup %17552  ;;  %v15977_v28 = vcombine.high %v6957_v18, %v6961_v62 }
 0xd92   : > { %v6929_v48 = vadd.f32 1.0, %v17553_v44  ;;  %v17555_v49 = vpop.eup %17554  ;;  %v6965_v44 = vld [vmem:[%s19262_s13 + $0x1090] sm:$0xff] }
 0xd93   : > { %17558 = vrcp.f32 %v6928_v56  ;;  %v17557_v26 = vpop.eup %17556  ;;  %v15979_v56 = vcombine.high %v6958_v9, %v6962_v23 }
 0xd94   : > { %17560 = vrcp.f32 %v6929_v48  ;;  %v6930_v4 = vadd.f32 1.0, %v17557_v26  ;;  %v6969_v48 = vld [vmem:[%s19262_s13 + $0x10b0] sm:$0xff]  ;;  %v6970_v26 = vld [vmem:[%s19262_s13 + $0x10b8] sm:$0xff] }
 0xd95   : > { %v15984_v11 = vcombine.low %v6965_v44, %v6969_v48 }
 0xd96   : > { %17562 = vrcp.f32 %v6930_v4  ;;  %v6973_v4 = vld [vmem:[%s19262_s13 + $0x10d0] sm:$0xff] }
 0xd9d   : > { %v17559_v32 = vpop.eup %17558 }
 0xd9e   : > { %v6942_v33 = vmul.f32 %v17559_v32, %v17555_v49  ;;  %v17561_v54 = vpop.eup %17560  ;;  %v6966_v49 = vld [vmem:[%s19262_s13 + $0x1098] sm:$0xff]  ;;  %v15976_v32 = vcombine.low %v6957_v18, %v6961_v62 }
 0xd9f   : > { %v6941_v55 = vmul.f32 %v17561_v54, %v6939_v43  ;;  %v15978_v43 = vcombine.low %v6958_v9, %v6962_v23  ;;  %v15987_v54 = vcombine.high %v6966_v49, %v6970_v26  ;;  %v15986_v7 = vcombine.low %v6966_v49, %v6970_v26  ;;  %v6982_v18 = vld [vmem:[%s19262_s13 + $0x1118] sm:$0xff] }
 0xda0   : > { %v17563_v10 = vpop.eup %17562  ;;  %v6986_v62 = vld [vmem:[%s19262_s13 + $0x1138] sm:$0xff] }
 0xda1   : > { %v20868_v5 = vadd.f32 %v6942_v33, %v6941_v55  ;;  %v15985_v33 = vcombine.high %v6965_v44, %v6969_v48  ;;  %v6977_v55 = vld [vmem:[%s19262_s13 + $0x10f0] sm:$0xff]  ;;  %v6990_v48 = vld [vmem:[%s19262_s13 + $0x1158] sm:$0xff] }
 0xda2   : > { %v15993_v27 = vcombine.high %v6973_v4, %v6977_v55  ;;  %v15992_v9 = vcombine.low %v6973_v4, %v6977_v55  ;;  %v6993_v44 = vld [vmem:[%s19262_s13 + $0x1170] sm:$0xff]  ;;  %v6994_v49 = vld [vmem:[%s19262_s13 + $0x1178] sm:$0xff] }
 0xda3   : > { %17564 = vtanh.f32 %v20868_v5  ;;  %v7001_v4 = vld [vmem:[%s19262_s13 + $0x11b0] sm:$0xff]  ;;  %v6998_v55 = vld [vmem:[%s19262_s13 + $0x1198] sm:$0xff] }
 0xdad   : > { %v17565_v6 = vpop.eup %17564 }
 0xdae   : > { %v6945_v17 = vmul.f32 %v17565_v6, %v17563_v10  ;;  %v6974_v10 = vld [vmem:[%s19262_s13 + $0x10d8] sm:$0xff] }
 0xdaf   : > { %v6978_v6 = vld [vmem:[%s19262_s13 + $0x10f8] sm:$0xff] }
 0xdb0   : > { %v20875_v22 = vpack.c.bf16 %v6945_v17, %v6945_v17  ;;  %v15994_v23 = vcombine.low %v6974_v10, %v6978_v6 }
 0xdb2   : > { %7364 = vmatmul.mubr.bf16.vlgmr.msra.gmra.mrb[8].mxu0 %v20875_v22  ;;  %7405 = vmatmul.mubr.bf16.vlgmr.msra.gmra.mrb[8].mxu1 %v20875_v22 }
 0xdb3   : > { %7414 = vmatpush1.bf16.msra.mxu0 %v15968_v47  ;;  %7455 = vmatpush1.bf16.msra.mxu1 %v15970_v31  ;;  %v15995_v47 = vcombine.high %v6974_v10, %v6978_v6  ;;  %v6985_v31 = vld [vmem:[%s19262_s13 + $0x1130] sm:$0xff]  ;;  %v7002_v10 = vld [vmem:[%s19262_s13 + $0x11b8] sm:$0xff] }
 0xdb4   : > { %7415 = vmatprep.subr.bf16.mxu0 %v15977_v28  ;;  %7456 = vmatprep.subr.bf16.mxu1 %v15979_v56  ;;  %v16001_v17 = vcombine.high %v6981_v30, %v6985_v31  ;;  %v16003_v28 = vcombine.high %v6982_v18, %v6986_v62  ;;  %v6989_v56 = vld [vmem:[%s19262_s13 + $0x1150] sm:$0xff]  ;;  %v16000_v26 = vcombine.low %v6981_v30, %v6985_v31  ;;  %v7006_v31 = vld [vmem:[%s19262_s13 + $0x11d8] sm:$0xff] }
 0xdb5   : > { %7445 = vmatprep.mubr.bf16.mxu0 %v18868_v13  ;;  %7486 = vmatprep.mubr.bf16.mxu1 %v18868_v13  ;;  %v16008_v6 = vcombine.low %v6989_v56, %v6993_v44  ;;  %v7009_v30 = vld [vmem:[%s19262_s13 + $0x11f0] sm:$0xff] }
 0xdb7   : > { %7416 = vmatpush1.bf16.msra.mxu0 %v15976_v32  ;;  %7457 = vmatpush1.bf16.msra.mxu1 %v15978_v43  ;;  %v16002_v32 = vcombine.low %v6982_v18, %v6986_v62  ;;  %v16009_v43 = vcombine.high %v6989_v56, %v6993_v44  ;;  %v7010_v18 = vld [vmem:[%s19262_s13 + $0x11f8] sm:$0xff]  ;;  %v7665_v44 = vld [vmem:[%s19262_s13 + $0x1320] sm:$0xff] }
 0xdb8   : > { %7417 = vmatprep.subr.bf16.mxu0 %v15985_v33  ;;  %7458 = vmatprep.subr.bf16.mxu1 %v15987_v54  ;;  %v16011_v33 = vcombine.high %v6990_v48, %v6994_v49  ;;  %v6997_v54 = vld [vmem:[%s19262_s13 + $0x1190] sm:$0xff]  ;;  %v16026_v56 = vcombine.low %v7006_v31, %v7010_v18 }
 0xdb9   : > { %v16016_v62 = vcombine.low %v6997_v54, %v7001_v4 }
 0xdbb   : > { %7418 = vmatpush1.bf16.msra.mxu0 %v15984_v11  ;;  %7459 = vmatpush1.bf16.msra.mxu1 %v15986_v7  ;;  %v16010_v11 = vcombine.low %v6990_v48, %v6994_v49  ;;  %v16017_v7 = vcombine.high %v6997_v54, %v7001_v4  ;;  %v7662_v48 = vld [vmem:[%s19262_s13 + $0x1308] sm:$0xff]  ;;  %v7669_v54 = vld [vmem:[%s19262_s13 + $0x1340] sm:$0xff] }
 0xdbc   : > { %7419 = vmatprep.subr.bf16.mxu0 %v15993_v27  ;;  %7460 = vmatprep.subr.bf16.mxu1 %v15995_v47  ;;  %v16019_v27 = vcombine.high %v6998_v55, %v7002_v10  ;;  %v7005_v47 = vld [vmem:[%s19262_s13 + $0x11d0] sm:$0xff]  ;;  %v7673_v4 = vld [vmem:[%s19262_s13 + $0x1360] sm:$0xff] }
 0xdbf   : > { %7420 = vmatpush1.bf16.msra.mxu0 %v15992_v9  ;;  %7461 = vmatpush1.bf16.msra.mxu1 %v15994_v23  ;;  %v16018_v9 = vcombine.low %v6998_v55, %v7002_v10  ;;  %v16025_v23 = vcombine.high %v7005_v47, %v7009_v30  ;;  %v7670_v55 = vld [vmem:[%s19262_s13 + $0x1348] sm:$0xff]  ;;  %v16071_v10 = vcombine.low %v7669_v54, %v7673_v4 }
 0xdc0   : > { %7421 = vmatprep.subr.bf16.mxu0 %v16001_v17  ;;  %7462 = vmatprep.subr.bf16.mxu1 %v16003_v28  ;;  %v16027_v17 = vcombine.high %v7006_v31, %v7010_v18  ;;  %v16024_v28 = vcombine.low %v7005_v47, %v7009_v30  ;;  %v7678_v18 = vld [vmem:[%s19262_s13 + $0x1388] sm:$0xff] }
 0xdc3   : > { %7422 = vmatpush1.bf16.msra.mxu0 %v16000_v26  ;;  %7463 = vmatpush1.bf16.msra.mxu1 %v16002_v32  ;;  %v7666_v26 = vld [vmem:[%s19262_s13 + $0x1328] sm:$0xff] }
 0xdc4   : > { %7423 = vmatprep.subr.bf16.mxu0 %v16009_v43  ;;  %7464 = vmatprep.subr.bf16.mxu1 %v16011_v33  ;;  %v16065_v43 = vcombine.low %v7662_v48, %v7666_v26  ;;  %v16066_v33 = vcombine.high %v7662_v48, %v7666_v26 }
 0xdc7   : > { %7424 = vmatpush1.bf16.msra.mxu0 %v16008_v6  ;;  %7465 = vmatpush1.bf16.msra.mxu1 %v16010_v11  ;;  %v16072_v6 = vcombine.high %v7669_v54, %v7673_v4  ;;  %v7674_v11 = vld [vmem:[%s19262_s13 + $0x1368] sm:$0xff] }
 0xdc8   : > { %7425 = vmatprep.subr.bf16.mxu0 %v16017_v7  ;;  %7466 = vmatprep.subr.bf16.mxu1 %v16019_v27  ;;  %v7677_v7 = vld [vmem:[%s19262_s13 + $0x1380] sm:$0xff]  ;;  %v16073_v47 = vcombine.low %v7670_v55, %v7674_v11  ;;  %v16074_v30 = vcombine.high %v7670_v55, %v7674_v11  ;;  %v7639_v11 = vld [vmem:[%s19262_s13 + $0x1250] sm:$0xff] }
 0xdc9   : > { %v7681_v27 = vld [vmem:[%s19262_s13 + $0x13a0] sm:$0xff] }
 0xdca   : > { %v16080_v31 = vcombine.high %v7677_v7, %v7681_v27 }
 0xdcb   : > { %7426 = vmatpush1.bf16.msra.mxu0 %v16016_v62  ;;  %7467 = vmatpush1.bf16.msra.mxu1 %v16018_v9  ;;  %v7682_v62 = vld [vmem:[%s19262_s13 + $0x13a8] sm:$0xff]  ;;  %v7685_v9 = vld [vmem:[%s19262_s13 + $0x13c0] sm:$0xff] }
 0xdcc   : > { %7427 = vmatprep.subr.bf16.mxu0 %v16025_v23  ;;  %7468 = vmatprep.subr.bf16.mxu1 %v16027_v17  ;;  %v16082_v23 = vcombine.high %v7678_v18, %v7682_v62  ;;  %v7689_v17 = vld [vmem:[%s19262_s13 + $0x13e0] sm:$0xff] }
 0xdcf   : > { %7428 = vmatpush1.bf16.msra.mxu0 %v16024_v28  ;;  %7469 = vmatpush1.bf16.msra.mxu1 %v16026_v56  ;;  %v7686_v28 = vld [vmem:[%s19262_s13 + $0x13c8] sm:$0xff] }
 0xdd0   : > { %7503 = vmatprep.subr.bf16.mxu0 %v20695_v12  ;;  %7544 = vmatprep.subr.bf16.mxu1 %v20698_v29  ;;  %v7629_v12 = vld [vmem:[%s19262_s13 + $0x1200] sm:$0xff]  ;;  %v7690_v56 = vld [vmem:[%s19262_s13 + $0x13e8] sm:$0xff] }
 0xdd1   : > { %v7633_v29 = vld [vmem:[%s19262_s13 + $0x1220] sm:$0xff] }
 0xdd2   : > { %7446 = vmatmul.mubr.bf16.vlgmr.msra.gmra.mrb[12].mxu0 %v20875_v22  ;;  %7487 = vmatmul.mubr.bf16.vlgmr.msra.gmra.mrb[12].mxu1 %v20875_v22 }
 0xdd3   : > { %7504 = vmatpush1.bf16.msra.mxu0 %v20703_v20  ;;  %7545 = vmatpush1.bf16.msra.mxu1 %v20706_v25  ;;  %v7630_v20 = vld [vmem:[%s19262_s13 + $0x1208] sm:$0xff]  ;;  %v16032_v25 = vcombine.high %v7629_v12, %v7633_v29 }
 0xdd4   : > { %7505 = vmatprep.subr.bf16.mxu0 %v20709_v51  ;;  %7546 = vmatprep.subr.bf16.mxu1 %v20712_v21  ;;  %v7634_v51 = vld [vmem:[%s19262_s13 + $0x1228] sm:$0xff]  ;;  %v16031_v21 = vcombine.low %v7629_v12, %v7633_v29  ;;  %v20984_v12 = vld [vmem:[%s19262_s13 + $0x1210] sm:$0xff] }
 0xdd5   : > { %7535 = vmatprep.mubr.bf16.mxu0 %v18868_v13  ;;  %7576 = vmatprep.mubr.bf16.mxu1 %v18868_v13  ;;  %v20987_v29 = vld [vmem:[%s19262_s13 + $0x1230] sm:$0xff] }
 0xdd7   : > { %7506 = vmatpush1.bf16.msra.mxu0 %v20717_v36  ;;  %7547 = vmatpush1.bf16.msra.mxu1 %v20720_v19  ;;  %v16033_v36 = vcombine.low %v7630_v20, %v7634_v51  ;;  %v16034_v19 = vcombine.high %v7630_v20, %v7634_v51  ;;  %v20990_v20 = vld [vmem:[%s19262_s13 + $0x1218] sm:$0xff]  ;;  %v16035_v51 = vcombine.low %v20984_v12, %v20987_v29 }
 0xdd8   : > { %7507 = vmatprep.subr.bf16.mxu0 %v20723_v15  ;;  %7548 = vmatprep.subr.bf16.mxu1 %v20726_v1  ;;  %v7637_v15 = vld [vmem:[%s19262_s13 + $0x1240] sm:$0xff] }
 0xdd9   : > { %v7641_v1 = vld [vmem:[%s19262_s13 + $0x1260] sm:$0xff] }
 0xddb   : > { %7508 = vmatpush1.bf16.msra.mxu0 %v20729_v57  ;;  %7549 = vmatpush1.bf16.msra.mxu1 %v20732_v3  ;;  %v7638_v57 = vld [vmem:[%s19262_s13 + $0x1248] sm:$0xff]  ;;  %v16040_v3 = vcombine.high %v7637_v15, %v7641_v1 }
 0xddc   : > { %7509 = vmatprep.subr.bf16.mxu0 %v20735_v52  ;;  %7550 = vmatprep.subr.bf16.mxu1 %v20738_v37  ;;  %v7642_v52 = vld [vmem:[%s19262_s13 + $0x1268] sm:$0xff]  ;;  %v16039_v37 = vcombine.low %v7637_v15, %v7641_v1  ;;  %v16090_v1 = vcombine.high %v7686_v28, %v7690_v56 }
 0xddf   : > { %7510 = vmatpush1.bf16.msra.mxu0 %v20741_v53  ;;  %7551 = vmatpush1.bf16.msra.mxu1 %v20744_v16  ;;  %v16041_v53 = vcombine.low %v7638_v57, %v7642_v52  ;;  %v16042_v16 = vcombine.high %v7638_v57, %v7642_v52  ;;  %v16087_v57 = vcombine.low %v7685_v9, %v7689_v17 }
 0xde0   : > { %7511 = vmatprep.subr.bf16.mxu0 %v20747_v61  ;;  %7552 = vmatprep.subr.bf16.mxu1 %v20750_v34  ;;  %v7645_v61 = vld [vmem:[%s19262_s13 + $0x1280] sm:$0xff]  ;;  %v16036_v52 = vcombine.high %v20984_v12, %v20987_v29 }
 0xde1   : > { %v7649_v34 = vld [vmem:[%s19262_s13 + $0x12a0] sm:$0xff] }
 0xde3   : > { %7512 = vmatpush1.bf16.msra.mxu0 %v20753_v59  ;;  %7553 = vmatpush1.bf16.msra.mxu1 %v20756_v38  ;;  %v7646_v59 = vld [vmem:[%s19262_s13 + $0x1288] sm:$0xff]  ;;  %v16048_v38 = vcombine.high %v7645_v61, %v7649_v34 }
 0xde4   : > { %7513 = vmatprep.subr.bf16.mxu0 %v20759_v8  ;;  %7554 = vmatprep.subr.bf16.mxu1 %v20762_v46  ;;  %v7650_v8 = vld [vmem:[%s19262_s13 + $0x12a8] sm:$0xff]  ;;  %v16047_v46 = vcombine.low %v7645_v61, %v7649_v34 }
 0xde7   : > { %7514 = vmatpush1.bf16.msra.mxu0 %v20765_v39  ;;  %7555 = vmatpush1.bf16.msra.mxu1 %v20768_v35  ;;  %v16049_v39 = vcombine.low %v7646_v59, %v7650_v8  ;;  %v16050_v35 = vcombine.high %v7646_v59, %v7650_v8 }
 0xde8   : > { %7515 = vmatprep.subr.bf16.mxu0 %v20771_v24  ;;  %7556 = vmatprep.subr.bf16.mxu1 %v20774_v41  ;;  %v7653_v24 = vld [vmem:[%s19262_s13 + $0x12c0] sm:$0xff] }
 0xde9   : > { %v7657_v41 = vld [vmem:[%s19262_s13 + $0x12e0] sm:$0xff] }
 0xdeb   : > { %7516 = vmatpush1.bf16.msra.mxu0 %v20777_v42  ;;  %7557 = vmatpush1.bf16.msra.mxu1 %v20780_v58  ;;  %v7654_v42 = vld [vmem:[%s19262_s13 + $0x12c8] sm:$0xff]  ;;  %v16056_v58 = vcombine.high %v7653_v24, %v7657_v41 }
 0xdec   : > { %7517 = vmatprep.subr.bf16.mxu0 %v20783_v63  ;;  %7558 = vmatprep.subr.bf16.mxu1 %v20786_v40  ;;  %v7658_v63 = vld [vmem:[%s19262_s13 + $0x12e8] sm:$0xff]  ;;  %v16055_v40 = vcombine.low %v7653_v24, %v7657_v41 }
 0xdef   : > { %7518 = vmatpush1.bf16.msra.mxu0 %v20789_v60  ;;  %7559 = vmatpush1.bf16.msra.mxu1 %v20792_v45  ;;  %v16057_v60 = vcombine.low %v7654_v42, %v7658_v63  ;;  %v16058_v45 = vcombine.high %v7654_v42, %v7658_v63 }
 0xdf0   : > { %8016 = vmatprep.subr.bf16.mxu0 %v16032_v25  ;;  %8057 = vmatprep.subr.bf16.mxu1 %v16034_v19  ;;  %v16079_v25 = vcombine.low %v7677_v7, %v7681_v27  ;;  %v16088_v19 = vcombine.high %v7685_v9, %v7689_v17  ;;  %v7643_v7 = vld [vmem:[%s19262_s13 + $0x1270] sm:$0xff]  ;;  %v7640_v27 = vld [vmem:[%s19262_s13 + $0x1258] sm:$0xff] }
 0xdf1   : > { %v7651_v9 = vld [vmem:[%s19262_s13 + $0x12b0] sm:$0xff]  ;;  %v7652_v17 = vld [vmem:[%s19262_s13 + $0x12b8] sm:$0xff] }
 0xdf2   : > { %7536 = vmatmul.mubr.bf16.vlgmr.msra.gmra.mrb[44].mxu0 %v20875_v22  ;;  %7577 = vmatmul.mubr.bf16.vlgmr.msra.gmra.mrb[44].mxu1 %v20875_v22  ;;  %v7661_v22 = vld [vmem:[%s19262_s13 + $0x1300] sm:$0xff] }
 0xdf3   : > { %8048 = vmatprep.mubr.bf16.mxu0 %v18868_v13  ;;  %8089 = vmatprep.mubr.bf16.mxu1 %v18868_v13  ;;  %v16064_v49 = vcombine.high %v7661_v22, %v7665_v44  ;;  %v16063_v32 = vcombine.low %v7661_v22, %v7665_v44 }
 0xdf4   : > { %8017 = vmatpush1.bf16.msra.mxu0 %v16031_v21  ;;  %8058 = vmatpush1.bf16.msra.mxu1 %v16033_v36  ;;  %v20995_v21 = vld [vmem:[%s19262_s13 + $0x1238] sm:$0xff]  ;;  %v16081_v36 = vcombine.low %v7678_v18, %v7682_v62  ;;  %v7647_v62 = vld [vmem:[%s19262_s13 + $0x1290] sm:$0xff] }
 0xdf5   : > { %8018 = vmatprep.subr.bf16.mxu0 %v16040_v3  ;;  %8059 = vmatprep.subr.bf16.mxu1 %v16042_v16  ;;  %v16037_v15 = vcombine.low %v20990_v20, %v20995_v21  ;;  %v16089_v3 = vcombine.low %v7686_v28, %v7690_v56  ;;  %v16043_v28 = vcombine.low %v7639_v11, %v7643_v7 }
 0xdf6   : > { %v16051_v12 = vcombine.low %v7647_v62, %v7651_v9 }
 0xdf8   : > { %8019 = vmatpush1.bf16.msra.mxu0 %v16039_v37  ;;  %8060 = vmatpush1.bf16.msra.mxu1 %v16041_v53  ;;  %v16038_v37 = vcombine.high %v20990_v20, %v20995_v21  ;;  %v7663_v21 = vld [vmem:[%s19262_s13 + $0x1310] sm:$0xff] }
 0xdf9   : > { %8020 = vmatprep.subr.bf16.mxu0 %v16048_v38  ;;  %8061 = vmatprep.subr.bf16.mxu1 %v16050_v35 }
 0xdfc   : > { %8021 = vmatpush1.bf16.msra.mxu0 %v16047_v46  ;;  %8062 = vmatpush1.bf16.msra.mxu1 %v16049_v39 }
 0xdfd   : > { %8022 = vmatprep.subr.bf16.mxu0 %v16056_v58  ;;  %8063 = vmatprep.subr.bf16.mxu1 %v16058_v45 }
 0xe00   : > { %8023 = vmatpush1.bf16.msra.mxu0 %v16055_v40  ;;  %8064 = vmatpush1.bf16.msra.mxu1 %v16057_v60 }
 0xe01   : > { %8024 = vmatprep.subr.bf16.mxu0 %v16064_v49  ;;  %8065 = vmatprep.subr.bf16.mxu1 %v16066_v33 }
 0xe04   : > { %8025 = vmatpush1.bf16.msra.mxu0 %v16063_v32  ;;  %8066 = vmatpush1.bf16.msra.mxu1 %v16065_v43 }
 0xe05   : > { %8026 = vmatprep.subr.bf16.mxu0 %v16072_v6  ;;  %8067 = vmatprep.subr.bf16.mxu1 %v16074_v30 }
 0xe08   : > { %8027 = vmatpush1.bf16.msra.mxu0 %v16071_v10  ;;  %8068 = vmatpush1.bf16.msra.mxu1 %v16073_v47 }
 0xe09   : > { %8028 = vmatprep.subr.bf16.mxu0 %v16080_v31  ;;  %8069 = vmatprep.subr.bf16.mxu1 %v16082_v23  ;;  %v16044_v31 = vcombine.high %v7639_v11, %v7643_v7  ;;  %v7648_v23 = vld [vmem:[%s19262_s13 + $0x1298] sm:$0xff]  ;;  %v21065_v11 = vld [vmem:[#allocation9 + $0x24] ss:$16 sps:$4 sm:$0xff]  }
 0xe0a   : > { %v16053_v29 = vcombine.low %v7648_v23, %v7652_v17  ;;  %v21068_v7 = vld [vmem:[#allocation9 + $0x2c] ss:$16 sps:$4 sm:$0xff]  }
 0xe0c   : > { %8029 = vmatpush1.bf16.msra.mxu0 %v16079_v25  ;;  %8070 = vmatpush1.bf16.msra.mxu1 %v16081_v36  ;;  %v16052_v25 = vcombine.high %v7647_v62, %v7651_v9  ;;  %v16054_v36 = vcombine.high %v7648_v23, %v7652_v17  ;;  %v21088_v62 = vld [vmem:[#allocation9 + $0x48] ss:$16 sps:$4 sm:$0xff]   ;;  %v21091_v9 = vld [vmem:[#allocation9 + $0x64] ss:$16 sps:$4 sm:$0xff]   ;;  %v21094_v23 = vld [vmem:[#allocation9 + $0x6c] ss:$16 sps:$4 sm:$0xff]  }
 0xe0d   : > { %8030 = vmatprep.subr.bf16.mxu0 %v16088_v19  ;;  %8071 = vmatprep.subr.bf16.mxu1 %v16090_v1  ;;  %v7655_v19 = vld [vmem:[%s19262_s13 + $0x12d0] sm:$0xff]  ;;  %v21097_v17 = vld [vmem:[#allocation9 + $0x60] ss:$16 sps:$4 sm:$0xff]  }
 0xe0e   : > { %v7659_v1 = vld [vmem:[%s19262_s13 + $0x12f0] sm:$0xff] }
 0xe0f   : > { %v16060_v20 = vcombine.high %v7655_v19, %v7659_v1 }
 0xe10   : > { %8031 = vmatpush1.bf16.msra.mxu0 %v16087_v57  ;;  %8072 = vmatpush1.bf16.msra.mxu1 %v16089_v3  ;;  %v7656_v57 = vld [vmem:[%s19262_s13 + $0x12d8] sm:$0xff] }
 0xe11   : > { %8098 = vmatprep.subr.bf16.mxu0 %v16036_v52  ;;  %8139 = vmatprep.subr.bf16.mxu1 %v16038_v37  ;;  %v7660_v3 = vld [vmem:[%s19262_s13 + $0x12f8] sm:$0xff] }
 0xe12   : > { %v7664_v52 = vld [vmem:[%s19262_s13 + $0x1318] sm:$0xff] }
 0xe13   : > { %v7668_v37 = vld [vmem:[%s19262_s13 + $0x1338] sm:$0xff] }
 0xec5   : > { %v7537_v53 = vpop.f32.mrb[44].mxu0  ;;  %v7578_v16 = vpop.f32.mrb[44].mxu1 }
 0xec6   : > { %v7589_v61 = vrot.slane %v7537_v53, 6  ;;  %v7539_v34 = vpop.f32.mrb[45].mxu0  ;;  %v7580_v59 = vpop.f32.mrb[45].mxu1  ;;  %v7591_v63 = vrot.slane %v7578_v16, 6  ;;  %v16059_v53 = vcombine.low %v7655_v19, %v7659_v1  ;;  %v16061_v16 = vcombine.low %v7656_v57, %v7660_v3  ;;  %v21112_v19 = vld [vmem:[#allocation9 + $0x88] ss:$16 sps:$4 sm:$0xff]  }
 0xec7   : > { %v7590_v38 = vrot.slane %v7539_v34, 6  ;;  %v7541_v8 = vpop.f32.mrb[46].mxu0  ;;  %v7582_v46 = vpop.f32.mrb[46].mxu1  ;;  %v7592_v40 = vrot.slane %v7580_v59, 6  ;;  %v16070_v34 = vcombine.high %v7664_v52, %v7668_v37  ;;  %v7671_v59 = vld [vmem:[%s19262_s13 + $0x1350] sm:$0xff] }
 0xec8   : > { %v7597_v39 = vadd.f32 %v7589_v61, %v20852_v14  ;;  %v7542_v35 = vpop.f32.mrb[47].mxu0  ;;  %v7583_v24 = vpop.f32.mrb[47].mxu1  ;;  %v7599_v60 = vadd.f32 %v7591_v63, %v20860_v0  ;;  %v7621_v0 = vrot.slane %v20868_v5, 6  ;;  %v7644_v5 = vld [vmem:[%s19262_s13 + $0x1278] sm:$0xff]  ;;  %v21115_v1 = vld [vmem:[#allocation9 + $0xa4] ss:$16 sps:$4 sm:$0xff]  }
 0xec9   : > { %v7598_v41 = vadd.f32 %v7590_v38, %v20855_v50  ;;  %v7600_v45 = vadd.f32 %v7592_v40, %v20864_v2  ;;  %v16046_v18 = vcombine.high %v7640_v27, %v7644_v5  ;;  %v16045_v56 = vcombine.low %v7640_v27, %v7644_v5  ;;  %v7675_v38 = vld [vmem:[%s19262_s13 + $0x1370] sm:$0xff]  ;;  %v7672_v8 = vld [vmem:[%s19262_s13 + $0x1358] sm:$0xff] }
 0xeca   : > { %v16028_v42 = vmul.f32 -1.442695, %v7597_v39  ;;  %v16030_v22 = vmul.f32 -1.442695, %v7599_v60  ;;  %v7676_v46 = vld [vmem:[%s19262_s13 + $0x1378] sm:$0xff]  ;;  %v16069_v35 = vcombine.low %v7664_v52, %v7668_v37  ;;  %v16076_v24 = vcombine.high %v7671_v59, %v7675_v38 }
 0xecb   : > { %v16029_v58 = vmul.f32 -1.442695, %v7598_v41  ;;  %v16078_v41 = vcombine.high %v7672_v8, %v7676_v46  ;;  %v7680_v63 = vld [vmem:[%s19262_s13 + $0x1398] sm:$0xff]  ;;  %v16075_v60 = vcombine.low %v7671_v59, %v7675_v38  ;;  %v21076_v5 = vld [vmem:[#allocation9 + $0x28] ss:$16 sps:$4 sm:$0xff]   ;;  %v8319_v38 = vld [vmem:[%s19262_s13 + $0x1428] sm:$0xff] }
 0xecc   : > { %17566 = vpow2.f32 %v16028_v42  ;;  %v7679_v42 = vld [vmem:[%s19262_s13 + $0x1390] sm:$0xff]  ;;  %v7684_v40 = vld [vmem:[%s19262_s13 + $0x13b8] sm:$0xff] }
 0xecd   : > { %17568 = vpow2.f32 %v16029_v58  ;;  %v7683_v58 = vld [vmem:[%s19262_s13 + $0x13b0] sm:$0xff]  ;;  %v21073_v27 = vld [vmem:[#allocation9 + $0x20] ss:$16 sps:$4 sm:$0xff]   ;;  %v21142_v52 = vld [vmem:[#allocation9 + $0xec] ss:$16 sps:$4 sm:$0xff]  }
 0xece   : > { %17570 = vtanh.f32 %v7600_v45  ;;  %v16077_v45 = vcombine.low %v7672_v8, %v7676_v46  ;;  %v21145_v37 = vld [vmem:[#allocation9 + $0xe0] ss:$16 sps:$4 sm:$0xff]  }
 0xecf   : > { %17572 = vpow2.f32 %v16030_v22  ;;  %v16084_v22 = vcombine.high %v7679_v42, %v7683_v58 }
 0xed6   : > { %v17567_v44 = vpop.eup %17566 }
 0xed7   : > { %v7610_v48 = vadd.f32 1.0, %v17567_v44  ;;  %v17569_v49 = vpop.eup %17568  ;;  %v16086_v44 = vcombine.high %v7680_v63, %v7684_v40 }
 0xed8   : > { %v7611_v14 = vadd.f32 1.0, %v17569_v49  ;;  %v17571_v50 = vpop.eup %17570  ;;  %v7691_v49 = vld [vmem:[%s19262_s13 + $0x13f0] sm:$0xff] }
 0xed9   : > { %17574 = vrcp.f32 %v7610_v48  ;;  %v17573_v26 = vpop.eup %17572  ;;  %v7687_v48 = vld [vmem:[%s19262_s13 + $0x13d0] sm:$0xff] }
 0xeda   : > { %17576 = vrcp.f32 %v7611_v14  ;;  %v7612_v33 = vadd.f32 1.0, %v17573_v26  ;;  %v7688_v14 = vld [vmem:[%s19262_s13 + $0x13d8] sm:$0xff]  ;;  %v16083_v26 = vcombine.low %v7679_v42, %v7683_v58  ;;  %v8327_v42 = vld [vmem:[%s19262_s13 + $0x1468] sm:$0xff] }
 0xedc   : > { %17578 = vrcp.f32 %v7612_v33 }
 0xee3   : > { %v17575_v32 = vpop.eup %17574 }
 0xee4   : > { %v7624_v43 = vmul.f32 %v17575_v32, %v17571_v50  ;;  %v17577_v2 = vpop.eup %17576  ;;  %v7692_v50 = vld [vmem:[%s19262_s13 + $0x13f8] sm:$0xff]  ;;  %v16085_v32 = vcombine.low %v7680_v63, %v7684_v40 }
 0xee5   : > { %v7623_v54 = vmul.f32 %v17577_v2, %v7621_v0  ;;  %v16092_v0 = vcombine.high %v7687_v48, %v7691_v49  ;;  %v16091_v2 = vcombine.low %v7687_v48, %v7691_v49  ;;  %v16093_v33 = vcombine.low %v7688_v14, %v7692_v50  ;;  %v8335_v48 = vld [vmem:[%s19262_s13 + $0x14a8] sm:$0xff] }
 0xee6   : > { %v17579_v55 = vpop.eup %17578 }
 0xee7   : > { %v21008_v4 = vadd.f32 %v7624_v43, %v7623_v54  ;;  %v16094_v43 = vcombine.high %v7688_v14, %v7692_v50  ;;  %v21051_v54 = vld [vmem:[#allocation9 + $0x4] ss:$16 sps:$4 sm:$0xff]  }
 0xee9   : > { %17580 = vtanh.f32 %v21008_v4 }
 0xef3   : > { %v17581_v10 = vpop.eup %17580 }
 0xef4   : > { %v7627_v6 = vmul.f32 %v17581_v10, %v17579_v55  ;;  %v21054_v55 = vld [vmem:[#allocation9 + $0xc] ss:$16 sps:$4 sm:$0xff]   ;;  %v21059_v10 = vld [vmem:[#allocation9] ss:$16 sps:$4 sm:$0xff]  }
 0xef6   : > { %v7628_v47 = vpack.c.bf16 %v7627_v6, %v7627_v6  ;;  %v21062_v6 = vld [vmem:[#allocation9 + $0x8] ss:$16 sps:$4 sm:$0xff]  }
 0xef8   : > { %v21015_v30 = vrot.slane %v7628_v47, 1  ;;  %v21079_v47 = vld [vmem:[#allocation9 + $0x44] ss:$16 sps:$4 sm:$0xff]  }
 0xefa   : > { %8049 = vmatmul.mubr.bf16.vlgmr.msra.gmra.mrb[8].mxu0 %v21015_v30  ;;  %8090 = vmatmul.mubr.bf16.vlgmr.msra.gmra.mrb[8].mxu1 %v21015_v30 }
 0xefb   : > { %8099 = vmatpush1.bf16.msra.mxu0 %v16035_v51  ;;  %8140 = vmatpush1.bf16.msra.mxu1 %v16037_v15  ;;  %v16062_v51 = vcombine.high %v7656_v57, %v7660_v3  ;;  %v7667_v15 = vld [vmem:[%s19262_s13 + $0x1330] sm:$0xff]  ;;  %v21118_v57 = vld [vmem:[#allocation9 + $0xac] ss:$16 sps:$4 sm:$0xff]   ;;  %v21121_v3 = vld [vmem:[#allocation9 + $0xa0] ss:$16 sps:$4 sm:$0xff]  }
 0xefc   : > { %8100 = vmatprep.subr.bf16.mxu0 %v16044_v31  ;;  %8141 = vmatprep.subr.bf16.mxu1 %v16046_v18  ;;  %v16068_v61 = vcombine.high %v7663_v21, %v7667_v15  ;;  %v16067_v39 = vcombine.low %v7663_v21, %v7667_v15  ;;  %v21082_v31 = vld [vmem:[#allocation9 + $0x4c] ss:$16 sps:$4 sm:$0xff]   ;;  %v21085_v18 = vld [vmem:[#allocation9 + $0x40] ss:$16 sps:$4 sm:$0xff]   ;;  %v21136_v21 = vld [vmem:[#allocation9 + $0xc8] ss:$16 sps:$4 sm:$0xff]  }
 0xefd   : > { %8130 = vmatprep.mubr.bf16.mxu0 %v18868_v13  ;;  %8171 = vmatprep.mubr.bf16.mxu1 %v18868_v13  ;;  %v21139_v15 = vld [vmem:[#allocation9 + $0xe4] ss:$16 sps:$4 sm:$0xff]  }
 0xeff   : > { %8101 = vmatpush1.bf16.msra.mxu0 %v16043_v28  ;;  %8142 = vmatpush1.bf16.msra.mxu1 %v16045_v56  ;;  %v21100_v28 = vld [vmem:[#allocation9 + $0x68] ss:$16 sps:$4 sm:$0xff]   ;;  %v21103_v56 = vld [vmem:[#allocation9 + $0x84] ss:$16 sps:$4 sm:$0xff]  }
 0xf00   : > { %8102 = vmatprep.subr.bf16.mxu0 %v16052_v25  ;;  %8143 = vmatprep.subr.bf16.mxu1 %v16054_v36  ;;  %v21106_v25 = vld [vmem:[#allocation9 + $0x8c] ss:$16 sps:$4 sm:$0xff]   ;;  %v21109_v36 = vld [vmem:[#allocation9 + $0x80] ss:$16 sps:$4 sm:$0xff]  }
 0xf03   : > { %8103 = vmatpush1.bf16.msra.mxu0 %v16051_v12  ;;  %8144 = vmatpush1.bf16.msra.mxu1 %v16053_v29  ;;  %v21124_v12 = vld [vmem:[#allocation9 + $0xa8] ss:$16 sps:$4 sm:$0xff]   ;;  %v21127_v29 = vld [vmem:[#allocation9 + $0xc4] ss:$16 sps:$4 sm:$0xff]  }
 0xf04   : > { %8104 = vmatprep.subr.bf16.mxu0 %v16060_v20  ;;  %8145 = vmatprep.subr.bf16.mxu1 %v16062_v51  ;;  %v21130_v20 = vld [vmem:[#allocation9 + $0xcc] ss:$16 sps:$4 sm:$0xff]   ;;  %v21133_v51 = vld [vmem:[#allocation9 + $0xc0] ss:$16 sps:$4 sm:$0xff]  }
 0xf07   : > { %8105 = vmatpush1.bf16.msra.mxu0 %v16059_v53  ;;  %8146 = vmatpush1.bf16.msra.mxu1 %v16061_v16  ;;  %v21148_v53 = vld [vmem:[#allocation9 + $0xe8] ss:$16 sps:$4 sm:$0xff]  }
 0xf08   : > { %8106 = vmatprep.subr.bf16.mxu0 %v16068_v61  ;;  %8147 = vmatprep.subr.bf16.mxu1 %v16070_v34  ;;  %v8314_v16 = vld [vmem:[%s19262_s13 + $0x1400] sm:$0xff]  ;;  %v8315_v34 = vld [vmem:[%s19262_s13 + $0x1408] sm:$0xff] }
 0xf09   : > { %v8318_v61 = vld [vmem:[%s19262_s13 + $0x1420] sm:$0xff]  ;;  %v16100_v46 = vcombine.low %v8315_v34, %v8319_v38 }
 0xf0a   : > { %v16099_v59 = vcombine.high %v8314_v16, %v8318_v61  ;;  %v16098_v8 = vcombine.low %v8314_v16, %v8318_v61 }
 0xf0b   : > { %8107 = vmatpush1.bf16.msra.mxu0 %v16067_v39  ;;  %8148 = vmatpush1.bf16.msra.mxu1 %v16069_v35  ;;  %v16101_v39 = vcombine.high %v8315_v34, %v8319_v38  ;;  %v8326_v35 = vld [vmem:[%s19262_s13 + $0x1460] sm:$0xff]  ;;  %v8347_v38 = vld [vmem:[%s19262_s13 + $0x1508] sm:$0xff] }
 0xf0c   : > { %8108 = vmatprep.subr.bf16.mxu0 %v16076_v24  ;;  %8149 = vmatprep.subr.bf16.mxu1 %v16078_v41  ;;  %v8323_v24 = vld [vmem:[%s19262_s13 + $0x1448] sm:$0xff]  ;;  %v8346_v34 = vld [vmem:[%s19262_s13 + $0x1500] sm:$0xff] }
 0xf0d   : > { %v16108_v63 = vcombine.low %v8323_v24, %v8327_v42  ;;  %v16109_v40 = vcombine.high %v8323_v24, %v8327_v42  ;;  %v8354_v24 = vld [vmem:[%s19262_s13 + $0x1540] sm:$0xff]  ;;  %v8355_v42 = vld [vmem:[%s19262_s13 + $0x1548] sm:$0xff] }
 0xf0f   : > { %8109 = vmatpush1.bf16.msra.mxu0 %v16075_v60  ;;  %8150 = vmatpush1.bf16.msra.mxu1 %v16077_v45  ;;  %v8330_v60 = vld [vmem:[%s19262_s13 + $0x1480] sm:$0xff] }
 0xf10   : > { %8110 = vmatprep.subr.bf16.mxu0 %v16084_v22  ;;  %8151 = vmatprep.subr.bf16.mxu1 %v16086_v44  ;;  %v8334_v45 = vld [vmem:[%s19262_s13 + $0x14a0] sm:$0xff]  ;;  %v8331_v22 = vld [vmem:[%s19262_s13 + $0x1488] sm:$0xff] }
 0xf11   : > { %v16115_v44 = vcombine.high %v8330_v60, %v8334_v45  ;;  %v16114_v49 = vcombine.low %v8330_v60, %v8334_v45  ;;  %v16116_v14 = vcombine.low %v8331_v22, %v8335_v48  ;;  %v16117_v50 = vcombine.high %v8331_v22, %v8335_v48  ;;  %v8362_v60 = vld [vmem:[%s19262_s13 + $0x1580] sm:$0xff] }
 0xf12   : > { %v8366_v45 = vld [vmem:[%s19262_s13 + $0x15a0] sm:$0xff] }
 0xf13   : > { %8111 = vmatpush1.bf16.msra.mxu0 %v16083_v26  ;;  %8152 = vmatpush1.bf16.msra.mxu1 %v16085_v32  ;;  %v8338_v26 = vld [vmem:[%s19262_s13 + $0x14c0] sm:$0xff]  ;;  %v16147_v48 = vcombine.high %v8362_v60, %v8366_v45 }
 0xf14   : > { %8112 = vmatprep.subr.bf16.mxu0 %v16092_v0  ;;  %8153 = vmatprep.subr.bf16.mxu1 %v16094_v43  ;;  %v8342_v32 = vld [vmem:[%s19262_s13 + $0x14e0] sm:$0xff]  ;;  %v8339_v0 = vld [vmem:[%s19262_s13 + $0x14c8] sm:$0xff] }
 0xf15   : > { %v16123_v43 = vcombine.high %v8338_v26, %v8342_v32 }
 0xf17   : > { %8113 = vmatpush1.bf16.msra.mxu0 %v16091_v2  ;;  %8154 = vmatpush1.bf16.msra.mxu1 %v16093_v33  ;;  %v8343_v2 = vld [vmem:[%s19262_s13 + $0x14e8] sm:$0xff]  ;;  %v16122_v33 = vcombine.low %v8338_v26, %v8342_v32  ;;  %v8374_v32 = vld [vmem:[%s19262_s13 + $0x15e0] sm:$0xff] }
 0xf18   : > { %8188 = vmatprep.subr.bf16.mxu0 %v21051_v54  ;;  %8229 = vmatprep.subr.bf16.mxu1 %v21054_v55  ;;  %v16124_v16 = vcombine.low %v8339_v0, %v8343_v2  ;;  %v16125_v61 = vcombine.high %v8339_v0, %v8343_v2  ;;  %v8371_v0 = vld [vmem:[%s19262_s13 + $0x15c8] sm:$0xff]  ;;  %v21188_v2 = vld [vmem:[%s19262_s13 + $0x1410] sm:$0xff] }
 0xf1a   : > { %8131 = vmatmul.mubr.bf16.vlgmr.msra.gmra.mrb[12].mxu0 %v21015_v30  ;;  %8172 = vmatmul.mubr.bf16.vlgmr.msra.gmra.mrb[12].mxu1 %v21015_v30 }
 0xf1b   : > { %8189 = vmatpush1.bf16.msra.mxu0 %v21059_v10  ;;  %8230 = vmatpush1.bf16.msra.mxu1 %v21062_v6 }
 0xf1c   : > { %8190 = vmatprep.subr.bf16.mxu0 %v21065_v11  ;;  %8231 = vmatprep.subr.bf16.mxu1 %v21068_v7 }
 0xf1d   : > { %8220 = vmatprep.mubr.bf16.mxu0 %v18868_v13  ;;  %8261 = vmatprep.mubr.bf16.mxu1 %v18868_v13 }
 0xf1f   : > { %8191 = vmatpush1.bf16.msra.mxu0 %v21073_v27  ;;  %8232 = vmatpush1.bf16.msra.mxu1 %v21076_v5 }
 0xf20   : > { %8192 = vmatprep.subr.bf16.mxu0 %v21079_v47  ;;  %8233 = vmatprep.subr.bf16.mxu1 %v21082_v31 }
 0xf23   : > { %8193 = vmatpush1.bf16.msra.mxu0 %v21085_v18  ;;  %8234 = vmatpush1.bf16.msra.mxu1 %v21088_v62 }
 0xf24   : > { %8194 = vmatprep.subr.bf16.mxu0 %v21091_v9  ;;  %8235 = vmatprep.subr.bf16.mxu1 %v21094_v23 }
 0xf27   : > { %8195 = vmatpush1.bf16.msra.mxu0 %v21097_v17  ;;  %8236 = vmatpush1.bf16.msra.mxu1 %v21100_v28 }
 0xf28   : > { %8196 = vmatprep.subr.bf16.mxu0 %v21103_v56  ;;  %8237 = vmatprep.subr.bf16.mxu1 %v21106_v25 }
 0xf2b   : > { %8197 = vmatpush1.bf16.msra.mxu0 %v21109_v36  ;;  %8238 = vmatpush1.bf16.msra.mxu1 %v21112_v19 }
 0xf2c   : > { %8198 = vmatprep.subr.bf16.mxu0 %v21115_v1  ;;  %8239 = vmatprep.subr.bf16.mxu1 %v21118_v57 }
 0xf2f   : > { %8199 = vmatpush1.bf16.msra.mxu0 %v21121_v3  ;;  %8240 = vmatpush1.bf16.msra.mxu1 %v21124_v12 }
 0xf30   : > { %8200 = vmatprep.subr.bf16.mxu0 %v21127_v29  ;;  %8241 = vmatprep.subr.bf16.mxu1 %v21130_v20 }
 0xf33   : > { %8201 = vmatpush1.bf16.msra.mxu0 %v21133_v51  ;;  %8242 = vmatpush1.bf16.msra.mxu1 %v21136_v21 }
 0xf34   : > { %8202 = vmatprep.subr.bf16.mxu0 %v21139_v15  ;;  %8243 = vmatprep.subr.bf16.mxu1 %v21142_v52 }
 0xf37   : > { %8203 = vmatpush1.bf16.msra.mxu0 %v21145_v37  ;;  %8244 = vmatpush1.bf16.msra.mxu1 %v21148_v53 }
 0xf38   : > { %8701 = vmatprep.subr.bf16.mxu0 %v16099_v59  ;;  %8742 = vmatprep.subr.bf16.mxu1 %v16101_v39  ;;  %v8350_v59 = vld [vmem:[%s19262_s13 + $0x1520] sm:$0xff] }
 0xf39   : > { %v16130_v39 = vcombine.low %v8346_v34, %v8350_v59 }
 0xf3a   : > { %8221 = vmatmul.mubr.bf16.vlgmr.msra.gmra.mrb[48].mxu0 %v21015_v30  ;;  %8262 = vmatmul.mubr.bf16.vlgmr.msra.gmra.mrb[48].mxu1 %v21015_v30  ;;  %v8322_v30 = vld [vmem:[%s19262_s13 + $0x1440] sm:$0xff] }
 0xf3b   : > { %8733 = vmatprep.mubr.bf16.mxu0 %v18868_v13  ;;  %8774 = vmatprep.mubr.bf16.mxu1 %v18868_v13  ;;  %v16107_v41 = vcombine.high %v8322_v30, %v8326_v35  ;;  %v16106_v58 = vcombine.low %v8322_v30, %v8326_v35 }
 0xf3c   : > { %8702 = vmatpush1.bf16.msra.mxu0 %v16098_v8  ;;  %8743 = vmatpush1.bf16.msra.mxu1 %v16100_v46  ;;  %v16131_v8 = vcombine.high %v8346_v34, %v8350_v59  ;;  %v8351_v46 = vld [vmem:[%s19262_s13 + $0x1528] sm:$0xff]  ;;  %v21199_v59 = vld [vmem:[%s19262_s13 + $0x1438] sm:$0xff] }
 0xf3d   : > { %8703 = vmatprep.subr.bf16.mxu0 %v16107_v41  ;;  %8744 = vmatprep.subr.bf16.mxu1 %v16109_v40  ;;  %v16132_v30 = vcombine.low %v8347_v38, %v8351_v46  ;;  %v16133_v35 = vcombine.high %v8347_v38, %v8351_v46  ;;  %v8358_v41 = vld [vmem:[%s19262_s13 + $0x1560] sm:$0xff]  ;;  %v8359_v40 = vld [vmem:[%s19262_s13 + $0x1568] sm:$0xff] }
 0xf3e   : > { %v16140_v22 = vcombine.low %v8355_v42, %v8359_v40 }
 0xf40   : > { %8704 = vmatpush1.bf16.msra.mxu0 %v16106_v58  ;;  %8745 = vmatpush1.bf16.msra.mxu1 %v16108_v63  ;;  %v16138_v58 = vcombine.low %v8354_v24, %v8358_v41  ;;  %v16139_v63 = vcombine.high %v8354_v24, %v8358_v41 }
 0xf41   : > { %8705 = vmatprep.subr.bf16.mxu0 %v16115_v44  ;;  %8746 = vmatprep.subr.bf16.mxu1 %v16117_v50  ;;  %v16141_v44 = vcombine.high %v8355_v42, %v8359_v40  ;;  %v8370_v50 = vld [vmem:[%s19262_s13 + $0x15c0] sm:$0xff] }
 0xf44   : > { %8706 = vmatpush1.bf16.msra.mxu0 %v16114_v49  ;;  %8747 = vmatpush1.bf16.msra.mxu1 %v16116_v14  ;;  %v8363_v49 = vld [vmem:[%s19262_s13 + $0x1588] sm:$0xff] }
 0xf45   : > { %8707 = vmatprep.subr.bf16.mxu0 %v16123_v43  ;;  %8748 = vmatprep.subr.bf16.mxu1 %v16125_v61  ;;  %v8367_v14 = vld [vmem:[%s19262_s13 + $0x15a8] sm:$0xff]  ;;  %v16146_v61 = vcombine.low %v8362_v60, %v8366_v45 }
 0xf46   : > { %v16149_v26 = vcombine.high %v8363_v49, %v8367_v14  ;;  %v8375_v43 = vld [vmem:[%s19262_s13 + $0x15e8] sm:$0xff]  ;;  %v16148_v38 = vcombine.low %v8363_v49, %v8367_v14 }
 0xf48   : > { %8708 = vmatpush1.bf16.msra.mxu0 %v16122_v33  ;;  %8749 = vmatpush1.bf16.msra.mxu1 %v16124_v16  ;;  %v21191_v33 = vld [vmem:[%s19262_s13 + $0x1430] sm:$0xff]  ;;  %v21194_v16 = vld [vmem:[%s19262_s13 + $0x1418] sm:$0xff] }
 0xf49   : > { %8709 = vmatprep.subr.bf16.mxu0 %v16131_v8  ;;  %8750 = vmatprep.subr.bf16.mxu1 %v16133_v35  ;;  %v16102_v34 = vcombine.low %v21188_v2, %v21191_v33  ;;  %v16155_v8 = vcombine.high %v8370_v50, %v8374_v32  ;;  %v16104_v46 = vcombine.low %v21194_v16, %v21199_v59 }
 0xf4a   : > { %v16156_v35 = vcombine.low %v8371_v0, %v8375_v43  ;;  %v16103_v24 = vcombine.high %v21188_v2, %v21191_v33  ;;  %v16105_v41 = vcombine.high %v21194_v16, %v21199_v59  ;;  %v8348_v59 = vld [vmem:[%s19262_s13 + $0x1510] sm:$0xff] }
 0xf4c   : > { %8710 = vmatpush1.bf16.msra.mxu0 %v16130_v39  ;;  %8751 = vmatpush1.bf16.msra.mxu1 %v16132_v30  ;;  %v16157_v39 = vcombine.high %v8371_v0, %v8375_v43  ;;  %v16154_v30 = vcombine.low %v8370_v50, %v8374_v32 }
 0xf4d   : > { %8711 = vmatprep.subr.bf16.mxu0 %v16139_v63  ;;  %8752 = vmatprep.subr.bf16.mxu1 %v16141_v44 }
 0xf50   : > { %8712 = vmatpush1.bf16.msra.mxu0 %v16138_v58  ;;  %8753 = vmatpush1.bf16.msra.mxu1 %v16140_v22 }
 0xf51   : > { %8713 = vmatprep.subr.bf16.mxu0 %v16147_v48  ;;  %8754 = vmatprep.subr.bf16.mxu1 %v16149_v26  ;;  %v21208_v48 = vld [vmem:[%s19428_s24 + $0x40] sm:$0xff]  ;;  %v21212_v26 = vld [vmem:[%s19428_s24 + $0x48] sm:$0xff] }
 0xf54   : > { %8714 = vmatpush1.bf16.msra.mxu0 %v16146_v61  ;;  %8755 = vmatpush1.bf16.msra.mxu1 %v16148_v38 }
 0xf55   : > { %8715 = vmatprep.subr.bf16.mxu0 %v16155_v8  ;;  %8756 = vmatprep.subr.bf16.mxu1 %v16157_v39  ;;  %v21216_v8 = vld [vmem:[%s19428_s24 + $0x50] sm:$0xff] }
 0xf58   : > { %8716 = vmatpush1.bf16.msra.mxu0 %v16154_v30  ;;  %8757 = vmatpush1.bf16.msra.mxu1 %v16156_v35  ;;  %v21220_v30 = vld [vmem:[%s19428_s24 + $0x58] sm:$0xff] }
 0xf59   : > { %8783 = vmatprep.subr.bf16.mxu0 %v16103_v24  ;;  %8824 = vmatprep.subr.bf16.mxu1 %v16105_v41 }
0x100d   : > { %v8222_v42 = vpop.f32.mrb[48].mxu0  ;;  %v8263_v58 = vpop.f32.mrb[48].mxu1 }
0x100e   : > { %v8274_v63 = vrot.slane %v8222_v42, 4  ;;  %v8224_v40 = vpop.f32.mrb[49].mxu0  ;;  %v8265_v60 = vpop.f32.mrb[49].mxu1  ;;  %v8276_v61 = vrot.slane %v8263_v58, 4 }
0x100f   : > { %v8275_v45 = vrot.slane %v8224_v40, 4  ;;  %v8226_v22 = vpop.f32.mrb[50].mxu0  ;;  %v8267_v44 = vpop.f32.mrb[50].mxu1  ;;  %v8277_v38 = vrot.slane %v8265_v60, 4 }
0x1010   : > { %v8282_v49 = vadd.f32 %v21208_v48, %v8274_v63  ;;  %v8227_v14 = vpop.f32.mrb[51].mxu0  ;;  %v8268_v50 = vpop.f32.mrb[51].mxu1  ;;  %v8284_v39 = vadd.f32 %v21216_v8, %v8276_v61  ;;  %v8306_v22 = vrot.slane %v21008_v4, 6  ;;  %v8329_v4 = vld [vmem:[%s19262_s13 + $0x1478] sm:$0xff] }
0x1011   : > { %v8283_v32 = vadd.f32 %v21212_v26, %v8275_v45  ;;  %v8285_v35 = vadd.f32 %v21220_v30, %v8277_v38  ;;  %v8324_v38 = vld [vmem:[%s19262_s13 + $0x1450] sm:$0xff] }
0x1012   : > { %v16095_v0 = vmul.f32 -1.442695, %v8282_v49  ;;  %v16097_v24 = vmul.f32 -1.442695, %v8284_v39  ;;  %v8328_v39 = vld [vmem:[%s19262_s13 + $0x1470] sm:$0xff] }
0x1013   : > { %v16096_v43 = vmul.f32 -1.442695, %v8283_v32 }
0x1014   : > { %17582 = vpow2.f32 %v16095_v0 }
0x1015   : > { %17584 = vpow2.f32 %v16096_v43 }
0x1016   : > { %17586 = vtanh.f32 %v8285_v35  ;;  %v8325_v35 = vld [vmem:[%s19262_s13 + $0x1458] sm:$0xff] }
0x1017   : > { %17588 = vpow2.f32 %v16097_v24 }
0x101e   : > { %v17583_v41 = vpop.eup %17582 }
0x101f   : > { %v8295_v42 = vadd.f32 1.0, %v17583_v41  ;;  %v17585_v63 = vpop.eup %17584 }
0x1020   : > { %v8296_v40 = vadd.f32 1.0, %v17585_v63  ;;  %v17587_v58 = vpop.eup %17586  ;;  %v16113_v63 = vcombine.high %v8325_v35, %v8329_v4 }
0x1021   : > { %17590 = vrcp.f32 %v8295_v42  ;;  %v17589_v60 = vpop.eup %17588  ;;  %v16111_v42 = vcombine.high %v8324_v38, %v8328_v39 }
0x1022   : > { %17592 = vrcp.f32 %v8296_v40  ;;  %v8297_v14 = vadd.f32 1.0, %v17589_v60  ;;  %v8332_v40 = vld [vmem:[%s19262_s13 + $0x1490] sm:$0xff]  ;;  %v8333_v60 = vld [vmem:[%s19262_s13 + $0x1498] sm:$0xff] }
0x1024   : > { %17594 = vrcp.f32 %v8297_v14 }
0x102b   : > { %v17591_v45 = vpop.eup %17590 }
0x102c   : > { %v8309_v44 = vmul.f32 %v17591_v45, %v17587_v58  ;;  %v17593_v49 = vpop.eup %17592  ;;  %v8336_v58 = vld [vmem:[%s19262_s13 + $0x14b0] sm:$0xff]  ;;  %v8337_v45 = vld [vmem:[%s19262_s13 + $0x14b8] sm:$0xff] }
0x102d   : > { %v8308_v50 = vmul.f32 %v17593_v49, %v8306_v22  ;;  %v16110_v22 = vcombine.low %v8324_v38, %v8328_v39  ;;  %v16119_v49 = vcombine.high %v8332_v40, %v8336_v58  ;;  %v16121_v14 = vcombine.high %v8333_v60, %v8337_v45  ;;  %v8349_v38 = vld [vmem:[%s19262_s13 + $0x1518] sm:$0xff] }
0x102e   : > { %v17595_v0 = vpop.eup %17594  ;;  %v16118_v2 = vcombine.low %v8332_v40, %v8336_v58  ;;  %v16120_v33 = vcombine.low %v8333_v60, %v8337_v45  ;;  %v8353_v39 = vld [vmem:[%s19262_s13 + $0x1538] sm:$0xff]  ;;  %v8360_v40 = vld [vmem:[%s19262_s13 + $0x1570] sm:$0xff] }
0x102f   : > { %v21224_v32 = vadd.f32 %v8309_v44, %v8308_v50  ;;  %v16112_v44 = vcombine.low %v8325_v35, %v8329_v4  ;;  %v8340_v50 = vld [vmem:[%s19262_s13 + $0x14d0] sm:$0xff]  ;;  %v8357_v58 = vld [vmem:[%s19262_s13 + $0x1558] sm:$0xff] }
0x1030   : > { %v8361_v60 = vld [vmem:[%s19262_s13 + $0x1578] sm:$0xff] }
0x1031   : > { %17596 = vtanh.f32 %v21224_v32 }
0x103b   : > { %v17597_v43 = vpop.eup %17596 }
0x103c   : > { %v8312_v61 = vmul.f32 %v17597_v43, %v17595_v0  ;;  %v8344_v0 = vld [vmem:[%s19262_s13 + $0x14f0] sm:$0xff]  ;;  %v8341_v43 = vld [vmem:[%s19262_s13 + $0x14d8] sm:$0xff] }
0x103d   : > { %v16127_v16 = vcombine.high %v8340_v50, %v8344_v0  ;;  %v16126_v35 = vcombine.low %v8340_v50, %v8344_v0  ;;  %v8368_v50 = vld [vmem:[%s19262_s13 + $0x15b0] sm:$0xff]  ;;  %v8365_v0 = vld [vmem:[%s19262_s13 + $0x1598] sm:$0xff] }
0x103e   : > { %v8313_v24 = vpack.c.bf16 %v8312_v61, %v8312_v61  ;;  %v8345_v61 = vld [vmem:[%s19262_s13 + $0x14f8] sm:$0xff] }
0x103f   : > { %v16128_v4 = vcombine.low %v8341_v43, %v8345_v61 }
0x1040   : > { %v21231_v41 = vrot.slane %v8313_v24, 2 }
0x1042   : > { %8734 = vmatmul.mubr.bf16.vlgmr.msra.gmra.mrb[8].mxu0 %v21231_v41  ;;  %8775 = vmatmul.mubr.bf16.vlgmr.msra.gmra.mrb[8].mxu1 %v21231_v41 }
0x1043   : > { %8784 = vmatpush1.bf16.msra.mxu0 %v16102_v34  ;;  %8825 = vmatpush1.bf16.msra.mxu1 %v16104_v46  ;;  %v16129_v34 = vcombine.high %v8341_v43, %v8345_v61  ;;  %v8352_v46 = vld [vmem:[%s19262_s13 + $0x1530] sm:$0xff]  ;;  %v8369_v43 = vld [vmem:[%s19262_s13 + $0x15b8] sm:$0xff] }
0x1044   : > { %8785 = vmatprep.subr.bf16.mxu0 %v16111_v42  ;;  %8826 = vmatprep.subr.bf16.mxu1 %v16113_v63  ;;  %v16135_v24 = vcombine.high %v8348_v59, %v8352_v46  ;;  %v16137_v42 = vcombine.high %v8349_v38, %v8353_v39  ;;  %v8356_v63 = vld [vmem:[%s19262_s13 + $0x1550] sm:$0xff]  ;;  %v16134_v45 = vcombine.low %v8348_v59, %v8352_v46  ;;  %v8373_v46 = vld [vmem:[%s19262_s13 + $0x15d8] sm:$0xff] }
0x1045   : > { %8815 = vmatprep.mubr.bf16.mxu0 %v18868_v13  ;;  %8856 = vmatprep.mubr.bf16.mxu1 %v18868_v13  ;;  %v16142_v61 = vcombine.low %v8356_v63, %v8360_v40  ;;  %v8376_v59 = vld [vmem:[%s19262_s13 + $0x15f0] sm:$0xff] }
0x1047   : > { %8786 = vmatpush1.bf16.msra.mxu0 %v16110_v22  ;;  %8827 = vmatpush1.bf16.msra.mxu1 %v16112_v44  ;;  %v16136_v22 = vcombine.low %v8349_v38, %v8353_v39  ;;  %v16143_v44 = vcombine.high %v8356_v63, %v8360_v40  ;;  %v8377_v38 = vld [vmem:[%s19262_s13 + $0x15f8] sm:$0xff]  ;;  %v9035_v40 = vld [vmem:[%s19262_s13 + $0x1720] sm:$0xff] }
0x1048   : > { %8787 = vmatprep.subr.bf16.mxu0 %v16119_v49  ;;  %8828 = vmatprep.subr.bf16.mxu1 %v16121_v14  ;;  %v16145_v49 = vcombine.high %v8357_v58, %v8361_v60  ;;  %v8364_v14 = vld [vmem:[%s19262_s13 + $0x1590] sm:$0xff]  ;;  %v16160_v63 = vcombine.low %v8373_v46, %v8377_v38 }
0x1049   : > { %v16150_v39 = vcombine.low %v8364_v14, %v8368_v50 }
0x104b   : > { %8788 = vmatpush1.bf16.msra.mxu0 %v16118_v2  ;;  %8829 = vmatpush1.bf16.msra.mxu1 %v16120_v33  ;;  %v16144_v2 = vcombine.low %v8357_v58, %v8361_v60  ;;  %v16151_v33 = vcombine.high %v8364_v14, %v8368_v50  ;;  %v9032_v58 = vld [vmem:[%s19262_s13 + $0x1708] sm:$0xff]  ;;  %v9039_v14 = vld [vmem:[%s19262_s13 + $0x1740] sm:$0xff] }
0x104c   : > { %8789 = vmatprep.subr.bf16.mxu0 %v16127_v16  ;;  %8830 = vmatprep.subr.bf16.mxu1 %v16129_v34  ;;  %v16153_v16 = vcombine.high %v8365_v0, %v8369_v43  ;;  %v8372_v34 = vld [vmem:[%s19262_s13 + $0x15d0] sm:$0xff]  ;;  %v9043_v50 = vld [vmem:[%s19262_s13 + $0x1760] sm:$0xff] }
0x104f   : > { %8790 = vmatpush1.bf16.msra.mxu0 %v16126_v35  ;;  %8831 = vmatpush1.bf16.msra.mxu1 %v16128_v4  ;;  %v16152_v35 = vcombine.low %v8365_v0, %v8369_v43  ;;  %v16159_v4 = vcombine.high %v8372_v34, %v8376_v59  ;;  %v9040_v0 = vld [vmem:[%s19262_s13 + $0x1748] sm:$0xff]  ;;  %v16205_v43 = vcombine.low %v9039_v14, %v9043_v50 }
0x1050   : > { %8791 = vmatprep.subr.bf16.mxu0 %v16135_v24  ;;  %8832 = vmatprep.subr.bf16.mxu1 %v16137_v42  ;;  %v16161_v24 = vcombine.high %v8373_v46, %v8377_v38  ;;  %v16158_v42 = vcombine.low %v8372_v34, %v8376_v59  ;;  %v9048_v38 = vld [vmem:[%s19262_s13 + $0x1788] sm:$0xff] }
0x1053   : > { %8792 = vmatpush1.bf16.msra.mxu0 %v16134_v45  ;;  %8833 = vmatpush1.bf16.msra.mxu1 %v16136_v22  ;;  %v9036_v45 = vld [vmem:[%s19262_s13 + $0x1728] sm:$0xff] }
0x1054   : > { %8793 = vmatprep.subr.bf16.mxu0 %v16143_v44  ;;  %8834 = vmatprep.subr.bf16.mxu1 %v16145_v49  ;;  %v16199_v44 = vcombine.low %v9032_v58, %v9036_v45  ;;  %v16200_v49 = vcombine.high %v9032_v58, %v9036_v45 }
0x1057   : > { %8794 = vmatpush1.bf16.msra.mxu0 %v16142_v61  ;;  %8835 = vmatpush1.bf16.msra.mxu1 %v16144_v2  ;;  %v16206_v61 = vcombine.high %v9039_v14, %v9043_v50  ;;  %v9044_v2 = vld [vmem:[%s19262_s13 + $0x1768] sm:$0xff] }
0x1058   : > { %8795 = vmatprep.subr.bf16.mxu0 %v16151_v33  ;;  %8836 = vmatprep.subr.bf16.mxu1 %v16153_v16  ;;  %v9047_v33 = vld [vmem:[%s19262_s13 + $0x1780] sm:$0xff]  ;;  %v16207_v34 = vcombine.low %v9040_v0, %v9044_v2  ;;  %v16208_v59 = vcombine.high %v9040_v0, %v9044_v2  ;;  %v9009_v2 = vld [vmem:[%s19262_s13 + $0x1650] sm:$0xff] }
0x1059   : > { %v9051_v16 = vld [vmem:[%s19262_s13 + $0x17a0] sm:$0xff] }
0x105a   : > { %v16214_v46 = vcombine.high %v9047_v33, %v9051_v16 }
0x105b   : > { %8796 = vmatpush1.bf16.msra.mxu0 %v16150_v39  ;;  %8837 = vmatpush1.bf16.msra.mxu1 %v16152_v35  ;;  %v9052_v39 = vld [vmem:[%s19262_s13 + $0x17a8] sm:$0xff]  ;;  %v9055_v35 = vld [vmem:[%s19262_s13 + $0x17c0] sm:$0xff] }
0x105c   : > { %8797 = vmatprep.subr.bf16.mxu0 %v16159_v4  ;;  %8838 = vmatprep.subr.bf16.mxu1 %v16161_v24  ;;  %v16216_v4 = vcombine.high %v9048_v38, %v9052_v39  ;;  %v9059_v24 = vld [vmem:[%s19262_s13 + $0x17e0] sm:$0xff] }
0x105f   : > { %8798 = vmatpush1.bf16.msra.mxu0 %v16158_v42  ;;  %8839 = vmatpush1.bf16.msra.mxu1 %v16160_v63  ;;  %v9056_v42 = vld [vmem:[%s19262_s13 + $0x17c8] sm:$0xff] }
0x1060   : > { %8873 = vmatprep.subr.bf16.mxu0 %v21051_v54  ;;  %8914 = vmatprep.subr.bf16.mxu1 %v21054_v55  ;;  %v8999_v54 = vld [vmem:[%s19262_s13 + $0x1600] sm:$0xff]  ;;  %v9060_v63 = vld [vmem:[%s19262_s13 + $0x17e8] sm:$0xff] }
0x1061   : > { %v9003_v55 = vld [vmem:[%s19262_s13 + $0x1620] sm:$0xff] }
0x1062   : > { %8816 = vmatmul.mubr.bf16.vlgmr.msra.gmra.mrb[12].mxu0 %v21231_v41  ;;  %8857 = vmatmul.mubr.bf16.vlgmr.msra.gmra.mrb[12].mxu1 %v21231_v41 }
0x1063   : > { %8874 = vmatpush1.bf16.msra.mxu0 %v21059_v10  ;;  %8915 = vmatpush1.bf16.msra.mxu1 %v21062_v6  ;;  %v9000_v10 = vld [vmem:[%s19262_s13 + $0x1608] sm:$0xff]  ;;  %v16166_v6 = vcombine.high %v8999_v54, %v9003_v55 }
0x1064   : > { %8875 = vmatprep.subr.bf16.mxu0 %v21065_v11  ;;  %8916 = vmatprep.subr.bf16.mxu1 %v21068_v7  ;;  %v9004_v11 = vld [vmem:[%s19262_s13 + $0x1628] sm:$0xff]  ;;  %v16165_v7 = vcombine.low %v8999_v54, %v9003_v55  ;;  %v21340_v54 = vld [vmem:[%s19262_s13 + $0x1610] sm:$0xff] }
0x1065   : > { %8905 = vmatprep.mubr.bf16.mxu0 %v18868_v13  ;;  %8946 = vmatprep.mubr.bf16.mxu1 %v18868_v13  ;;  %v21343_v55 = vld [vmem:[%s19262_s13 + $0x1630] sm:$0xff] }
0x1067   : > { %8876 = vmatpush1.bf16.msra.mxu0 %v21073_v27  ;;  %8917 = vmatpush1.bf16.msra.mxu1 %v21076_v5  ;;  %v16167_v27 = vcombine.low %v9000_v10, %v9004_v11  ;;  %v16168_v5 = vcombine.high %v9000_v10, %v9004_v11  ;;  %v21346_v10 = vld [vmem:[%s19262_s13 + $0x1618] sm:$0xff]  ;;  %v16169_v11 = vcombine.low %v21340_v54, %v21343_v55 }
0x1068   : > { %8877 = vmatprep.subr.bf16.mxu0 %v21079_v47  ;;  %8918 = vmatprep.subr.bf16.mxu1 %v21082_v31  ;;  %v9007_v47 = vld [vmem:[%s19262_s13 + $0x1640] sm:$0xff] }
0x1069   : > { %v9011_v31 = vld [vmem:[%s19262_s13 + $0x1660] sm:$0xff] }
0x106b   : > { %8878 = vmatpush1.bf16.msra.mxu0 %v21085_v18  ;;  %8919 = vmatpush1.bf16.msra.mxu1 %v21088_v62  ;;  %v9008_v18 = vld [vmem:[%s19262_s13 + $0x1648] sm:$0xff]  ;;  %v16174_v62 = vcombine.high %v9007_v47, %v9011_v31 }
0x106c   : > { %8879 = vmatprep.subr.bf16.mxu0 %v21091_v9  ;;  %8920 = vmatprep.subr.bf16.mxu1 %v21094_v23  ;;  %v9012_v9 = vld [vmem:[%s19262_s13 + $0x1668] sm:$0xff]  ;;  %v16173_v23 = vcombine.low %v9007_v47, %v9011_v31  ;;  %v16224_v31 = vcombine.high %v9056_v42, %v9060_v63 }
0x106f   : > { %8880 = vmatpush1.bf16.msra.mxu0 %v21097_v17  ;;  %8921 = vmatpush1.bf16.msra.mxu1 %v21100_v28  ;;  %v16175_v17 = vcombine.low %v9008_v18, %v9012_v9  ;;  %v16176_v28 = vcombine.high %v9008_v18, %v9012_v9  ;;  %v16221_v18 = vcombine.low %v9055_v35, %v9059_v24 }
0x1070   : > { %8881 = vmatprep.subr.bf16.mxu0 %v21103_v56  ;;  %8922 = vmatprep.subr.bf16.mxu1 %v21106_v25  ;;  %v9015_v56 = vld [vmem:[%s19262_s13 + $0x1680] sm:$0xff]  ;;  %v16170_v9 = vcombine.high %v21340_v54, %v21343_v55 }
0x1071   : > { %v9019_v25 = vld [vmem:[%s19262_s13 + $0x16a0] sm:$0xff] }
0x1073   : > { %8882 = vmatpush1.bf16.msra.mxu0 %v21109_v36  ;;  %8923 = vmatpush1.bf16.msra.mxu1 %v21112_v19  ;;  %v9016_v36 = vld [vmem:[%s19262_s13 + $0x1688] sm:$0xff]  ;;  %v16182_v19 = vcombine.high %v9015_v56, %v9019_v25 }
0x1074   : > { %8883 = vmatprep.subr.bf16.mxu0 %v21115_v1  ;;  %8924 = vmatprep.subr.bf16.mxu1 %v21118_v57  ;;  %v9020_v1 = vld [vmem:[%s19262_s13 + $0x16a8] sm:$0xff]  ;;  %v16181_v57 = vcombine.low %v9015_v56, %v9019_v25 }
0x1077   : > { %8884 = vmatpush1.bf16.msra.mxu0 %v21121_v3  ;;  %8925 = vmatpush1.bf16.msra.mxu1 %v21124_v12  ;;  %v16183_v3 = vcombine.low %v9016_v36, %v9020_v1  ;;  %v16184_v12 = vcombine.high %v9016_v36, %v9020_v1 }
0x1078   : > { %8885 = vmatprep.subr.bf16.mxu0 %v21127_v29  ;;  %8926 = vmatprep.subr.bf16.mxu1 %v21130_v20  ;;  %v9023_v29 = vld [vmem:[%s19262_s13 + $0x16c0] sm:$0xff] }
0x1079   : > { %v9027_v20 = vld [vmem:[%s19262_s13 + $0x16e0] sm:$0xff] }
0x107b   : > { %8886 = vmatpush1.bf16.msra.mxu0 %v21133_v51  ;;  %8927 = vmatpush1.bf16.msra.mxu1 %v21136_v21  ;;  %v9024_v51 = vld [vmem:[%s19262_s13 + $0x16c8] sm:$0xff]  ;;  %v16190_v21 = vcombine.high %v9023_v29, %v9027_v20 }
0x107c   : > { %8887 = vmatprep.subr.bf16.mxu0 %v21139_v15  ;;  %8928 = vmatprep.subr.bf16.mxu1 %v21142_v52  ;;  %v9028_v15 = vld [vmem:[%s19262_s13 + $0x16e8] sm:$0xff]  ;;  %v16189_v52 = vcombine.low %v9023_v29, %v9027_v20 }
0x107f   : > { %8888 = vmatpush1.bf16.msra.mxu0 %v21145_v37  ;;  %8929 = vmatpush1.bf16.msra.mxu1 %v21148_v53  ;;  %v16191_v37 = vcombine.low %v9024_v51, %v9028_v15  ;;  %v16192_v53 = vcombine.high %v9024_v51, %v9028_v15 }
0x1080   : > { %9386 = vmatprep.subr.bf16.mxu0 %v16166_v6  ;;  %9427 = vmatprep.subr.bf16.mxu1 %v16168_v5  ;;  %v16213_v6 = vcombine.low %v9047_v33, %v9051_v16  ;;  %v16222_v5 = vcombine.high %v9055_v35, %v9059_v24  ;;  %v9013_v33 = vld [vmem:[%s19262_s13 + $0x1670] sm:$0xff]  ;;  %v9010_v16 = vld [vmem:[%s19262_s13 + $0x1658] sm:$0xff] }
0x1081   : > { %v9021_v35 = vld [vmem:[%s19262_s13 + $0x16b0] sm:$0xff]  ;;  %v9022_v24 = vld [vmem:[%s19262_s13 + $0x16b8] sm:$0xff] }
0x1082   : > { %8906 = vmatmul.mubr.bf16.vlgmr.msra.gmra.mrb[52].mxu0 %v21231_v41  ;;  %8947 = vmatmul.mubr.bf16.vlgmr.msra.gmra.mrb[52].mxu1 %v21231_v41  ;;  %v9031_v41 = vld [vmem:[%s19262_s13 + $0x1700] sm:$0xff] }
0x1083   : > { %9418 = vmatprep.mubr.bf16.mxu0 %v18868_v13  ;;  %9459 = vmatprep.mubr.bf16.mxu1 %v18868_v13  ;;  %v16198_v60 = vcombine.high %v9031_v41, %v9035_v40  ;;  %v16197_v22 = vcombine.low %v9031_v41, %v9035_v40 }
0x1084   : > { %9387 = vmatpush1.bf16.msra.mxu0 %v16165_v7  ;;  %9428 = vmatpush1.bf16.msra.mxu1 %v16167_v27  ;;  %v21351_v7 = vld [vmem:[%s19262_s13 + $0x1638] sm:$0xff]  ;;  %v16215_v27 = vcombine.low %v9048_v38, %v9052_v39  ;;  %v9017_v39 = vld [vmem:[%s19262_s13 + $0x1690] sm:$0xff] }
0x1085   : > { %9388 = vmatprep.subr.bf16.mxu0 %v16174_v62  ;;  %9429 = vmatprep.subr.bf16.mxu1 %v16176_v28  ;;  %v16171_v47 = vcombine.low %v21346_v10, %v21351_v7  ;;  %v16223_v62 = vcombine.low %v9056_v42, %v9060_v63  ;;  %v16177_v42 = vcombine.low %v9009_v2, %v9013_v33 }
0x1086   : > { %v16185_v54 = vcombine.low %v9017_v39, %v9021_v35 }
0x1088   : > { %9389 = vmatpush1.bf16.msra.mxu0 %v16173_v23  ;;  %9430 = vmatpush1.bf16.msra.mxu1 %v16175_v17  ;;  %v16172_v23 = vcombine.high %v21346_v10, %v21351_v7  ;;  %v9033_v7 = vld [vmem:[%s19262_s13 + $0x1710] sm:$0xff] }
0x1089   : > { %9390 = vmatprep.subr.bf16.mxu0 %v16182_v19  ;;  %9431 = vmatprep.subr.bf16.mxu1 %v16184_v12 }
0x108c   : > { %9391 = vmatpush1.bf16.msra.mxu0 %v16181_v57  ;;  %9432 = vmatpush1.bf16.msra.mxu1 %v16183_v3 }
0x108d   : > { %9392 = vmatprep.subr.bf16.mxu0 %v16190_v21  ;;  %9433 = vmatprep.subr.bf16.mxu1 %v16192_v53 }
0x1090   : > { %9393 = vmatpush1.bf16.msra.mxu0 %v16189_v52  ;;  %9434 = vmatpush1.bf16.msra.mxu1 %v16191_v37 }
0x1091   : > { %9394 = vmatprep.subr.bf16.mxu0 %v16198_v60  ;;  %9435 = vmatprep.subr.bf16.mxu1 %v16200_v49 }
0x1094   : > { %9395 = vmatpush1.bf16.msra.mxu0 %v16197_v22  ;;  %9436 = vmatpush1.bf16.msra.mxu1 %v16199_v44 }
0x1095   : > { %9396 = vmatprep.subr.bf16.mxu0 %v16206_v61  ;;  %9437 = vmatprep.subr.bf16.mxu1 %v16208_v59 }
0x1098   : > { %9397 = vmatpush1.bf16.msra.mxu0 %v16205_v43  ;;  %9438 = vmatpush1.bf16.msra.mxu1 %v16207_v34 }
0x1099   : > { %9398 = vmatprep.subr.bf16.mxu0 %v16214_v46  ;;  %9439 = vmatprep.subr.bf16.mxu1 %v16216_v4  ;;  %v16178_v46 = vcombine.high %v9009_v2, %v9013_v33  ;;  %v9018_v4 = vld [vmem:[%s19262_s13 + $0x1698] sm:$0xff]  ;;  %v21421_v2 = vld [vmem:[#allocation9 + $0x24] ss:$16 sps:$4 sm:$0xff]  }
0x109a   : > { %v16187_v55 = vcombine.low %v9018_v4, %v9022_v24  ;;  %v21424_v33 = vld [vmem:[#allocation9 + $0x2c] ss:$16 sps:$4 sm:$0xff]  }
0x109c   : > { %9399 = vmatpush1.bf16.msra.mxu0 %v16213_v6  ;;  %9440 = vmatpush1.bf16.msra.mxu1 %v16215_v27  ;;  %v16186_v6 = vcombine.high %v9017_v39, %v9021_v35  ;;  %v16188_v27 = vcombine.high %v9018_v4, %v9022_v24  ;;  %v21444_v39 = vld [vmem:[#allocation9 + $0x48] ss:$16 sps:$4 sm:$0xff]   ;;  %v21447_v35 = vld [vmem:[#allocation9 + $0x64] ss:$16 sps:$4 sm:$0xff]   ;;  %v21450_v4 = vld [vmem:[#allocation9 + $0x6c] ss:$16 sps:$4 sm:$0xff]  }
0x109d   : > { %9400 = vmatprep.subr.bf16.mxu0 %v16222_v5  ;;  %9441 = vmatprep.subr.bf16.mxu1 %v16224_v31  ;;  %v9025_v5 = vld [vmem:[%s19262_s13 + $0x16d0] sm:$0xff]  ;;  %v21453_v24 = vld [vmem:[#allocation9 + $0x60] ss:$16 sps:$4 sm:$0xff]  }
0x109e   : > { %v9029_v31 = vld [vmem:[%s19262_s13 + $0x16f0] sm:$0xff] }
0x109f   : > { %v16194_v10 = vcombine.high %v9025_v5, %v9029_v31 }
0x10a0   : > { %9401 = vmatpush1.bf16.msra.mxu0 %v16221_v18  ;;  %9442 = vmatpush1.bf16.msra.mxu1 %v16223_v62  ;;  %v9026_v18 = vld [vmem:[%s19262_s13 + $0x16d8] sm:$0xff] }
0x10a1   : > { %9468 = vmatprep.subr.bf16.mxu0 %v16170_v9  ;;  %9509 = vmatprep.subr.bf16.mxu1 %v16172_v23  ;;  %v9030_v62 = vld [vmem:[%s19262_s13 + $0x16f8] sm:$0xff] }
0x10a2   : > { %v9034_v9 = vld [vmem:[%s19262_s13 + $0x1718] sm:$0xff] }
0x10a3   : > { %v9038_v23 = vld [vmem:[%s19262_s13 + $0x1738] sm:$0xff] }
0x1155   : > { %v8907_v17 = vpop.f32.mrb[52].mxu0  ;;  %v8948_v28 = vpop.f32.mrb[52].mxu1 }
0x1156   : > { %v8959_v56 = vrot.slane %v8907_v17, 2  ;;  %v8909_v25 = vpop.f32.mrb[53].mxu0  ;;  %v8950_v36 = vpop.f32.mrb[53].mxu1  ;;  %v8961_v15 = vrot.slane %v8948_v28, 2  ;;  %v16193_v17 = vcombine.low %v9025_v5, %v9029_v31  ;;  %v16195_v28 = vcombine.low %v9026_v18, %v9030_v62  ;;  %v21468_v5 = vld [vmem:[#allocation9 + $0x88] ss:$16 sps:$4 sm:$0xff]  }
0x1157   : > { %v8960_v19 = vrot.slane %v8909_v25, 2  ;;  %v8911_v1 = vpop.f32.mrb[54].mxu0  ;;  %v8952_v57 = vpop.f32.mrb[54].mxu1  ;;  %v8962_v52 = vrot.slane %v8950_v36, 2  ;;  %v16204_v25 = vcombine.high %v9034_v9, %v9038_v23  ;;  %v9041_v36 = vld [vmem:[%s19262_s13 + $0x1750] sm:$0xff] }
0x1158   : > { %v8967_v3 = vadd.f32 %v21208_v48, %v8959_v56  ;;  %v8912_v12 = vpop.f32.mrb[55].mxu0  ;;  %v8953_v29 = vpop.f32.mrb[55].mxu1  ;;  %v8969_v37 = vadd.f32 %v21216_v8, %v8961_v15  ;;  %v8991_v8 = vrot.slane %v21224_v32, 6  ;;  %v9014_v32 = vld [vmem:[%s19262_s13 + $0x1678] sm:$0xff]  ;;  %v21471_v31 = vld [vmem:[#allocation9 + $0xa4] ss:$16 sps:$4 sm:$0xff]  }
0x1159   : > { %v8968_v20 = vadd.f32 %v21212_v26, %v8960_v19  ;;  %v8970_v53 = vadd.f32 %v21220_v30, %v8962_v52  ;;  %v16180_v38 = vcombine.high %v9010_v16, %v9014_v32  ;;  %v16179_v63 = vcombine.low %v9010_v16, %v9014_v32  ;;  %v9045_v19 = vld [vmem:[%s19262_s13 + $0x1770] sm:$0xff]  ;;  %v9042_v1 = vld [vmem:[%s19262_s13 + $0x1758] sm:$0xff] }
0x115a   : > { %v16162_v51 = vmul.f32 -1.442695, %v8967_v3  ;;  %v16164_v41 = vmul.f32 -1.442695, %v8969_v37  ;;  %v9046_v57 = vld [vmem:[%s19262_s13 + $0x1778] sm:$0xff]  ;;  %v16203_v12 = vcombine.low %v9034_v9, %v9038_v23  ;;  %v16210_v29 = vcombine.high %v9041_v36, %v9045_v19 }
0x115b   : > { %v16163_v21 = vmul.f32 -1.442695, %v8968_v20  ;;  %v16212_v20 = vcombine.high %v9042_v1, %v9046_v57  ;;  %v9050_v15 = vld [vmem:[%s19262_s13 + $0x1798] sm:$0xff]  ;;  %v16209_v37 = vcombine.low %v9041_v36, %v9045_v19  ;;  %v21432_v32 = vld [vmem:[#allocation9 + $0x28] ss:$16 sps:$4 sm:$0xff]   ;;  %v9677_v19 = vld [vmem:[%s19262_s13 + $0x1828] sm:$0xff] }
0x115c   : > { %17598 = vpow2.f32 %v16162_v51  ;;  %v9049_v51 = vld [vmem:[%s19262_s13 + $0x1790] sm:$0xff]  ;;  %v9054_v52 = vld [vmem:[%s19262_s13 + $0x17b8] sm:$0xff] }
0x115d   : > { %17600 = vpow2.f32 %v16163_v21  ;;  %v9053_v21 = vld [vmem:[%s19262_s13 + $0x17b0] sm:$0xff]  ;;  %v21429_v16 = vld [vmem:[#allocation9 + $0x20] ss:$16 sps:$4 sm:$0xff]   ;;  %v21498_v9 = vld [vmem:[#allocation9 + $0xec] ss:$16 sps:$4 sm:$0xff]  }
0x115e   : > { %17602 = vtanh.f32 %v8970_v53  ;;  %v16211_v53 = vcombine.low %v9042_v1, %v9046_v57  ;;  %v21501_v23 = vld [vmem:[#allocation9 + $0xe0] ss:$16 sps:$4 sm:$0xff]  }
0x115f   : > { %17604 = vpow2.f32 %v16164_v41  ;;  %v16218_v41 = vcombine.high %v9049_v51, %v9053_v21 }
0x1166   : > { %v17599_v40 = vpop.eup %17598 }
0x1167   : > { %v8980_v58 = vadd.f32 1.0, %v17599_v40  ;;  %v17601_v60 = vpop.eup %17600  ;;  %v16220_v40 = vcombine.high %v9050_v15, %v9054_v52 }
0x1168   : > { %v8981_v48 = vadd.f32 1.0, %v17601_v60  ;;  %v17603_v26 = vpop.eup %17602  ;;  %v9061_v60 = vld [vmem:[%s19262_s13 + $0x17f0] sm:$0xff] }
0x1169   : > { %17606 = vrcp.f32 %v8980_v58  ;;  %v17605_v45 = vpop.eup %17604  ;;  %v9057_v58 = vld [vmem:[%s19262_s13 + $0x17d0] sm:$0xff] }
0x116a   : > { %17608 = vrcp.f32 %v8981_v48  ;;  %v8982_v49 = vadd.f32 1.0, %v17605_v45  ;;  %v9058_v48 = vld [vmem:[%s19262_s13 + $0x17d8] sm:$0xff]  ;;  %v16217_v45 = vcombine.low %v9049_v51, %v9053_v21  ;;  %v9685_v51 = vld [vmem:[%s19262_s13 + $0x1868] sm:$0xff] }
0x116c   : > { %17610 = vrcp.f32 %v8982_v49 }
0x1173   : > { %v17607_v22 = vpop.eup %17606 }
0x1174   : > { %v8994_v44 = vmul.f32 %v17607_v22, %v17603_v26  ;;  %v17609_v30 = vpop.eup %17608  ;;  %v9062_v26 = vld [vmem:[%s19262_s13 + $0x17f8] sm:$0xff]  ;;  %v16219_v22 = vcombine.low %v9050_v15, %v9054_v52 }
0x1175   : > { %v8993_v14 = vmul.f32 %v17609_v30, %v8991_v8  ;;  %v16226_v8 = vcombine.high %v9057_v58, %v9061_v60  ;;  %v16225_v30 = vcombine.low %v9057_v58, %v9061_v60  ;;  %v16227_v49 = vcombine.low %v9058_v48, %v9062_v26  ;;  %v9693_v58 = vld [vmem:[%s19262_s13 + $0x18a8] sm:$0xff] }
0x1176   : > { %v17611_v0 = vpop.eup %17610 }
0x1177   : > { %v21364_v50 = vadd.f32 %v8994_v44, %v8993_v14  ;;  %v16228_v44 = vcombine.high %v9058_v48, %v9062_v26  ;;  %v21407_v14 = vld [vmem:[#allocation9 + $0x4] ss:$16 sps:$4 sm:$0xff]  }
0x1179   : > { %17612 = vtanh.f32 %v21364_v50 }
0x1183   : > { %v17613_v43 = vpop.eup %17612 }
0x1184   : > { %v8997_v61 = vmul.f32 %v17613_v43, %v17611_v0  ;;  %v21410_v0 = vld [vmem:[#allocation9 + $0xc] ss:$16 sps:$4 sm:$0xff]   ;;  %v21415_v43 = vld [vmem:[#allocation9] ss:$16 sps:$4 sm:$0xff]  }
0x1186   : > { %v8998_v34 = vpack.c.bf16 %v8997_v61, %v8997_v61  ;;  %v21418_v61 = vld [vmem:[#allocation9 + $0x8] ss:$16 sps:$4 sm:$0xff]  }
0x1188   : > { %v21371_v59 = vrot.slane %v8998_v34, 3  ;;  %v21435_v34 = vld [vmem:[#allocation9 + $0x44] ss:$16 sps:$4 sm:$0xff]  }
0x118a   : > { %9419 = vmatmul.mubr.bf16.vlgmr.msra.gmra.mrb[8].mxu0 %v21371_v59  ;;  %9460 = vmatmul.mubr.bf16.vlgmr.msra.gmra.mrb[8].mxu1 %v21371_v59 }
0x118b   : > { %9469 = vmatpush1.bf16.msra.mxu0 %v16169_v11  ;;  %9510 = vmatpush1.bf16.msra.mxu1 %v16171_v47  ;;  %v16196_v11 = vcombine.high %v9026_v18, %v9030_v62  ;;  %v9037_v47 = vld [vmem:[%s19262_s13 + $0x1730] sm:$0xff]  ;;  %v21474_v18 = vld [vmem:[#allocation9 + $0xac] ss:$16 sps:$4 sm:$0xff]   ;;  %v21477_v62 = vld [vmem:[#allocation9 + $0xa0] ss:$16 sps:$4 sm:$0xff]  }
0x118c   : > { %9470 = vmatprep.subr.bf16.mxu0 %v16178_v46  ;;  %9511 = vmatprep.subr.bf16.mxu1 %v16180_v38  ;;  %v16202_v56 = vcombine.high %v9033_v7, %v9037_v47  ;;  %v16201_v3 = vcombine.low %v9033_v7, %v9037_v47  ;;  %v21438_v46 = vld [vmem:[#allocation9 + $0x4c] ss:$16 sps:$4 sm:$0xff]   ;;  %v21441_v38 = vld [vmem:[#allocation9 + $0x40] ss:$16 sps:$4 sm:$0xff]   ;;  %v21492_v7 = vld [vmem:[#allocation9 + $0xc8] ss:$16 sps:$4 sm:$0xff]  }
0x118d   : > { %9500 = vmatprep.mubr.bf16.mxu0 %v18868_v13  ;;  %9541 = vmatprep.mubr.bf16.mxu1 %v18868_v13  ;;  %v21495_v47 = vld [vmem:[#allocation9 + $0xe4] ss:$16 sps:$4 sm:$0xff]  }
0x118f   : > { %9471 = vmatpush1.bf16.msra.mxu0 %v16177_v42  ;;  %9512 = vmatpush1.bf16.msra.mxu1 %v16179_v63  ;;  %v21456_v42 = vld [vmem:[#allocation9 + $0x68] ss:$16 sps:$4 sm:$0xff]   ;;  %v21459_v63 = vld [vmem:[#allocation9 + $0x84] ss:$16 sps:$4 sm:$0xff]  }
0x1190   : > { %9472 = vmatprep.subr.bf16.mxu0 %v16186_v6  ;;  %9513 = vmatprep.subr.bf16.mxu1 %v16188_v27  ;;  %v21462_v6 = vld [vmem:[#allocation9 + $0x8c] ss:$16 sps:$4 sm:$0xff]   ;;  %v21465_v27 = vld [vmem:[#allocation9 + $0x80] ss:$16 sps:$4 sm:$0xff]  }
0x1193   : > { %9473 = vmatpush1.bf16.msra.mxu0 %v16185_v54  ;;  %9514 = vmatpush1.bf16.msra.mxu1 %v16187_v55  ;;  %v21480_v54 = vld [vmem:[#allocation9 + $0xa8] ss:$16 sps:$4 sm:$0xff]   ;;  %v21483_v55 = vld [vmem:[#allocation9 + $0xc4] ss:$16 sps:$4 sm:$0xff]  }
0x1194   : > { %9474 = vmatprep.subr.bf16.mxu0 %v16194_v10  ;;  %9515 = vmatprep.subr.bf16.mxu1 %v16196_v11  ;;  %v21486_v10 = vld [vmem:[#allocation9 + $0xcc] ss:$16 sps:$4 sm:$0xff]   ;;  %v21489_v11 = vld [vmem:[#allocation9 + $0xc0] ss:$16 sps:$4 sm:$0xff]  }
0x1197   : > { %9475 = vmatpush1.bf16.msra.mxu0 %v16193_v17  ;;  %9516 = vmatpush1.bf16.msra.mxu1 %v16195_v28  ;;  %v21504_v17 = vld [vmem:[#allocation9 + $0xe8] ss:$16 sps:$4 sm:$0xff]  }
0x1198   : > { %9476 = vmatprep.subr.bf16.mxu0 %v16202_v56  ;;  %9517 = vmatprep.subr.bf16.mxu1 %v16204_v25  ;;  %v9672_v28 = vld [vmem:[%s19262_s13 + $0x1800] sm:$0xff]  ;;  %v9673_v25 = vld [vmem:[%s19262_s13 + $0x1808] sm:$0xff] }
0x1199   : > { %v9676_v56 = vld [vmem:[%s19262_s13 + $0x1820] sm:$0xff]  ;;  %v16234_v57 = vcombine.low %v9673_v25, %v9677_v19 }
0x119a   : > { %v16233_v36 = vcombine.high %v9672_v28, %v9676_v56  ;;  %v16232_v1 = vcombine.low %v9672_v28, %v9676_v56 }
0x119b   : > { %9477 = vmatpush1.bf16.msra.mxu0 %v16201_v3  ;;  %9518 = vmatpush1.bf16.msra.mxu1 %v16203_v12  ;;  %v16235_v3 = vcombine.high %v9673_v25, %v9677_v19  ;;  %v9684_v12 = vld [vmem:[%s19262_s13 + $0x1860] sm:$0xff]  ;;  %v9705_v19 = vld [vmem:[%s19262_s13 + $0x1908] sm:$0xff] }
0x119c   : > { %9478 = vmatprep.subr.bf16.mxu0 %v16210_v29  ;;  %9519 = vmatprep.subr.bf16.mxu1 %v16212_v20  ;;  %v9681_v29 = vld [vmem:[%s19262_s13 + $0x1848] sm:$0xff]  ;;  %v9704_v25 = vld [vmem:[%s19262_s13 + $0x1900] sm:$0xff] }
0x119d   : > { %v16242_v15 = vcombine.low %v9681_v29, %v9685_v51  ;;  %v16243_v52 = vcombine.high %v9681_v29, %v9685_v51  ;;  %v9712_v29 = vld [vmem:[%s19262_s13 + $0x1940] sm:$0xff]  ;;  %v9713_v51 = vld [vmem:[%s19262_s13 + $0x1948] sm:$0xff] }
0x119f   : > { %9479 = vmatpush1.bf16.msra.mxu0 %v16209_v37  ;;  %9520 = vmatpush1.bf16.msra.mxu1 %v16211_v53  ;;  %v9688_v37 = vld [vmem:[%s19262_s13 + $0x1880] sm:$0xff] }
0x11a0   : > { %9480 = vmatprep.subr.bf16.mxu0 %v16218_v41  ;;  %9521 = vmatprep.subr.bf16.mxu1 %v16220_v40  ;;  %v9692_v53 = vld [vmem:[%s19262_s13 + $0x18a0] sm:$0xff]  ;;  %v9689_v41 = vld [vmem:[%s19262_s13 + $0x1888] sm:$0xff] }
0x11a1   : > { %v16249_v40 = vcombine.high %v9688_v37, %v9692_v53  ;;  %v16248_v60 = vcombine.low %v9688_v37, %v9692_v53  ;;  %v16250_v48 = vcombine.low %v9689_v41, %v9693_v58  ;;  %v16251_v26 = vcombine.high %v9689_v41, %v9693_v58  ;;  %v9720_v37 = vld [vmem:[%s19262_s13 + $0x1980] sm:$0xff] }
0x11a2   : > { %v9724_v53 = vld [vmem:[%s19262_s13 + $0x19a0] sm:$0xff] }
0x11a3   : > { %9481 = vmatpush1.bf16.msra.mxu0 %v16217_v45  ;;  %9522 = vmatpush1.bf16.msra.mxu1 %v16219_v22  ;;  %v9696_v45 = vld [vmem:[%s19262_s13 + $0x18c0] sm:$0xff]  ;;  %v16281_v58 = vcombine.high %v9720_v37, %v9724_v53 }
0x11a4   : > { %9482 = vmatprep.subr.bf16.mxu0 %v16226_v8  ;;  %9523 = vmatprep.subr.bf16.mxu1 %v16228_v44  ;;  %v9700_v22 = vld [vmem:[%s19262_s13 + $0x18e0] sm:$0xff]  ;;  %v9697_v8 = vld [vmem:[%s19262_s13 + $0x18c8] sm:$0xff] }
0x11a5   : > { %v16257_v44 = vcombine.high %v9696_v45, %v9700_v22 }
0x11a7   : > { %9483 = vmatpush1.bf16.msra.mxu0 %v16225_v30  ;;  %9524 = vmatpush1.bf16.msra.mxu1 %v16227_v49  ;;  %v9701_v30 = vld [vmem:[%s19262_s13 + $0x18e8] sm:$0xff]  ;;  %v16256_v49 = vcombine.low %v9696_v45, %v9700_v22  ;;  %v9732_v22 = vld [vmem:[%s19262_s13 + $0x19e0] sm:$0xff] }
0x11a8   : > { %9558 = vmatprep.subr.bf16.mxu0 %v21407_v14  ;;  %9599 = vmatprep.subr.bf16.mxu1 %v21410_v0  ;;  %v16258_v28 = vcombine.low %v9697_v8, %v9701_v30  ;;  %v16259_v56 = vcombine.high %v9697_v8, %v9701_v30  ;;  %v9729_v8 = vld [vmem:[%s19262_s13 + $0x19c8] sm:$0xff]  ;;  %v16280_v30 = vcombine.low %v9720_v37, %v9724_v53 }
0x11aa   : > { %9501 = vmatmul.mubr.bf16.vlgmr.msra.gmra.mrb[12].mxu0 %v21371_v59  ;;  %9542 = vmatmul.mubr.bf16.vlgmr.msra.gmra.mrb[12].mxu1 %v21371_v59 }
0x11ab   : > { %9559 = vmatpush1.bf16.msra.mxu0 %v21415_v43  ;;  %9600 = vmatpush1.bf16.msra.mxu1 %v21418_v61 }
0x11ac   : > { %9560 = vmatprep.subr.bf16.mxu0 %v21421_v2  ;;  %9601 = vmatprep.subr.bf16.mxu1 %v21424_v33 }
0x11ad   : > { %9590 = vmatprep.mubr.bf16.mxu0 %v18868_v13  ;;  %9631 = vmatprep.mubr.bf16.mxu1 %v18868_v13 }
0x11af   : > { %9561 = vmatpush1.bf16.msra.mxu0 %v21429_v16  ;;  %9602 = vmatpush1.bf16.msra.mxu1 %v21432_v32 }
0x11b0   : > { %9562 = vmatprep.subr.bf16.mxu0 %v21435_v34  ;;  %9603 = vmatprep.subr.bf16.mxu1 %v21438_v46 }
0x11b3   : > { %9563 = vmatpush1.bf16.msra.mxu0 %v21441_v38  ;;  %9604 = vmatpush1.bf16.msra.mxu1 %v21444_v39 }
0x11b4   : > { %9564 = vmatprep.subr.bf16.mxu0 %v21447_v35  ;;  %9605 = vmatprep.subr.bf16.mxu1 %v21450_v4 }
0x11b7   : > { %9565 = vmatpush1.bf16.msra.mxu0 %v21453_v24  ;;  %9606 = vmatpush1.bf16.msra.mxu1 %v21456_v42 }
0x11b8   : > { %9566 = vmatprep.subr.bf16.mxu0 %v21459_v63  ;;  %9607 = vmatprep.subr.bf16.mxu1 %v21462_v6 }
0x11bb   : > { %9567 = vmatpush1.bf16.msra.mxu0 %v21465_v27  ;;  %9608 = vmatpush1.bf16.msra.mxu1 %v21468_v5 }
0x11bc   : > { %9568 = vmatprep.subr.bf16.mxu0 %v21471_v31  ;;  %9609 = vmatprep.subr.bf16.mxu1 %v21474_v18 }
0x11bf   : > { %9569 = vmatpush1.bf16.msra.mxu0 %v21477_v62  ;;  %9610 = vmatpush1.bf16.msra.mxu1 %v21480_v54 }
0x11c0   : > { %9570 = vmatprep.subr.bf16.mxu0 %v21483_v55  ;;  %9611 = vmatprep.subr.bf16.mxu1 %v21486_v10 }
0x11c3   : > { %9571 = vmatpush1.bf16.msra.mxu0 %v21489_v11  ;;  %9612 = vmatpush1.bf16.msra.mxu1 %v21492_v7 }
0x11c4   : > { %9572 = vmatprep.subr.bf16.mxu0 %v21495_v47  ;;  %9613 = vmatprep.subr.bf16.mxu1 %v21498_v9 }
0x11c7   : > { %9573 = vmatpush1.bf16.msra.mxu0 %v21501_v23  ;;  %9614 = vmatpush1.bf16.msra.mxu1 %v21504_v17 }
0x11c8   : > { %10056 = vmatprep.subr.bf16.mxu0 %v16233_v36  ;;  %10097 = vmatprep.subr.bf16.mxu1 %v16235_v3  ;;  %v9708_v36 = vld [vmem:[%s19262_s13 + $0x1920] sm:$0xff] }
0x11c9   : > { %v16264_v3 = vcombine.low %v9704_v25, %v9708_v36 }
0x11ca   : > { %9591 = vmatmul.mubr.bf16.vlgmr.msra.gmra.mrb[56].mxu0 %v21371_v59  ;;  %9632 = vmatmul.mubr.bf16.vlgmr.msra.gmra.mrb[56].mxu1 %v21371_v59  ;;  %v9680_v59 = vld [vmem:[%s19262_s13 + $0x1840] sm:$0xff] }
0x11cb   : > { %10088 = vmatprep.mubr.bf16.mxu0 %v18868_v13  ;;  %10129 = vmatprep.mubr.bf16.mxu1 %v18868_v13  ;;  %v16241_v20 = vcombine.high %v9680_v59, %v9684_v12  ;;  %v16240_v21 = vcombine.low %v9680_v59, %v9684_v12 }
0x11cc   : > { %10057 = vmatpush1.bf16.msra.mxu0 %v16232_v1  ;;  %10098 = vmatpush1.bf16.msra.mxu1 %v16234_v57  ;;  %v16265_v1 = vcombine.high %v9704_v25, %v9708_v36  ;;  %v9709_v57 = vld [vmem:[%s19262_s13 + $0x1928] sm:$0xff] }
0x11cd   : > { %10058 = vmatprep.subr.bf16.mxu0 %v16241_v20  ;;  %10099 = vmatprep.subr.bf16.mxu1 %v16243_v52  ;;  %v16266_v59 = vcombine.low %v9705_v19, %v9709_v57  ;;  %v16267_v12 = vcombine.high %v9705_v19, %v9709_v57  ;;  %v9716_v20 = vld [vmem:[%s19262_s13 + $0x1960] sm:$0xff]  ;;  %v9717_v52 = vld [vmem:[%s19262_s13 + $0x1968] sm:$0xff] }
0x11ce   : > { %v16274_v41 = vcombine.low %v9713_v51, %v9717_v52 }
0x11d0   : > { %10059 = vmatpush1.bf16.msra.mxu0 %v16240_v21  ;;  %10100 = vmatpush1.bf16.msra.mxu1 %v16242_v15  ;;  %v16272_v21 = vcombine.low %v9712_v29, %v9716_v20  ;;  %v16273_v15 = vcombine.high %v9712_v29, %v9716_v20 }
0x11d1   : > { %10060 = vmatprep.subr.bf16.mxu0 %v16249_v40  ;;  %10101 = vmatprep.subr.bf16.mxu1 %v16251_v26  ;;  %v16275_v40 = vcombine.high %v9713_v51, %v9717_v52  ;;  %v9728_v26 = vld [vmem:[%s19262_s13 + $0x19c0] sm:$0xff]  ;;  %v21564_v51 = vld [vmem:[%s19428_s24 + $0x60] sm:$0xff] }
0x11d2   : > { %v16289_v36 = vcombine.high %v9728_v26, %v9732_v22 }
0x11d4   : > { %10061 = vmatpush1.bf16.msra.mxu0 %v16248_v60  ;;  %10102 = vmatpush1.bf16.msra.mxu1 %v16250_v48  ;;  %v9721_v60 = vld [vmem:[%s19262_s13 + $0x1988] sm:$0xff] }
0x11d5   : > { %10062 = vmatprep.subr.bf16.mxu0 %v16257_v44  ;;  %10103 = vmatprep.subr.bf16.mxu1 %v16259_v56  ;;  %v9725_v48 = vld [vmem:[%s19262_s13 + $0x19a8] sm:$0xff]  ;;  %v21550_v56 = vld [vmem:[%s19262_s13 + $0x1818] sm:$0xff] }
0x11d6   : > { %v16283_v45 = vcombine.high %v9721_v60, %v9725_v48  ;;  %v9733_v44 = vld [vmem:[%s19262_s13 + $0x19e8] sm:$0xff]  ;;  %v16282_v25 = vcombine.low %v9721_v60, %v9725_v48 }
0x11d7   : > { %v16291_v57 = vcombine.high %v9729_v8, %v9733_v44 }
0x11d8   : > { %10063 = vmatpush1.bf16.msra.mxu0 %v16256_v49  ;;  %10104 = vmatpush1.bf16.msra.mxu1 %v16258_v28  ;;  %v21544_v49 = vld [vmem:[%s19262_s13 + $0x1810] sm:$0xff] }
0x11d9   : > { %10064 = vmatprep.subr.bf16.mxu0 %v16265_v1  ;;  %10105 = vmatprep.subr.bf16.mxu1 %v16267_v12  ;;  %v21547_v28 = vld [vmem:[%s19262_s13 + $0x1830] sm:$0xff]  ;;  %v21555_v1 = vld [vmem:[%s19262_s13 + $0x1838] sm:$0xff]  ;;  %v16290_v12 = vcombine.low %v9729_v8, %v9733_v44  ;;  %v21572_v8 = vld [vmem:[%s19428_s24 + $0x70] sm:$0xff] }
0x11da   : > { %v16236_v19 = vcombine.low %v21544_v49, %v21547_v28  ;;  %v16237_v29 = vcombine.high %v21544_v49, %v21547_v28  ;;  %v16239_v20 = vcombine.high %v21550_v56, %v21555_v1 }
0x11dc   : > { %10065 = vmatpush1.bf16.msra.mxu0 %v16264_v3  ;;  %10106 = vmatpush1.bf16.msra.mxu1 %v16266_v59  ;;  %v16238_v3 = vcombine.low %v21550_v56, %v21555_v1  ;;  %v16288_v59 = vcombine.low %v9728_v26, %v9732_v22  ;;  %v9706_v1 = vld [vmem:[%s19262_s13 + $0x1910] sm:$0xff] }
0x11dd   : > { %10066 = vmatprep.subr.bf16.mxu0 %v16273_v15  ;;  %10107 = vmatprep.subr.bf16.mxu1 %v16275_v40 }
0x11e0   : > { %10067 = vmatpush1.bf16.msra.mxu0 %v16272_v21  ;;  %10108 = vmatpush1.bf16.msra.mxu1 %v16274_v41  ;;  %v21567_v21 = vld [vmem:[%s19428_s24 + $0x68] sm:$0xff] }
0x11e1   : > { %10068 = vmatprep.subr.bf16.mxu0 %v16281_v58  ;;  %10109 = vmatprep.subr.bf16.mxu1 %v16283_v45 }
0x11e4   : > { %10069 = vmatpush1.bf16.msra.mxu0 %v16280_v30  ;;  %10110 = vmatpush1.bf16.msra.mxu1 %v16282_v25  ;;  %v21576_v30 = vld [vmem:[%s19428_s24 + $0x78] sm:$0xff] }
0x11e5   : > { %10070 = vmatprep.subr.bf16.mxu0 %v16289_v36  ;;  %10111 = vmatprep.subr.bf16.mxu1 %v16291_v57 }
0x11e8   : > { %10071 = vmatpush1.bf16.msra.mxu0 %v16288_v59  ;;  %10112 = vmatpush1.bf16.msra.mxu1 %v16290_v12 }
0x11e9   : > { %10138 = vmatprep.subr.bf16.mxu0 %v16237_v29  ;;  %10179 = vmatprep.subr.bf16.mxu1 %v16239_v20 }
0x129d   : > { %v9592_v15 = vpop.f32.mrb[56].mxu0  ;;  %v9633_v52 = vpop.f32.mrb[56].mxu1 }
0x129e   : > { %v9640_v37 = vadd.f32 %v9592_v15, %v21564_v51  ;;  %v9594_v53 = vpop.f32.mrb[57].mxu0  ;;  %v9635_v41 = vpop.f32.mrb[57].mxu1  ;;  %v9642_v44 = vadd.f32 %v9633_v52, %v21572_v8 }
0x129f   : > { %v9641_v40 = vadd.f32 %v9594_v53, %v21567_v21  ;;  %v9596_v58 = vpop.f32.mrb[58].mxu0  ;;  %v9637_v60 = vpop.f32.mrb[58].mxu1  ;;  %v9643_v25 = vadd.f32 %v9635_v41, %v21576_v30 }
0x12a0   : > { %v16229_v48 = vmul.f32 -1.442695, %v9640_v37  ;;  %v9597_v26 = vpop.f32.mrb[59].mxu0  ;;  %v9638_v45 = vpop.f32.mrb[59].mxu1  ;;  %v16231_v36 = vmul.f32 -1.442695, %v9642_v44 }
0x12a1   : > { %v16230_v22 = vmul.f32 -1.442695, %v9641_v40  ;;  %v9664_v37 = vrot.slane %v21364_v50, 6  ;;  %v9682_v26 = vld [vmem:[%s19262_s13 + $0x1850] sm:$0xff]  ;;  %v9683_v44 = vld [vmem:[%s19262_s13 + $0x1858] sm:$0xff] }
0x12a2   : > { %17614 = vpow2.f32 %v16229_v48 }
0x12a3   : > { %17616 = vpow2.f32 %v16230_v22  ;;  %v9686_v22 = vld [vmem:[%s19262_s13 + $0x1870] sm:$0xff] }
0x12a4   : > { %17618 = vtanh.f32 %v9643_v25  ;;  %v9687_v25 = vld [vmem:[%s19262_s13 + $0x1878] sm:$0xff] }
0x12a5   : > { %17620 = vpow2.f32 %v16231_v36 }
0x12ac   : > { %v17615_v57 = vpop.eup %17614 }
0x12ad   : > { %v9653_v59 = vadd.f32 1.0, %v17615_v57  ;;  %v17617_v12 = vpop.eup %17616  ;;  %v16245_v57 = vcombine.high %v9682_v26, %v9686_v22 }
0x12ae   : > { %v9654_v29 = vadd.f32 1.0, %v17617_v12  ;;  %v17619_v20 = vpop.eup %17618  ;;  %v9690_v12 = vld [vmem:[%s19262_s13 + $0x1890] sm:$0xff] }
0x12af   : > { %17622 = vrcp.f32 %v9653_v59  ;;  %v17621_v15 = vpop.eup %17620  ;;  %v16247_v59 = vcombine.high %v9683_v44, %v9687_v25 }
0x12b0   : > { %17624 = vrcp.f32 %v9654_v29  ;;  %v9655_v40 = vadd.f32 1.0, %v17621_v15  ;;  %v9694_v29 = vld [vmem:[%s19262_s13 + $0x18b0] sm:$0xff]  ;;  %v9695_v15 = vld [vmem:[%s19262_s13 + $0x18b8] sm:$0xff] }
0x12b1   : > { %v16252_v49 = vcombine.low %v9690_v12, %v9694_v29 }
0x12b2   : > { %17626 = vrcp.f32 %v9655_v40  ;;  %v9698_v40 = vld [vmem:[%s19262_s13 + $0x18d0] sm:$0xff] }
0x12b9   : > { %v17623_v52 = vpop.eup %17622 }
0x12ba   : > { %v9667_v53 = vmul.f32 %v17623_v52, %v17619_v20  ;;  %v17625_v41 = vpop.eup %17624  ;;  %v9691_v20 = vld [vmem:[%s19262_s13 + $0x1898] sm:$0xff]  ;;  %v16244_v52 = vcombine.low %v9682_v26, %v9686_v22 }
0x12bb   : > { %v9666_v58 = vmul.f32 %v17625_v41, %v9664_v37  ;;  %v16246_v37 = vcombine.low %v9683_v44, %v9687_v25  ;;  %v16255_v41 = vcombine.high %v9691_v20, %v9695_v15  ;;  %v16254_v28 = vcombine.low %v9691_v20, %v9695_v15  ;;  %v9707_v26 = vld [vmem:[%s19262_s13 + $0x1918] sm:$0xff] }
0x12bc   : > { %v17627_v48 = vpop.eup %17626  ;;  %v9711_v22 = vld [vmem:[%s19262_s13 + $0x1938] sm:$0xff] }
0x12bd   : > { %v21580_v60 = vadd.f32 %v9667_v53, %v9666_v58  ;;  %v16253_v53 = vcombine.high %v9690_v12, %v9694_v29  ;;  %v9702_v58 = vld [vmem:[%s19262_s13 + $0x18f0] sm:$0xff]  ;;  %v9715_v29 = vld [vmem:[%s19262_s13 + $0x1958] sm:$0xff] }
0x12be   : > { %v16261_v56 = vcombine.high %v9698_v40, %v9702_v58  ;;  %v16260_v44 = vcombine.low %v9698_v40, %v9702_v58  ;;  %v9718_v12 = vld [vmem:[%s19262_s13 + $0x1970] sm:$0xff]  ;;  %v9719_v20 = vld [vmem:[%s19262_s13 + $0x1978] sm:$0xff] }
0x12bf   : > { %17628 = vtanh.f32 %v21580_v60  ;;  %v9726_v40 = vld [vmem:[%s19262_s13 + $0x19b0] sm:$0xff]  ;;  %v9723_v58 = vld [vmem:[%s19262_s13 + $0x1998] sm:$0xff] }
0x12c9   : > { %v17629_v45 = vpop.eup %17628 }
0x12ca   : > { %v9670_v50 = vmul.f32 %v17629_v45, %v17627_v48  ;;  %v9699_v48 = vld [vmem:[%s19262_s13 + $0x18d8] sm:$0xff] }
0x12cb   : > { %v9703_v45 = vld [vmem:[%s19262_s13 + $0x18f8] sm:$0xff] }
0x12cc   : > { %v21587_v36 = vpack.c.bf16 %v9670_v50, %v9670_v50  ;;  %v16262_v25 = vcombine.low %v9699_v48, %v9703_v45 }
0x12ce   : > { %10089 = vmatmul.mubr.bf16.vlgmr.msra.gmra.mrb[8].mxu0 %v21587_v36  ;;  %10130 = vmatmul.mubr.bf16.vlgmr.msra.gmra.mrb[8].mxu1 %v21587_v36 }
0x12cf   : > { %10139 = vmatpush1.bf16.msra.mxu0 %v16236_v19  ;;  %10180 = vmatpush1.bf16.msra.mxu1 %v16238_v3  ;;  %v16263_v19 = vcombine.high %v9699_v48, %v9703_v45  ;;  %v9710_v3 = vld [vmem:[%s19262_s13 + $0x1930] sm:$0xff]  ;;  %v9727_v48 = vld [vmem:[%s19262_s13 + $0x19b8] sm:$0xff] }
0x12d0   : > { %10140 = vmatprep.subr.bf16.mxu0 %v16245_v57  ;;  %10181 = vmatprep.subr.bf16.mxu1 %v16247_v59  ;;  %v16269_v50 = vcombine.high %v9706_v1, %v9710_v3  ;;  %v16271_v57 = vcombine.high %v9707_v26, %v9711_v22  ;;  %v9714_v59 = vld [vmem:[%s19262_s13 + $0x1950] sm:$0xff]  ;;  %v16268_v15 = vcombine.low %v9706_v1, %v9710_v3  ;;  %v9731_v3 = vld [vmem:[%s19262_s13 + $0x19d8] sm:$0xff] }
0x12d1   : > { %10170 = vmatprep.mubr.bf16.mxu0 %v18868_v13  ;;  %10211 = vmatprep.mubr.bf16.mxu1 %v18868_v13  ;;  %v16276_v45 = vcombine.low %v9714_v59, %v9718_v12  ;;  %v9734_v1 = vld [vmem:[%s19262_s13 + $0x19f0] sm:$0xff] }
0x12d3   : > { %10141 = vmatpush1.bf16.msra.mxu0 %v16244_v52  ;;  %10182 = vmatpush1.bf16.msra.mxu1 %v16246_v37  ;;  %v16270_v52 = vcombine.low %v9707_v26, %v9711_v22  ;;  %v16277_v37 = vcombine.high %v9714_v59, %v9718_v12  ;;  %v9735_v26 = vld [vmem:[%s19262_s13 + $0x19f8] sm:$0xff]  ;;  %v10390_v12 = vld [vmem:[%s19262_s13 + $0x1b20] sm:$0xff] }
0x12d4   : > { %10142 = vmatprep.subr.bf16.mxu0 %v16253_v53  ;;  %10183 = vmatprep.subr.bf16.mxu1 %v16255_v41  ;;  %v16279_v53 = vcombine.high %v9715_v29, %v9719_v20  ;;  %v9722_v41 = vld [vmem:[%s19262_s13 + $0x1990] sm:$0xff]  ;;  %v16294_v59 = vcombine.low %v9731_v3, %v9735_v26 }
0x12d5   : > { %v16284_v22 = vcombine.low %v9722_v41, %v9726_v40 }
0x12d7   : > { %10143 = vmatpush1.bf16.msra.mxu0 %v16252_v49  ;;  %10184 = vmatpush1.bf16.msra.mxu1 %v16254_v28  ;;  %v16278_v49 = vcombine.low %v9715_v29, %v9719_v20  ;;  %v16285_v28 = vcombine.high %v9722_v41, %v9726_v40  ;;  %v10387_v29 = vld [vmem:[%s19262_s13 + $0x1b08] sm:$0xff]  ;;  %v10394_v41 = vld [vmem:[%s19262_s13 + $0x1b40] sm:$0xff] }
0x12d8   : > { %10144 = vmatprep.subr.bf16.mxu0 %v16261_v56  ;;  %10185 = vmatprep.subr.bf16.mxu1 %v16263_v19  ;;  %v16287_v56 = vcombine.high %v9723_v58, %v9727_v48  ;;  %v9730_v19 = vld [vmem:[%s19262_s13 + $0x19d0] sm:$0xff]  ;;  %v10398_v40 = vld [vmem:[%s19262_s13 + $0x1b60] sm:$0xff] }
0x12db   : > { %10145 = vmatpush1.bf16.msra.mxu0 %v16260_v44  ;;  %10186 = vmatpush1.bf16.msra.mxu1 %v16262_v25  ;;  %v16286_v44 = vcombine.low %v9723_v58, %v9727_v48  ;;  %v16293_v25 = vcombine.high %v9730_v19, %v9734_v1  ;;  %v10395_v58 = vld [vmem:[%s19262_s13 + $0x1b48] sm:$0xff]  ;;  %v16339_v48 = vcombine.low %v10394_v41, %v10398_v40 }
0x12dc   : > { %10146 = vmatprep.subr.bf16.mxu0 %v16269_v50  ;;  %10187 = vmatprep.subr.bf16.mxu1 %v16271_v57  ;;  %v16295_v50 = vcombine.high %v9731_v3, %v9735_v26  ;;  %v16292_v57 = vcombine.low %v9730_v19, %v9734_v1  ;;  %v10403_v26 = vld [vmem:[%s19262_s13 + $0x1b88] sm:$0xff] }
0x12df   : > { %10147 = vmatpush1.bf16.msra.mxu0 %v16268_v15  ;;  %10188 = vmatpush1.bf16.msra.mxu1 %v16270_v52  ;;  %v10391_v15 = vld [vmem:[%s19262_s13 + $0x1b28] sm:$0xff] }
0x12e0   : > { %10148 = vmatprep.subr.bf16.mxu0 %v16277_v37  ;;  %10189 = vmatprep.subr.bf16.mxu1 %v16279_v53  ;;  %v16333_v37 = vcombine.low %v10387_v29, %v10391_v15  ;;  %v16334_v53 = vcombine.high %v10387_v29, %v10391_v15 }
0x12e3   : > { %10149 = vmatpush1.bf16.msra.mxu0 %v16276_v45  ;;  %10190 = vmatpush1.bf16.msra.mxu1 %v16278_v49  ;;  %v16340_v45 = vcombine.high %v10394_v41, %v10398_v40  ;;  %v10399_v49 = vld [vmem:[%s19262_s13 + $0x1b68] sm:$0xff] }
0x12e4   : > { %10150 = vmatprep.subr.bf16.mxu0 %v16285_v28  ;;  %10191 = vmatprep.subr.bf16.mxu1 %v16287_v56  ;;  %v10402_v28 = vld [vmem:[%s19262_s13 + $0x1b80] sm:$0xff]  ;;  %v16341_v19 = vcombine.low %v10395_v58, %v10399_v49  ;;  %v16342_v1 = vcombine.high %v10395_v58, %v10399_v49  ;;  %v10364_v49 = vld [vmem:[%s19262_s13 + $0x1a50] sm:$0xff] }
0x12e5   : > { %v10406_v56 = vld [vmem:[%s19262_s13 + $0x1ba0] sm:$0xff] }
0x12e6   : > { %v16348_v3 = vcombine.high %v10402_v28, %v10406_v56 }
0x12e7   : > { %10151 = vmatpush1.bf16.msra.mxu0 %v16284_v22  ;;  %10192 = vmatpush1.bf16.msra.mxu1 %v16286_v44  ;;  %v10407_v22 = vld [vmem:[%s19262_s13 + $0x1ba8] sm:$0xff]  ;;  %v10410_v44 = vld [vmem:[%s19262_s13 + $0x1bc0] sm:$0xff] }
0x12e8   : > { %10152 = vmatprep.subr.bf16.mxu0 %v16293_v25  ;;  %10193 = vmatprep.subr.bf16.mxu1 %v16295_v50  ;;  %v16350_v25 = vcombine.high %v10403_v26, %v10407_v22  ;;  %v10414_v50 = vld [vmem:[%s19262_s13 + $0x1be0] sm:$0xff] }
0x12eb   : > { %10153 = vmatpush1.bf16.msra.mxu0 %v16292_v57  ;;  %10194 = vmatpush1.bf16.msra.mxu1 %v16294_v59  ;;  %v10411_v57 = vld [vmem:[%s19262_s13 + $0x1bc8] sm:$0xff] }
0x12ec   : > { %10228 = vmatprep.subr.bf16.mxu0 %v21407_v14  ;;  %10269 = vmatprep.subr.bf16.mxu1 %v21410_v0  ;;  %v10354_v14 = vld [vmem:[%s19262_s13 + $0x1a00] sm:$0xff]  ;;  %v10415_v59 = vld [vmem:[%s19262_s13 + $0x1be8] sm:$0xff] }
0x12ed   : > { %v10358_v0 = vld [vmem:[%s19262_s13 + $0x1a20] sm:$0xff] }
0x12ee   : > { %10171 = vmatmul.mubr.bf16.vlgmr.msra.gmra.mrb[12].mxu0 %v21587_v36  ;;  %10212 = vmatmul.mubr.bf16.vlgmr.msra.gmra.mrb[12].mxu1 %v21587_v36 }
0x12ef   : > { %10229 = vmatpush1.bf16.msra.mxu0 %v21415_v43  ;;  %10270 = vmatpush1.bf16.msra.mxu1 %v21418_v61  ;;  %v10355_v43 = vld [vmem:[%s19262_s13 + $0x1a08] sm:$0xff]  ;;  %v16300_v61 = vcombine.high %v10354_v14, %v10358_v0 }
0x12f0   : > { %10230 = vmatprep.subr.bf16.mxu0 %v21421_v2  ;;  %10271 = vmatprep.subr.bf16.mxu1 %v21424_v33  ;;  %v10359_v2 = vld [vmem:[%s19262_s13 + $0x1a28] sm:$0xff]  ;;  %v16299_v33 = vcombine.low %v10354_v14, %v10358_v0  ;;  %v21696_v14 = vld [vmem:[%s19262_s13 + $0x1a10] sm:$0xff] }
0x12f1   : > { %10260 = vmatprep.mubr.bf16.mxu0 %v18868_v13  ;;  %10301 = vmatprep.mubr.bf16.mxu1 %v18868_v13  ;;  %v21699_v0 = vld [vmem:[%s19262_s13 + $0x1a30] sm:$0xff] }
0x12f3   : > { %10231 = vmatpush1.bf16.msra.mxu0 %v21429_v16  ;;  %10272 = vmatpush1.bf16.msra.mxu1 %v21432_v32  ;;  %v16301_v16 = vcombine.low %v10355_v43, %v10359_v2  ;;  %v16302_v32 = vcombine.high %v10355_v43, %v10359_v2  ;;  %v21702_v43 = vld [vmem:[%s19262_s13 + $0x1a18] sm:$0xff]  ;;  %v16303_v2 = vcombine.low %v21696_v14, %v21699_v0 }
0x12f4   : > { %10232 = vmatprep.subr.bf16.mxu0 %v21435_v34  ;;  %10273 = vmatprep.subr.bf16.mxu1 %v21438_v46  ;;  %v10362_v34 = vld [vmem:[%s19262_s13 + $0x1a40] sm:$0xff] }
0x12f5   : > { %v10366_v46 = vld [vmem:[%s19262_s13 + $0x1a60] sm:$0xff] }
0x12f7   : > { %10233 = vmatpush1.bf16.msra.mxu0 %v21441_v38  ;;  %10274 = vmatpush1.bf16.msra.mxu1 %v21444_v39  ;;  %v10363_v38 = vld [vmem:[%s19262_s13 + $0x1a48] sm:$0xff]  ;;  %v16308_v39 = vcombine.high %v10362_v34, %v10366_v46 }
0x12f8   : > { %10234 = vmatprep.subr.bf16.mxu0 %v21447_v35  ;;  %10275 = vmatprep.subr.bf16.mxu1 %v21450_v4  ;;  %v10367_v35 = vld [vmem:[%s19262_s13 + $0x1a68] sm:$0xff]  ;;  %v16307_v4 = vcombine.low %v10362_v34, %v10366_v46  ;;  %v16358_v46 = vcombine.high %v10411_v57, %v10415_v59 }
0x12fb   : > { %10235 = vmatpush1.bf16.msra.mxu0 %v21453_v24  ;;  %10276 = vmatpush1.bf16.msra.mxu1 %v21456_v42  ;;  %v16309_v24 = vcombine.low %v10363_v38, %v10367_v35  ;;  %v16310_v42 = vcombine.high %v10363_v38, %v10367_v35  ;;  %v16355_v38 = vcombine.low %v10410_v44, %v10414_v50 }
0x12fc   : > { %10236 = vmatprep.subr.bf16.mxu0 %v21459_v63  ;;  %10277 = vmatprep.subr.bf16.mxu1 %v21462_v6  ;;  %v10370_v63 = vld [vmem:[%s19262_s13 + $0x1a80] sm:$0xff]  ;;  %v16304_v35 = vcombine.high %v21696_v14, %v21699_v0 }
0x12fd   : > { %v10374_v6 = vld [vmem:[%s19262_s13 + $0x1aa0] sm:$0xff] }
0x12ff   : > { %10237 = vmatpush1.bf16.msra.mxu0 %v21465_v27  ;;  %10278 = vmatpush1.bf16.msra.mxu1 %v21468_v5  ;;  %v10371_v27 = vld [vmem:[%s19262_s13 + $0x1a88] sm:$0xff]  ;;  %v16316_v5 = vcombine.high %v10370_v63, %v10374_v6 }
0x1300   : > { %10238 = vmatprep.subr.bf16.mxu0 %v21471_v31  ;;  %10279 = vmatprep.subr.bf16.mxu1 %v21474_v18  ;;  %v10375_v31 = vld [vmem:[%s19262_s13 + $0x1aa8] sm:$0xff]  ;;  %v16315_v18 = vcombine.low %v10370_v63, %v10374_v6 }
0x1303   : > { %10239 = vmatpush1.bf16.msra.mxu0 %v21477_v62  ;;  %10280 = vmatpush1.bf16.msra.mxu1 %v21480_v54  ;;  %v16317_v62 = vcombine.low %v10371_v27, %v10375_v31  ;;  %v16318_v54 = vcombine.high %v10371_v27, %v10375_v31 }
0x1304   : > { %10240 = vmatprep.subr.bf16.mxu0 %v21483_v55  ;;  %10281 = vmatprep.subr.bf16.mxu1 %v21486_v10  ;;  %v10378_v55 = vld [vmem:[%s19262_s13 + $0x1ac0] sm:$0xff] }
0x1305   : > { %v10382_v10 = vld [vmem:[%s19262_s13 + $0x1ae0] sm:$0xff] }
0x1307   : > { %10241 = vmatpush1.bf16.msra.mxu0 %v21489_v11  ;;  %10282 = vmatpush1.bf16.msra.mxu1 %v21492_v7  ;;  %v10379_v11 = vld [vmem:[%s19262_s13 + $0x1ac8] sm:$0xff]  ;;  %v16324_v7 = vcombine.high %v10378_v55, %v10382_v10 }
0x1308   : > { %10242 = vmatprep.subr.bf16.mxu0 %v21495_v47  ;;  %10283 = vmatprep.subr.bf16.mxu1 %v21498_v9  ;;  %v10383_v47 = vld [vmem:[%s19262_s13 + $0x1ae8] sm:$0xff]  ;;  %v16323_v9 = vcombine.low %v10378_v55, %v10382_v10 }
0x130b   : > { %10243 = vmatpush1.bf16.msra.mxu0 %v21501_v23  ;;  %10284 = vmatpush1.bf16.msra.mxu1 %v21504_v17  ;;  %v16325_v23 = vcombine.low %v10379_v11, %v10383_v47  ;;  %v16326_v17 = vcombine.high %v10379_v11, %v10383_v47 }
0x130c   : > { %10741 = vmatprep.subr.bf16.mxu0 %v16300_v61  ;;  %10782 = vmatprep.subr.bf16.mxu1 %v16302_v32  ;;  %v16347_v61 = vcombine.low %v10402_v28, %v10406_v56  ;;  %v16356_v32 = vcombine.high %v10410_v44, %v10414_v50  ;;  %v10368_v28 = vld [vmem:[%s19262_s13 + $0x1a70] sm:$0xff]  ;;  %v10365_v56 = vld [vmem:[%s19262_s13 + $0x1a58] sm:$0xff] }
0x130d   : > { %v10376_v44 = vld [vmem:[%s19262_s13 + $0x1ab0] sm:$0xff]  ;;  %v10377_v50 = vld [vmem:[%s19262_s13 + $0x1ab8] sm:$0xff] }
0x130e   : > { %10261 = vmatmul.mubr.bf16.vlgmr.msra.gmra.mrb[60].mxu0 %v21587_v36  ;;  %10302 = vmatmul.mubr.bf16.vlgmr.msra.gmra.mrb[60].mxu1 %v21587_v36  ;;  %v10386_v36 = vld [vmem:[%s19262_s13 + $0x1b00] sm:$0xff] }
0x130f   : > { %10773 = vmatprep.mubr.bf16.mxu0 %v18868_v13  ;;  %10814 = vmatprep.mubr.bf16.mxu1 %v18868_v13  ;;  %v16332_v20 = vcombine.high %v10386_v36, %v10390_v12  ;;  %v16331_v52 = vcombine.low %v10386_v36, %v10390_v12 }
0x1310   : > { %10742 = vmatpush1.bf16.msra.mxu0 %v16299_v33  ;;  %10783 = vmatpush1.bf16.msra.mxu1 %v16301_v16  ;;  %v21707_v33 = vld [vmem:[%s19262_s13 + $0x1a38] sm:$0xff]  ;;  %v16349_v16 = vcombine.low %v10403_v26, %v10407_v22  ;;  %v10372_v22 = vld [vmem:[%s19262_s13 + $0x1a90] sm:$0xff] }
0x1311   : > { %10743 = vmatprep.subr.bf16.mxu0 %v16308_v39  ;;  %10784 = vmatprep.subr.bf16.mxu1 %v16310_v42  ;;  %v16305_v34 = vcombine.low %v21702_v43, %v21707_v33  ;;  %v16357_v39 = vcombine.low %v10411_v57, %v10415_v59  ;;  %v16311_v57 = vcombine.low %v10364_v49, %v10368_v28 }
0x1312   : > { %v16319_v14 = vcombine.low %v10372_v22, %v10376_v44 }
0x1314   : > { %10744 = vmatpush1.bf16.msra.mxu0 %v16307_v4  ;;  %10785 = vmatpush1.bf16.msra.mxu1 %v16309_v24  ;;  %v16306_v4 = vcombine.high %v21702_v43, %v21707_v33  ;;  %v10388_v33 = vld [vmem:[%s19262_s13 + $0x1b10] sm:$0xff] }
0x1315   : > { %10745 = vmatprep.subr.bf16.mxu0 %v16316_v5  ;;  %10786 = vmatprep.subr.bf16.mxu1 %v16318_v54 }
0x1318   : > { %10746 = vmatpush1.bf16.msra.mxu0 %v16315_v18  ;;  %10787 = vmatpush1.bf16.msra.mxu1 %v16317_v62 }
0x1319   : > { %10747 = vmatprep.subr.bf16.mxu0 %v16324_v7  ;;  %10788 = vmatprep.subr.bf16.mxu1 %v16326_v17 }
0x131c   : > { %10748 = vmatpush1.bf16.msra.mxu0 %v16323_v9  ;;  %10789 = vmatpush1.bf16.msra.mxu1 %v16325_v23 }
0x131d   : > { %10749 = vmatprep.subr.bf16.mxu0 %v16332_v20  ;;  %10790 = vmatprep.subr.bf16.mxu1 %v16334_v53 }
0x1320   : > { %10750 = vmatpush1.bf16.msra.mxu0 %v16331_v52  ;;  %10791 = vmatpush1.bf16.msra.mxu1 %v16333_v37 }
0x1321   : > { %10751 = vmatprep.subr.bf16.mxu0 %v16340_v45  ;;  %10792 = vmatprep.subr.bf16.mxu1 %v16342_v1 }
0x1324   : > { %10752 = vmatpush1.bf16.msra.mxu0 %v16339_v48  ;;  %10793 = vmatpush1.bf16.msra.mxu1 %v16341_v19 }
0x1325   : > { %10753 = vmatprep.subr.bf16.mxu0 %v16348_v3  ;;  %10794 = vmatprep.subr.bf16.mxu1 %v16350_v25  ;;  %v16312_v3 = vcombine.high %v10364_v49, %v10368_v28  ;;  %v10373_v25 = vld [vmem:[%s19262_s13 + $0x1a98] sm:$0xff]  ;;  %v21777_v49 = vld [vmem:[#allocation9 + $0x24] ss:$16 sps:$4 sm:$0xff]  }
0x1326   : > { %v16321_v0 = vcombine.low %v10373_v25, %v10377_v50  ;;  %v21780_v28 = vld [vmem:[#allocation9 + $0x2c] ss:$16 sps:$4 sm:$0xff]  }
0x1328   : > { %10754 = vmatpush1.bf16.msra.mxu0 %v16347_v61  ;;  %10795 = vmatpush1.bf16.msra.mxu1 %v16349_v16  ;;  %v16320_v61 = vcombine.high %v10372_v22, %v10376_v44  ;;  %v16322_v16 = vcombine.high %v10373_v25, %v10377_v50  ;;  %v21800_v22 = vld [vmem:[#allocation9 + $0x48] ss:$16 sps:$4 sm:$0xff]   ;;  %v21803_v44 = vld [vmem:[#allocation9 + $0x64] ss:$16 sps:$4 sm:$0xff]   ;;  %v21806_v25 = vld [vmem:[#allocation9 + $0x6c] ss:$16 sps:$4 sm:$0xff]  }
0x1329   : > { %10755 = vmatprep.subr.bf16.mxu0 %v16356_v32  ;;  %10796 = vmatprep.subr.bf16.mxu1 %v16358_v46  ;;  %v10380_v32 = vld [vmem:[%s19262_s13 + $0x1ad0] sm:$0xff]  ;;  %v21809_v50 = vld [vmem:[#allocation9 + $0x60] ss:$16 sps:$4 sm:$0xff]  }
0x132a   : > { %v10384_v46 = vld [vmem:[%s19262_s13 + $0x1af0] sm:$0xff] }
0x132b   : > { %v16328_v43 = vcombine.high %v10380_v32, %v10384_v46 }
0x132c   : > { %10756 = vmatpush1.bf16.msra.mxu0 %v16355_v38  ;;  %10797 = vmatpush1.bf16.msra.mxu1 %v16357_v39  ;;  %v10381_v38 = vld [vmem:[%s19262_s13 + $0x1ad8] sm:$0xff] }
0x132d   : > { %10823 = vmatprep.subr.bf16.mxu0 %v16304_v35  ;;  %10864 = vmatprep.subr.bf16.mxu1 %v16306_v4  ;;  %v10385_v39 = vld [vmem:[%s19262_s13 + $0x1af8] sm:$0xff] }
0x132e   : > { %v10389_v35 = vld [vmem:[%s19262_s13 + $0x1b18] sm:$0xff] }
0x132f   : > { %v10393_v4 = vld [vmem:[%s19262_s13 + $0x1b38] sm:$0xff] }
0x13e1   : > { %v10262_v24 = vpop.f32.mrb[60].mxu0  ;;  %v10303_v42 = vpop.f32.mrb[60].mxu1 }
0x13e2   : > { %v10314_v63 = vrot.slane %v10262_v24, 6  ;;  %v10264_v6 = vpop.f32.mrb[61].mxu0  ;;  %v10305_v27 = vpop.f32.mrb[61].mxu1  ;;  %v10316_v47 = vrot.slane %v10303_v42, 6  ;;  %v16327_v24 = vcombine.low %v10380_v32, %v10384_v46  ;;  %v16329_v42 = vcombine.low %v10381_v38, %v10385_v39  ;;  %v21824_v32 = vld [vmem:[#allocation9 + $0x88] ss:$16 sps:$4 sm:$0xff]  }
0x13e3   : > { %v10315_v5 = vrot.slane %v10264_v6, 6  ;;  %v10266_v31 = vpop.f32.mrb[62].mxu0  ;;  %v10307_v18 = vpop.f32.mrb[62].mxu1  ;;  %v10317_v9 = vrot.slane %v10305_v27, 6  ;;  %v16338_v6 = vcombine.high %v10389_v35, %v10393_v4  ;;  %v10396_v27 = vld [vmem:[%s19262_s13 + $0x1b50] sm:$0xff] }
0x13e4   : > { %v10322_v62 = vadd.f32 %v10314_v63, %v21564_v51  ;;  %v10267_v54 = vpop.f32.mrb[63].mxu0  ;;  %v10308_v55 = vpop.f32.mrb[63].mxu1  ;;  %v10324_v23 = vadd.f32 %v10316_v47, %v21572_v8  ;;  %v10346_v8 = vrot.slane %v21580_v60, 6  ;;  %v10369_v60 = vld [vmem:[%s19262_s13 + $0x1a78] sm:$0xff]  ;;  %v21827_v46 = vld [vmem:[#allocation9 + $0xa4] ss:$16 sps:$4 sm:$0xff]  }
0x13e5   : > { %v10323_v10 = vadd.f32 %v10315_v5, %v21567_v21  ;;  %v10325_v17 = vadd.f32 %v10317_v9, %v21576_v30  ;;  %v16314_v26 = vcombine.high %v10365_v56, %v10369_v60  ;;  %v16313_v59 = vcombine.low %v10365_v56, %v10369_v60  ;;  %v10400_v5 = vld [vmem:[%s19262_s13 + $0x1b70] sm:$0xff]  ;;  %v10397_v31 = vld [vmem:[%s19262_s13 + $0x1b58] sm:$0xff] }
0x13e6   : > { %v16296_v11 = vmul.f32 -1.442695, %v10322_v62  ;;  %v16298_v36 = vmul.f32 -1.442695, %v10324_v23  ;;  %v10401_v18 = vld [vmem:[%s19262_s13 + $0x1b78] sm:$0xff]  ;;  %v16337_v54 = vcombine.low %v10389_v35, %v10393_v4  ;;  %v16344_v55 = vcombine.high %v10396_v27, %v10400_v5 }
0x13e7   : > { %v16297_v7 = vmul.f32 -1.442695, %v10323_v10  ;;  %v16346_v10 = vcombine.high %v10397_v31, %v10401_v18  ;;  %v10405_v47 = vld [vmem:[%s19262_s13 + $0x1b98] sm:$0xff]  ;;  %v16343_v23 = vcombine.low %v10396_v27, %v10400_v5  ;;  %v21788_v60 = vld [vmem:[#allocation9 + $0x28] ss:$16 sps:$4 sm:$0xff]   ;;  %v11044_v5 = vld [vmem:[%s19262_s13 + $0x1c28] sm:$0xff] }
0x13e8   : > { %17630 = vpow2.f32 %v16296_v11  ;;  %v10404_v11 = vld [vmem:[%s19262_s13 + $0x1b90] sm:$0xff]  ;;  %v10409_v9 = vld [vmem:[%s19262_s13 + $0x1bb8] sm:$0xff] }
0x13e9   : > { %17632 = vpow2.f32 %v16297_v7  ;;  %v10408_v7 = vld [vmem:[%s19262_s13 + $0x1bb0] sm:$0xff]  ;;  %v21785_v56 = vld [vmem:[#allocation9 + $0x20] ss:$16 sps:$4 sm:$0xff]   ;;  %v21854_v35 = vld [vmem:[#allocation9 + $0xec] ss:$16 sps:$4 sm:$0xff]  }
0x13ea   : > { %17634 = vtanh.f32 %v10325_v17  ;;  %v16345_v17 = vcombine.low %v10397_v31, %v10401_v18  ;;  %v21857_v4 = vld [vmem:[#allocation9 + $0xe0] ss:$16 sps:$4 sm:$0xff]  }
0x13eb   : > { %17636 = vpow2.f32 %v16298_v36  ;;  %v16352_v36 = vcombine.high %v10404_v11, %v10408_v7 }
0x13f2   : > { %v17631_v12 = vpop.eup %17630 }
0x13f3   : > { %v10335_v29 = vadd.f32 1.0, %v17631_v12  ;;  %v17633_v20 = vpop.eup %17632  ;;  %v16354_v12 = vcombine.high %v10405_v47, %v10409_v9 }
0x13f4   : > { %v10336_v51 = vadd.f32 1.0, %v17633_v20  ;;  %v17635_v21 = vpop.eup %17634  ;;  %v10416_v20 = vld [vmem:[%s19262_s13 + $0x1bf0] sm:$0xff] }
0x13f5   : > { %17638 = vrcp.f32 %v10335_v29  ;;  %v17637_v15 = vpop.eup %17636  ;;  %v10412_v29 = vld [vmem:[%s19262_s13 + $0x1bd0] sm:$0xff] }
0x13f6   : > { %17640 = vrcp.f32 %v10336_v51  ;;  %v10337_v53 = vadd.f32 1.0, %v17637_v15  ;;  %v10413_v51 = vld [vmem:[%s19262_s13 + $0x1bd8] sm:$0xff]  ;;  %v16351_v15 = vcombine.low %v10404_v11, %v10408_v7  ;;  %v11052_v11 = vld [vmem:[%s19262_s13 + $0x1c68] sm:$0xff] }
0x13f8   : > { %17642 = vrcp.f32 %v10337_v53 }
0x13ff   : > { %v17639_v52 = vpop.eup %17638 }
0x1400   : > { %v10349_v37 = vmul.f32 %v17639_v52, %v17635_v21  ;;  %v17641_v30 = vpop.eup %17640  ;;  %v10417_v21 = vld [vmem:[%s19262_s13 + $0x1bf8] sm:$0xff]  ;;  %v16353_v52 = vcombine.low %v10405_v47, %v10409_v9 }
0x1401   : > { %v10348_v41 = vmul.f32 %v17641_v30, %v10346_v8  ;;  %v16360_v8 = vcombine.high %v10412_v29, %v10416_v20  ;;  %v16359_v30 = vcombine.low %v10412_v29, %v10416_v20  ;;  %v16361_v53 = vcombine.low %v10413_v51, %v10417_v21  ;;  %v11060_v29 = vld [vmem:[%s19262_s13 + $0x1ca8] sm:$0xff] }
0x1402   : > { %v17643_v58 = vpop.eup %17642 }
0x1403   : > { %v21720_v40 = vadd.f32 %v10349_v37, %v10348_v41  ;;  %v16362_v37 = vcombine.high %v10413_v51, %v10417_v21  ;;  %v21763_v41 = vld [vmem:[#allocation9 + $0x4] ss:$16 sps:$4 sm:$0xff]  }
0x1405   : > { %17644 = vtanh.f32 %v21720_v40 }
0x140f   : > { %v17645_v48 = vpop.eup %17644 }
0x1410   : > { %v10352_v45 = vmul.f32 %v17645_v48, %v17643_v58  ;;  %v21766_v58 = vld [vmem:[#allocation9 + $0xc] ss:$16 sps:$4 sm:$0xff]   ;;  %v21771_v48 = vld [vmem:[#allocation9] ss:$16 sps:$4 sm:$0xff]  }
0x1412   : > { %v10353_v19 = vpack.c.bf16 %v10352_v45, %v10352_v45  ;;  %v21774_v45 = vld [vmem:[#allocation9 + $0x8] ss:$16 sps:$4 sm:$0xff]  }
0x1414   : > { %v21727_v1 = vrot.slane %v10353_v19, 1  ;;  %v21791_v19 = vld [vmem:[#allocation9 + $0x44] ss:$16 sps:$4 sm:$0xff]  }
0x1416   : > { %10774 = vmatmul.mubr.bf16.vlgmr.msra.gmra.mrb[8].mxu0 %v21727_v1  ;;  %10815 = vmatmul.mubr.bf16.vlgmr.msra.gmra.mrb[8].mxu1 %v21727_v1 }
0x1417   : > { %10824 = vmatpush1.bf16.msra.mxu0 %v16303_v2  ;;  %10865 = vmatpush1.bf16.msra.mxu1 %v16305_v34  ;;  %v16330_v2 = vcombine.high %v10381_v38, %v10385_v39  ;;  %v10392_v34 = vld [vmem:[%s19262_s13 + $0x1b30] sm:$0xff]  ;;  %v21830_v38 = vld [vmem:[#allocation9 + $0xac] ss:$16 sps:$4 sm:$0xff]   ;;  %v21833_v39 = vld [vmem:[#allocation9 + $0xa0] ss:$16 sps:$4 sm:$0xff]  }
0x1418   : > { %10825 = vmatprep.subr.bf16.mxu0 %v16312_v3  ;;  %10866 = vmatprep.subr.bf16.mxu1 %v16314_v26  ;;  %v16336_v63 = vcombine.high %v10388_v33, %v10392_v34  ;;  %v16335_v62 = vcombine.low %v10388_v33, %v10392_v34  ;;  %v21794_v3 = vld [vmem:[#allocation9 + $0x4c] ss:$16 sps:$4 sm:$0xff]   ;;  %v21797_v26 = vld [vmem:[#allocation9 + $0x40] ss:$16 sps:$4 sm:$0xff]   ;;  %v21848_v33 = vld [vmem:[#allocation9 + $0xc8] ss:$16 sps:$4 sm:$0xff]  }
0x1419   : > { %10855 = vmatprep.mubr.bf16.mxu0 %v18868_v13  ;;  %10896 = vmatprep.mubr.bf16.mxu1 %v18868_v13  ;;  %v21851_v34 = vld [vmem:[#allocation9 + $0xe4] ss:$16 sps:$4 sm:$0xff]  }
0x141b   : > { %10826 = vmatpush1.bf16.msra.mxu0 %v16311_v57  ;;  %10867 = vmatpush1.bf16.msra.mxu1 %v16313_v59  ;;  %v21812_v57 = vld [vmem:[#allocation9 + $0x68] ss:$16 sps:$4 sm:$0xff]   ;;  %v21815_v59 = vld [vmem:[#allocation9 + $0x84] ss:$16 sps:$4 sm:$0xff]  }
0x141c   : > { %10827 = vmatprep.subr.bf16.mxu0 %v16320_v61  ;;  %10868 = vmatprep.subr.bf16.mxu1 %v16322_v16  ;;  %v21818_v61 = vld [vmem:[#allocation9 + $0x8c] ss:$16 sps:$4 sm:$0xff]   ;;  %v21821_v16 = vld [vmem:[#allocation9 + $0x80] ss:$16 sps:$4 sm:$0xff]  }
0x141f   : > { %10828 = vmatpush1.bf16.msra.mxu0 %v16319_v14  ;;  %10869 = vmatpush1.bf16.msra.mxu1 %v16321_v0  ;;  %v21836_v14 = vld [vmem:[#allocation9 + $0xa8] ss:$16 sps:$4 sm:$0xff]   ;;  %v21839_v0 = vld [vmem:[#allocation9 + $0xc4] ss:$16 sps:$4 sm:$0xff]  }
0x1420   : > { %10829 = vmatprep.subr.bf16.mxu0 %v16328_v43  ;;  %10870 = vmatprep.subr.bf16.mxu1 %v16330_v2  ;;  %v21842_v43 = vld [vmem:[#allocation9 + $0xcc] ss:$16 sps:$4 sm:$0xff]   ;;  %v21845_v2 = vld [vmem:[#allocation9 + $0xc0] ss:$16 sps:$4 sm:$0xff]  }
0x1423   : > { %10830 = vmatpush1.bf16.msra.mxu0 %v16327_v24  ;;  %10871 = vmatpush1.bf16.msra.mxu1 %v16329_v42  ;;  %v21860_v24 = vld [vmem:[#allocation9 + $0xe8] ss:$16 sps:$4 sm:$0xff]  }
0x1424   : > { %10831 = vmatprep.subr.bf16.mxu0 %v16336_v63  ;;  %10872 = vmatprep.subr.bf16.mxu1 %v16338_v6  ;;  %v11039_v42 = vld [vmem:[%s19262_s13 + $0x1c00] sm:$0xff]  ;;  %v11040_v6 = vld [vmem:[%s19262_s13 + $0x1c08] sm:$0xff] }
0x1425   : > { %v11043_v63 = vld [vmem:[%s19262_s13 + $0x1c20] sm:$0xff]  ;;  %v16368_v18 = vcombine.low %v11040_v6, %v11044_v5 }
0x1426   : > { %v16367_v27 = vcombine.high %v11039_v42, %v11043_v63  ;;  %v16366_v31 = vcombine.low %v11039_v42, %v11043_v63 }
0x1427   : > { %10832 = vmatpush1.bf16.msra.mxu0 %v16335_v62  ;;  %10873 = vmatpush1.bf16.msra.mxu1 %v16337_v54  ;;  %v16369_v62 = vcombine.high %v11040_v6, %v11044_v5  ;;  %v11051_v54 = vld [vmem:[%s19262_s13 + $0x1c60] sm:$0xff]  ;;  %v11072_v5 = vld [vmem:[%s19262_s13 + $0x1d08] sm:$0xff] }
0x1428   : > { %10833 = vmatprep.subr.bf16.mxu0 %v16344_v55  ;;  %10874 = vmatprep.subr.bf16.mxu1 %v16346_v10  ;;  %v11048_v55 = vld [vmem:[%s19262_s13 + $0x1c48] sm:$0xff]  ;;  %v11071_v6 = vld [vmem:[%s19262_s13 + $0x1d00] sm:$0xff] }
0x1429   : > { %v16376_v47 = vcombine.low %v11048_v55, %v11052_v11  ;;  %v16377_v9 = vcombine.high %v11048_v55, %v11052_v11  ;;  %v11079_v55 = vld [vmem:[%s19262_s13 + $0x1d40] sm:$0xff]  ;;  %v11080_v11 = vld [vmem:[%s19262_s13 + $0x1d48] sm:$0xff] }
0x142b   : > { %10834 = vmatpush1.bf16.msra.mxu0 %v16343_v23  ;;  %10875 = vmatpush1.bf16.msra.mxu1 %v16345_v17  ;;  %v11055_v23 = vld [vmem:[%s19262_s13 + $0x1c80] sm:$0xff] }
0x142c   : > { %10835 = vmatprep.subr.bf16.mxu0 %v16352_v36  ;;  %10876 = vmatprep.subr.bf16.mxu1 %v16354_v12  ;;  %v11059_v17 = vld [vmem:[%s19262_s13 + $0x1ca0] sm:$0xff]  ;;  %v11056_v36 = vld [vmem:[%s19262_s13 + $0x1c88] sm:$0xff] }
0x142d   : > { %v16383_v12 = vcombine.high %v11055_v23, %v11059_v17  ;;  %v16382_v20 = vcombine.low %v11055_v23, %v11059_v17  ;;  %v16384_v51 = vcombine.low %v11056_v36, %v11060_v29  ;;  %v16385_v21 = vcombine.high %v11056_v36, %v11060_v29  ;;  %v11087_v23 = vld [vmem:[%s19262_s13 + $0x1d80] sm:$0xff] }
0x142e   : > { %v11091_v17 = vld [vmem:[%s19262_s13 + $0x1da0] sm:$0xff] }
0x142f   : > { %10836 = vmatpush1.bf16.msra.mxu0 %v16351_v15  ;;  %10877 = vmatpush1.bf16.msra.mxu1 %v16353_v52  ;;  %v11063_v15 = vld [vmem:[%s19262_s13 + $0x1cc0] sm:$0xff]  ;;  %v16415_v29 = vcombine.high %v11087_v23, %v11091_v17 }
0x1430   : > { %10837 = vmatprep.subr.bf16.mxu0 %v16360_v8  ;;  %10878 = vmatprep.subr.bf16.mxu1 %v16362_v37  ;;  %v11067_v52 = vld [vmem:[%s19262_s13 + $0x1ce0] sm:$0xff]  ;;  %v11064_v8 = vld [vmem:[%s19262_s13 + $0x1cc8] sm:$0xff] }
0x1431   : > { %v16391_v37 = vcombine.high %v11063_v15, %v11067_v52 }
0x1433   : > { %10838 = vmatpush1.bf16.msra.mxu0 %v16359_v30  ;;  %10879 = vmatpush1.bf16.msra.mxu1 %v16361_v53  ;;  %v11068_v30 = vld [vmem:[%s19262_s13 + $0x1ce8] sm:$0xff]  ;;  %v16390_v53 = vcombine.low %v11063_v15, %v11067_v52  ;;  %v11099_v52 = vld [vmem:[%s19262_s13 + $0x1de0] sm:$0xff] }
0x1434   : > { %10913 = vmatprep.subr.bf16.mxu0 %v21763_v41  ;;  %10954 = vmatprep.subr.bf16.mxu1 %v21766_v58  ;;  %v16392_v42 = vcombine.low %v11064_v8, %v11068_v30  ;;  %v16393_v63 = vcombine.high %v11064_v8, %v11068_v30  ;;  %v11096_v8 = vld [vmem:[%s19262_s13 + $0x1dc8] sm:$0xff]  ;;  %v21900_v30 = vld [vmem:[%s19262_s13 + $0x1c10] sm:$0xff] }
0x1436   : > { %10856 = vmatmul.mubr.bf16.vlgmr.msra.gmra.mrb[12].mxu0 %v21727_v1  ;;  %10897 = vmatmul.mubr.bf16.vlgmr.msra.gmra.mrb[12].mxu1 %v21727_v1 }
0x1437   : > { %10914 = vmatpush1.bf16.msra.mxu0 %v21771_v48  ;;  %10955 = vmatpush1.bf16.msra.mxu1 %v21774_v45 }
0x1438   : > { %10915 = vmatprep.subr.bf16.mxu0 %v21777_v49  ;;  %10956 = vmatprep.subr.bf16.mxu1 %v21780_v28 }
0x1439   : > { %10945 = vmatprep.mubr.bf16.mxu0 %v18868_v13  ;;  %10986 = vmatprep.mubr.bf16.mxu1 %v18868_v13 }
0x143b   : > { %10916 = vmatpush1.bf16.msra.mxu0 %v21785_v56  ;;  %10957 = vmatpush1.bf16.msra.mxu1 %v21788_v60 }
0x143c   : > { %10917 = vmatprep.subr.bf16.mxu0 %v21791_v19  ;;  %10958 = vmatprep.subr.bf16.mxu1 %v21794_v3 }
0x143f   : > { %10918 = vmatpush1.bf16.msra.mxu0 %v21797_v26  ;;  %10959 = vmatpush1.bf16.msra.mxu1 %v21800_v22 }
0x1440   : > { %10919 = vmatprep.subr.bf16.mxu0 %v21803_v44  ;;  %10960 = vmatprep.subr.bf16.mxu1 %v21806_v25 }
0x1443   : > { %10920 = vmatpush1.bf16.msra.mxu0 %v21809_v50  ;;  %10961 = vmatpush1.bf16.msra.mxu1 %v21812_v57 }
0x1444   : > { %10921 = vmatprep.subr.bf16.mxu0 %v21815_v59  ;;  %10962 = vmatprep.subr.bf16.mxu1 %v21818_v61 }
0x1447   : > { %10922 = vmatpush1.bf16.msra.mxu0 %v21821_v16  ;;  %10963 = vmatpush1.bf16.msra.mxu1 %v21824_v32 }
0x1448   : > { %10923 = vmatprep.subr.bf16.mxu0 %v21827_v46  ;;  %10964 = vmatprep.subr.bf16.mxu1 %v21830_v38 }
0x144b   : > { %10924 = vmatpush1.bf16.msra.mxu0 %v21833_v39  ;;  %10965 = vmatpush1.bf16.msra.mxu1 %v21836_v14 }
0x144c   : > { %10925 = vmatprep.subr.bf16.mxu0 %v21839_v0  ;;  %10966 = vmatprep.subr.bf16.mxu1 %v21842_v43 }
0x144f   : > { %10926 = vmatpush1.bf16.msra.mxu0 %v21845_v2  ;;  %10967 = vmatpush1.bf16.msra.mxu1 %v21848_v33 }
0x1450   : > { %10927 = vmatprep.subr.bf16.mxu0 %v21851_v34  ;;  %10968 = vmatprep.subr.bf16.mxu1 %v21854_v35 }
0x1453   : > { %10928 = vmatpush1.bf16.msra.mxu0 %v21857_v4  ;;  %10969 = vmatpush1.bf16.msra.mxu1 %v21860_v24 }
0x1454   : > { %11426 = vmatprep.subr.bf16.mxu0 %v16367_v27  ;;  %11467 = vmatprep.subr.bf16.mxu1 %v16369_v62  ;;  %v11075_v27 = vld [vmem:[%s19262_s13 + $0x1d20] sm:$0xff] }
0x1455   : > { %v16398_v62 = vcombine.low %v11071_v6, %v11075_v27 }
0x1456   : > { %10946 = vmatmul.mubr.bf16.vlgmr.msra.gmra.mrb[64].mxu0 %v21727_v1  ;;  %10987 = vmatmul.mubr.bf16.vlgmr.msra.gmra.mrb[64].mxu1 %v21727_v1  ;;  %v11047_v1 = vld [vmem:[%s19262_s13 + $0x1c40] sm:$0xff] }
0x1457   : > { %11458 = vmatprep.mubr.bf16.mxu0 %v18868_v13  ;;  %11499 = vmatprep.mubr.bf16.mxu1 %v18868_v13  ;;  %v16375_v10 = vcombine.high %v11047_v1, %v11051_v54  ;;  %v16374_v7 = vcombine.low %v11047_v1, %v11051_v54 }
0x1458   : > { %11427 = vmatpush1.bf16.msra.mxu0 %v16366_v31  ;;  %11468 = vmatpush1.bf16.msra.mxu1 %v16368_v18  ;;  %v16399_v31 = vcombine.high %v11071_v6, %v11075_v27  ;;  %v11076_v18 = vld [vmem:[%s19262_s13 + $0x1d28] sm:$0xff]  ;;  %v21911_v27 = vld [vmem:[%s19262_s13 + $0x1c38] sm:$0xff] }
0x1459   : > { %11428 = vmatprep.subr.bf16.mxu0 %v16375_v10  ;;  %11469 = vmatprep.subr.bf16.mxu1 %v16377_v9  ;;  %v16400_v1 = vcombine.low %v11072_v5, %v11076_v18  ;;  %v16401_v54 = vcombine.high %v11072_v5, %v11076_v18  ;;  %v11083_v10 = vld [vmem:[%s19262_s13 + $0x1d60] sm:$0xff]  ;;  %v11084_v9 = vld [vmem:[%s19262_s13 + $0x1d68] sm:$0xff] }
0x145a   : > { %v16408_v36 = vcombine.low %v11080_v11, %v11084_v9 }
0x145c   : > { %11429 = vmatpush1.bf16.msra.mxu0 %v16374_v7  ;;  %11470 = vmatpush1.bf16.msra.mxu1 %v16376_v47  ;;  %v16406_v7 = vcombine.low %v11079_v55, %v11083_v10  ;;  %v16407_v47 = vcombine.high %v11079_v55, %v11083_v10 }
0x145d   : > { %11430 = vmatprep.subr.bf16.mxu0 %v16383_v12  ;;  %11471 = vmatprep.subr.bf16.mxu1 %v16385_v21  ;;  %v16409_v12 = vcombine.high %v11080_v11, %v11084_v9  ;;  %v11095_v21 = vld [vmem:[%s19262_s13 + $0x1dc0] sm:$0xff] }
0x1460   : > { %11431 = vmatpush1.bf16.msra.mxu0 %v16382_v20  ;;  %11472 = vmatpush1.bf16.msra.mxu1 %v16384_v51  ;;  %v11088_v20 = vld [vmem:[%s19262_s13 + $0x1d88] sm:$0xff] }
0x1461   : > { %11432 = vmatprep.subr.bf16.mxu0 %v16391_v37  ;;  %11473 = vmatprep.subr.bf16.mxu1 %v16393_v63  ;;  %v11092_v51 = vld [vmem:[%s19262_s13 + $0x1da8] sm:$0xff]  ;;  %v16414_v63 = vcombine.low %v11087_v23, %v11091_v17 }
0x1462   : > { %v16417_v15 = vcombine.high %v11088_v20, %v11092_v51  ;;  %v11100_v37 = vld [vmem:[%s19262_s13 + $0x1de8] sm:$0xff]  ;;  %v16416_v5 = vcombine.low %v11088_v20, %v11092_v51 }
0x1464   : > { %11433 = vmatpush1.bf16.msra.mxu0 %v16390_v53  ;;  %11474 = vmatpush1.bf16.msra.mxu1 %v16392_v42  ;;  %v21903_v53 = vld [vmem:[%s19262_s13 + $0x1c30] sm:$0xff]  ;;  %v21906_v42 = vld [vmem:[%s19262_s13 + $0x1c18] sm:$0xff] }
0x1465   : > { %11434 = vmatprep.subr.bf16.mxu0 %v16399_v31  ;;  %11475 = vmatprep.subr.bf16.mxu1 %v16401_v54  ;;  %v16370_v6 = vcombine.low %v21900_v30, %v21903_v53  ;;  %v16423_v31 = vcombine.high %v11095_v21, %v11099_v52  ;;  %v16372_v18 = vcombine.low %v21906_v42, %v21911_v27 }
0x1466   : > { %v16424_v54 = vcombine.low %v11096_v8, %v11100_v37  ;;  %v16371_v55 = vcombine.high %v21900_v30, %v21903_v53  ;;  %v16373_v10 = vcombine.high %v21906_v42, %v21911_v27  ;;  %v11073_v27 = vld [vmem:[%s19262_s13 + $0x1d10] sm:$0xff] }
0x1468   : > { %11435 = vmatpush1.bf16.msra.mxu0 %v16398_v62  ;;  %11476 = vmatpush1.bf16.msra.mxu1 %v16400_v1  ;;  %v16425_v62 = vcombine.high %v11096_v8, %v11100_v37  ;;  %v16422_v1 = vcombine.low %v11095_v21, %v11099_v52 }
0x1469   : > { %11436 = vmatprep.subr.bf16.mxu0 %v16407_v47  ;;  %11477 = vmatprep.subr.bf16.mxu1 %v16409_v12 }
0x146c   : > { %11437 = vmatpush1.bf16.msra.mxu0 %v16406_v7  ;;  %11478 = vmatpush1.bf16.msra.mxu1 %v16408_v36 }
0x146d   : > { %11438 = vmatprep.subr.bf16.mxu0 %v16415_v29  ;;  %11479 = vmatprep.subr.bf16.mxu1 %v16417_v15  ;;  %v21920_v29 = vld [vmem:[%s19428_s24 + $0x60] sm:$0xff]  ;;  %v21924_v15 = vld [vmem:[%s19428_s24 + $0x68] sm:$0xff] }
0x1470   : > { %11439 = vmatpush1.bf16.msra.mxu0 %v16414_v63  ;;  %11480 = vmatpush1.bf16.msra.mxu1 %v16416_v5 }
0x1471   : > { %11440 = vmatprep.subr.bf16.mxu0 %v16423_v31  ;;  %11481 = vmatprep.subr.bf16.mxu1 %v16425_v62  ;;  %v21928_v31 = vld [vmem:[%s19428_s24 + $0x70] sm:$0xff] }
0x1474   : > { %11441 = vmatpush1.bf16.msra.mxu0 %v16422_v1  ;;  %11482 = vmatpush1.bf16.msra.mxu1 %v16424_v54  ;;  %v21932_v1 = vld [vmem:[%s19428_s24 + $0x78] sm:$0xff] }
0x1475   : > { %11508 = vmatprep.subr.bf16.mxu0 %v16371_v55  ;;  %11549 = vmatprep.subr.bf16.mxu1 %v16373_v10 }
0x1529   : > { %v10947_v11 = vpop.f32.mrb[64].mxu0  ;;  %v10988_v7 = vpop.f32.mrb[64].mxu1 }
0x152a   : > { %v10999_v47 = vrot.slane %v10947_v11, 4  ;;  %v10949_v9 = vpop.f32.mrb[65].mxu0  ;;  %v10990_v23 = vpop.f32.mrb[65].mxu1  ;;  %v11001_v63 = vrot.slane %v10988_v7, 4 }
0x152b   : > { %v11000_v17 = vrot.slane %v10949_v9, 4  ;;  %v10951_v36 = vpop.f32.mrb[66].mxu0  ;;  %v10992_v12 = vpop.f32.mrb[66].mxu1  ;;  %v11002_v5 = vrot.slane %v10990_v23, 4 }
0x152c   : > { %v11007_v20 = vadd.f32 %v21920_v29, %v10999_v47  ;;  %v10952_v51 = vpop.f32.mrb[67].mxu0  ;;  %v10993_v21 = vpop.f32.mrb[67].mxu1  ;;  %v11009_v62 = vadd.f32 %v21928_v31, %v11001_v63  ;;  %v11031_v36 = vrot.slane %v21720_v40, 6  ;;  %v11054_v40 = vld [vmem:[%s19262_s13 + $0x1c78] sm:$0xff] }
0x152d   : > { %v11008_v52 = vadd.f32 %v21924_v15, %v11000_v17  ;;  %v11010_v54 = vadd.f32 %v21932_v1, %v11002_v5  ;;  %v11049_v5 = vld [vmem:[%s19262_s13 + $0x1c50] sm:$0xff] }
0x152e   : > { %v16363_v8 = vmul.f32 -1.442695, %v11007_v20  ;;  %v16365_v55 = vmul.f32 -1.442695, %v11009_v62  ;;  %v11053_v62 = vld [vmem:[%s19262_s13 + $0x1c70] sm:$0xff] }
0x152f   : > { %v16364_v37 = vmul.f32 -1.442695, %v11008_v52 }
0x1530   : > { %17646 = vpow2.f32 %v16363_v8 }
0x1531   : > { %17648 = vpow2.f32 %v16364_v37 }
0x1532   : > { %17650 = vtanh.f32 %v11010_v54  ;;  %v11050_v54 = vld [vmem:[%s19262_s13 + $0x1c58] sm:$0xff] }
0x1533   : > { %17652 = vpow2.f32 %v16365_v55 }
0x153a   : > { %v17647_v10 = vpop.eup %17646 }
0x153b   : > { %v11020_v11 = vadd.f32 1.0, %v17647_v10  ;;  %v17649_v47 = vpop.eup %17648 }
0x153c   : > { %v11021_v9 = vadd.f32 1.0, %v17649_v47  ;;  %v17651_v7 = vpop.eup %17650  ;;  %v16381_v47 = vcombine.high %v11050_v54, %v11054_v40 }
0x153d   : > { %17654 = vrcp.f32 %v11020_v11  ;;  %v17653_v23 = vpop.eup %17652  ;;  %v16379_v11 = vcombine.high %v11049_v5, %v11053_v62 }
0x153e   : > { %17656 = vrcp.f32 %v11021_v9  ;;  %v11022_v51 = vadd.f32 1.0, %v17653_v23  ;;  %v11057_v9 = vld [vmem:[%s19262_s13 + $0x1c90] sm:$0xff]  ;;  %v11058_v23 = vld [vmem:[%s19262_s13 + $0x1c98] sm:$0xff] }
0x1540   : > { %17658 = vrcp.f32 %v11022_v51 }
0x1547   : > { %v17655_v17 = vpop.eup %17654 }
0x1548   : > { %v11034_v12 = vmul.f32 %v17655_v17, %v17651_v7  ;;  %v17657_v20 = vpop.eup %17656  ;;  %v11061_v7 = vld [vmem:[%s19262_s13 + $0x1cb0] sm:$0xff]  ;;  %v11062_v17 = vld [vmem:[%s19262_s13 + $0x1cb8] sm:$0xff] }
0x1549   : > { %v11033_v21 = vmul.f32 %v17657_v20, %v11031_v36  ;;  %v16378_v36 = vcombine.low %v11049_v5, %v11053_v62  ;;  %v16387_v20 = vcombine.high %v11057_v9, %v11061_v7  ;;  %v16389_v51 = vcombine.high %v11058_v23, %v11062_v17  ;;  %v11074_v5 = vld [vmem:[%s19262_s13 + $0x1d18] sm:$0xff] }
0x154a   : > { %v17659_v8 = vpop.eup %17658  ;;  %v16386_v30 = vcombine.low %v11057_v9, %v11061_v7  ;;  %v16388_v53 = vcombine.low %v11058_v23, %v11062_v17  ;;  %v11078_v62 = vld [vmem:[%s19262_s13 + $0x1d38] sm:$0xff]  ;;  %v11085_v9 = vld [vmem:[%s19262_s13 + $0x1d70] sm:$0xff] }
0x154b   : > { %v21936_v52 = vadd.f32 %v11034_v12, %v11033_v21  ;;  %v16380_v12 = vcombine.low %v11050_v54, %v11054_v40  ;;  %v11065_v21 = vld [vmem:[%s19262_s13 + $0x1cd0] sm:$0xff]  ;;  %v11082_v7 = vld [vmem:[%s19262_s13 + $0x1d58] sm:$0xff] }
0x154c   : > { %v11086_v23 = vld [vmem:[%s19262_s13 + $0x1d78] sm:$0xff] }
0x154d   : > { %17660 = vtanh.f32 %v21936_v52 }
0x1557   : > { %v17661_v37 = vpop.eup %17660 }
0x1558   : > { %v11037_v63 = vmul.f32 %v17661_v37, %v17659_v8  ;;  %v11069_v8 = vld [vmem:[%s19262_s13 + $0x1cf0] sm:$0xff]  ;;  %v11066_v37 = vld [vmem:[%s19262_s13 + $0x1cd8] sm:$0xff] }
0x1559   : > { %v16395_v42 = vcombine.high %v11065_v21, %v11069_v8  ;;  %v16394_v54 = vcombine.low %v11065_v21, %v11069_v8  ;;  %v11093_v21 = vld [vmem:[%s19262_s13 + $0x1db0] sm:$0xff]  ;;  %v11090_v8 = vld [vmem:[%s19262_s13 + $0x1d98] sm:$0xff] }
0x155a   : > { %v11038_v55 = vpack.c.bf16 %v11037_v63, %v11037_v63  ;;  %v11070_v63 = vld [vmem:[%s19262_s13 + $0x1cf8] sm:$0xff] }
0x155b   : > { %v16396_v40 = vcombine.low %v11066_v37, %v11070_v63 }
0x155c   : > { %v21943_v10 = vrot.slane %v11038_v55, 2 }
0x155e   : > { %11459 = vmatmul.mubr.bf16.vlgmr.msra.gmra.mrb[8].mxu0 %v21943_v10  ;;  %11500 = vmatmul.mubr.bf16.vlgmr.msra.gmra.mrb[8].mxu1 %v21943_v10 }
0x155f   : > { %11509 = vmatpush1.bf16.msra.mxu0 %v16370_v6  ;;  %11550 = vmatpush1.bf16.msra.mxu1 %v16372_v18  ;;  %v16397_v6 = vcombine.high %v11066_v37, %v11070_v63  ;;  %v11077_v18 = vld [vmem:[%s19262_s13 + $0x1d30] sm:$0xff]  ;;  %v11094_v37 = vld [vmem:[%s19262_s13 + $0x1db8] sm:$0xff] }
0x1560   : > { %11510 = vmatprep.subr.bf16.mxu0 %v16379_v11  ;;  %11551 = vmatprep.subr.bf16.mxu1 %v16381_v47  ;;  %v16403_v55 = vcombine.high %v11073_v27, %v11077_v18  ;;  %v16405_v11 = vcombine.high %v11074_v5, %v11078_v62  ;;  %v11081_v47 = vld [vmem:[%s19262_s13 + $0x1d50] sm:$0xff]  ;;  %v16402_v17 = vcombine.low %v11073_v27, %v11077_v18  ;;  %v11098_v18 = vld [vmem:[%s19262_s13 + $0x1dd8] sm:$0xff] }
0x1561   : > { %11540 = vmatprep.mubr.bf16.mxu0 %v18868_v13  ;;  %11581 = vmatprep.mubr.bf16.mxu1 %v18868_v13  ;;  %v16410_v63 = vcombine.low %v11081_v47, %v11085_v9  ;;  %v11101_v27 = vld [vmem:[%s19262_s13 + $0x1df0] sm:$0xff] }
0x1563   : > { %11511 = vmatpush1.bf16.msra.mxu0 %v16378_v36  ;;  %11552 = vmatpush1.bf16.msra.mxu1 %v16380_v12  ;;  %v16404_v36 = vcombine.low %v11074_v5, %v11078_v62  ;;  %v16411_v12 = vcombine.high %v11081_v47, %v11085_v9  ;;  %v11102_v5 = vld [vmem:[%s19262_s13 + $0x1df8] sm:$0xff]  ;;  %v11760_v9 = vld [vmem:[%s19262_s13 + $0x1f20] sm:$0xff] }
0x1564   : > { %11512 = vmatprep.subr.bf16.mxu0 %v16387_v20  ;;  %11553 = vmatprep.subr.bf16.mxu1 %v16389_v51  ;;  %v16413_v20 = vcombine.high %v11082_v7, %v11086_v23  ;;  %v11089_v51 = vld [vmem:[%s19262_s13 + $0x1d90] sm:$0xff]  ;;  %v16428_v47 = vcombine.low %v11098_v18, %v11102_v5 }
0x1565   : > { %v16418_v62 = vcombine.low %v11089_v51, %v11093_v21 }
0x1567   : > { %11513 = vmatpush1.bf16.msra.mxu0 %v16386_v30  ;;  %11554 = vmatpush1.bf16.msra.mxu1 %v16388_v53  ;;  %v16412_v30 = vcombine.low %v11082_v7, %v11086_v23  ;;  %v16419_v53 = vcombine.high %v11089_v51, %v11093_v21  ;;  %v11757_v7 = vld [vmem:[%s19262_s13 + $0x1f08] sm:$0xff]  ;;  %v11764_v51 = vld [vmem:[%s19262_s13 + $0x1f40] sm:$0xff] }
0x1568   : > { %11514 = vmatprep.subr.bf16.mxu0 %v16395_v42  ;;  %11555 = vmatprep.subr.bf16.mxu1 %v16397_v6  ;;  %v16421_v42 = vcombine.high %v11090_v8, %v11094_v37  ;;  %v11097_v6 = vld [vmem:[%s19262_s13 + $0x1dd0] sm:$0xff]  ;;  %v11768_v21 = vld [vmem:[%s19262_s13 + $0x1f60] sm:$0xff] }
0x156b   : > { %11515 = vmatpush1.bf16.msra.mxu0 %v16394_v54  ;;  %11556 = vmatpush1.bf16.msra.mxu1 %v16396_v40  ;;  %v16420_v54 = vcombine.low %v11090_v8, %v11094_v37  ;;  %v16427_v40 = vcombine.high %v11097_v6, %v11101_v27  ;;  %v11765_v8 = vld [vmem:[%s19262_s13 + $0x1f48] sm:$0xff]  ;;  %v16473_v37 = vcombine.low %v11764_v51, %v11768_v21 }
0x156c   : > { %11516 = vmatprep.subr.bf16.mxu0 %v16403_v55  ;;  %11557 = vmatprep.subr.bf16.mxu1 %v16405_v11  ;;  %v16429_v55 = vcombine.high %v11098_v18, %v11102_v5  ;;  %v16426_v11 = vcombine.low %v11097_v6, %v11101_v27  ;;  %v11773_v5 = vld [vmem:[%s19262_s13 + $0x1f88] sm:$0xff] }
0x156f   : > { %11517 = vmatpush1.bf16.msra.mxu0 %v16402_v17  ;;  %11558 = vmatpush1.bf16.msra.mxu1 %v16404_v36  ;;  %v11761_v17 = vld [vmem:[%s19262_s13 + $0x1f28] sm:$0xff] }
0x1570   : > { %11518 = vmatprep.subr.bf16.mxu0 %v16411_v12  ;;  %11559 = vmatprep.subr.bf16.mxu1 %v16413_v20  ;;  %v16467_v12 = vcombine.low %v11757_v7, %v11761_v17  ;;  %v16468_v20 = vcombine.high %v11757_v7, %v11761_v17 }
0x1573   : > { %11519 = vmatpush1.bf16.msra.mxu0 %v16410_v63  ;;  %11560 = vmatpush1.bf16.msra.mxu1 %v16412_v30  ;;  %v16474_v63 = vcombine.high %v11764_v51, %v11768_v21  ;;  %v11769_v30 = vld [vmem:[%s19262_s13 + $0x1f68] sm:$0xff] }
0x1574   : > { %11520 = vmatprep.subr.bf16.mxu0 %v16419_v53  ;;  %11561 = vmatprep.subr.bf16.mxu1 %v16421_v42  ;;  %v11772_v53 = vld [vmem:[%s19262_s13 + $0x1f80] sm:$0xff]  ;;  %v16475_v6 = vcombine.low %v11765_v8, %v11769_v30  ;;  %v16476_v27 = vcombine.high %v11765_v8, %v11769_v30  ;;  %v11734_v30 = vld [vmem:[%s19262_s13 + $0x1e50] sm:$0xff] }
0x1575   : > { %v11776_v42 = vld [vmem:[%s19262_s13 + $0x1fa0] sm:$0xff] }
0x1576   : > { %v16482_v18 = vcombine.high %v11772_v53, %v11776_v42 }
0x1577   : > { %11521 = vmatpush1.bf16.msra.mxu0 %v16418_v62  ;;  %11562 = vmatpush1.bf16.msra.mxu1 %v16420_v54  ;;  %v11777_v62 = vld [vmem:[%s19262_s13 + $0x1fa8] sm:$0xff]  ;;  %v11780_v54 = vld [vmem:[%s19262_s13 + $0x1fc0] sm:$0xff] }
0x1578   : > { %11522 = vmatprep.subr.bf16.mxu0 %v16427_v40  ;;  %11563 = vmatprep.subr.bf16.mxu1 %v16429_v55  ;;  %v16484_v40 = vcombine.high %v11773_v5, %v11777_v62  ;;  %v11784_v55 = vld [vmem:[%s19262_s13 + $0x1fe0] sm:$0xff] }
0x157b   : > { %11523 = vmatpush1.bf16.msra.mxu0 %v16426_v11  ;;  %11564 = vmatpush1.bf16.msra.mxu1 %v16428_v47  ;;  %v11781_v11 = vld [vmem:[%s19262_s13 + $0x1fc8] sm:$0xff] }
0x157c   : > { %11598 = vmatprep.subr.bf16.mxu0 %v21763_v41  ;;  %11639 = vmatprep.subr.bf16.mxu1 %v21766_v58  ;;  %v11724_v41 = vld [vmem:[%s19262_s13 + $0x1e00] sm:$0xff]  ;;  %v11785_v47 = vld [vmem:[%s19262_s13 + $0x1fe8] sm:$0xff] }
0x157d   : > { %v11728_v58 = vld [vmem:[%s19262_s13 + $0x1e20] sm:$0xff] }
0x157e   : > { %11541 = vmatmul.mubr.bf16.vlgmr.msra.gmra.mrb[12].mxu0 %v21943_v10  ;;  %11582 = vmatmul.mubr.bf16.vlgmr.msra.gmra.mrb[12].mxu1 %v21943_v10 }
0x157f   : > { %11599 = vmatpush1.bf16.msra.mxu0 %v21771_v48  ;;  %11640 = vmatpush1.bf16.msra.mxu1 %v21774_v45  ;;  %v11725_v48 = vld [vmem:[%s19262_s13 + $0x1e08] sm:$0xff]  ;;  %v16434_v45 = vcombine.high %v11724_v41, %v11728_v58 }
0x1580   : > { %11600 = vmatprep.subr.bf16.mxu0 %v21777_v49  ;;  %11641 = vmatprep.subr.bf16.mxu1 %v21780_v28  ;;  %v11729_v49 = vld [vmem:[%s19262_s13 + $0x1e28] sm:$0xff]  ;;  %v16433_v28 = vcombine.low %v11724_v41, %v11728_v58  ;;  %v22052_v41 = vld [vmem:[%s19262_s13 + $0x1e10] sm:$0xff] }
0x1581   : > { %11630 = vmatprep.mubr.bf16.mxu0 %v18868_v13  ;;  %11671 = vmatprep.mubr.bf16.mxu1 %v18868_v13  ;;  %v22055_v58 = vld [vmem:[%s19262_s13 + $0x1e30] sm:$0xff] }
0x1583   : > { %11601 = vmatpush1.bf16.msra.mxu0 %v21785_v56  ;;  %11642 = vmatpush1.bf16.msra.mxu1 %v21788_v60  ;;  %v16435_v56 = vcombine.low %v11725_v48, %v11729_v49  ;;  %v16436_v60 = vcombine.high %v11725_v48, %v11729_v49  ;;  %v22058_v48 = vld [vmem:[%s19262_s13 + $0x1e18] sm:$0xff]  ;;  %v16437_v49 = vcombine.low %v22052_v41, %v22055_v58 }
0x1584   : > { %11602 = vmatprep.subr.bf16.mxu0 %v21791_v19  ;;  %11643 = vmatprep.subr.bf16.mxu1 %v21794_v3  ;;  %v11732_v19 = vld [vmem:[%s19262_s13 + $0x1e40] sm:$0xff] }
0x1585   : > { %v11736_v3 = vld [vmem:[%s19262_s13 + $0x1e60] sm:$0xff] }
0x1587   : > { %11603 = vmatpush1.bf16.msra.mxu0 %v21797_v26  ;;  %11644 = vmatpush1.bf16.msra.mxu1 %v21800_v22  ;;  %v11733_v26 = vld [vmem:[%s19262_s13 + $0x1e48] sm:$0xff]  ;;  %v16442_v22 = vcombine.high %v11732_v19, %v11736_v3 }
0x1588   : > { %11604 = vmatprep.subr.bf16.mxu0 %v21803_v44  ;;  %11645 = vmatprep.subr.bf16.mxu1 %v21806_v25  ;;  %v11737_v44 = vld [vmem:[%s19262_s13 + $0x1e68] sm:$0xff]  ;;  %v16441_v25 = vcombine.low %v11732_v19, %v11736_v3  ;;  %v16492_v3 = vcombine.high %v11781_v11, %v11785_v47 }
0x158b   : > { %11605 = vmatpush1.bf16.msra.mxu0 %v21809_v50  ;;  %11646 = vmatpush1.bf16.msra.mxu1 %v21812_v57  ;;  %v16443_v50 = vcombine.low %v11733_v26, %v11737_v44  ;;  %v16444_v57 = vcombine.high %v11733_v26, %v11737_v44  ;;  %v16489_v26 = vcombine.low %v11780_v54, %v11784_v55 }
0x158c   : > { %11606 = vmatprep.subr.bf16.mxu0 %v21815_v59  ;;  %11647 = vmatprep.subr.bf16.mxu1 %v21818_v61  ;;  %v11740_v59 = vld [vmem:[%s19262_s13 + $0x1e80] sm:$0xff]  ;;  %v16438_v44 = vcombine.high %v22052_v41, %v22055_v58 }
0x158d   : > { %v11744_v61 = vld [vmem:[%s19262_s13 + $0x1ea0] sm:$0xff] }
0x158f   : > { %11607 = vmatpush1.bf16.msra.mxu0 %v21821_v16  ;;  %11648 = vmatpush1.bf16.msra.mxu1 %v21824_v32  ;;  %v11741_v16 = vld [vmem:[%s19262_s13 + $0x1e88] sm:$0xff]  ;;  %v16450_v32 = vcombine.high %v11740_v59, %v11744_v61 }
0x1590   : > { %11608 = vmatprep.subr.bf16.mxu0 %v21827_v46  ;;  %11649 = vmatprep.subr.bf16.mxu1 %v21830_v38  ;;  %v11745_v46 = vld [vmem:[%s19262_s13 + $0x1ea8] sm:$0xff]  ;;  %v16449_v38 = vcombine.low %v11740_v59, %v11744_v61 }
0x1593   : > { %11609 = vmatpush1.bf16.msra.mxu0 %v21833_v39  ;;  %11650 = vmatpush1.bf16.msra.mxu1 %v21836_v14  ;;  %v16451_v39 = vcombine.low %v11741_v16, %v11745_v46  ;;  %v16452_v14 = vcombine.high %v11741_v16, %v11745_v46 }
0x1594   : > { %11610 = vmatprep.subr.bf16.mxu0 %v21839_v0  ;;  %11651 = vmatprep.subr.bf16.mxu1 %v21842_v43  ;;  %v11748_v0 = vld [vmem:[%s19262_s13 + $0x1ec0] sm:$0xff] }
0x1595   : > { %v11752_v43 = vld [vmem:[%s19262_s13 + $0x1ee0] sm:$0xff] }
0x1597   : > { %11611 = vmatpush1.bf16.msra.mxu0 %v21845_v2  ;;  %11652 = vmatpush1.bf16.msra.mxu1 %v21848_v33  ;;  %v11749_v2 = vld [vmem:[%s19262_s13 + $0x1ec8] sm:$0xff]  ;;  %v16458_v33 = vcombine.high %v11748_v0, %v11752_v43 }
0x1598   : > { %11612 = vmatprep.subr.bf16.mxu0 %v21851_v34  ;;  %11653 = vmatprep.subr.bf16.mxu1 %v21854_v35  ;;  %v11753_v34 = vld [vmem:[%s19262_s13 + $0x1ee8] sm:$0xff]  ;;  %v16457_v35 = vcombine.low %v11748_v0, %v11752_v43 }
0x159b   : > { %11613 = vmatpush1.bf16.msra.mxu0 %v21857_v4  ;;  %11654 = vmatpush1.bf16.msra.mxu1 %v21860_v24  ;;  %v16459_v4 = vcombine.low %v11749_v2, %v11753_v34  ;;  %v16460_v24 = vcombine.high %v11749_v2, %v11753_v34 }
0x159c   : > { %12111 = vmatprep.subr.bf16.mxu0 %v16434_v45  ;;  %12152 = vmatprep.subr.bf16.mxu1 %v16436_v60  ;;  %v16481_v45 = vcombine.low %v11772_v53, %v11776_v42  ;;  %v16490_v60 = vcombine.high %v11780_v54, %v11784_v55  ;;  %v11738_v53 = vld [vmem:[%s19262_s13 + $0x1e70] sm:$0xff]  ;;  %v11735_v42 = vld [vmem:[%s19262_s13 + $0x1e58] sm:$0xff] }
0x159d   : > { %v11746_v54 = vld [vmem:[%s19262_s13 + $0x1eb0] sm:$0xff]  ;;  %v11747_v55 = vld [vmem:[%s19262_s13 + $0x1eb8] sm:$0xff] }
0x159e   : > { %11631 = vmatmul.mubr.bf16.vlgmr.msra.gmra.mrb[68].mxu0 %v21943_v10  ;;  %11672 = vmatmul.mubr.bf16.vlgmr.msra.gmra.mrb[68].mxu1 %v21943_v10  ;;  %v11756_v10 = vld [vmem:[%s19262_s13 + $0x1f00] sm:$0xff] }
0x159f   : > { %12143 = vmatprep.mubr.bf16.mxu0 %v18868_v13  ;;  %12184 = vmatprep.mubr.bf16.mxu1 %v18868_v13  ;;  %v16466_v23 = vcombine.high %v11756_v10, %v11760_v9  ;;  %v16465_v36 = vcombine.low %v11756_v10, %v11760_v9 }
0x15a0   : > { %12112 = vmatpush1.bf16.msra.mxu0 %v16433_v28  ;;  %12153 = vmatpush1.bf16.msra.mxu1 %v16435_v56  ;;  %v22063_v28 = vld [vmem:[%s19262_s13 + $0x1e38] sm:$0xff]  ;;  %v16483_v56 = vcombine.low %v11773_v5, %v11777_v62  ;;  %v11742_v62 = vld [vmem:[%s19262_s13 + $0x1e90] sm:$0xff] }
0x15a1   : > { %12113 = vmatprep.subr.bf16.mxu0 %v16442_v22  ;;  %12154 = vmatprep.subr.bf16.mxu1 %v16444_v57  ;;  %v16439_v19 = vcombine.low %v22058_v48, %v22063_v28  ;;  %v16491_v22 = vcombine.low %v11781_v11, %v11785_v47  ;;  %v16445_v11 = vcombine.low %v11734_v30, %v11738_v53 }
0x15a2   : > { %v16453_v41 = vcombine.low %v11742_v62, %v11746_v54 }
0x15a4   : > { %12114 = vmatpush1.bf16.msra.mxu0 %v16441_v25  ;;  %12155 = vmatpush1.bf16.msra.mxu1 %v16443_v50  ;;  %v16440_v25 = vcombine.high %v22058_v48, %v22063_v28  ;;  %v11758_v28 = vld [vmem:[%s19262_s13 + $0x1f10] sm:$0xff] }
0x15a5   : > { %12115 = vmatprep.subr.bf16.mxu0 %v16450_v32  ;;  %12156 = vmatprep.subr.bf16.mxu1 %v16452_v14 }
0x15a8   : > { %12116 = vmatpush1.bf16.msra.mxu0 %v16449_v38  ;;  %12157 = vmatpush1.bf16.msra.mxu1 %v16451_v39 }
0x15a9   : > { %12117 = vmatprep.subr.bf16.mxu0 %v16458_v33  ;;  %12158 = vmatprep.subr.bf16.mxu1 %v16460_v24 }
0x15ac   : > { %12118 = vmatpush1.bf16.msra.mxu0 %v16457_v35  ;;  %12159 = vmatpush1.bf16.msra.mxu1 %v16459_v4 }
0x15ad   : > { %12119 = vmatprep.subr.bf16.mxu0 %v16466_v23  ;;  %12160 = vmatprep.subr.bf16.mxu1 %v16468_v20 }
0x15b0   : > { %12120 = vmatpush1.bf16.msra.mxu0 %v16465_v36  ;;  %12161 = vmatpush1.bf16.msra.mxu1 %v16467_v12 }
0x15b1   : > { %12121 = vmatprep.subr.bf16.mxu0 %v16474_v63  ;;  %12162 = vmatprep.subr.bf16.mxu1 %v16476_v27 }
0x15b4   : > { %12122 = vmatpush1.bf16.msra.mxu0 %v16473_v37  ;;  %12163 = vmatpush1.bf16.msra.mxu1 %v16475_v6  ;;  %v11739_v6 = vld [vmem:[%s19262_s13 + $0x1e78] sm:$0xff] }
0x15b5   : > { %12123 = vmatprep.subr.bf16.mxu0 %v16482_v18  ;;  %12164 = vmatprep.subr.bf16.mxu1 %v16484_v40  ;;  %v16446_v18 = vcombine.high %v11734_v30, %v11738_v53  ;;  %v16448_v5 = vcombine.high %v11735_v42, %v11739_v6  ;;  %v11743_v40 = vld [vmem:[%s19262_s13 + $0x1e98] sm:$0xff]  ;;  %v16447_v47 = vcombine.low %v11735_v42, %v11739_v6 }
0x15b6   : > { %v16455_v58 = vcombine.low %v11743_v40, %v11747_v55 }
0x15b8   : > { %12124 = vmatpush1.bf16.msra.mxu0 %v16481_v45  ;;  %12165 = vmatpush1.bf16.msra.mxu1 %v16483_v56  ;;  %v16454_v45 = vcombine.high %v11742_v62, %v11746_v54  ;;  %v16456_v56 = vcombine.high %v11743_v40, %v11747_v55 }
0x15b9   : > { %12125 = vmatprep.subr.bf16.mxu0 %v16490_v60  ;;  %12166 = vmatprep.subr.bf16.mxu1 %v16492_v3  ;;  %v11750_v60 = vld [vmem:[%s19262_s13 + $0x1ed0] sm:$0xff] }
0x15ba   : > { %v11754_v3 = vld [vmem:[%s19262_s13 + $0x1ef0] sm:$0xff] }
0x15bb   : > { %v16462_v48 = vcombine.high %v11750_v60, %v11754_v3 }
0x15bc   : > { %12126 = vmatpush1.bf16.msra.mxu0 %v16489_v26  ;;  %12167 = vmatpush1.bf16.msra.mxu1 %v16491_v22  ;;  %v11751_v26 = vld [vmem:[%s19262_s13 + $0x1ed8] sm:$0xff] }
0x15bd   : > { %12193 = vmatprep.subr.bf16.mxu0 %v16438_v44  ;;  %12234 = vmatprep.subr.bf16.mxu1 %v16440_v25  ;;  %v11755_v22 = vld [vmem:[%s19262_s13 + $0x1ef8] sm:$0xff] }
0x15be   : > { %v11759_v44 = vld [vmem:[%s19262_s13 + $0x1f18] sm:$0xff] }
0x15bf   : > { %v11763_v25 = vld [vmem:[%s19262_s13 + $0x1f38] sm:$0xff] }
0x1671   : > { %v11632_v50 = vpop.f32.mrb[68].mxu0  ;;  %v11673_v57 = vpop.f32.mrb[68].mxu1 }
0x1672   : > { %v11684_v59 = vrot.slane %v11632_v50, 2  ;;  %v11634_v61 = vpop.f32.mrb[69].mxu0  ;;  %v11675_v16 = vpop.f32.mrb[69].mxu1  ;;  %v11686_v34 = vrot.slane %v11673_v57, 2  ;;  %v16461_v50 = vcombine.low %v11750_v60, %v11754_v3 }
0x1673   : > { %v11685_v32 = vrot.slane %v11634_v61, 2  ;;  %v11636_v46 = vpop.f32.mrb[70].mxu0  ;;  %v11677_v38 = vpop.f32.mrb[70].mxu1  ;;  %v11687_v35 = vrot.slane %v11675_v16, 2  ;;  %v11766_v61 = vld [vmem:[%s19262_s13 + $0x1f50] sm:$0xff] }
0x1674   : > { %v11692_v39 = vadd.f32 %v21920_v29, %v11684_v59  ;;  %v11637_v14 = vpop.f32.mrb[71].mxu0  ;;  %v11678_v0 = vpop.f32.mrb[71].mxu1  ;;  %v11694_v4 = vadd.f32 %v21928_v31, %v11686_v34  ;;  %v11716_v31 = vrot.slane %v21936_v52, 6  ;;  %v16472_v59 = vcombine.high %v11759_v44, %v11763_v25  ;;  %v11770_v16 = vld [vmem:[%s19262_s13 + $0x1f70] sm:$0xff]  ;;  %v11771_v46 = vld [vmem:[%s19262_s13 + $0x1f78] sm:$0xff] }
0x1675   : > { %v11693_v43 = vadd.f32 %v21924_v15, %v11685_v32  ;;  %v11695_v24 = vadd.f32 %v21932_v1, %v11687_v35  ;;  %v11767_v32 = vld [vmem:[%s19262_s13 + $0x1f58] sm:$0xff]  ;;  %v16478_v14 = vcombine.high %v11766_v61, %v11770_v16  ;;  %v16477_v35 = vcombine.low %v11766_v61, %v11770_v16  ;;  %v17923_v16 = vld [vmem:[#allocation15 + $0x8] ss:$16 sps:$4 sm:$0xff] (!%p16497_p3)  }
0x1676   : > { %v16430_v2 = vmul.f32 -1.442695, %v11692_v39  ;;  %v16432_v10 = vmul.f32 -1.442695, %v11694_v4  ;;  %v16471_v39 = vcombine.low %v11759_v44, %v11763_v25  ;;  %v16480_v0 = vcombine.high %v11767_v32, %v11771_v46  ;;  %v11779_v34 = vld [vmem:[%s19262_s13 + $0x1fb8] sm:$0xff]  ;;  %v12286_v25 = vld [vmem:[#allocation5 + $0x8] sm:$0xff] }
0x1677   : > { %v16431_v33 = vmul.f32 -1.442695, %v11693_v43  ;;  %v11774_v43 = vld [vmem:[%s19262_s13 + $0x1f90] sm:$0xff]  ;;  %v16479_v4 = vcombine.low %v11767_v32, %v11771_v46  ;;  %v17922_v61 = vld [vmem:[#allocation15] ss:$16 sps:$4 sm:$0xff] (!%p16497_p3)  }
0x1678   : > { %17662 = vpow2.f32 %v16430_v2  ;;  %v11778_v2 = vld [vmem:[%s19262_s13 + $0x1fb0] sm:$0xff]  ;;  %v17924_v32 = vld [vmem:[#allocation15 + $0x24] ss:$16 sps:$4 sm:$0xff] (!%p16497_p3)  }
0x1679   : > { %17664 = vpow2.f32 %v16431_v33  ;;  %v11775_v33 = vld [vmem:[%s19262_s13 + $0x1f98] sm:$0xff]  ;;  %v17926_v46 = vld [vmem:[#allocation15 + $0x2c] ss:$16 sps:$4 sm:$0xff] (!%p16497_p3)  }
0x167a   : > { %17666 = vtanh.f32 %v11695_v24  ;;  %v16486_v24 = vcombine.high %v11774_v43, %v11778_v2 }
0x167b   : > { %17668 = vpow2.f32 %v16432_v10  ;;  %v16488_v10 = vcombine.high %v11775_v33, %v11779_v34 }
0x1682   : > { %v17663_v9 = vpop.eup %17662 }
0x1683   : > { %v11705_v7 = vadd.f32 1.0, %v17663_v9  ;;  %v17665_v23 = vpop.eup %17664  ;;  %v11782_v9 = vld [vmem:[%s19262_s13 + $0x1fd0] sm:$0xff] }
0x1684   : > { %v11706_v29 = vadd.f32 1.0, %v17665_v23  ;;  %v17667_v15 = vpop.eup %17666  ;;  %v11783_v23 = vld [vmem:[%s19262_s13 + $0x1fd8] sm:$0xff] }
0x1685   : > { %17670 = vrcp.f32 %v11705_v7  ;;  %v17669_v17 = vpop.eup %17668  ;;  %v11786_v7 = vld [vmem:[%s19262_s13 + $0x1ff0] sm:$0xff] }
0x1686   : > { %17672 = vrcp.f32 %v11706_v29  ;;  %v11707_v20 = vadd.f32 1.0, %v17669_v17  ;;  %v11787_v29 = vld [vmem:[%s19262_s13 + $0x1ff8] sm:$0xff]  ;;  %v16487_v17 = vcombine.low %v11775_v33, %v11779_v34  ;;  %v17938_v34 = vld [vmem:[#allocation15 + $0x6c] ss:$16 sps:$4 sm:$0xff] (!%p16497_p3)  }
0x1687   : > { %v17936_v33 = vld [vmem:[#allocation15 + $0x64] ss:$16 sps:$4 sm:$0xff] (!%p16497_p3)  }
0x1688   : > { %17674 = vrcp.f32 %v11707_v20  ;;  %v18869_v20 = vmov 1983009808  }
0x168f   : > { %v17671_v36 = vpop.eup %17670 }
0x1690   : > { %v11719_v12 = vmul.f32 %v17671_v36, %v17667_v15  ;;  %v17673_v1 = vpop.eup %17672  ;;  %v16485_v15 = vcombine.low %v11774_v43, %v11778_v2  ;;  %v16494_v36 = vcombine.high %v11782_v9, %v11786_v7  ;;  %v17934_v43 = vld [vmem:[#allocation15 + $0x40] ss:$16 sps:$4 sm:$0xff] (!%p16497_p3)   ;;  %v17935_v2 = vld [vmem:[#allocation15 + $0x48] ss:$16 sps:$4 sm:$0xff] (!%p16497_p3)  }
0x1691   : > { %v11718_v51 = vmul.f32 %v17673_v1, %v11716_v31  ;;  %v16496_v31 = vcombine.high %v11783_v23, %v11787_v29  ;;  %v16495_v1 = vcombine.low %v11783_v23, %v11787_v29  ;;  %v17948_v23 = vld [vmem:[#allocation15 + $0xa4] ss:$16 sps:$4 sm:$0xff] (!%p16497_p3)   ;;  %v17950_v29 = vld [vmem:[#allocation15 + $0xac] ss:$16 sps:$4 sm:$0xff] (!%p16497_p3)  }
0x1692   : > { %v17675_v8 = vpop.eup %17674 }
0x1693   : > { %v11720_v21 = vadd.f32 %v11719_v12, %v11718_v51  ;;  %v16493_v12 = vcombine.low %v11782_v9, %v11786_v7  ;;  %v12298_v51 = vunpack.c.l.s4 %v18869_v20  ;;  %v17946_v9 = vld [vmem:[#allocation15 + $0x80] ss:$16 sps:$4 sm:$0xff] (!%p16497_p3)   ;;  %v17947_v7 = vld [vmem:[#allocation15 + $0x88] ss:$16 sps:$4 sm:$0xff] (!%p16497_p3)   ;;  %v17960_v20 = vld [vmem:[#allocation15 + $0xe4] ss:$16 sps:$4 sm:$0xff] (!%p16497_p3)  }
0x1695   : > { %17676 = vtanh.f32 %v11720_v21  ;;  %12284 = vst [vmem:[#allocation4 - $0x6] sm:$0xc0] %v11720_v21  ;;  %v12300_v21 = vlaneseq }
0x169f   : > { %v17677_v37 = vpop.eup %17676 }
0x16a0   : > { %v11722_v63 = vmul.f32 %v17677_v37, %v17675_v8  ;;  %v12299_v8 = vunpack.c.0.s8 %v12298_v51  ;;  %v22118_v37 = vshrl.u32 %v12300_v21, 7  ;;  %v17962_v51 = vld [vmem:[#allocation15 + $0xec] ss:$16 sps:$4 sm:$0xff] (!%p16497_p3)   ;;  %v17964_v21 = vld [vmem:[#allocation15 + $0xe0] ss:$16 sps:$4 sm:$0xff] (!%p16497_p3)  }
0x16a2   : > { %v11723_v52 = vpack.c.bf16 %v11722_v63, %v11722_v63  ;;  %12283 = vst [vmem:[#allocation3 - $0x6] sm:$0xc0] %v11722_v63  ;;  %v22121_v53 = vsub.s32 %v12299_v8, %v22118_v37  ;;  %v17965_v8 = vld [vmem:[#allocation15 + $0xe8] ss:$16 sps:$4 sm:$0xff] (!%p16497_p3)  }
0x16a4   : > { %v22080_v27 = vrot.slane %v11723_v52, 3 }
0x16a6   : > { %12144 = vmatmul.mubr.bf16.vlgmr.msra.gmra.mrb[8].mxu0 %v22080_v27  ;;  %12185 = vmatmul.mubr.bf16.vlgmr.msra.gmra.mrb[8].mxu1 %v22080_v27 }
0x16a7   : > { %12194 = vmatpush1.bf16.msra.mxu0 %v16437_v49  ;;  %12235 = vmatpush1.bf16.msra.mxu1 %v16439_v19  ;;  %v16464_v49 = vcombine.high %v11751_v26, %v11755_v22  ;;  %v11762_v19 = vld [vmem:[%s19262_s13 + $0x1f30] sm:$0xff] }
0x16a8   : > { %12195 = vmatprep.subr.bf16.mxu0 %v16446_v18  ;;  %12236 = vmatprep.subr.bf16.mxu1 %v16448_v5  ;;  %v16470_v57 = vcombine.high %v11758_v28, %v11762_v19  ;;  %v16469_v38 = vcombine.low %v11758_v28, %v11762_v19 }
0x16a9   : > { %12225 = vmatprep.mubr.bf16.mxu0 %v18868_v13  ;;  %12266 = vmatprep.mubr.bf16.mxu1 %v18868_v13  ;;  %v16463_v13 = vcombine.low %v11751_v26, %v11755_v22 }
0x16ab   : > { %12196 = vmatpush1.bf16.msra.mxu0 %v16445_v11  ;;  %12237 = vmatpush1.bf16.msra.mxu1 %v16447_v47  ;;  %v12285_v11 = vld [vmem:[#allocation5] sm:$0xff] }
0x16ac   : > { %12197 = vmatprep.subr.bf16.mxu0 %v16454_v45  ;;  %12238 = vmatprep.subr.bf16.mxu1 %v16456_v56 }
0x16af   : > { %12198 = vmatpush1.bf16.msra.mxu0 %v16453_v41  ;;  %12239 = vmatpush1.bf16.msra.mxu1 %v16455_v58 }
0x16b0   : > { %12199 = vmatprep.subr.bf16.mxu0 %v16462_v48  ;;  %12240 = vmatprep.subr.bf16.mxu1 %v16464_v49 }
0x16b3   : > { %12200 = vmatpush1.bf16.msra.mxu0 %v16461_v50  ;;  %12241 = vmatpush1.bf16.msra.mxu1 %v16463_v13 }
0x16b4   : > { %12201 = vmatprep.subr.bf16.mxu0 %v16470_v57  ;;  %12242 = vmatprep.subr.bf16.mxu1 %v16472_v59  ;;  %v17918_v57 = vld [vmem:[#allocation15 + $0x4] ss:$16 sps:$4 sm:$0xff] (!%p16497_p3)   ;;  %v17920_v59 = vld [vmem:[#allocation15 + $0xc] ss:$16 sps:$4 sm:$0xff] (!%p16497_p3)  }
0x16b7   : > { %12202 = vmatpush1.bf16.msra.mxu0 %v16469_v38  ;;  %12243 = vmatpush1.bf16.msra.mxu1 %v16471_v39  ;;  %v17928_v38 = vld [vmem:[#allocation15 + $0x20] ss:$16 sps:$4 sm:$0xff] (!%p16497_p3)   ;;  %v17929_v39 = vld [vmem:[#allocation15 + $0x28] ss:$16 sps:$4 sm:$0xff] (!%p16497_p3)  }
0x16b8   : > { %12203 = vmatprep.subr.bf16.mxu0 %v16478_v14  ;;  %12244 = vmatprep.subr.bf16.mxu1 %v16480_v0  ;;  %v17930_v14 = vld [vmem:[#allocation15 + $0x44] ss:$16 sps:$4 sm:$0xff] (!%p16497_p3)   ;;  %v17932_v0 = vld [vmem:[#allocation15 + $0x4c] ss:$16 sps:$4 sm:$0xff] (!%p16497_p3)  }
0x16bb   : > { %12204 = vmatpush1.bf16.msra.mxu0 %v16477_v35  ;;  %12245 = vmatpush1.bf16.msra.mxu1 %v16479_v4  ;;  %v17940_v35 = vld [vmem:[#allocation15 + $0x60] ss:$16 sps:$4 sm:$0xff] (!%p16497_p3)   ;;  %v17941_v4 = vld [vmem:[#allocation15 + $0x68] ss:$16 sps:$4 sm:$0xff] (!%p16497_p3)  }
0x16bc   : > { %12205 = vmatprep.subr.bf16.mxu0 %v16486_v24  ;;  %12246 = vmatprep.subr.bf16.mxu1 %v16488_v10  ;;  %v17942_v24 = vld [vmem:[#allocation15 + $0x84] ss:$16 sps:$4 sm:$0xff] (!%p16497_p3)   ;;  %v17944_v10 = vld [vmem:[#allocation15 + $0x8c] ss:$16 sps:$4 sm:$0xff] (!%p16497_p3)  }
0x16bf   : > { %12206 = vmatpush1.bf16.msra.mxu0 %v16485_v15  ;;  %12247 = vmatpush1.bf16.msra.mxu1 %v16487_v17  ;;  %v17952_v15 = vld [vmem:[#allocation15 + $0xa0] ss:$16 sps:$4 sm:$0xff] (!%p16497_p3)   ;;  %v17953_v17 = vld [vmem:[#allocation15 + $0xa8] ss:$16 sps:$4 sm:$0xff] (!%p16497_p3)  }
0x16c0   : > { %12207 = vmatprep.subr.bf16.mxu0 %v16494_v36  ;;  %12248 = vmatprep.subr.bf16.mxu1 %v16496_v31  ;;  %v17954_v36 = vld [vmem:[#allocation15 + $0xc4] ss:$16 sps:$4 sm:$0xff] (!%p16497_p3)   ;;  %v17956_v31 = vld [vmem:[#allocation15 + $0xcc] ss:$16 sps:$4 sm:$0xff] (!%p16497_p3)  }
0x16c3   : > { %12208 = vmatpush1.bf16.msra.mxu0 %v16493_v12  ;;  %12249 = vmatpush1.bf16.msra.mxu1 %v16495_v1  ;;  %v17958_v12 = vld [vmem:[#allocation15 + $0xc0] ss:$16 sps:$4 sm:$0xff] (!%p16497_p3)   ;;  %v17959_v1 = vld [vmem:[#allocation15 + $0xc8] ss:$16 sps:$4 sm:$0xff] (!%p16497_p3)  }
0x16c4   : > { %14035 = vmatprep.subr.bf16.mxu0 (!%p16497_p3), %v17918_v57  ;;  %14199 = vmatprep.subr.bf16.mxu1 (!%p16497_p3), %v17920_v59  ;;  %v17995_v57 = vld [vmem:[#allocation15 + $0x188] ss:$16 sps:$4 sm:$0xff] (!%p16497_p3)  }
0x16c6   : > { %12226 = vmatmul.mubr.bf16.vlgmr.msra.gmra.mrb[12].mxu0 %v22080_v27  ;;  %12267 = vmatmul.mubr.bf16.vlgmr.msra.gmra.mrb[12].mxu1 %v22080_v27 }
0x16c7   : > { %14036 = vmatpush1.bf16.msra.mxu0 (!%p16497_p3), %v17922_v61  ;;  %14200 = vmatpush1.bf16.msra.mxu1 (!%p16497_p3), %v17923_v16  ;;  %v17996_v61 = vld [vmem:[#allocation15 + $0x1a4] ss:$16 sps:$4 sm:$0xff] (!%p16497_p3)   ;;  %v17998_v16 = vld [vmem:[#allocation15 + $0x1ac] ss:$16 sps:$4 sm:$0xff] (!%p16497_p3)  }
0x16c8   : > { %14037 = vmatprep.subr.bf16.mxu0 (!%p16497_p3), %v17924_v32  ;;  %14201 = vmatprep.subr.bf16.mxu1 (!%p16497_p3), %v17926_v46 }
0x16cb   : > { %14038 = vmatpush1.bf16.msra.mxu0 (!%p16497_p3), %v17928_v38  ;;  %14202 = vmatpush1.bf16.msra.mxu1 (!%p16497_p3), %v17929_v39  ;;  %v18000_v39 = vld [vmem:[#allocation15 + $0x1a0] ss:$16 sps:$4 sm:$0xff] (!%p16497_p3)  }
0x16cc   : > { %14039 = vmatprep.subr.bf16.mxu0 (!%p16497_p3), %v17930_v14  ;;  %14203 = vmatprep.subr.bf16.mxu1 (!%p16497_p3), %v17932_v0  ;;  %v18001_v14 = vld [vmem:[#allocation15 + $0x1a8] ss:$16 sps:$4 sm:$0xff] (!%p16497_p3)   ;;  %v18002_v0 = vld [vmem:[#allocation15 + $0x1c4] ss:$16 sps:$4 sm:$0xff] (!%p16497_p3)  }
0x16cf   : > { %14040 = vmatpush1.bf16.msra.mxu0 (!%p16497_p3), %v17934_v43  ;;  %14204 = vmatpush1.bf16.msra.mxu1 (!%p16497_p3), %v17935_v2  ;;  %v18004_v43 = vld [vmem:[#allocation15 + $0x1cc] ss:$16 sps:$4 sm:$0xff] (!%p16497_p3)  }
0x16d0   : > { %14041 = vmatprep.subr.bf16.mxu0 (!%p16497_p3), %v17936_v33  ;;  %14205 = vmatprep.subr.bf16.mxu1 (!%p16497_p3), %v17938_v34  ;;  %v18006_v34 = vld [vmem:[#allocation15 + $0x1c0] ss:$16 sps:$4 sm:$0xff] (!%p16497_p3)  }
0x16d3   : > { %14042 = vmatpush1.bf16.msra.mxu0 (!%p16497_p3), %v17940_v35  ;;  %14206 = vmatpush1.bf16.msra.mxu1 (!%p16497_p3), %v17941_v4  ;;  %v18007_v35 = vld [vmem:[#allocation15 + $0x1c8] ss:$16 sps:$4 sm:$0xff] (!%p16497_p3)   ;;  %v18008_v4 = vld [vmem:[#allocation15 + $0x1e4] ss:$16 sps:$4 sm:$0xff] (!%p16497_p3)  }
0x16d4   : > { %14043 = vmatprep.subr.bf16.mxu0 (!%p16497_p3), %v17942_v24  ;;  %14207 = vmatprep.subr.bf16.mxu1 (!%p16497_p3), %v17944_v10  ;;  %v18010_v24 = vld [vmem:[#allocation15 + $0x1ec] ss:$16 sps:$4 sm:$0xff] (!%p16497_p3)   ;;  %v18012_v10 = vld [vmem:[#allocation15 + $0x1e0] ss:$16 sps:$4 sm:$0xff] (!%p16497_p3)  }
0x16d7   : > { %14044 = vmatpush1.bf16.msra.mxu0 (!%p16497_p3), %v17946_v9  ;;  %14208 = vmatpush1.bf16.msra.mxu1 (!%p16497_p3), %v17947_v7  ;;  %v18013_v9 = vld [vmem:[#allocation15 + $0x1e8] ss:$16 sps:$4 sm:$0xff] (!%p16497_p3)   ;;  %v18016_v7 = vld [vmem:[#allocation15 + $0x204] ss:$16 sps:$4 sm:$0xff] (!%p16497_p3)  }
0x16d8   : > { %14045 = vmatprep.subr.bf16.mxu0 (!%p16497_p3), %v17948_v23  ;;  %14209 = vmatprep.subr.bf16.mxu1 (!%p16497_p3), %v17950_v29  ;;  %v18019_v23 = vld [vmem:[#allocation15 + $0x20c] ss:$16 sps:$4 sm:$0xff] (!%p16497_p3)  }
0x16db   : > { %14046 = vmatpush1.bf16.msra.mxu0 (!%p16497_p3), %v17952_v15  ;;  %14210 = vmatpush1.bf16.msra.mxu1 (!%p16497_p3), %v17953_v17 }
0x16dc   : > { %14047 = vmatprep.subr.bf16.mxu0 (!%p16497_p3), %v17954_v36  ;;  %14211 = vmatprep.subr.bf16.mxu1 (!%p16497_p3), %v17956_v31 }
0x16df   : > { %14048 = vmatpush1.bf16.msra.mxu0 (!%p16497_p3), %v17958_v12  ;;  %14212 = vmatpush1.bf16.msra.mxu1 (!%p16497_p3), %v17959_v1 }
0x16e0   : > { %14049 = vmatprep.subr.bf16.mxu0 (!%p16497_p3), %v17960_v20  ;;  %14213 = vmatprep.subr.bf16.mxu1 (!%p16497_p3), %v17962_v51  ;;  %v18014_v20 = vld [vmem:[#allocation15 + $0x200] ss:$16 sps:$4 sm:$0xff] (!%p16497_p3)  }
0x16e3   : > { %14050 = vmatpush1.bf16.msra.mxu0 (!%p16497_p3), %v17964_v21  ;;  %14214 = vmatpush1.bf16.msra.mxu1 (!%p16497_p3), %v17965_v8  ;;  %v18017_v8 = vld [vmem:[#allocation15 + $0x208] ss:$16 sps:$4 sm:$0xff] (!%p16497_p3)  }
0x1779   : > { %v12145_v63 = vpop.f32.mrb[8].mxu0  ;;  %v12186_v30 = vpop.f32.mrb[8].mxu1 }
0x177a   : > { %v12147_v42 = vpop.f32.mrb[9].mxu0  ;;  %v12188_v6 = vpop.f32.mrb[9].mxu1 }
0x177b   : > { %v12295_v52 = vcombine.low %v12145_v63, %v12147_v42  ;;  %v12296_v18 = vcombine.low %v12186_v30, %v12188_v6  ;;  %v12149_v5 = vpop.f32.mrb[10].mxu0  ;;  %v12190_v62 = vpop.f32.mrb[10].mxu1  ;;  %v17966_v63 = vld [vmem:[#allocation15 + $0x104] ss:$16 sps:$4 sm:$0xff] (!%p16497_p3)   ;;  %v17968_v30 = vld [vmem:[#allocation15 + $0x10c] ss:$16 sps:$4 sm:$0xff] (!%p16497_p3)  }
0x177c   : > { %v12150_v54 = vpop.f32.mrb[11].mxu0  ;;  %v12191_v40 = vpop.f32.mrb[11].mxu1  ;;  %v17970_v42 = vld [vmem:[#allocation15 + $0x100] ss:$16 sps:$4 sm:$0xff] (!%p16497_p3)   ;;  %v17971_v6 = vld [vmem:[#allocation15 + $0x108] ss:$16 sps:$4 sm:$0xff] (!%p16497_p3)   ;;  %14051 = vmatprep.subr.bf16.mxu0 (!%p16497_p3), %v17966_v63  ;;  %14215 = vmatprep.subr.bf16.mxu1 (!%p16497_p3), %v17968_v30 }
0x177d   : > { %v12303_v27 = vrot.slane %v12295_v52, %v22121_v53  ;;  %v12310_v55 = vrot.slane %v12296_v18, %v22121_v53  ;;  %v17972_v52 = vld [vmem:[#allocation15 + $0x124] ss:$16 sps:$4 sm:$0xff] (!%p16497_p3)   ;;  %v17974_v18 = vld [vmem:[#allocation15 + $0x12c] ss:$16 sps:$4 sm:$0xff] (!%p16497_p3)   ;;  %v17976_v5 = vld [vmem:[#allocation15 + $0x120] ss:$16 sps:$4 sm:$0xff] (!%p16497_p3)   ;;  %14052 = vmatpush1.bf16.msra.mxu0 (!%p16497_p3), %v17970_v42  ;;  %14216 = vmatpush1.bf16.msra.mxu1 (!%p16497_p3), %v17971_v6 }
0x177e   : > { %v17977_v62 = vld [vmem:[#allocation15 + $0x128] ss:$16 sps:$4 sm:$0xff] (!%p16497_p3)   ;;  %v17978_v54 = vld [vmem:[#allocation15 + $0x144] ss:$16 sps:$4 sm:$0xff] (!%p16497_p3)   ;;  %14053 = vmatprep.subr.bf16.mxu0 (!%p16497_p3), %v17972_v52  ;;  %14217 = vmatprep.subr.bf16.mxu1 (!%p16497_p3), %v17974_v18  ;;  %v17980_v40 = vld [vmem:[#allocation15 + $0x14c] ss:$16 sps:$4 sm:$0xff] (!%p16497_p3)  }
0x177f   : > { %v12311_v47 = vcombine.low %v12303_v27, %v12310_v55  ;;  %v17982_v27 = vld [vmem:[#allocation15 + $0x140] ss:$16 sps:$4 sm:$0xff] (!%p16497_p3)   ;;  %v17983_v55 = vld [vmem:[#allocation15 + $0x148] ss:$16 sps:$4 sm:$0xff] (!%p16497_p3)   ;;  %v18022_v63 = vld [vmem:[#allocation15 + $0x224] ss:$16 sps:$4 sm:$0xff] (!%p16497_p3)  }
0x1780   : > { %v18025_v42 = vld [vmem:[#allocation15 + $0x22c] ss:$16 sps:$4 sm:$0xff] (!%p16497_p3)   ;;  %v18020_v52 = vld [vmem:[#allocation15 + $0x220] ss:$16 sps:$4 sm:$0xff] (!%p16497_p3)   ;;  %v18023_v18 = vld [vmem:[#allocation15 + $0x228] ss:$16 sps:$4 sm:$0xff] (!%p16497_p3)  }
0x1781   : > { %v12331_v45 = vadd.f32 %v12311_v47, %v12285_v11  ;;  %v22129_v11 = vsub.s32 (!%p16497_p3), 0, %v22118_v37  ;;  %14054 = vmatpush1.bf16.msra.mxu0 (!%p16497_p3), %v17976_v5  ;;  %14218 = vmatpush1.bf16.msra.mxu1 (!%p16497_p3), %v17977_v62  ;;  %v17984_v47 = vld [vmem:[#allocation15 + $0x164] ss:$16 sps:$4 sm:$0xff] (!%p16497_p3)   ;;  %v18031_v62 = vld [vmem:[#allocation15 + $0x24c] ss:$16 sps:$4 sm:$0xff] (!%p16497_p3)  }
0x1782   : > { %14055 = vmatprep.subr.bf16.mxu0 (!%p16497_p3), %v17978_v54  ;;  %14219 = vmatprep.subr.bf16.mxu1 (!%p16497_p3), %v17980_v40  ;;  %v18028_v5 = vld [vmem:[#allocation15 + $0x244] ss:$16 sps:$4 sm:$0xff] (!%p16497_p3)   ;;  %v18026_v54 = vld [vmem:[#allocation15 + $0x240] ss:$16 sps:$4 sm:$0xff] (!%p16497_p3)   ;;  %v18029_v40 = vld [vmem:[#allocation15 + $0x248] ss:$16 sps:$4 sm:$0xff] (!%p16497_p3)  }
0x1783   : > { %12333 = vst [vmem:[#allocation5] sm:$0xff] %v12331_v45  ;;  %v22132_v45 = vsub.s32 (!%p16497_p3), 1, %v22118_v37 }
0x1785   : > { %14056 = vmatpush1.bf16.msra.mxu0 (!%p16497_p3), %v17982_v27  ;;  %14220 = vmatpush1.bf16.msra.mxu1 (!%p16497_p3), %v17983_v55  ;;  %v18034_v27 = vld [vmem:[#allocation15 + $0x264] ss:$16 sps:$4 sm:$0xff] (!%p16497_p3)   ;;  %v18037_v55 = vld [vmem:[#allocation15 + $0x26c] ss:$16 sps:$4 sm:$0xff] (!%p16497_p3)  }
0x1786   : > { %14057 = vmatprep.subr.bf16.mxu0 (!%p16497_p3), %v17984_v47  ;;  %v18032_v47 = vld [vmem:[#allocation15 + $0x260] ss:$16 sps:$4 sm:$0xff] (!%p16497_p3)  }
0x178a   : > { %v12339_v46 = vld [vmem:[#allocation5] sm:$0xff] (!%p16497_p3) }
0x1799   : > { %v12227_v56 = vpop.f32.mrb[12].mxu0  ;;  %v12268_v60 = vpop.f32.mrb[12].mxu1 }
0x179a   : > { %v12229_v3 = vpop.f32.mrb[13].mxu0  ;;  %v12270_v26 = vpop.f32.mrb[13].mxu1 }
0x179b   : > { %v12312_v22 = vcombine.low %v12227_v56, %v12229_v3  ;;  %v12313_v41 = vcombine.low %v12268_v60, %v12270_v26  ;;  %v12231_v58 = vpop.f32.mrb[14].mxu0  ;;  %v12272_v48 = vpop.f32.mrb[14].mxu1  ;;  %v12353_v56 = vsub.s32 (!%p16497_p3), 2, %v22118_v37  ;;  %v17986_v60 = vld [vmem:[#allocation15 + $0x16c] ss:$16 sps:$4 sm:$0xff] (!%p16497_p3)   ;;  %v12357_v3 = vsub.s32 (!%p16497_p3), 3, %v22118_v37 }
0x179c   : > { %v12232_v49 = vpop.f32.mrb[15].mxu0  ;;  %v12273_v28 = vpop.f32.mrb[15].mxu1  ;;  %v22136_v26 = vld [vmem:[#allocation14] sm:$0xff] (!%p16497_p3)  ;;  %14221 = vmatprep.subr.bf16.mxu1 (!%p16497_p3), %v17986_v60 }
0x179d   : > { %v12320_v19 = vrot.slane %v12312_v22, %v22121_v53  ;;  %v12327_v44 = vrot.slane %v12313_v41, %v22121_v53  ;;  %12338 = sbr.rel (%p16497_p3) target bundleno = 7054 (0x1b8e), region = 116  ;;  %v17988_v22 = vld [vmem:[#allocation15 + $0x160] ss:$16 sps:$4 sm:$0xff] (!%p16497_p3)   ;;  %v17989_v41 = vld [vmem:[#allocation15 + $0x168] ss:$16 sps:$4 sm:$0xff] (!%p16497_p3)   ;;  %v12346_v58 = vrot.slane (!%p16497_p3), %v22136_v26, %v22129_v11  ;;  %v12350_v48 = vrot.slane (!%p16497_p3), %v22136_v26, %v22132_v45 }
0x179e   : > { %v12354_v49 = vrot.slane (!%p16497_p3), %v22136_v26, %v12353_v56  ;;  %v17990_v28 = vld [vmem:[#allocation15 + $0x184] ss:$16 sps:$4 sm:$0xff] (!%p16497_p3)   ;;  %14058 = vmatpush1.bf16.msra.mxu0 (!%p16497_p3), %v17988_v22  ;;  %14222 = vmatpush1.bf16.msra.mxu1 (!%p16497_p3), %v17989_v41  ;;  %v18035_v60 = vld [vmem:[#allocation15 + $0x268] ss:$16 sps:$4 sm:$0xff] (!%p16497_p3)   ;;  %v18043_v41 = vld [vmem:[#allocation15 + $0x28c] ss:$16 sps:$4 sm:$0xff] (!%p16497_p3)  }
0x179f   : > { %v12328_v50 = vcombine.low %v12320_v19, %v12327_v44  ;;  %v17992_v19 = vld [vmem:[#allocation15 + $0x18c] ss:$16 sps:$4 sm:$0xff] (!%p16497_p3)   ;;  %v12358_v44 = vrot.slane (!%p16497_p3), %v22136_v26, %v12357_v3  ;;  %14059 = vmatprep.subr.bf16.mxu0 (!%p16497_p3), %v17990_v28  ;;  %v18040_v22 = vld [vmem:[#allocation15 + $0x284] ss:$16 sps:$4 sm:$0xff] (!%p16497_p3)  }
0x17a0   : > { %14223 = vmatprep.subr.bf16.mxu1 (!%p16497_p3), %v17992_v19  ;;  %v18049_v28 = vld [vmem:[#allocation15 + $0x2ac] ss:$16 sps:$4 sm:$0xff] (!%p16497_p3)   ;;  %v18044_v19 = vld [vmem:[#allocation15 + $0x2a0] ss:$16 sps:$4 sm:$0xff] (!%p16497_p3)  }
0x17a1   : > { %v12332_v13 = vadd.f32 %v12328_v50, %v12286_v25  ;;  %v12375_v25 = vcombine.low (!%p16497_p3), %v12346_v58, %v12350_v48  ;;  %v12376_v50 = vcombine.low (!%p16497_p3), %v12354_v49, %v12358_v44  ;;  %v18038_v58 = vld [vmem:[#allocation15 + $0x280] ss:$16 sps:$4 sm:$0xff] (!%p16497_p3)   ;;  %v18041_v48 = vld [vmem:[#allocation15 + $0x288] ss:$16 sps:$4 sm:$0xff] (!%p16497_p3)   ;;  %v18046_v49 = vld [vmem:[#allocation15 + $0x2a4] ss:$16 sps:$4 sm:$0xff] (!%p16497_p3)  }
0x17a2   : > { %14224 = vmatpush1.bf16.msra.mxu1 (!%p16497_p3), %v17995_v57  ;;  %v18047_v44 = vld [vmem:[#allocation15 + $0x2a8] ss:$16 sps:$4 sm:$0xff] (!%p16497_p3)   ;;  %v12361_v57 = vsub.s32 (!%p16497_p3), 4, %v22118_v37 }
0x17a3   : > { %12334 = vst [vmem:[#allocation5 + $0x8] sm:$0xff] %v12332_v13  ;;  %v17994_v13 = vld [vmem:[#allocation15 + $0x180] ss:$16 sps:$4 sm:$0xff] (!%p16497_p3)   ;;  %v12383_v59 = vrot.slane (!%p16497_p3), %v12375_v25, %v22121_v53  ;;  %v12390_v32 = vrot.slane (!%p16497_p3), %v12376_v50, %v22121_v53  ;;  %14225 = vmatprep.subr.bf16.mxu1 (!%p16497_p3), %v17998_v16  ;;  %v18052_v25 = vld [vmem:[#allocation15 + $0x2c4] ss:$16 sps:$4 sm:$0xff] (!%p16497_p3)  }
0x17a4   : > { %14060 = vmatpush1.bf16.msra.mxu0 %v17994_v13  ;;  %v18055_v50 = vld [vmem:[#allocation15 + $0x2cc] ss:$16 sps:$4 sm:$0xff]   ;;  %v18050_v13 = vld [vmem:[#allocation15 + $0x2c0] ss:$16 sps:$4 sm:$0xff]   ;;  %v18053_v16 = vld [vmem:[#allocation15 + $0x2c8] ss:$16 sps:$4 sm:$0xff]  }
0x17a5   : > { %v12391_v38 = vcombine.low %v12383_v59, %v12390_v32  ;;  %14061 = vmatprep.subr.bf16.mxu0 %v17996_v61  ;;  %v12365_v59 = vsub.s32 5, %v22118_v37  ;;  %v12369_v61 = vsub.s32 6, %v22118_v37  ;;  %v18058_v32 = vld [vmem:[#allocation15 + $0x2e4] ss:$16 sps:$4 sm:$0xff]  }
0x17a6   : > { %14226 = vmatpush1.bf16.msra.mxu1 %v18001_v14  ;;  %v12362_v14 = vrot.slane %v22136_v26, %v12361_v57  ;;  %v18110_v57 = vld [vmem:[#allocation15 + $0x400] ss:$16 sps:$4 sm:$0xff]  }
0x17a7   : > { %v12411_v2 = vadd.f32 %v12391_v38, %v12339_v46  ;;  %14227 = vmatprep.subr.bf16.mxu1 %v18004_v43  ;;  %v12373_v46 = vsub.s32 7, %v22118_v37  ;;  %v18061_v38 = vld [vmem:[#allocation15 + $0x2ec] ss:$16 sps:$4 sm:$0xff]   ;;  %v18064_v43 = vld [vmem:[#allocation15 + $0x304] ss:$16 sps:$4 sm:$0xff]  }
0x17a8   : > { %14062 = vmatpush1.bf16.msra.mxu0 %v18000_v39  ;;  %v18056_v39 = vld [vmem:[#allocation15 + $0x2e0] ss:$16 sps:$4 sm:$0xff]  }
0x17a9   : > { %v16498_v33 = vmul.f32 -1.442695, %v12411_v2  ;;  %14063 = vmatprep.subr.bf16.mxu0 %v18002_v0  ;;  %v18059_v0 = vld [vmem:[#allocation15 + $0x2e8] ss:$16 sps:$4 sm:$0xff]   ;;  %v12366_v2 = vrot.slane %v22136_v26, %v12365_v59 }
0x17aa   : > { %14228 = vmatpush1.bf16.msra.mxu1 %v18007_v35  ;;  %v18067_v35 = vld [vmem:[#allocation15 + $0x30c] ss:$16 sps:$4 sm:$0xff]   ;;  %v18382_v37 = vld [vmem:[#allocation18 + $0x1a4] ss:$8 sps:$4 sm:$0xff]  }
0x17ab   : > { %18446 = vpow2.f32 %v16498_v33  ;;  %14229 = vmatprep.subr.bf16.mxu1 %v18010_v24  ;;  %v12370_v33 = vrot.slane %v22136_v26, %v12369_v61  ;;  %v18065_v24 = vld [vmem:[#allocation15 + $0x308] ss:$16 sps:$4 sm:$0xff]  }
0x17ac   : > { %14064 = vmatpush1.bf16.msra.mxu0 %v18006_v34  ;;  %v12374_v34 = vrot.slane %v22136_v26, %v12373_v46  ;;  %v18113_v61 = vld [vmem:[#allocation15 + $0x408] ss:$16 sps:$4 sm:$0xff]   ;;  %v18116_v46 = vld [vmem:[#allocation15 + $0x420] ss:$16 sps:$4 sm:$0xff]  }
0x17ad   : > { %14065 = vmatprep.subr.bf16.mxu0 %v18008_v4  ;;  %v18062_v4 = vld [vmem:[#allocation15 + $0x300] ss:$16 sps:$4 sm:$0xff]  }
0x17ae   : > { %14230 = vmatpush1.bf16.msra.mxu1 %v18013_v9  ;;  %v12392_v9 = vcombine.low %v12362_v14, %v12366_v2  ;;  %v18127_v14 = vld [vmem:[#allocation15 + $0x44c] ss:$16 sps:$4 sm:$0xff]  }
0x17af   : > { %14240 = vmatprep.subr.bf16.mxu1 %v18019_v23  ;;  %v18073_v23 = vld [vmem:[#allocation15 + $0x32c] ss:$16 sps:$4 sm:$0xff]  }
0x17b0   : > { %14066 = vmatpush1.bf16.msra.mxu0 %v18012_v10  ;;  %v18070_v10 = vld [vmem:[#allocation15 + $0x324] ss:$16 sps:$4 sm:$0xff]   ;;  %v12400_v26 = vrot.slane %v12392_v9, %v22121_v53 }
0x17b1   : > { %14076 = vmatprep.subr.bf16.mxu0 %v18016_v7  ;;  %v12393_v7 = vcombine.low %v12370_v33, %v12374_v34  ;;  %v18130_v33 = vld [vmem:[#allocation15 + $0x464] ss:$16 sps:$4 sm:$0xff]   ;;  %v18133_v34 = vld [vmem:[#allocation15 + $0x46c] ss:$16 sps:$4 sm:$0xff]  }
0x17b2   : > { %v18136_v9 = vld [vmem:[#allocation15 + $0x484] ss:$16 sps:$4 sm:$0xff]  }
0x17b5   : > { %v18447_v29 = vpop.eup %18446 }
0x17b6   : > { %v12419_v15 = vadd.f32 1.0, %v18447_v29  ;;  %v18068_v29 = vld [vmem:[#allocation15 + $0x320] ss:$16 sps:$4 sm:$0xff]  }
0x17b8   : > { %18448 = vrcp.f32 %v12419_v15  ;;  %v18071_v15 = vld [vmem:[#allocation15 + $0x328] ss:$16 sps:$4 sm:$0xff]  }
0x17c2   : > { %v18449_v17 = vpop.eup %18448 }
0x17c3   : > { %v12434_v36 = vrot.slane %v18449_v17, %v22121_v53  ;;  %v12427_v31 = vcombine.high %v18449_v17, %v18449_v17  ;;  %v18076_v17 = vld [vmem:[#allocation15 + $0x344] ss:$16 sps:$4 sm:$0xff]  }
0x17c5   : > { %v12442_v12 = vcombine.high %v12434_v36, %v12434_v36  ;;  %v22152_v1 = vrot.slane %v12427_v31, %v22121_v53  ;;  %v12469_v51 = vpack.c.bf16 %v12434_v36, %v12434_v36  ;;  %v12407_v36 = vrot.slane %v12393_v7, %v22121_v53  ;;  %v18079_v31 = vld [vmem:[#allocation15 + $0x34c] ss:$16 sps:$4 sm:$0xff]  }
0x17c6   : > { %v18139_v7 = vld [vmem:[#allocation15 + $0x48c] ss:$16 sps:$4 sm:$0xff]  }
0x17c7   : > { %v12470_v21 = vpack.c.bf16 %v12442_v12, %v12442_v12  ;;  %v12443_v30 = vcombine.high %v22152_v1, %v22152_v1  ;;  %v18074_v12 = vld [vmem:[#allocation15 + $0x340] ss:$16 sps:$4 sm:$0xff]   ;;  %v12471_v59 = vpack.c.bf16 %v22152_v1, %v22152_v1 }
0x17c8   : > { %v18122_v1 = vld [vmem:[#allocation15 + $0x440] ss:$16 sps:$4 sm:$0xff]  }
0x17c9   : > { %14067 = vmatprep.mubr.bf16.mxu0 %v12470_v21  ;;  %14231 = vmatprep.mubr.bf16.mxu1 %v12470_v21  ;;  %v12472_v6 = vpack.c.bf16 %v12443_v30, %v12443_v30  ;;  %v12408_v21 = vcombine.low %v12400_v26, %v12407_v36  ;;  %v18083_v30 = vld [vmem:[#allocation15 + $0x368] ss:$16 sps:$4 sm:$0xff]   ;;  %v18140_v26 = vld [vmem:[#allocation15 + $0x4a0] ss:$16 sps:$4 sm:$0xff]  }
0x17ca   : > { %14068 = vmatmul.mubr.bf16.vlgmr.msra.gmra.mrb[0].mxu0 %v12469_v51  ;;  %14232 = vmatmul.mubr.bf16.vlgmr.msra.gmra.mrb[0].mxu1 %v12469_v51  ;;  %v18082_v51 = vld [vmem:[#allocation15 + $0x364] ss:$16 sps:$4 sm:$0xff]   ;;  %v18143_v36 = vld [vmem:[#allocation15 + $0x4a8] ss:$16 sps:$4 sm:$0xff]  }
0x17cb   : > { %14077 = vmatpush1.bf16.msra.mxu0 %v18014_v20  ;;  %14241 = vmatpush1.bf16.msra.mxu1 %v18017_v8  ;;  %v18077_v20 = vld [vmem:[#allocation15 + $0x348] ss:$16 sps:$4 sm:$0xff]   ;;  %v18085_v8 = vld [vmem:[#allocation15 + $0x36c] ss:$16 sps:$4 sm:$0xff]  }
0x17cc   : > { %14078 = vmatprep.subr.bf16.mxu0 %v18022_v63  ;;  %14242 = vmatprep.subr.bf16.mxu1 %v18025_v42  ;;  %v18080_v63 = vld [vmem:[#allocation15 + $0x360] ss:$16 sps:$4 sm:$0xff]  }
0x17cd   : > { %14108 = vmatprep.mubr.bf16.mxu0 %v12472_v6  ;;  %14272 = vmatprep.mubr.bf16.mxu1 %v12472_v6  ;;  %v12340_v42 = vld [vmem:[#allocation5 + $0x8] sm:$0xff]  ;;  %v18088_v6 = vld [vmem:[#allocation15 + $0x384] ss:$16 sps:$4 sm:$0xff]  }
0x17cf   : > { %14079 = vmatpush1.bf16.msra.mxu0 %v18020_v52  ;;  %14243 = vmatpush1.bf16.msra.mxu1 %v18023_v18  ;;  %v12412_v52 = vadd.f32 %v12408_v21, %v12340_v42  ;;  %v18091_v18 = vld [vmem:[#allocation15 + $0x38c] ss:$16 sps:$4 sm:$0xff]   ;;  %v18154_v21 = vld [vmem:[#allocation15 + $0x4e4] ss:$16 sps:$4 sm:$0xff]  }
0x17d0   : > { %14080 = vmatprep.subr.bf16.mxu0 %v18028_v5  ;;  %14244 = vmatprep.subr.bf16.mxu1 %v18031_v62  ;;  %v18086_v62 = vld [vmem:[#allocation15 + $0x380] ss:$16 sps:$4 sm:$0xff]   ;;  %v18160_v42 = vld [vmem:[#allocation15 + $0x504] ss:$16 sps:$4 sm:$0xff]  }
0x17d1   : > { %v16499_v5 = vmul.f32 -1.442695, %v12412_v52  ;;  %v18158_v52 = vld [vmem:[#allocation15 + $0x500] ss:$16 sps:$4 sm:$0xff]  }
0x17d3   : > { %14081 = vmatpush1.bf16.msra.mxu0 %v18026_v54  ;;  %14245 = vmatpush1.bf16.msra.mxu1 %v18029_v40  ;;  %v18089_v54 = vld [vmem:[#allocation15 + $0x388] ss:$16 sps:$4 sm:$0xff]   ;;  %18450 = vpow2.f32 %v16499_v5  ;;  %v18094_v40 = vld [vmem:[#allocation15 + $0x3a4] ss:$16 sps:$4 sm:$0xff]  }
0x17d4   : > { %14082 = vmatprep.subr.bf16.mxu0 %v18034_v27  ;;  %14246 = vmatprep.subr.bf16.mxu1 %v18037_v55  ;;  %v18097_v27 = vld [vmem:[#allocation15 + $0x3ac] ss:$16 sps:$4 sm:$0xff]   ;;  %v18092_v55 = vld [vmem:[#allocation15 + $0x3a0] ss:$16 sps:$4 sm:$0xff]   ;;  %v18166_v5 = vld [vmem:[#allocation15 + $0x524] ss:$16 sps:$4 sm:$0xff]  }
0x17d7   : > { %14083 = vmatpush1.bf16.msra.mxu0 %v18032_v47  ;;  %14247 = vmatpush1.bf16.msra.mxu1 %v18035_v60  ;;  %v18095_v47 = vld [vmem:[#allocation15 + $0x3a8] ss:$16 sps:$4 sm:$0xff]   ;;  %v18100_v60 = vld [vmem:[#allocation15 + $0x3c4] ss:$16 sps:$4 sm:$0xff]  }
0x17d8   : > { %14084 = vmatprep.subr.bf16.mxu0 %v18040_v22  ;;  %14248 = vmatprep.subr.bf16.mxu1 %v18043_v41  ;;  %v18103_v22 = vld [vmem:[#allocation15 + $0x3cc] ss:$16 sps:$4 sm:$0xff]   ;;  %v18098_v41 = vld [vmem:[#allocation15 + $0x3c0] ss:$16 sps:$4 sm:$0xff]  }
0x17db   : > { %14085 = vmatpush1.bf16.msra.mxu0 %v18038_v58  ;;  %14249 = vmatpush1.bf16.msra.mxu1 %v18041_v48  ;;  %v18101_v58 = vld [vmem:[#allocation15 + $0x3c8] ss:$16 sps:$4 sm:$0xff]   ;;  %v18106_v48 = vld [vmem:[#allocation15 + $0x3e4] ss:$16 sps:$4 sm:$0xff]  }
0x17dc   : > { %14086 = vmatprep.subr.bf16.mxu0 %v18046_v49  ;;  %14250 = vmatprep.subr.bf16.mxu1 %v18049_v28  ;;  %v18109_v49 = vld [vmem:[#allocation15 + $0x3ec] ss:$16 sps:$4 sm:$0xff]  }
0x17dd   : > { %v18451_v28 = vpop.eup %18450 }
0x17df   : > { %14087 = vmatpush1.bf16.msra.mxu0 %v18044_v19  ;;  %14251 = vmatpush1.bf16.msra.mxu1 %v18047_v44  ;;  %v18104_v19 = vld [vmem:[#allocation15 + $0x3e0] ss:$16 sps:$4 sm:$0xff]   ;;  %v12420_v44 = vadd.f32 1.0, %v18451_v28  ;;  %v18187_v28 = vld [vmem:[#allocation15 + $0x58c] ss:$16 sps:$4 sm:$0xff]  }
0x17e0   : > { %14088 = vmatprep.subr.bf16.mxu0 %v18052_v25  ;;  %14252 = vmatprep.subr.bf16.mxu1 %v18055_v50  ;;  %v18107_v25 = vld [vmem:[#allocation15 + $0x3e8] ss:$16 sps:$4 sm:$0xff]   ;;  %v18112_v50 = vld [vmem:[#allocation15 + $0x404] ss:$16 sps:$4 sm:$0xff]  }
0x17e1   : > { %18452 = vrcp.f32 %v12420_v44  ;;  %v18185_v44 = vld [vmem:[#allocation15 + $0x588] ss:$16 sps:$4 sm:$0xff]  }
0x17e3   : > { %14089 = vmatpush1.bf16.msra.mxu0 %v18050_v13  ;;  %14253 = vmatpush1.bf16.msra.mxu1 %v18053_v16  ;;  %v18115_v13 = vld [vmem:[#allocation15 + $0x40c] ss:$16 sps:$4 sm:$0xff]   ;;  %v18118_v16 = vld [vmem:[#allocation15 + $0x424] ss:$16 sps:$4 sm:$0xff]  }
0x17e4   : > { %14090 = vmatprep.subr.bf16.mxu0 %v18058_v32  ;;  %14254 = vmatprep.subr.bf16.mxu1 %v18061_v38  ;;  %v18121_v32 = vld [vmem:[#allocation15 + $0x42c] ss:$16 sps:$4 sm:$0xff]   ;;  %v18119_v38 = vld [vmem:[#allocation15 + $0x428] ss:$16 sps:$4 sm:$0xff]  }
0x17e7   : > { %14091 = vmatpush1.bf16.msra.mxu0 %v18056_v39  ;;  %14255 = vmatpush1.bf16.msra.mxu1 %v18059_v0  ;;  %v18124_v39 = vld [vmem:[#allocation15 + $0x444] ss:$16 sps:$4 sm:$0xff]  }
0x17e8   : > { %14092 = vmatprep.subr.bf16.mxu0 %v18064_v43  ;;  %14256 = vmatprep.subr.bf16.mxu1 %v18067_v35  ;;  %v18125_v43 = vld [vmem:[#allocation15 + $0x448] ss:$16 sps:$4 sm:$0xff]  }
0x17eb   : > { %14093 = vmatpush1.bf16.msra.mxu0 %v18062_v4  ;;  %14257 = vmatpush1.bf16.msra.mxu1 %v18065_v24  ;;  %v22168_v0 = vpop.eup %18452  ;;  %v18128_v4 = vld [vmem:[#allocation15 + $0x460] ss:$16 sps:$4 sm:$0xff]   ;;  %v18131_v24 = vld [vmem:[#allocation15 + $0x468] ss:$16 sps:$4 sm:$0xff]  }
0x17ec   : > { %14094 = vmatprep.subr.bf16.mxu0 %v18070_v10  ;;  %14258 = vmatprep.subr.bf16.mxu1 %v18073_v23  ;;  %v22172_v2 = vrot.slane %v22168_v0, %v22121_v53  ;;  %v18134_v23 = vld [vmem:[#allocation15 + $0x480] ss:$16 sps:$4 sm:$0xff]  }
0x17ee   : > { %v12459_v35 = vcombine.high %v22172_v2, %v22172_v2 }
0x17ef   : > { %14095 = vmatpush1.bf16.msra.mxu0 %v18068_v29  ;;  %14259 = vmatpush1.bf16.msra.mxu1 %v18071_v15  ;;  %v18137_v29 = vld [vmem:[#allocation15 + $0x488] ss:$16 sps:$4 sm:$0xff]   ;;  %v18142_v15 = vld [vmem:[#allocation15 + $0x4a4] ss:$16 sps:$4 sm:$0xff]  }
0x17f0   : > { %14096 = vmatprep.subr.bf16.mxu0 %v18076_v17  ;;  %14260 = vmatprep.subr.bf16.mxu1 %v18079_v31  ;;  %v12474_v10 = vpack.c.bf16 %v12459_v35, %v12459_v35  ;;  %v18145_v17 = vld [vmem:[#allocation15 + $0x4ac] ss:$16 sps:$4 sm:$0xff]   ;;  %v18148_v31 = vld [vmem:[#allocation15 + $0x4c4] ss:$16 sps:$4 sm:$0xff]   ;;  %v12473_v35 = vpack.c.bf16 %v22172_v2, %v22172_v2  ;;  %v18218_v2 = vld [vmem:[#allocation15 + $0x640] ss:$16 sps:$4 sm:$0xff]  }
0x17f3   : > { %14097 = vmatpush1.bf16.msra.mxu0 %v18074_v12  ;;  %14261 = vmatpush1.bf16.msra.mxu1 %v18077_v20  ;;  %v18151_v12 = vld [vmem:[#allocation15 + $0x4cc] ss:$16 sps:$4 sm:$0xff]   ;;  %v18146_v20 = vld [vmem:[#allocation15 + $0x4c0] ss:$16 sps:$4 sm:$0xff]  }
0x17f4   : > { %14098 = vmatprep.subr.bf16.mxu0 %v18082_v51  ;;  %14262 = vmatprep.subr.bf16.mxu1 %v18085_v8  ;;  %v18149_v51 = vld [vmem:[#allocation15 + $0x4c8] ss:$16 sps:$4 sm:$0xff]   ;;  %v18157_v8 = vld [vmem:[#allocation15 + $0x4ec] ss:$16 sps:$4 sm:$0xff]  }
0x17f7   : > { %14099 = vmatpush1.bf16.msra.mxu0 %v18080_v63  ;;  %14263 = vmatpush1.bf16.msra.mxu1 %v18083_v30  ;;  %v18152_v63 = vld [vmem:[#allocation15 + $0x4e0] ss:$16 sps:$4 sm:$0xff]   ;;  %v18155_v30 = vld [vmem:[#allocation15 + $0x4e8] ss:$16 sps:$4 sm:$0xff]  }
0x17f8   : > { %14100 = vmatprep.subr.bf16.mxu0 %v18088_v6  ;;  %14264 = vmatprep.subr.bf16.mxu1 %v18091_v18  ;;  %v18163_v6 = vld [vmem:[#allocation15 + $0x50c] ss:$16 sps:$4 sm:$0xff]   ;;  %v18161_v18 = vld [vmem:[#allocation15 + $0x508] ss:$16 sps:$4 sm:$0xff]  }
0x17fb   : > { %14101 = vmatpush1.bf16.msra.mxu0 %v18086_v62  ;;  %14265 = vmatpush1.bf16.msra.mxu1 %v18089_v54  ;;  %v18169_v62 = vld [vmem:[#allocation15 + $0x52c] ss:$16 sps:$4 sm:$0xff]   ;;  %v18164_v54 = vld [vmem:[#allocation15 + $0x520] ss:$16 sps:$4 sm:$0xff]  }
0x17fc   : > { %14102 = vmatprep.subr.bf16.mxu0 %v18094_v40  ;;  %14266 = vmatprep.subr.bf16.mxu1 %v18097_v27  ;;  %v18167_v40 = vld [vmem:[#allocation15 + $0x528] ss:$16 sps:$4 sm:$0xff]   ;;  %v18172_v27 = vld [vmem:[#allocation15 + $0x544] ss:$16 sps:$4 sm:$0xff]  }
0x17ff   : > { %14103 = vmatpush1.bf16.msra.mxu0 %v18092_v55  ;;  %14267 = vmatpush1.bf16.msra.mxu1 %v18095_v47  ;;  %v18175_v55 = vld [vmem:[#allocation15 + $0x54c] ss:$16 sps:$4 sm:$0xff]   ;;  %v18170_v47 = vld [vmem:[#allocation15 + $0x540] ss:$16 sps:$4 sm:$0xff]  }
0x1800   : > { %14104 = vmatprep.subr.bf16.mxu0 %v18100_v60  ;;  %14268 = vmatprep.subr.bf16.mxu1 %v18103_v22  ;;  %v18173_v60 = vld [vmem:[#allocation15 + $0x548] ss:$16 sps:$4 sm:$0xff]   ;;  %v18178_v22 = vld [vmem:[#allocation15 + $0x564] ss:$16 sps:$4 sm:$0xff]  }
0x1803   : > { %14105 = vmatpush1.bf16.msra.mxu0 %v18098_v41  ;;  %14269 = vmatpush1.bf16.msra.mxu1 %v18101_v58  ;;  %v18181_v41 = vld [vmem:[#allocation15 + $0x56c] ss:$16 sps:$4 sm:$0xff]   ;;  %v18176_v58 = vld [vmem:[#allocation15 + $0x560] ss:$16 sps:$4 sm:$0xff]  }
0x1804   : > { %14106 = vmatprep.subr.bf16.mxu0 %v18106_v48  ;;  %14270 = vmatprep.subr.bf16.mxu1 %v18109_v49  ;;  %v18179_v48 = vld [vmem:[#allocation15 + $0x568] ss:$16 sps:$4 sm:$0xff]   ;;  %v18184_v49 = vld [vmem:[#allocation15 + $0x584] ss:$16 sps:$4 sm:$0xff]  }
0x1807   : > { %14107 = vmatpush1.bf16.msra.mxu0 %v18104_v19  ;;  %14271 = vmatpush1.bf16.msra.mxu1 %v18107_v25  ;;  %v18182_v19 = vld [vmem:[#allocation15 + $0x580] ss:$16 sps:$4 sm:$0xff]   ;;  %v18190_v25 = vld [vmem:[#allocation15 + $0x5a4] ss:$16 sps:$4 sm:$0xff]  }
0x1808   : > { %14117 = vmatprep.subr.bf16.mxu0 %v18112_v50  ;;  %14281 = vmatprep.subr.bf16.mxu1 %v18115_v13  ;;  %v18193_v50 = vld [vmem:[#allocation15 + $0x5ac] ss:$16 sps:$4 sm:$0xff]   ;;  %v18188_v13 = vld [vmem:[#allocation15 + $0x5a0] ss:$16 sps:$4 sm:$0xff]  }
0x180a   : > { %14109 = vmatmul.mubr.bf16.vlgmr.msra.gmra.mrb[0].mxu0 %v12471_v59  ;;  %14273 = vmatmul.mubr.bf16.vlgmr.msra.gmra.mrb[0].mxu1 %v12471_v59  ;;  %v18196_v59 = vld [vmem:[#allocation15 + $0x5c4] ss:$16 sps:$4 sm:$0xff]  }
0x180b   : > { %14118 = vmatpush1.bf16.msra.mxu0 %v18110_v57  ;;  %14282 = vmatpush1.bf16.msra.mxu1 %v18113_v61  ;;  %v18191_v57 = vld [vmem:[#allocation15 + $0x5a8] ss:$16 sps:$4 sm:$0xff]   ;;  %v18199_v61 = vld [vmem:[#allocation15 + $0x5cc] ss:$16 sps:$4 sm:$0xff]  }
0x180c   : > { %14119 = vmatprep.subr.bf16.mxu0 %v18118_v16  ;;  %14283 = vmatprep.subr.bf16.mxu1 %v18121_v32  ;;  %v18194_v16 = vld [vmem:[#allocation15 + $0x5c0] ss:$16 sps:$4 sm:$0xff]   ;;  %v18197_v32 = vld [vmem:[#allocation15 + $0x5c8] ss:$16 sps:$4 sm:$0xff]  }
0x180d   : > { %14149 = vmatprep.mubr.bf16.mxu0 %v12474_v10  ;;  %14313 = vmatprep.mubr.bf16.mxu1 %v12474_v10  ;;  %v18214_v10 = vld [vmem:[#allocation15 + $0x624] ss:$16 sps:$4 sm:$0xff]  }
0x180f   : > { %14120 = vmatpush1.bf16.msra.mxu0 %v18116_v46  ;;  %14284 = vmatpush1.bf16.msra.mxu1 %v18119_v38  ;;  %v12444_v46 = vcombine.high %v22168_v0, %v22168_v0  ;;  %v18202_v38 = vld [vmem:[#allocation15 + $0x5e4] ss:$16 sps:$4 sm:$0xff]  }
0x1810   : > { %14121 = vmatprep.subr.bf16.mxu0 %v18124_v39  ;;  %14285 = vmatprep.subr.bf16.mxu1 %v18127_v14  ;;  %v18205_v39 = vld [vmem:[#allocation15 + $0x5ec] ss:$16 sps:$4 sm:$0xff]   ;;  %v18200_v14 = vld [vmem:[#allocation15 + $0x5e0] ss:$16 sps:$4 sm:$0xff]  }
0x1813   : > { %14122 = vmatpush1.bf16.msra.mxu0 %v18122_v1  ;;  %14286 = vmatpush1.bf16.msra.mxu1 %v18125_v43  ;;  %v22179_v1 = vrot.slane %v12444_v46, %v22121_v53  ;;  %v18203_v43 = vld [vmem:[#allocation15 + $0x5e8] ss:$16 sps:$4 sm:$0xff]   ;;  %v18283_v46 = vld [vmem:[#allocation15 + $0x78c] ss:$16 sps:$4 sm:$0xff]  }
0x1814   : > { %14123 = vmatprep.subr.bf16.mxu0 %v18130_v33  ;;  %14287 = vmatprep.subr.bf16.mxu1 %v18133_v34  ;;  %v18208_v33 = vld [vmem:[#allocation15 + $0x604] ss:$16 sps:$4 sm:$0xff]   ;;  %v18211_v34 = vld [vmem:[#allocation15 + $0x60c] ss:$16 sps:$4 sm:$0xff]  }
0x1815   : > { %v12460_v0 = vcombine.high %v22179_v1, %v22179_v1 }
0x1817   : > { %14124 = vmatpush1.bf16.msra.mxu0 %v18128_v4  ;;  %14288 = vmatpush1.bf16.msra.mxu1 %v18131_v24  ;;  %v18206_v4 = vld [vmem:[#allocation15 + $0x600] ss:$16 sps:$4 sm:$0xff]   ;;  %v18209_v24 = vld [vmem:[#allocation15 + $0x608] ss:$16 sps:$4 sm:$0xff]  }
0x1818   : > { %14125 = vmatprep.subr.bf16.mxu0 %v18136_v9  ;;  %14289 = vmatprep.subr.bf16.mxu1 %v18139_v7  ;;  %v18217_v9 = vld [vmem:[#allocation15 + $0x62c] ss:$16 sps:$4 sm:$0xff]   ;;  %v12476_v7 = vpack.c.bf16 %v12460_v0, %v12460_v0  ;;  %v18292_v0 = vld [vmem:[#allocation15 + $0x7c4] ss:$16 sps:$4 sm:$0xff]  }
0x181b   : > { %14126 = vmatpush1.bf16.msra.mxu0 %v18134_v23  ;;  %14290 = vmatpush1.bf16.msra.mxu1 %v18137_v29  ;;  %v18212_v23 = vld [vmem:[#allocation15 + $0x620] ss:$16 sps:$4 sm:$0xff]   ;;  %v18215_v29 = vld [vmem:[#allocation15 + $0x628] ss:$16 sps:$4 sm:$0xff]  }
0x181c   : > { %14127 = vmatprep.subr.bf16.mxu0 %v18142_v15  ;;  %14291 = vmatprep.subr.bf16.mxu1 %v18145_v17  ;;  %v18220_v15 = vld [vmem:[#allocation15 + $0x644] ss:$16 sps:$4 sm:$0xff]   ;;  %v18223_v17 = vld [vmem:[#allocation15 + $0x64c] ss:$16 sps:$4 sm:$0xff]  }
0x181f   : > { %14128 = vmatpush1.bf16.msra.mxu0 %v18140_v26  ;;  %14292 = vmatpush1.bf16.msra.mxu1 %v18143_v36  ;;  %v18221_v26 = vld [vmem:[#allocation15 + $0x648] ss:$16 sps:$4 sm:$0xff]   ;;  %v18226_v36 = vld [vmem:[#allocation15 + $0x664] ss:$16 sps:$4 sm:$0xff]  }
0x1820   : > { %14129 = vmatprep.subr.bf16.mxu0 %v18148_v31  ;;  %14293 = vmatprep.subr.bf16.mxu1 %v18151_v12  ;;  %v18229_v31 = vld [vmem:[#allocation15 + $0x66c] ss:$16 sps:$4 sm:$0xff]   ;;  %v18224_v12 = vld [vmem:[#allocation15 + $0x660] ss:$16 sps:$4 sm:$0xff]  }
0x1823   : > { %14130 = vmatpush1.bf16.msra.mxu0 %v18146_v20  ;;  %14294 = vmatpush1.bf16.msra.mxu1 %v18149_v51  ;;  %v18227_v20 = vld [vmem:[#allocation15 + $0x668] ss:$16 sps:$4 sm:$0xff]   ;;  %v18232_v51 = vld [vmem:[#allocation15 + $0x684] ss:$16 sps:$4 sm:$0xff]  }
0x1824   : > { %14131 = vmatprep.subr.bf16.mxu0 %v18154_v21  ;;  %14295 = vmatprep.subr.bf16.mxu1 %v18157_v8  ;;  %v18235_v21 = vld [vmem:[#allocation15 + $0x68c] ss:$16 sps:$4 sm:$0xff]   ;;  %v18230_v8 = vld [vmem:[#allocation15 + $0x680] ss:$16 sps:$4 sm:$0xff]  }
0x1827   : > { %14132 = vmatpush1.bf16.msra.mxu0 %v18152_v63  ;;  %14296 = vmatpush1.bf16.msra.mxu1 %v18155_v30  ;;  %v18233_v63 = vld [vmem:[#allocation15 + $0x688] ss:$16 sps:$4 sm:$0xff]   ;;  %v18238_v30 = vld [vmem:[#allocation15 + $0x6a4] ss:$16 sps:$4 sm:$0xff]  }
0x1828   : > { %14133 = vmatprep.subr.bf16.mxu0 %v18160_v42  ;;  %14297 = vmatprep.subr.bf16.mxu1 %v18163_v6  ;;  %v18241_v42 = vld [vmem:[#allocation15 + $0x6ac] ss:$16 sps:$4 sm:$0xff]   ;;  %v18236_v6 = vld [vmem:[#allocation15 + $0x6a0] ss:$16 sps:$4 sm:$0xff]  }
0x182b   : > { %14134 = vmatpush1.bf16.msra.mxu0 %v18158_v52  ;;  %14298 = vmatpush1.bf16.msra.mxu1 %v18161_v18  ;;  %v18239_v52 = vld [vmem:[#allocation15 + $0x6a8] ss:$16 sps:$4 sm:$0xff]   ;;  %v18244_v18 = vld [vmem:[#allocation15 + $0x6c4] ss:$16 sps:$4 sm:$0xff]  }
0x182c   : > { %14135 = vmatprep.subr.bf16.mxu0 %v18166_v5  ;;  %14299 = vmatprep.subr.bf16.mxu1 %v18169_v62  ;;  %v18247_v5 = vld [vmem:[#allocation15 + $0x6cc] ss:$16 sps:$4 sm:$0xff]   ;;  %v18242_v62 = vld [vmem:[#allocation15 + $0x6c0] ss:$16 sps:$4 sm:$0xff]  }
0x182f   : > { %14136 = vmatpush1.bf16.msra.mxu0 %v18164_v54  ;;  %14300 = vmatpush1.bf16.msra.mxu1 %v18167_v40  ;;  %v18245_v54 = vld [vmem:[#allocation15 + $0x6c8] ss:$16 sps:$4 sm:$0xff]   ;;  %v18250_v40 = vld [vmem:[#allocation15 + $0x6e4] ss:$16 sps:$4 sm:$0xff]  }
0x1830   : > { %14137 = vmatprep.subr.bf16.mxu0 %v18172_v27  ;;  %14301 = vmatprep.subr.bf16.mxu1 %v18175_v55  ;;  %v18253_v27 = vld [vmem:[#allocation15 + $0x6ec] ss:$16 sps:$4 sm:$0xff]   ;;  %v18248_v55 = vld [vmem:[#allocation15 + $0x6e0] ss:$16 sps:$4 sm:$0xff]  }
0x1833   : > { %14138 = vmatpush1.bf16.msra.mxu0 %v18170_v47  ;;  %14302 = vmatpush1.bf16.msra.mxu1 %v18173_v60  ;;  %v18251_v47 = vld [vmem:[#allocation15 + $0x6e8] ss:$16 sps:$4 sm:$0xff]   ;;  %v18256_v60 = vld [vmem:[#allocation15 + $0x704] ss:$16 sps:$4 sm:$0xff]  }
0x1834   : > { %14139 = vmatprep.subr.bf16.mxu0 %v18178_v22  ;;  %14303 = vmatprep.subr.bf16.mxu1 %v18181_v41  ;;  %v18259_v22 = vld [vmem:[#allocation15 + $0x70c] ss:$16 sps:$4 sm:$0xff]   ;;  %v18254_v41 = vld [vmem:[#allocation15 + $0x700] ss:$16 sps:$4 sm:$0xff]  }
0x1837   : > { %14140 = vmatpush1.bf16.msra.mxu0 %v18176_v58  ;;  %14304 = vmatpush1.bf16.msra.mxu1 %v18179_v48  ;;  %v18257_v58 = vld [vmem:[#allocation15 + $0x708] ss:$16 sps:$4 sm:$0xff]   ;;  %v18262_v48 = vld [vmem:[#allocation15 + $0x724] ss:$16 sps:$4 sm:$0xff]  }
0x1838   : > { %14141 = vmatprep.subr.bf16.mxu0 %v18184_v49  ;;  %14305 = vmatprep.subr.bf16.mxu1 %v18187_v28  ;;  %v18265_v49 = vld [vmem:[#allocation15 + $0x72c] ss:$16 sps:$4 sm:$0xff]   ;;  %v18260_v28 = vld [vmem:[#allocation15 + $0x720] ss:$16 sps:$4 sm:$0xff]  }
0x183b   : > { %14142 = vmatpush1.bf16.msra.mxu0 %v18182_v19  ;;  %14306 = vmatpush1.bf16.msra.mxu1 %v18185_v44  ;;  %v18263_v19 = vld [vmem:[#allocation15 + $0x728] ss:$16 sps:$4 sm:$0xff]   ;;  %v18268_v44 = vld [vmem:[#allocation15 + $0x744] ss:$16 sps:$4 sm:$0xff]  }
0x183c   : > { %14143 = vmatprep.subr.bf16.mxu0 %v18190_v25  ;;  %14307 = vmatprep.subr.bf16.mxu1 %v18193_v50  ;;  %v18271_v25 = vld [vmem:[#allocation15 + $0x74c] ss:$16 sps:$4 sm:$0xff]   ;;  %v18266_v50 = vld [vmem:[#allocation15 + $0x740] ss:$16 sps:$4 sm:$0xff]  }
0x183f   : > { %14144 = vmatpush1.bf16.msra.mxu0 %v18188_v13  ;;  %14308 = vmatpush1.bf16.msra.mxu1 %v18191_v57  ;;  %v18269_v13 = vld [vmem:[#allocation15 + $0x748] ss:$16 sps:$4 sm:$0xff]   ;;  %v18274_v57 = vld [vmem:[#allocation15 + $0x764] ss:$16 sps:$4 sm:$0xff]  }
0x1840   : > { %14145 = vmatprep.subr.bf16.mxu0 %v18196_v59  ;;  %14309 = vmatprep.subr.bf16.mxu1 %v18199_v61  ;;  %v18277_v59 = vld [vmem:[#allocation15 + $0x76c] ss:$16 sps:$4 sm:$0xff]   ;;  %v18272_v61 = vld [vmem:[#allocation15 + $0x760] ss:$16 sps:$4 sm:$0xff]  }
0x1843   : > { %14146 = vmatpush1.bf16.msra.mxu0 %v18194_v16  ;;  %14310 = vmatpush1.bf16.msra.mxu1 %v18197_v32  ;;  %v18275_v16 = vld [vmem:[#allocation15 + $0x768] ss:$16 sps:$4 sm:$0xff]   ;;  %v18280_v32 = vld [vmem:[#allocation15 + $0x784] ss:$16 sps:$4 sm:$0xff]  }
0x1844   : > { %14147 = vmatprep.subr.bf16.mxu0 %v18202_v38  ;;  %14311 = vmatprep.subr.bf16.mxu1 %v18205_v39  ;;  %v18278_v38 = vld [vmem:[#allocation15 + $0x780] ss:$16 sps:$4 sm:$0xff]   ;;  %v18281_v39 = vld [vmem:[#allocation15 + $0x788] ss:$16 sps:$4 sm:$0xff]  }
0x1847   : > { %14148 = vmatpush1.bf16.msra.mxu0 %v18200_v14  ;;  %14312 = vmatpush1.bf16.msra.mxu1 %v18203_v43  ;;  %v18286_v14 = vld [vmem:[#allocation15 + $0x7a4] ss:$16 sps:$4 sm:$0xff]   ;;  %v18289_v43 = vld [vmem:[#allocation15 + $0x7ac] ss:$16 sps:$4 sm:$0xff]  }
0x1848   : > { %14158 = vmatprep.subr.bf16.mxu0 %v18208_v33  ;;  %14322 = vmatprep.subr.bf16.mxu1 %v18211_v34  ;;  %v18284_v33 = vld [vmem:[#allocation15 + $0x7a0] ss:$16 sps:$4 sm:$0xff]   ;;  %v18287_v34 = vld [vmem:[#allocation15 + $0x7a8] ss:$16 sps:$4 sm:$0xff]  }
0x184a   : > { %14150 = vmatmul.mubr.bf16.vlgmr.msra.gmra.mrb[0].mxu0 %v12473_v35  ;;  %14314 = vmatmul.mubr.bf16.vlgmr.msra.gmra.mrb[0].mxu1 %v12473_v35  ;;  %v18295_v35 = vld [vmem:[#allocation15 + $0x7cc] ss:$16 sps:$4 sm:$0xff]  }
0x184b   : > { %14159 = vmatpush1.bf16.msra.mxu0 %v18206_v4  ;;  %14323 = vmatpush1.bf16.msra.mxu1 %v18209_v24  ;;  %v18290_v4 = vld [vmem:[#allocation15 + $0x7c0] ss:$16 sps:$4 sm:$0xff]   ;;  %v18293_v24 = vld [vmem:[#allocation15 + $0x7c8] ss:$16 sps:$4 sm:$0xff]  }
0x184c   : > { %14160 = vmatprep.subr.bf16.mxu0 %v18214_v10  ;;  %14324 = vmatprep.subr.bf16.mxu1 %v18217_v9  ;;  %v18298_v10 = vld [vmem:[#allocation15 + $0x7e4] ss:$16 sps:$4 sm:$0xff]   ;;  %v18301_v9 = vld [vmem:[#allocation15 + $0x7ec] ss:$16 sps:$4 sm:$0xff]  }
0x184d   : > { %14190 = vmatprep.mubr.bf16.mxu0 %v12476_v7  ;;  %14354 = vmatprep.mubr.bf16.mxu1 %v12476_v7  ;;  %v18296_v7 = vld [vmem:[#allocation15 + $0x7e0] ss:$16 sps:$4 sm:$0xff]  }
0x184f   : > { %14161 = vmatpush1.bf16.msra.mxu0 %v18212_v23  ;;  %14325 = vmatpush1.bf16.msra.mxu1 %v18215_v29  ;;  %v18299_v23 = vld [vmem:[#allocation15 + $0x7e8] ss:$16 sps:$4 sm:$0xff]  }
0x1850   : > { %14162 = vmatprep.subr.bf16.mxu0 %v18220_v15  ;;  %14326 = vmatprep.subr.bf16.mxu1 %v18223_v17  ;;  %v18304_v29 = vld [vmem:[#allocation18 + $0x4] ss:$8 sps:$4 sm:$0xff]   ;;  %v12475_v15 = vpack.c.bf16 %v22179_v1, %v22179_v1  ;;  %v18302_v17 = vld [vmem:[#allocation18] ss:$8 sps:$4 sm:$0xff]  }
0x1851   : > { %v18314_v1 = vld [vmem:[#allocation18 + $0x40] ss:$8 sps:$4 sm:$0xff]  }
0x1853   : > { %14163 = vmatpush1.bf16.msra.mxu0 %v18218_v2  ;;  %14327 = vmatpush1.bf16.msra.mxu1 %v18221_v26  ;;  %v18307_v2 = vld [vmem:[#allocation18 + $0x14] ss:$8 sps:$4 sm:$0xff]   ;;  %v18305_v26 = vld [vmem:[#allocation18 + $0x10] ss:$8 sps:$4 sm:$0xff]  }
0x1854   : > { %14164 = vmatprep.subr.bf16.mxu0 %v18226_v36  ;;  %14328 = vmatprep.subr.bf16.mxu1 %v18229_v31  ;;  %v18310_v36 = vld [vmem:[#allocation18 + $0x24] ss:$8 sps:$4 sm:$0xff]   ;;  %v18308_v31 = vld [vmem:[#allocation18 + $0x20] ss:$8 sps:$4 sm:$0xff]  }
0x1857   : > { %14165 = vmatpush1.bf16.msra.mxu0 %v18224_v12  ;;  %14329 = vmatpush1.bf16.msra.mxu1 %v18227_v20  ;;  %v18313_v12 = vld [vmem:[#allocation18 + $0x34] ss:$8 sps:$4 sm:$0xff]   ;;  %v18311_v20 = vld [vmem:[#allocation18 + $0x30] ss:$8 sps:$4 sm:$0xff]  }
0x1858   : > { %14166 = vmatprep.subr.bf16.mxu0 %v18232_v51  ;;  %14330 = vmatprep.subr.bf16.mxu1 %v18235_v21  ;;  %v18316_v51 = vld [vmem:[#allocation18 + $0x44] ss:$8 sps:$4 sm:$0xff]   ;;  %v18319_v21 = vld [vmem:[#allocation18 + $0x54] ss:$8 sps:$4 sm:$0xff]  }
0x185b   : > { %14167 = vmatpush1.bf16.msra.mxu0 %v18230_v8  ;;  %14331 = vmatpush1.bf16.msra.mxu1 %v18233_v63  ;;  %v18317_v8 = vld [vmem:[#allocation18 + $0x50] ss:$8 sps:$4 sm:$0xff]   ;;  %v18322_v63 = vld [vmem:[#allocation18 + $0x64] ss:$8 sps:$4 sm:$0xff]  }
0x185c   : > { %14168 = vmatprep.subr.bf16.mxu0 %v18238_v30  ;;  %14332 = vmatprep.subr.bf16.mxu1 %v18241_v42  ;;  %v18320_v30 = vld [vmem:[#allocation18 + $0x60] ss:$8 sps:$4 sm:$0xff]   ;;  %v18325_v42 = vld [vmem:[#allocation18 + $0x74] ss:$8 sps:$4 sm:$0xff]  }
0x185f   : > { %14169 = vmatpush1.bf16.msra.mxu0 %v18236_v6  ;;  %14333 = vmatpush1.bf16.msra.mxu1 %v18239_v52  ;;  %v18323_v6 = vld [vmem:[#allocation18 + $0x70] ss:$8 sps:$4 sm:$0xff]   ;;  %v18328_v52 = vld [vmem:[#allocation18 + $0x84] ss:$8 sps:$4 sm:$0xff]  }
0x1860   : > { %14170 = vmatprep.subr.bf16.mxu0 %v18244_v18  ;;  %14334 = vmatprep.subr.bf16.mxu1 %v18247_v5  ;;  %v18326_v18 = vld [vmem:[#allocation18 + $0x80] ss:$8 sps:$4 sm:$0xff]   ;;  %v18331_v5 = vld [vmem:[#allocation18 + $0x94] ss:$8 sps:$4 sm:$0xff]  }
0x1863   : > { %14171 = vmatpush1.bf16.msra.mxu0 %v18242_v62  ;;  %14335 = vmatpush1.bf16.msra.mxu1 %v18245_v54  ;;  %v18329_v62 = vld [vmem:[#allocation18 + $0x90] ss:$8 sps:$4 sm:$0xff]   ;;  %v18334_v54 = vld [vmem:[#allocation18 + $0xa4] ss:$8 sps:$4 sm:$0xff]  }
0x1864   : > { %14172 = vmatprep.subr.bf16.mxu0 %v18250_v40  ;;  %14336 = vmatprep.subr.bf16.mxu1 %v18253_v27  ;;  %v18332_v40 = vld [vmem:[#allocation18 + $0xa0] ss:$8 sps:$4 sm:$0xff]   ;;  %v18337_v27 = vld [vmem:[#allocation18 + $0xb4] ss:$8 sps:$4 sm:$0xff]  }
0x1867   : > { %14173 = vmatpush1.bf16.msra.mxu0 %v18248_v55  ;;  %14337 = vmatpush1.bf16.msra.mxu1 %v18251_v47  ;;  %v18335_v55 = vld [vmem:[#allocation18 + $0xb0] ss:$8 sps:$4 sm:$0xff]   ;;  %v18340_v47 = vld [vmem:[#allocation18 + $0xc4] ss:$8 sps:$4 sm:$0xff]  }
0x1868   : > { %14174 = vmatprep.subr.bf16.mxu0 %v18256_v60  ;;  %14338 = vmatprep.subr.bf16.mxu1 %v18259_v22  ;;  %v18338_v60 = vld [vmem:[#allocation18 + $0xc0] ss:$8 sps:$4 sm:$0xff]   ;;  %v18343_v22 = vld [vmem:[#allocation18 + $0xd4] ss:$8 sps:$4 sm:$0xff]  }
0x186b   : > { %14175 = vmatpush1.bf16.msra.mxu0 %v18254_v41  ;;  %14339 = vmatpush1.bf16.msra.mxu1 %v18257_v58  ;;  %v18341_v41 = vld [vmem:[#allocation18 + $0xd0] ss:$8 sps:$4 sm:$0xff]   ;;  %v18346_v58 = vld [vmem:[#allocation18 + $0xe4] ss:$8 sps:$4 sm:$0xff]  }
0x186c   : > { %14176 = vmatprep.subr.bf16.mxu0 %v18262_v48  ;;  %14340 = vmatprep.subr.bf16.mxu1 %v18265_v49  ;;  %v18344_v48 = vld [vmem:[#allocation18 + $0xe0] ss:$8 sps:$4 sm:$0xff]   ;;  %v18349_v49 = vld [vmem:[#allocation18 + $0xf4] ss:$8 sps:$4 sm:$0xff]  }
0x186f   : > { %14177 = vmatpush1.bf16.msra.mxu0 %v18260_v28  ;;  %14341 = vmatpush1.bf16.msra.mxu1 %v18263_v19  ;;  %v18347_v28 = vld [vmem:[#allocation18 + $0xf0] ss:$8 sps:$4 sm:$0xff]   ;;  %v18352_v19 = vld [vmem:[#allocation18 + $0x104] ss:$8 sps:$4 sm:$0xff]  }
0x1870   : > { %14178 = vmatprep.subr.bf16.mxu0 %v18268_v44  ;;  %14342 = vmatprep.subr.bf16.mxu1 %v18271_v25  ;;  %v18398_v44 = vld [vmem:[%s22385_s12] ss:$8 sps:$4 sm:$0xff]   ;;  %v18400_v25 = vld [vmem:[%s22385_s12 + $0x4] ss:$8 sps:$4 sm:$0xff]  }
0x1873   : > { %14179 = vmatpush1.bf16.msra.mxu0 %v18266_v50  ;;  %14343 = vmatpush1.bf16.msra.mxu1 %v18269_v13  ;;  %v18403_v50 = vld [vmem:[%s22385_s12 + $0x14] ss:$8 sps:$4 sm:$0xff]   ;;  %v18401_v13 = vld [vmem:[%s22385_s12 + $0x10] ss:$8 sps:$4 sm:$0xff]  }
0x1874   : > { %14180 = vmatprep.subr.bf16.mxu0 %v18274_v57  ;;  %14344 = vmatprep.subr.bf16.mxu1 %v18277_v59  ;;  %v18406_v57 = vld [vmem:[%s22385_s12 + $0x24] ss:$8 sps:$4 sm:$0xff]   ;;  %v18404_v59 = vld [vmem:[%s22385_s12 + $0x20] ss:$8 sps:$4 sm:$0xff]  }
0x1877   : > { %14181 = vmatpush1.bf16.msra.mxu0 %v18272_v61  ;;  %14345 = vmatpush1.bf16.msra.mxu1 %v18275_v16  ;;  %v18409_v61 = vld [vmem:[%s22385_s12 + $0x34] ss:$8 sps:$4 sm:$0xff]   ;;  %v18407_v16 = vld [vmem:[%s22385_s12 + $0x30] ss:$8 sps:$4 sm:$0xff]  }
0x1878   : > { %14182 = vmatprep.subr.bf16.mxu0 %v18280_v32  ;;  %14346 = vmatprep.subr.bf16.mxu1 %v18283_v46  ;;  %v18412_v32 = vld [vmem:[%s22385_s12 + $0x44] ss:$8 sps:$4 sm:$0xff]   ;;  %v18410_v46 = vld [vmem:[%s22385_s12 + $0x40] ss:$8 sps:$4 sm:$0xff]  }
0x187b   : > { %14183 = vmatpush1.bf16.msra.mxu0 %v18278_v38  ;;  %14347 = vmatpush1.bf16.msra.mxu1 %v18281_v39  ;;  %v18415_v38 = vld [vmem:[%s22385_s12 + $0x54] ss:$8 sps:$4 sm:$0xff]   ;;  %v18413_v39 = vld [vmem:[%s22385_s12 + $0x50] ss:$8 sps:$4 sm:$0xff]  }
0x187c   : > { %14184 = vmatprep.subr.bf16.mxu0 %v18286_v14  ;;  %14348 = vmatprep.subr.bf16.mxu1 %v18289_v43  ;;  %v18418_v14 = vld [vmem:[%s22385_s12 + $0x64] ss:$8 sps:$4 sm:$0xff]   ;;  %v18416_v43 = vld [vmem:[%s22385_s12 + $0x60] ss:$8 sps:$4 sm:$0xff]  }
0x187f   : > { %14185 = vmatpush1.bf16.msra.mxu0 %v18284_v33  ;;  %14349 = vmatpush1.bf16.msra.mxu1 %v18287_v34  ;;  %v22229_v33 = vld [vmem:[#allocation17] sm:$0xf]  ;;  %v18421_v34 = vld [vmem:[%s22385_s12 + $0x74] ss:$8 sps:$4 sm:$0xff]  }
0x1880   : > { %14186 = vmatprep.subr.bf16.mxu0 %v18292_v0  ;;  %14350 = vmatprep.subr.bf16.mxu1 %v18295_v35  ;;  %v12738_v0 = vrot.slane %v22229_v33, %v22129_v11  ;;  %v18419_v35 = vld [vmem:[%s22385_s12 + $0x70] ss:$8 sps:$4 sm:$0xff]  }
0x1883   : > { %14187 = vmatpush1.bf16.msra.mxu0 %v18290_v4  ;;  %14351 = vmatpush1.bf16.msra.mxu1 %v18293_v24  ;;  %v12742_v4 = vrot.slane %v22229_v33, %v22132_v45  ;;  %v12750_v24 = vrot.slane %v22229_v33, %v12357_v3 }
0x1884   : > { %14188 = vmatprep.subr.bf16.mxu0 %v18298_v10  ;;  %14352 = vmatprep.subr.bf16.mxu1 %v18301_v9 }
0x1887   : > { %14189 = vmatpush1.bf16.msra.mxu0 %v18296_v7  ;;  %14353 = vmatpush1.bf16.msra.mxu1 %v18299_v23 }
0x1888   : > { %14787 = vmatprep.subr.bf16.mxu0 %v18304_v29  ;;  %15087 = vmatprep.subr.bf16.mxu1 %v18400_v25  ;;  %v18373_v25 = vld [vmem:[#allocation18 + $0x174] ss:$8 sps:$4 sm:$0xff]  }
0x188a   : > { %14191 = vmatmul.mubr.bf16.vlgmr.msra.gmra.mrb[0].mxu0 %v12475_v15  ;;  %14355 = vmatmul.mubr.bf16.vlgmr.msra.gmra.mrb[0].mxu1 %v12475_v15 }
0x188b   : > { %14788 = vmatpush1.bf16.msra.mxu0 %v18302_v17  ;;  %15088 = vmatpush1.bf16.msra.mxu1 %v18398_v44  ;;  %v18368_v44 = vld [vmem:[#allocation18 + $0x160] ss:$8 sps:$4 sm:$0xff]  }
0x188c   : > { %14789 = vmatprep.subr.bf16.mxu0 %v18307_v2  ;;  %15089 = vmatprep.subr.bf16.mxu1 %v18403_v50 }
0x188f   : > { %14790 = vmatpush1.bf16.msra.mxu0 %v18305_v26  ;;  %15090 = vmatpush1.bf16.msra.mxu1 %v18401_v13  ;;  %v18371_v13 = vld [vmem:[#allocation18 + $0x170] ss:$8 sps:$4 sm:$0xff]  }
0x1890   : > { %14791 = vmatprep.subr.bf16.mxu0 %v18310_v36  ;;  %15091 = vmatprep.subr.bf16.mxu1 %v18406_v57  ;;  %v18376_v57 = vld [vmem:[#allocation18 + $0x184] ss:$8 sps:$4 sm:$0xff]  }
0x1893   : > { %14792 = vmatpush1.bf16.msra.mxu0 %v18308_v31  ;;  %15092 = vmatpush1.bf16.msra.mxu1 %v18404_v59 }
0x1894   : > { %14793 = vmatprep.subr.bf16.mxu0 %v18313_v12  ;;  %15093 = vmatprep.subr.bf16.mxu1 %v18409_v61  ;;  %v18374_v61 = vld [vmem:[#allocation18 + $0x180] ss:$8 sps:$4 sm:$0xff]  }
0x1897   : > { %14794 = vmatpush1.bf16.msra.mxu0 %v18311_v20  ;;  %15094 = vmatpush1.bf16.msra.mxu1 %v18407_v16  ;;  %v18379_v16 = vld [vmem:[#allocation18 + $0x194] ss:$8 sps:$4 sm:$0xff]  }
0x1898   : > { %14795 = vmatprep.subr.bf16.mxu0 %v18316_v51  ;;  %15095 = vmatprep.subr.bf16.mxu1 %v18412_v32  ;;  %v18377_v32 = vld [vmem:[#allocation18 + $0x190] ss:$8 sps:$4 sm:$0xff]  }
0x189b   : > { %14796 = vmatpush1.bf16.msra.mxu0 %v18314_v1  ;;  %15096 = vmatpush1.bf16.msra.mxu1 %v18410_v46  ;;  %v18385_v46 = vld [vmem:[#allocation18 + $0x1b4] ss:$8 sps:$4 sm:$0xff]  }
0x189c   : > { %14797 = vmatprep.subr.bf16.mxu0 %v18319_v21  ;;  %15097 = vmatprep.subr.bf16.mxu1 %v18415_v38  ;;  %v18383_v38 = vld [vmem:[#allocation18 + $0x1b0] ss:$8 sps:$4 sm:$0xff]  }
0x189f   : > { %14798 = vmatpush1.bf16.msra.mxu0 %v18317_v8  ;;  %15098 = vmatpush1.bf16.msra.mxu1 %v18413_v39 }
0x18a0   : > { %14799 = vmatprep.subr.bf16.mxu0 %v18322_v63  ;;  %15099 = vmatprep.subr.bf16.mxu1 %v18418_v14  ;;  %v18388_v14 = vld [vmem:[#allocation18 + $0x1c4] ss:$8 sps:$4 sm:$0xff]  }
0x18a3   : > { %14800 = vmatpush1.bf16.msra.mxu0 %v18320_v30  ;;  %15100 = vmatpush1.bf16.msra.mxu1 %v18416_v43 }
0x18a4   : > { %14801 = vmatprep.subr.bf16.mxu0 %v18325_v42  ;;  %15101 = vmatprep.subr.bf16.mxu1 %v18421_v34  ;;  %v18391_v34 = vld [vmem:[#allocation18 + $0x1d4] ss:$8 sps:$4 sm:$0xff]  }
0x18a7   : > { %14802 = vmatpush1.bf16.msra.mxu0 %v18323_v6  ;;  %15102 = vmatpush1.bf16.msra.mxu1 %v18419_v35  ;;  %v18394_v35 = vld [vmem:[#allocation18 + $0x1e4] ss:$8 sps:$4 sm:$0xff]  }
0x18a8   : > { %14803 = vmatprep.subr.bf16.mxu0 %v18328_v52 }
0x18ab   : > { %14804 = vmatpush1.bf16.msra.mxu0 %v18326_v18 }
0x18ac   : > { %14805 = vmatprep.subr.bf16.mxu0 %v18331_v5  ;;  %v18350_v5 = vld [vmem:[#allocation18 + $0x100] ss:$8 sps:$4 sm:$0xff]  }
0x18af   : > { %14806 = vmatpush1.bf16.msra.mxu0 %v18329_v62 }
0x18b0   : > { %14807 = vmatprep.subr.bf16.mxu0 %v18334_v54  ;;  %v18355_v54 = vld [vmem:[#allocation18 + $0x114] ss:$8 sps:$4 sm:$0xff]  }
0x18b3   : > { %14808 = vmatpush1.bf16.msra.mxu0 %v18332_v40 }
0x18b4   : > { %14809 = vmatprep.subr.bf16.mxu0 %v18337_v27  ;;  %v18353_v27 = vld [vmem:[#allocation18 + $0x110] ss:$8 sps:$4 sm:$0xff]  }
0x18b7   : > { %14810 = vmatpush1.bf16.msra.mxu0 %v18335_v55  ;;  %v18358_v55 = vld [vmem:[#allocation18 + $0x124] ss:$8 sps:$4 sm:$0xff]  }
0x18b8   : > { %14811 = vmatprep.subr.bf16.mxu0 %v18340_v47  ;;  %v18356_v47 = vld [vmem:[#allocation18 + $0x120] ss:$8 sps:$4 sm:$0xff]  }
0x18bb   : > { %14812 = vmatpush1.bf16.msra.mxu0 %v18338_v60  ;;  %v18361_v60 = vld [vmem:[#allocation18 + $0x134] ss:$8 sps:$4 sm:$0xff]  }
0x18bc   : > { %14813 = vmatprep.subr.bf16.mxu0 %v18343_v22  ;;  %v18359_v22 = vld [vmem:[#allocation18 + $0x130] ss:$8 sps:$4 sm:$0xff]  }
0x18bf   : > { %14814 = vmatpush1.bf16.msra.mxu0 %v18341_v41  ;;  %v18364_v41 = vld [vmem:[#allocation18 + $0x144] ss:$8 sps:$4 sm:$0xff]  }
0x18c0   : > { %14815 = vmatprep.subr.bf16.mxu0 %v18346_v58  ;;  %v18362_v58 = vld [vmem:[#allocation18 + $0x140] ss:$8 sps:$4 sm:$0xff]  }
0x18c3   : > { %14816 = vmatpush1.bf16.msra.mxu0 %v18344_v48  ;;  %v18367_v48 = vld [vmem:[#allocation18 + $0x154] ss:$8 sps:$4 sm:$0xff]  }
0x18c4   : > { %14817 = vmatprep.subr.bf16.mxu0 %v18349_v49  ;;  %v18365_v49 = vld [vmem:[#allocation18 + $0x150] ss:$8 sps:$4 sm:$0xff]  }
0x18c7   : > { %14818 = vmatpush1.bf16.msra.mxu0 %v18347_v28  ;;  %v18370_v28 = vld [vmem:[#allocation18 + $0x164] ss:$8 sps:$4 sm:$0xff]  }
0x18c8   : > { %14828 = vmatprep.subr.bf16.mxu0 %v18352_v19  ;;  %v12746_v19 = vrot.slane %v22229_v33, %v12353_v56  ;;  %v18380_v56 = vld [vmem:[#allocation18 + $0x1a0] ss:$8 sps:$4 sm:$0xff]  }
0x18c9   : > { %v18386_v33 = vld [vmem:[#allocation18 + $0x1c0] ss:$8 sps:$4 sm:$0xff]  }
0x195d   : > { %v14192_v10 = vpop.f32.mrb[0].mxu0  ;;  %v14356_v9 = vpop.f32.mrb[0].mxu1 }
0x195e   : > { %v17105_v7 = vadd.f32 %v14192_v10, %v12738_v0  ;;  %v14194_v23 = vpop.f32.mrb[1].mxu0  ;;  %v14358_v29 = vpop.f32.mrb[1].mxu1  ;;  %v17107_v50 = vadd.f32 %v14356_v9, %v12746_v19  ;;  %v18389_v0 = vld [vmem:[#allocation18 + $0x1d0] ss:$8 sps:$4 sm:$0xff]   ;;  %v14915_v19 = vld [vmem:[#allocation21] sm:$0x3] }
0x195f   : > { %v17106_v15 = vadd.f32 %v14194_v23, %v12742_v4  ;;  %v17108_v17 = vadd.f32 %v14358_v29, %v12750_v24  ;;  %v14196_v2 = vpop.f32.mrb[2].mxu0  ;;  %v14360_v26 = vpop.f32.mrb[2].mxu1  ;;  %v18392_v4 = vld [vmem:[#allocation18 + $0x1e0] ss:$8 sps:$4 sm:$0xff]   ;;  %v18397_v24 = vld [vmem:[#allocation18 + $0x1f4] ss:$8 sps:$4 sm:$0xff]  }
0x1960   : > { %v16756_v36 = vmul.f32 -1.442695, %v17105_v7  ;;  %v14197_v31 = vpop.f32.mrb[3].mxu0  ;;  %v14361_v12 = vpop.f32.mrb[3].mxu1  ;;  %v16758_v59 = vmul.f32 -1.442695, %v17107_v50 }
0x1961   : > { %v16757_v20 = vmul.f32 -1.442695, %v17106_v15  ;;  %v16759_v51 = vmul.f32 -1.442695, %v17108_v17  ;;  %v18395_v10 = vld [vmem:[#allocation18 + $0x1f0] ss:$8 sps:$4 sm:$0xff]  }
0x1962   : > { %18454 = vpow2.f32 %v16756_v36  ;;  %v18424_v23 = vld [vmem:[%s22385_s12 + $0x84] ss:$8 sps:$4 sm:$0xff]   ;;  %v18422_v29 = vld [vmem:[%s22385_s12 + $0x80] ss:$8 sps:$4 sm:$0xff]   ;;  %v18427_v15 = vld [vmem:[%s22385_s12 + $0x94] ss:$8 sps:$4 sm:$0xff]  }
0x1963   : > { %18456 = vpow2.f32 %v16757_v20  ;;  %15103 = vmatprep.subr.bf16.mxu1 %v18424_v23  ;;  %v18425_v17 = vld [vmem:[%s22385_s12 + $0x90] ss:$8 sps:$4 sm:$0xff]   ;;  %v18430_v2 = vld [vmem:[%s22385_s12 + $0xa4] ss:$8 sps:$4 sm:$0xff]   ;;  %v18428_v26 = vld [vmem:[%s22385_s12 + $0xa0] ss:$8 sps:$4 sm:$0xff]  }
0x1964   : > { %18458 = vpow2.f32 %v16759_v51  ;;  %15104 = vmatpush1.bf16.msra.mxu1 %v18422_v29  ;;  %v18433_v36 = vld [vmem:[%s22385_s12 + $0xb4] ss:$8 sps:$4 sm:$0xff]   ;;  %v18431_v31 = vld [vmem:[%s22385_s12 + $0xb0] ss:$8 sps:$4 sm:$0xff]   ;;  %v18436_v12 = vld [vmem:[%s22385_s12 + $0xc4] ss:$8 sps:$4 sm:$0xff]  }
0x1965   : > { %15105 = vmatprep.subr.bf16.mxu1 %v18427_v15  ;;  %v18434_v20 = vld [vmem:[%s22385_s12 + $0xc0] ss:$8 sps:$4 sm:$0xff]   ;;  %v18437_v51 = vld [vmem:[%s22385_s12 + $0xd0] ss:$8 sps:$4 sm:$0xff]  }
0x1968   : > { %15106 = vmatpush1.bf16.msra.mxu1 %v18425_v17 }
0x1969   : > { %15107 = vmatprep.subr.bf16.mxu1 %v18430_v2 }
0x196c   : > { %v18455_v3 = vpop.eup %18454  ;;  %15108 = vmatpush1.bf16.msra.mxu1 %v18428_v26 }
0x196d   : > { %v14375_v1 = vadd.f32 1.0, %v18455_v3  ;;  %v18457_v21 = vpop.eup %18456  ;;  %15109 = vmatprep.subr.bf16.mxu1 %v18433_v36  ;;  %v18439_v3 = vld [vmem:[%s22385_s12 + $0xd4] ss:$8 sps:$4 sm:$0xff]  }
0x196e   : > { %v18459_v8 = vpop.eup %18458  ;;  %v14376_v63 = vadd.f32 1.0, %v18457_v21  ;;  %v18440_v21 = vld [vmem:[%s22385_s12 + $0xe0] ss:$8 sps:$4 sm:$0xff]  }
0x196f   : > { %18460 = vrcp.f32 %v14375_v1  ;;  %v14378_v30 = vadd.f32 1.0, %v18459_v8  ;;  %v18442_v1 = vld [vmem:[%s22385_s12 + $0xe4] ss:$8 sps:$4 sm:$0xff]   ;;  %v18445_v8 = vld [vmem:[%s22385_s12 + $0xf4] ss:$8 sps:$4 sm:$0xff]  }
0x1970   : > { %18462 = vrcp.f32 %v14376_v63  ;;  %15110 = vmatpush1.bf16.msra.mxu1 %v18431_v31  ;;  %v18443_v63 = vld [vmem:[%s22385_s12 + $0xf0] ss:$8 sps:$4 sm:$0xff]  }
0x1971   : > { %18464 = vrcp.f32 %v14378_v30  ;;  %15111 = vmatprep.subr.bf16.mxu1 %v18436_v12  ;;  %v14455_v30 = vld [vmem:[#allocation20] sm:$0x3] }
0x1972   : > { %18466 = vpow2.f32 %v16758_v59 }
0x1974   : > { %15112 = vmatpush1.bf16.msra.mxu1 %v18434_v20 }
0x1975   : > { %15113 = vmatprep.subr.bf16.mxu1 %v18439_v3 }
0x1978   : > { %15114 = vmatpush1.bf16.msra.mxu1 %v18437_v51 }
0x1979   : > { %v18461_v42 = vpop.eup %18460  ;;  %15115 = vmatprep.subr.bf16.mxu1 %v18442_v1 }
0x197a   : > { %v18463_v6 = vpop.eup %18462  ;;  %v14387_v62 = vpack.c.bf16 %v18461_v42, %v18461_v42  ;;  %v14460_v42 = vrot.slane %v14455_v30, %v22129_v11 }
0x197b   : > { %v18465_v52 = vpop.eup %18464  ;;  %v14388_v18 = vpack.c.bf16 %v18463_v6, %v18463_v6  ;;  %v14464_v6 = vrot.slane %v14455_v30, %v22132_v45 }
0x197c   : > { %v14390_v40 = vpack.c.bf16 %v18465_v52, %v18465_v52  ;;  %v18467_v39 = vpop.eup %18466  ;;  %15116 = vmatpush1.bf16.msra.mxu1 %v18440_v21 }
0x197d   : > { %14819 = vmatprep.mubr.bf16.mxu0 %v14388_v18  ;;  %v14377_v43 = vadd.f32 1.0, %v18467_v39  ;;  %15117 = vmatprep.subr.bf16.mxu1 %v18445_v8 }
0x197e   : > { %14820 = vmatmul.mubr.bf16.vlgmr.msra.gmra.mrb[4].mxu0 %v14387_v62 }
0x197f   : > { %14829 = vmatpush1.bf16.msra.mxu0 %v18350_v5  ;;  %14860 = vmatprep.mubr.bf16.mxu0 %v14390_v40  ;;  %18468 = vrcp.f32 %v14377_v43 }
0x1980   : > { %14830 = vmatprep.subr.bf16.mxu0 %v18355_v54  ;;  %15118 = vmatpush1.bf16.msra.mxu1 %v18443_v63 }
0x1983   : > { %14831 = vmatpush1.bf16.msra.mxu0 %v18353_v27 }
0x1984   : > { %14832 = vmatprep.subr.bf16.mxu0 %v18358_v55 }
0x1987   : > { %14833 = vmatpush1.bf16.msra.mxu0 %v18356_v47 }
0x1988   : > { %14834 = vmatprep.subr.bf16.mxu0 %v18361_v60 }
0x1989   : > { %v18469_v9 = vpop.eup %18468 }
0x198a   : > { %v14389_v7 = vpack.c.bf16 %v18469_v9, %v18469_v9 }
0x198b   : > { %14835 = vmatpush1.bf16.msra.mxu0 %v18359_v22 }
0x198c   : > { %14836 = vmatprep.subr.bf16.mxu0 %v18364_v41 }
0x198f   : > { %14837 = vmatpush1.bf16.msra.mxu0 %v18362_v58 }
0x1990   : > { %14838 = vmatprep.subr.bf16.mxu0 %v18367_v48 }
0x1993   : > { %14839 = vmatpush1.bf16.msra.mxu0 %v18365_v49 }
0x1994   : > { %14840 = vmatprep.subr.bf16.mxu0 %v18370_v28 }
0x1997   : > { %14841 = vmatpush1.bf16.msra.mxu0 %v18368_v44  ;;  %v14920_v44 = vrot.slane %v14915_v19, %v22129_v11 }
0x1998   : > { %14842 = vmatprep.subr.bf16.mxu0 %v18373_v25  ;;  %v14924_v25 = vrot.slane %v14915_v19, %v22132_v45 }
0x199b   : > { %14843 = vmatpush1.bf16.msra.mxu0 %v18371_v13 }
0x199c   : > { %14844 = vmatprep.subr.bf16.mxu0 %v18376_v57 }
0x199f   : > { %14845 = vmatpush1.bf16.msra.mxu0 %v18374_v61 }
0x19a0   : > { %14846 = vmatprep.subr.bf16.mxu0 %v18379_v16 }
0x19a3   : > { %14847 = vmatpush1.bf16.msra.mxu0 %v18377_v32 }
0x19a4   : > { %14848 = vmatprep.subr.bf16.mxu0 %v18382_v37 }
0x19a7   : > { %14849 = vmatpush1.bf16.msra.mxu0 %v18380_v56 }
0x19a8   : > { %14850 = vmatprep.subr.bf16.mxu0 %v18385_v46 }
0x19ab   : > { %14851 = vmatpush1.bf16.msra.mxu0 %v18383_v38 }
0x19ac   : > { %14852 = vmatprep.subr.bf16.mxu0 %v18388_v14 }
0x19af   : > { %14853 = vmatpush1.bf16.msra.mxu0 %v18386_v33 }
0x19b0   : > { %14854 = vmatprep.subr.bf16.mxu0 %v18391_v34 }
0x19b3   : > { %14855 = vmatpush1.bf16.msra.mxu0 %v18389_v0 }
0x19b4   : > { %14856 = vmatprep.subr.bf16.mxu0 %v18394_v35 }
0x19b7   : > { %14857 = vmatpush1.bf16.msra.mxu0 %v18392_v4 }
0x19b8   : > { %14858 = vmatprep.subr.bf16.mxu0 %v18397_v24 }
0x19bb   : > { %14859 = vmatpush1.bf16.msra.mxu0 %v18395_v10 }
0x19be   : > { %14861 = vmatmul.mubr.bf16.vlgmr.msra.gmra.mrb[4].mxu0 %v14389_v7 }
0x1a91   : > { %v14862_v52 = vpop.f32.mrb[4].mxu0 }
0x1a92   : > { %v17109_v18 = vadd.f32 %v14862_v52, %v14460_v42  ;;  %v14864_v5 = vpop.f32.mrb[5].mxu0 }
0x1a93   : > { %v17110_v62 = vadd.f32 %v14864_v5, %v14464_v6  ;;  %v14866_v54 = vpop.f32.mrb[6].mxu0 }
0x1a94   : > { %v16824_v40 = vmul.f32 -1.442695, %v17109_v18  ;;  %v14867_v27 = vpop.f32.mrb[7].mxu0 }
0x1a95   : > { %v16825_v55 = vmul.f32 -1.442695, %v17110_v62 }
0x1a96   : > { %18470 = vpow2.f32 %v16824_v40 }
0x1a97   : > { %18472 = vpow2.f32 %v16825_v55 }
0x1aa0   : > { %v18471_v47 = vpop.eup %18470 }
0x1aa1   : > { %v18473_v60 = vpop.eup %18472  ;;  %v14875_v22 = vadd.f32 1.0, %v18471_v47 }
0x1aa2   : > { %v14876_v41 = vadd.f32 1.0, %v18473_v60 }
0x1aa3   : > { %18474 = vrcp.f32 %v14875_v22 }
0x1aa4   : > { %18476 = vrcp.f32 %v14876_v41 }
0x1aad   : > { %v18475_v58 = vpop.eup %18474 }
0x1aae   : > { %v18477_v48 = vpop.eup %18476  ;;  %v14881_v28 = vpack.c.bf16 %v18475_v58, %v18475_v58 }
0x1aaf   : > { %v14882_v49 = vpack.c.bf16 %v18477_v48, %v18477_v48 }
0x1ab1   : > { %15119 = vmatprep.mubr.bf16.mxu1 %v14882_v49 }
0x1ab2   : > { %15120 = vmatmul.mubr.bf16.vlgmr.msra.gmra.mrb[4].mxu1 %v14881_v28 }
0x1b85   : > { %v15121_v50 = vpop.f32.mrb[4].mxu1 }
0x1b86   : > { %v15122_v13 = vadd.f32 %v15121_v50, %v14920_v44  ;;  %v15123_v57 = vpop.f32.mrb[5].mxu1 }
0x1b87   : > { %v15124_v59 = vadd.f32 %v15123_v57, %v14924_v25  ;;  %v15125_v61 = vpop.f32.mrb[6].mxu1 }
0x1b88   : > { %v15126_v16 = vpop.f32.mrb[7].mxu1 }
0x1b89   : > { %v15130_v32 = vcombine.low %v15122_v13, %v15124_v59 }
0x1b8b   : > { %v15137_v37 = vrot.slane %v15130_v32, %v22121_v53 }
0x1b8d   : > { %15142 = vst.msk [vmem:[#allocation23] sm:$0xf] %vm15141_vm5, %v15137_v37 }
0x1b8e PF: > { %p17232_p11 = scmp.eq.s32.totalorder %s18957_s25, 2  ;;  %s18870_s10 = smov [#allocation23]  }
0x1b8f   : > { %s15150_s0 = sshll.u32 %s18870_s10, 4  ;;  %s15151_s0 = int_to_ptr.vmem [resolvable:$true] %s15150_s0 }
0x1b90   : > { %s18760_s19 = scalar_lea.vmem %s15151_s0, 64  ;;  %p18767_p6 = scmp.lt.s32.totalorder %s15151_s0, %s15151_s0 }
0x1b91   : > { %p18761_p4 = scmp.ne.s32.totalorder %s15151_s0, %s18760_s19  ;;  %p18768_p2 = scmp.lt.s32.totalorder %s18760_s19, %s18760_s19 }
0x1b93   : > { %p18762_p13 = pnand %p18761_p4, %p17232_p11  ;;  %p18769_p7 = por %p18768_p2, %p18767_p6 }
0x1b95   : > { %p18763_p0 = pneg %p18762_p13 }
0x1b97   : > { %p18770_p9 = pnand %p18769_p7, %p18763_p0 }
0x1b99   : > { %18773 = shalt.err (!%p18770_p9)
}
0x1b9a   : > { %s22386_s24 = sld [smem:[#allocation35_spill]] }
0x1ba0   : > { %s22387_s13 = smov %s22386_s24  ;;  %s18774_s20 = scalar_lea.hbm %s22386_s24, 64 }
0x1ba1   : > { %p18775_p10 = scmp.ne.s32.totalorder %s22387_s13, %s18774_s20  ;;  %p18780_p8 = scmp.lt.u32.totalorder %s18774_s20, %s22387_s13 }
0x1ba3   : > { %p18776_p12 = pnand %p18775_p10, %p17232_p11 }
0x1ba5   : > { %p18777_p5 = pneg %p18776_p12 }
0x1ba7   : > { %p18782_p1 = pnand %p18780_p8, %p18777_p5 }
0x1ba9   : > { %18785 = shalt.err (!%p18782_p1)
}
0x1baa   : > { %17178 = dma.vmem_to_hbm [thread:$0]  (%p17232_p11), %s15151_s0, 64, %s22387_s13, [#allocation8]  }
0x1bab   : > { %18831 = dma.done.wait (%p17232_p11), [#allocation8], 64  }
0x1bac   : > { %18833 = vsyncadd (%p17232_p11), [#allocation8], 4294967232 }
0x1bad PF: > { %p28_p3 = scmp.ge.s32.totalorder %s19188_s27, 5   ;;  %s22388_s21 = smov %s18840_s22 }
0x1bae   : > { %s22389_s22 = smov %s18844_s23  ;;  %s22390_s23 = smov %s19199_s14 }
0x1baf   : > { %s22391_s24 = smov %s19188_s27  ;;  %30 = sbr.rel (!%p28_p3) target bundleno = 13 (0xd), region = 151 }
0x1bb6   :  { %15163 = vsyncpa [#allocation7], 1 }
0x1bb7   :  { %15165 = vsyncpa [#allocation7 + $0x1], 1 }
0x1bb8   :  { %15166 = vsyncpa [#allocation10], 1 }
0x1bb9   :  { %15167 = vsyncpa [#allocation13], 1 }
0x1bba   :  { %15169 = vsyncpa [#allocation13 + $0x1], 1 }
0x1bbb   :  { %15170 = vsyncpa [#allocation16], 1 }
0x1bbc   :  { %15171 = vsyncpa [#allocation19], 1 }
0x1bbd   :  { %15172 = vsyncpa [#allocation22], 1 }
0x1bbe   :  { %15173 = vsyncpa [#allocation8], 1 }
0x1bbf   :  { %15175 = vsyncpa [#allocation8 + $0x1], 1 }

</bundles_post_ra>
